<compile_context>
chip_gen: v6e
topology: v6e:2x2x1
jax: 0.10.0
libtpu: 0.0.40
codegen_flags: <defaults>
</compile_context>

<pallas_src>
import functools

import jax
import jax.numpy as jnp
from jax.experimental import pallas as pl
from jax.experimental.pallas import tpu as pltpu


# ----------------------------- Pallas kernels ------------------------------ #

def _conv_gemm_kernel(a_ref, b_ref, bias_ref, o_ref, *, fuse_instnorm):
    """(HW, K) x (K, Cout) GEMM with fused bias [+InstanceNorm] + LeakyReLU.

    a_ref:    (HW, K)    bf16  -- ALL spatial rows of one sample
    b_ref:    (K, Cout)  bf16  -- resident across the batch grid axis
    bias_ref: (1, Cout)  f32
    o_ref:    (HW, Cout) bf16
    """
    y = jnp.dot(a_ref[...], b_ref[...], preferred_element_type=jnp.float32)
    y = y + bias_ref[...]
    if fuse_instnorm:
        # InstanceNorm2d (biased var, eps=1e-5, no affine).  NOTE: this is
        # correct only because this block spans the FULL Ho*Wo extent of one
        # sample, so axis 0 gives per-sample, per-channel statistics.  Do not
        # tile the HW axis without moving the stats out of the kernel.
        mean = jnp.mean(y, axis=0, keepdims=True)
        yc = y - mean
        var = jnp.mean(yc * yc, axis=0, keepdims=True)
        y = yc * jax.lax.rsqrt(var + 1e-5)
    y = jnp.where(y >= 0, y, 0.2 * y)                    # LeakyReLU(0.2)
    o_ref[...] = y.astype(o_ref.dtype)


def _conv4_final_kernel(a_ref, b_ref, bias_ref, w5e_ref, o_ref):
    """Layer 4 GEMM (+bias+InstanceNorm+LeakyReLU) with the ZeroPad + final
    512->1 conv folded into the epilogue.

    a_ref:    (4, 4096)    bf16   -- im2col rows of one sample (2x2 spatial)
    b_ref:    (4096, 512)  bf16
    bias_ref: (1, 512)     f32
    w5e_ref:  (4, 4, 512)  f32    -- W5e[p, s, c]: final-conv weight for
                                     output tap p=(ho,wo), activation s=(a,b)
    o_ref:    (4, 1)       f32    -- final discriminator map, row p = ho*2+wo
    """
    y = jnp.dot(a_ref[...], b_ref[...], preferred_element_type=jnp.float32)
    y = y + bias_ref[...]
    mean = jnp.mean(y, axis=0, keepdims=True)            # per-sample stats (2x2 map)
    yc = y - mean
    var = jnp.mean(yc * yc, axis=0, keepdims=True)
    y = yc * jax.lax.rsqrt(var + 1e-5)
    y = jnp.where(y >= 0, y, 0.2 * y)                    # (4, 512) f32

    # Final conv: every 4x4 window of the zero-padded 2x2 map sees the whole
    # map, so out[p] = sum_{s,c} y[s, c] * W5e[p, s, c].  Tiny (8K MACs) ->
    # VPU multiply + lane/sublane reductions, all 2-D ops.
    outs = []
    for pidx in range(4):
        contrib = jnp.sum(w5e_ref[pidx] * y, axis=1, keepdims=True)   # (4, 1)
        outs.append(jnp.sum(contrib, axis=0, keepdims=True))          # (1, 1)
    o_ref[...] = jnp.concatenate(outs, axis=0)                        # (4, 1)


# ------------------------------ Pallas wrappers ----------------------------- #

def conv_gemm_pallas(A, B, bias, *, fuse_instnorm):
    """A: (Nb, HW, K) bf16, B: (K, Cout) bf16, bias: (1, Cout) f32
    -> (Nb, HW, Cout) bf16."""
    Nb, HW, K = A.shape
    Cout = B.shape[1]
    kernel = functools.partial(_conv_gemm_kernel, fuse_instnorm=fuse_instnorm)
    return pl.pallas_call(
        kernel,
        out_shape=jax.ShapeDtypeStruct((Nb, HW, Cout), jnp.bfloat16),
        grid_spec=pltpu.PrefetchScalarGridSpec(
            num_scalar_prefetch=0,
            grid=(Nb,),
            in_specs=[
                # batch squeezed; full HW and full K in one block per sample
                pl.BlockSpec((None, HW, K), lambda b: (b, 0, 0)),
                # constant block index -> DMA'd to VMEM once, kept resident
                pl.BlockSpec((K, Cout), lambda b: (0, 0)),
                pl.BlockSpec((1, Cout), lambda b: (0, 0)),
            ],
            out_specs=pl.BlockSpec((None, HW, Cout), lambda b: (b, 0, 0)),
        ),
        compiler_params=pltpu.CompilerParams(
            dimension_semantics=("parallel",)),
    )(A, B, bias)


def conv4_final_pallas(A, B, bias, w5e):
    """Layer 4 + folded tail.  A: (Nb, 4, 4096) bf16 -> (Nb, 4, 1) f32."""
    Nb, HW, K = A.shape
    Cout = B.shape[1]
    return pl.pallas_call(
        _conv4_final_kernel,
        out_shape=jax.ShapeDtypeStruct((Nb, 4, 1), jnp.float32),
        grid_spec=pltpu.PrefetchScalarGridSpec(
            num_scalar_prefetch=0,
            grid=(Nb,),
            in_specs=[
                pl.BlockSpec((None, HW, K), lambda b: (b, 0, 0)),
                pl.BlockSpec((K, Cout), lambda b: (0, 0)),
                pl.BlockSpec((1, Cout), lambda b: (0, 0)),
                pl.BlockSpec((4, HW, Cout), lambda b: (0, 0, 0)),
            ],
            out_specs=pl.BlockSpec((None, 4, 1), lambda b: (b, 0, 0)),
        ),
        compiler_params=pltpu.CompilerParams(
            dimension_semantics=("parallel",)),
    )(A, B, bias, w5e)


def _im2col(x, k, stride, pad):
    """x: (N, H, W, C) -> (N, Ho*Wo, k*k*C), features ordered (kh, kw, C)."""
    # TODO(synk): do this gather inside the kernel from a padded VMEM scratch
    # to remove the remaining XLA pad/slice/concat chain per layer.
    N, H, W, C = x.shape
    xp = jnp.pad(x, ((0, 0), (pad, pad), (pad, pad), (0, 0)))
    Ho = (H + 2 * pad - k) // stride + 1
    Wo = (W + 2 * pad - k) // stride + 1
    cols = [xp[:, i:i + stride * Ho:stride, j:j + stride * Wo:stride, :]
            for i in range(k) for j in range(k)]
    patches = jnp.concatenate(cols, axis=-1)            # (N, Ho, Wo, k*k*C)
    return patches.reshape(N, Ho * Wo, k * k * C), Ho, Wo


# --------------------------- parameter preparation -------------------------- #

def prepare_params(p):
    """One-time conversion of PyTorch-layout params into kernel-ready form
    (done at param-init time, NOT per forward)."""
    def to_gemm(w):  # (Cout, Cin, kh, kw) -> (kh*kw*Cin, Cout) bf16
        Cout, Cin, kh, kw = w.shape
        return jnp.transpose(w, (2, 3, 1, 0)).reshape(kh * kw * Cin, Cout).astype(jnp.bfloat16)

    def to_bias(b):
        return b.reshape(1, -1).astype(jnp.float32)

    # Pre-gather the final-conv weights.  After ZeroPad2d((1,0,1,0)) and the
    # conv's own padding=1, the 2x2 layer-4 map sits at padded coords
    # rows/cols {2,3}; output tap (ho,wo) uses kernel index (a+2-ho, b+2-wo)
    # for activation position (a,b).
    w5 = p["w5"][0]                                               # (512, 4, 4)
    rows = []
    for ho in range(2):
        for wo in range(2):
            taps = []
            for a in range(2):
                for b in range(2):
                    taps.append(w5[:, a + 2 - ho, b + 2 - wo])    # (512,)
            rows.append(jnp.stack(taps, axis=0))                  # (4, 512)
    w5e = jnp.stack(rows, axis=0).astype(jnp.float32)             # (4, 4, 512)

    return {
        "B1": to_gemm(p["w1"]), "c1": to_bias(p["b1"]),
        "B2": to_gemm(p["w2"]), "c2": to_bias(p["b2"]),
        "B3": to_gemm(p["w3"]), "c3": to_bias(p["b3"]),
        "B4": to_gemm(p["w4"]), "c4": to_bias(p["b4"]),
        "W5e": w5e,
    }


# ----------------------------- Discriminator ------------------------------- #

def discriminator_pallas(x_nchw, q):
    x = jnp.transpose(x_nchw, (0, 2, 3, 1)).astype(jnp.bfloat16)   # NCHW -> NHWC bf16
    N = x.shape[0]

    # block 1: Conv(4->64, k4, s2, p1) + LeakyReLU               (no norm)
    A, Ho, Wo = _im2col(x, 4, 2, 1)
    x = conv_gemm_pallas(A, q["B1"], q["c1"], fuse_instnorm=False).reshape(N, Ho, Wo, -1)
    # blocks 2-3: Conv + InstanceNorm + LeakyReLU, fused in the GEMM epilogue
    A, Ho, Wo = _im2col(x, 4, 2, 1)
    x = conv_gemm_pallas(A, q["B2"], q["c2"], fuse_instnorm=True).reshape(N, Ho, Wo, -1)
    A, Ho, Wo = _im2col(x, 4, 2, 1)
    x = conv_gemm_pallas(A, q["B3"], q["c3"], fuse_instnorm=True).reshape(N, Ho, Wo, -1)
    # block 4 + ZeroPad2d((1,0,1,0)) + final Conv(512->1, k4, s1, p1, bias=False),
    # all folded into one kernel.
    A, Ho, Wo = _im2col(x, 4, 2, 1)
    assert Ho == 2 and Wo == 2, "folded tail is specialised to a 2x2 layer-4 map"
    out = conv4_final_pallas(A, q["B4"], q["c4"], q["W5e"])        # (N, 4, 1) f32
    return out.reshape(N, 2, 2)[:, None, :, :]                     # NCHW (N, 1, 2, 2)


# --------------------------- pure-JAX reference ----------------------------- #

def discriminator_ref(x_nchw, p):
    x = jnp.transpose(x_nchw, (0, 2, 3, 1))

    def conv(x, w, b, stride, pad):
        y = jax.lax.conv_general_dilated(
            x, jnp.transpose(w, (2, 3, 1, 0)), (stride, stride),
            [(pad, pad), (pad, pad)],
            dimension_numbers=("NHWC", "HWIO", "NHWC"),
            precision=jax.lax.Precision.HIGHEST)
        return y + b if b is not None else y

    def inorm(x):
        m = jnp.mean(x, axis=(1, 2), keepdims=True)
        v = jnp.mean((x - m) ** 2, axis=(1, 2), keepdims=True)
        return (x - m) / jnp.sqrt(v + 1e-5)

    lrelu = lambda t: jnp.where(t >= 0, t, 0.2 * t)

    x = lrelu(conv(x, p["w1"], p["b1"], 2, 1))
    x = lrelu(inorm(conv(x, p["w2"], p["b2"], 2, 1)))
    x = lrelu(inorm(conv(x, p["w3"], p["b3"], 2, 1)))
    x = lrelu(inorm(conv(x, p["w4"], p["b4"], 2, 1)))
    x = jnp.pad(x, ((0, 0), (1, 0), (1, 0), (0, 0)))
    x = conv(x, p["w5"], None, 1, 1)
    return jnp.transpose(x, (0, 3, 1, 2))


# ----------------------------------- main ----------------------------------- #

if __name__ == "__main__":
    key = jax.random.PRNGKey(0)
    keys = jax.random.split(key, 12)

    N, Cin, H = 2, 4, 32
    x = jax.random.normal(keys[0], (N, Cin, H, H), jnp.float32)

    def make_w(k, cout, cin, ks=4):
        scale = 1.0 / jnp.sqrt(jnp.float32(cin * ks * ks))
        return jax.random.normal(k, (cout, cin, ks, ks), jnp.float32) * scale

    def make_b(k, cout):
        return 0.01 * jax.random.normal(k, (cout,), jnp.float32)

    params = {
        "w1": make_w(keys[1], 64, 4),    "b1": make_b(keys[2], 64),
        "w2": make_w(keys[3], 128, 64),  "b2": make_b(keys[4], 128),
        "w3": make_w(keys[5], 256, 128), "b3": make_b(keys[6], 256),
        "w4": make_w(keys[7], 512, 256), "b4": make_b(keys[8], 512),
        "w5": make_w(keys[9], 1, 512),   # final conv has bias=False
    }

    # One-time weight transformation (GEMM layout, bf16) -- not per forward.
    q = prepare_params(params)

    fwd = jax.jit(discriminator_pallas)
    out = jax.block_until_ready(fwd(x, q))

    ref = discriminator_ref(x, params)
    err = float(jnp.max(jnp.abs(out - ref)))
    assert out.shape == ref.shape, (out.shape, ref.shape)
    assert err < 5e-2, f"max abs error too large: {err}"

    print("KERNEL_OK")
</pallas_src>

<mosaic_0001>
module attributes {stable_mosaic.version = 11 : i64} {
  func.func @_conv_gemm_kernel(%arg0: i32, %arg1: memref<1x256x64xbf16, #tpu.memory_space<vmem>>, %arg2: memref<64x64xbf16, #tpu.memory_space<vmem>>, %arg3: memref<1x64xf32, #tpu.memory_space<vmem>>, %arg4: memref<1x256x64xbf16, #tpu.memory_space<vmem>>) attributes {dimension_semantics = [#tpu.dimension_semantics<parallel>], iteration_bounds = array<i64: 2>, scalar_prefetch = 0 : i64, scratch_operands = 0 : i64, tpu.core_type = #tpu.core_type<tc>, window_params = [{transform_indices = @transform_0, window_bounds = array<i64: 1, 256, 64>}, {pipeline_mode = #tpu.pipeline_mode<synchronous>, transform_indices = @transform_1, window_bounds = array<i64: 64, 64>}, {pipeline_mode = #tpu.pipeline_mode<synchronous>, transform_indices = @transform_2, window_bounds = array<i64: 1, 64>}, {transform_indices = @transform_3, window_bounds = array<i64: 1, 256, 64>}]} {
    %c0 = arith.constant 0 : index
    %c0_0 = arith.constant 0 : index
    %c0_1 = arith.constant 0 : index
    %0 = vector.load %arg1[%c0, %c0_0, %c0_1] : memref<1x256x64xbf16, #tpu.memory_space<vmem>>, vector<1x256x64xbf16>
    %1 = vector.shape_cast %0 : vector<1x256x64xbf16> to vector<256x64xbf16>
    %c0_2 = arith.constant 0 : index
    %c0_3 = arith.constant 0 : index
    %2 = vector.load %arg2[%c0_2, %c0_3] : memref<64x64xbf16, #tpu.memory_space<vmem>>, vector<64x64xbf16>
    %cst = arith.constant dense<0.000000e+00> : vector<256x64xf32>
    %3 = tpu.matmul %1, %2, %cst {dimension_numbers = #tpu.dot_dimension_numbers<[1], [0], [0], [1], [0, 0, 1, 1], [], []>} : vector<256x64xbf16>, vector<64x64xbf16>, vector<256x64xf32> -> vector<256x64xf32>
    %c0_4 = arith.constant 0 : index
    %c0_5 = arith.constant 0 : index
    %4 = vector.load %arg3[%c0_4, %c0_5] : memref<1x64xf32, #tpu.memory_space<vmem>>, vector<1x64xf32>
    %5 = vector.broadcast %4 : vector<1x64xf32> to vector<256x64xf32>
    %6 = arith.addf %3, %5 : vector<256x64xf32>
    %cst_6 = arith.constant 0.000000e+00 : f32
    %7 = vector.broadcast %cst_6 : f32 to vector<256x64xf32>
    %8 = arith.cmpf oge, %6, %7 : vector<256x64xf32>
    %cst_7 = arith.constant 2.000000e-01 : f32
    %9 = vector.broadcast %cst_7 : f32 to vector<256x64xf32>
    %10 = arith.mulf %9, %6 : vector<256x64xf32>
    %11 = arith.select %8, %6, %10 : vector<256x64xi1>, vector<256x64xf32>
    %12 = arith.truncf %11 : vector<256x64xf32> to vector<256x64xbf16>
    %c0_8 = arith.constant 0 : index
    %c0_9 = arith.constant 0 : index
    %c0_10 = arith.constant 0 : index
    %13 = vector.load %arg4[%c0_8, %c0_9, %c0_10] : memref<1x256x64xbf16, #tpu.memory_space<vmem>>, vector<1x256x64xbf16>
    %14 = vector.shape_cast %13 : vector<1x256x64xbf16> to vector<256x64xbf16>
    %15 = vector.shape_cast %12 : vector<256x64xbf16> to vector<1x256x64xbf16>
    tpu.vector_store %arg4[%c0_8, %c0_9, %c0_10], %15 {strides = array<i32>} : memref<1x256x64xbf16, #tpu.memory_space<vmem>>, vector<1x256x64xbf16>,
    return
  }
  func.func @transform_0(%arg0: i32) -> (i32, i32, i32) {
    %c0_i32 = arith.constant 0 : i32
    %c0_i32_0 = arith.constant 0 : i32
    %c0_i32_1 = arith.constant 0 : i32
    return %arg0, %c0_i32, %c0_i32_0 : i32, i32, i32
  }
  func.func @transform_1(%arg0: i32) -> (i32, i32) {
    %c0_i32 = arith.constant 0 : i32
    %c0_i32_0 = arith.constant 0 : i32
    %c0_i32_1 = arith.constant 0 : i32
    return %c0_i32, %c0_i32_0 : i32, i32
  }
  func.func @transform_2(%arg0: i32) -> (i32, i32) {
    %c0_i32 = arith.constant 0 : i32
    %c0_i32_0 = arith.constant 0 : i32
    %c0_i32_1 = arith.constant 0 : i32
    return %c0_i32, %c0_i32_0 : i32, i32
  }
  func.func @transform_3(%arg0: i32) -> (i32, i32, i32) {
    %c0_i32 = arith.constant 0 : i32
    %c0_i32_0 = arith.constant 0 : i32
    %c0_i32_1 = arith.constant 0 : i32
    return %arg0, %c0_i32, %c0_i32_0 : i32, i32, i32
  }
}

module attributes {stable_mosaic.version = 11 : i64} {
  func.func @_conv_gemm_kernel(%arg0: i32, %arg1: memref<1x64x1024xbf16, #tpu.memory_space<vmem>>, %arg2: memref<1024x128xbf16, #tpu.memory_space<vmem>>, %arg3: memref<1x128xf32, #tpu.memory_space<vmem>>, %arg4: memref<1x64x128xbf16, #tpu.memory_space<vmem>>) attributes {dimension_semantics = [#tpu.dimension_semantics<parallel>], iteration_bounds = array<i64: 2>, scalar_prefetch = 0 : i64, scratch_operands = 0 : i64, tpu.core_type = #tpu.core_type<tc>, window_params = [{transform_indices = @transform_0, window_bounds = array<i64: 1, 64, 1024>}, {pipeline_mode = #tpu.pipeline_mode<synchronous>, transform_indices = @transform_1, window_bounds = array<i64: 1024, 128>}, {pipeline_mode = #tpu.pipeline_mode<synchronous>, transform_indices = @transform_2, window_bounds = array<i64: 1, 128>}, {transform_indices = @transform_3, window_bounds = array<i64: 1, 64, 128>}]} {
    %c0 = arith.constant 0 : index
    %c0_0 = arith.constant 0 : index
    %c0_1 = arith.constant 0 : index
    %0 = vector.load %arg1[%c0, %c0_0, %c0_1] : memref<1x64x1024xbf16, #tpu.memory_space<vmem>>, vector<1x64x1024xbf16>
    %1 = vector.shape_cast %0 : vector<1x64x1024xbf16> to vector<64x1024xbf16>
    %c0_2 = arith.constant 0 : index
    %c0_3 = arith.constant 0 : index
    %2 = vector.load %arg2[%c0_2, %c0_3] : memref<1024x128xbf16, #tpu.memory_space<vmem>>, vector<1024x128xbf16>
    %cst = arith.constant dense<0.000000e+00> : vector<64x128xf32>
    %3 = tpu.matmul %1, %2, %cst {dimension_numbers = #tpu.dot_dimension_numbers<[1], [0], [0], [1], [0, 0, 1, 1], [], []>} : vector<64x1024xbf16>, vector<1024x128xbf16>, vector<64x128xf32> -> vector<64x128xf32>
    %c0_4 = arith.constant 0 : index
    %c0_5 = arith.constant 0 : index
    %4 = vector.load %arg3[%c0_4, %c0_5] : memref<1x128xf32, #tpu.memory_space<vmem>>, vector<1x128xf32>
    %5 = vector.broadcast %4 : vector<1x128xf32> to vector<64x128xf32>
    %6 = arith.addf %3, %5 : vector<64x128xf32>
    %cst_6 = arith.constant dense<0.000000e+00> : vector<128xf32>
    %7 = vector.multi_reduction <add>, %6, %cst_6 [0] : vector<64x128xf32> to vector<128xf32>
    %8 = vector.shape_cast %7 : vector<128xf32> to vector<1x128xf32>
    %cst_7 = arith.constant 6.400000e+01 : f32
    %9 = vector.broadcast %cst_7 : f32 to vector<1x128xf32>
    %10 = arith.divf %8, %9 : vector<1x128xf32>
    %11 = vector.broadcast %10 : vector<1x128xf32> to vector<64x128xf32>
    %12 = arith.subf %6, %11 : vector<64x128xf32>
    %13 = arith.mulf %12, %12 : vector<64x128xf32>
    %cst_8 = arith.constant dense<0.000000e+00> : vector<128xf32>
    %14 = vector.multi_reduction <add>, %13, %cst_8 [0] : vector<64x128xf32> to vector<128xf32>
    %15 = vector.shape_cast %14 : vector<128xf32> to vector<1x128xf32>
    %cst_9 = arith.constant 6.400000e+01 : f32
    %16 = vector.broadcast %cst_9 : f32 to vector<1x128xf32>
    %17 = arith.divf %15, %16 : vector<1x128xf32>
    %cst_10 = arith.constant 9.99999974E-6 : f32
    %18 = vector.broadcast %cst_10 : f32 to vector<1x128xf32>
    %19 = arith.addf %17, %18 : vector<1x128xf32>
    %20 = math.rsqrt %19 : vector<1x128xf32>
    %21 = vector.broadcast %20 : vector<1x128xf32> to vector<64x128xf32>
    %22 = arith.mulf %12, %21 : vector<64x128xf32>
    %cst_11 = arith.constant 0.000000e+00 : f32
    %23 = vector.broadcast %cst_11 : f32 to vector<64x128xf32>
    %24 = arith.cmpf oge, %22, %23 : vector<64x128xf32>
    %cst_12 = arith.constant 2.000000e-01 : f32
    %25 = vector.broadcast %cst_12 : f32 to vector<64x128xf32>
    %26 = arith.mulf %25, %22 : vector<64x128xf32>
    %27 = arith.select %24, %22, %26 : vector<64x128xi1>, vector<64x128xf32>
    %28 = arith.truncf %27 : vector<64x128xf32> to vector<64x128xbf16>
    %c0_13 = arith.constant 0 : index
    %c0_14 = arith.constant 0 : index
    %c0_15 = arith.constant 0 : index
    %29 = vector.load %arg4[%c0_13, %c0_14, %c0_15] : memref<1x64x128xbf16, #tpu.memory_space<vmem>>, vector<1x64x128xbf16>
    %30 = vector.shape_cast %29 : vector<1x64x128xbf16> to vector<64x128xbf16>
    %31 = vector.shape_cast %28 : vector<64x128xbf16> to vector<1x64x128xbf16>
    tpu.vector_store %arg4[%c0_13, %c0_14, %c0_15], %31 {strides = array<i32>} : memref<1x64x128xbf16, #tpu.memory_space<vmem>>, vector<1x64x128xbf16>,
    return
  }
  func.func @transform_0(%arg0: i32) -> (i32, i32, i32) {
    %c0_i32 = arith.constant 0 : i32
    %c0_i32_0 = arith.constant 0 : i32
    %c0_i32_1 = arith.constant 0 : i32
    return %arg0, %c0_i32, %c0_i32_0 : i32, i32, i32
  }
  func.func @transform_1(%arg0: i32) -> (i32, i32) {
    %c0_i32 = arith.constant 0 : i32
    %c0_i32_0 = arith.constant 0 : i32
    %c0_i32_1 = arith.constant 0 : i32
    return %c0_i32, %c0_i32_0 : i32, i32
  }
  func.func @transform_2(%arg0: i32) -> (i32, i32) {
    %c0_i32 = arith.constant 0 : i32
    %c0_i32_0 = arith.constant 0 : i32
    %c0_i32_1 = arith.constant 0 : i32
    return %c0_i32, %c0_i32_0 : i32, i32
  }
  func.func @transform_3(%arg0: i32) -> (i32, i32, i32) {
    %c0_i32 = arith.constant 0 : i32
    %c0_i32_0 = arith.constant 0 : i32
    %c0_i32_1 = arith.constant 0 : i32
    return %arg0, %c0_i32, %c0_i32_0 : i32, i32, i32
  }
}

module attributes {stable_mosaic.version = 11 : i64} {
  func.func @_conv_gemm_kernel(%arg0: i32, %arg1: memref<1x16x2048xbf16, #tpu.memory_space<vmem>>, %arg2: memref<2048x256xbf16, #tpu.memory_space<vmem>>, %arg3: memref<1x256xf32, #tpu.memory_space<vmem>>, %arg4: memref<1x16x256xbf16, #tpu.memory_space<vmem>>) attributes {dimension_semantics = [#tpu.dimension_semantics<parallel>], iteration_bounds = array<i64: 2>, scalar_prefetch = 0 : i64, scratch_operands = 0 : i64, tpu.core_type = #tpu.core_type<tc>, window_params = [{transform_indices = @transform_0, window_bounds = array<i64: 1, 16, 2048>}, {pipeline_mode = #tpu.pipeline_mode<synchronous>, transform_indices = @transform_1, window_bounds = array<i64: 2048, 256>}, {pipeline_mode = #tpu.pipeline_mode<synchronous>, transform_indices = @transform_2, window_bounds = array<i64: 1, 256>}, {transform_indices = @transform_3, window_bounds = array<i64: 1, 16, 256>}]} {
    %c0 = arith.constant 0 : index
    %c0_0 = arith.constant 0 : index
    %c0_1 = arith.constant 0 : index
    %0 = vector.load %arg1[%c0, %c0_0, %c0_1] : memref<1x16x2048xbf16, #tpu.memory_space<vmem>>, vector<1x16x2048xbf16>
    %1 = vector.shape_cast %0 : vector<1x16x2048xbf16> to vector<16x2048xbf16>
    %c0_2 = arith.constant 0 : index
    %c0_3 = arith.constant 0 : index
    %2 = vector.load %arg2[%c0_2, %c0_3] : memref<2048x256xbf16, #tpu.memory_space<vmem>>, vector<2048x256xbf16>
    %cst = arith.constant dense<0.000000e+00> : vector<16x256xf32>
    %3 = tpu.matmul %1, %2, %cst {dimension_numbers = #tpu.dot_dimension_numbers<[1], [0], [0], [1], [0, 0, 1, 1], [], []>} : vector<16x2048xbf16>, vector<2048x256xbf16>, vector<16x256xf32> -> vector<16x256xf32>
    %c0_4 = arith.constant 0 : index
    %c0_5 = arith.constant 0 : index
    %4 = vector.load %arg3[%c0_4, %c0_5] : memref<1x256xf32, #tpu.memory_space<vmem>>, vector<1x256xf32>
    %5 = vector.broadcast %4 : vector<1x256xf32> to vector<16x256xf32>
    %6 = arith.addf %3, %5 : vector<16x256xf32>
    %cst_6 = arith.constant dense<0.000000e+00> : vector<256xf32>
    %7 = vector.multi_reduction <add>, %6, %cst_6 [0] : vector<16x256xf32> to vector<256xf32>
    %8 = vector.shape_cast %7 : vector<256xf32> to vector<1x256xf32>
    %cst_7 = arith.constant 1.600000e+01 : f32
    %9 = vector.broadcast %cst_7 : f32 to vector<1x256xf32>
    %10 = arith.divf %8, %9 : vector<1x256xf32>
    %11 = vector.broadcast %10 : vector<1x256xf32> to vector<16x256xf32>
    %12 = arith.subf %6, %11 : vector<16x256xf32>
    %13 = arith.mulf %12, %12 : vector<16x256xf32>
    %cst_8 = arith.constant dense<0.000000e+00> : vector<256xf32>
    %14 = vector.multi_reduction <add>, %13, %cst_8 [0] : vector<16x256xf32> to vector<256xf32>
    %15 = vector.shape_cast %14 : vector<256xf32> to vector<1x256xf32>
    %cst_9 = arith.constant 1.600000e+01 : f32
    %16 = vector.broadcast %cst_9 : f32 to vector<1x256xf32>
    %17 = arith.divf %15, %16 : vector<1x256xf32>
    %cst_10 = arith.constant 9.99999974E-6 : f32
    %18 = vector.broadcast %cst_10 : f32 to vector<1x256xf32>
    %19 = arith.addf %17, %18 : vector<1x256xf32>
    %20 = math.rsqrt %19 : vector<1x256xf32>
    %21 = vector.broadcast %20 : vector<1x256xf32> to vector<16x256xf32>
    %22 = arith.mulf %12, %21 : vector<16x256xf32>
    %cst_11 = arith.constant 0.000000e+00 : f32
    %23 = vector.broadcast %cst_11 : f32 to vector<16x256xf32>
    %24 = arith.cmpf oge, %22, %23 : vector<16x256xf32>
    %cst_12 = arith.constant 2.000000e-01 : f32
    %25 = vector.broadcast %cst_12 : f32 to vector<16x256xf32>
    %26 = arith.mulf %25, %22 : vector<16x256xf32>
    %27 = arith.select %24, %22, %26 : vector<16x256xi1>, vector<16x256xf32>
    %28 = arith.truncf %27 : vector<16x256xf32> to vector<16x256xbf16>
    %c0_13 = arith.constant 0 : index
    %c0_14 = arith.constant 0 : index
    %c0_15 = arith.constant 0 : index
    %29 = vector.load %arg4[%c0_13, %c0_14, %c0_15] : memref<1x16x256xbf16, #tpu.memory_space<vmem>>, vector<1x16x256xbf16>
    %30 = vector.shape_cast %29 : vector<1x16x256xbf16> to vector<16x256xbf16>
    %31 = vector.shape_cast %28 : vector<16x256xbf16> to vector<1x16x256xbf16>
    tpu.vector_store %arg4[%c0_13, %c0_14, %c0_15], %31 {strides = array<i32>} : memref<1x16x256xbf16, #tpu.memory_space<vmem>>, vector<1x16x256xbf16>,
    return
  }
  func.func @transform_0(%arg0: i32) -> (i32, i32, i32) {
    %c0_i32 = arith.constant 0 : i32
    %c0_i32_0 = arith.constant 0 : i32
    %c0_i32_1 = arith.constant 0 : i32
    return %arg0, %c0_i32, %c0_i32_0 : i32, i32, i32
  }
  func.func @transform_1(%arg0: i32) -> (i32, i32) {
    %c0_i32 = arith.constant 0 : i32
    %c0_i32_0 = arith.constant 0 : i32
    %c0_i32_1 = arith.constant 0 : i32
    return %c0_i32, %c0_i32_0 : i32, i32
  }
  func.func @transform_2(%arg0: i32) -> (i32, i32) {
    %c0_i32 = arith.constant 0 : i32
    %c0_i32_0 = arith.constant 0 : i32
    %c0_i32_1 = arith.constant 0 : i32
    return %c0_i32, %c0_i32_0 : i32, i32
  }
  func.func @transform_3(%arg0: i32) -> (i32, i32, i32) {
    %c0_i32 = arith.constant 0 : i32
    %c0_i32_0 = arith.constant 0 : i32
    %c0_i32_1 = arith.constant 0 : i32
    return %arg0, %c0_i32, %c0_i32_0 : i32, i32, i32
  }
}

module attributes {stable_mosaic.version = 11 : i64} {
  func.func @_conv4_final_kernel(%arg0: i32, %arg1: memref<1x4x4096xbf16, #tpu.memory_space<vmem>>, %arg2: memref<4096x512xbf16, #tpu.memory_space<vmem>>, %arg3: memref<1x512xf32, #tpu.memory_space<vmem>>, %arg4: memref<4x4x512xf32, #tpu.memory_space<vmem>>, %arg5: memref<1x4x1xf32, #tpu.memory_space<vmem>>) attributes {dimension_semantics = [#tpu.dimension_semantics<parallel>], iteration_bounds = array<i64: 2>, scalar_prefetch = 0 : i64, scratch_operands = 0 : i64, tpu.core_type = #tpu.core_type<tc>, window_params = [{transform_indices = @transform_0, window_bounds = array<i64: 1, 4, 4096>}, {pipeline_mode = #tpu.pipeline_mode<synchronous>, transform_indices = @transform_1, window_bounds = array<i64: 4096, 512>}, {pipeline_mode = #tpu.pipeline_mode<synchronous>, transform_indices = @transform_2, window_bounds = array<i64: 1, 512>}, {pipeline_mode = #tpu.pipeline_mode<synchronous>, transform_indices = @transform_3, window_bounds = array<i64: 4, 4, 512>}, {transform_indices = @transform_4, window_bounds = array<i64: 1, 4, 1>}]} {
    %c0 = arith.constant 0 : index
    %c0_0 = arith.constant 0 : index
    %c0_1 = arith.constant 0 : index
    %0 = vector.load %arg1[%c0, %c0_0, %c0_1] : memref<1x4x4096xbf16, #tpu.memory_space<vmem>>, vector<1x4x4096xbf16>
    %1 = vector.shape_cast %0 : vector<1x4x4096xbf16> to vector<4x4096xbf16>
    %c0_2 = arith.constant 0 : index
    %c0_3 = arith.constant 0 : index
    %2 = vector.load %arg2[%c0_2, %c0_3] : memref<4096x512xbf16, #tpu.memory_space<vmem>>, vector<4096x512xbf16>
    %cst = arith.constant dense<0.000000e+00> : vector<4x512xf32>
    %3 = tpu.matmul %1, %2, %cst {dimension_numbers = #tpu.dot_dimension_numbers<[1], [0], [0], [1], [0, 0, 1, 1], [], []>} : vector<4x4096xbf16>, vector<4096x512xbf16>, vector<4x512xf32> -> vector<4x512xf32>
    %c0_4 = arith.constant 0 : index
    %c0_5 = arith.constant 0 : index
    %4 = vector.load %arg3[%c0_4, %c0_5] : memref<1x512xf32, #tpu.memory_space<vmem>>, vector<1x512xf32>
    %5 = vector.broadcast %4 : vector<1x512xf32> to vector<4x512xf32>
    %6 = arith.addf %3, %5 : vector<4x512xf32>
    %cst_6 = arith.constant dense<0.000000e+00> : vector<512xf32>
    %7 = vector.multi_reduction <add>, %6, %cst_6 [0] : vector<4x512xf32> to vector<512xf32>
    %8 = vector.shape_cast %7 : vector<512xf32> to vector<1x512xf32>
    %cst_7 = arith.constant 4.000000e+00 : f32
    %9 = vector.broadcast %cst_7 : f32 to vector<1x512xf32>
    %10 = arith.divf %8, %9 : vector<1x512xf32>
    %11 = vector.broadcast %10 : vector<1x512xf32> to vector<4x512xf32>
    %12 = arith.subf %6, %11 : vector<4x512xf32>
    %13 = arith.mulf %12, %12 : vector<4x512xf32>
    %cst_8 = arith.constant dense<0.000000e+00> : vector<512xf32>
    %14 = vector.multi_reduction <add>, %13, %cst_8 [0] : vector<4x512xf32> to vector<512xf32>
    %15 = vector.shape_cast %14 : vector<512xf32> to vector<1x512xf32>
    %cst_9 = arith.constant 4.000000e+00 : f32
    %16 = vector.broadcast %cst_9 : f32 to vector<1x512xf32>
    %17 = arith.divf %15, %16 : vector<1x512xf32>
    %cst_10 = arith.constant 9.99999974E-6 : f32
    %18 = vector.broadcast %cst_10 : f32 to vector<1x512xf32>
    %19 = arith.addf %17, %18 : vector<1x512xf32>
    %20 = math.rsqrt %19 : vector<1x512xf32>
    %21 = vector.broadcast %20 : vector<1x512xf32> to vector<4x512xf32>
    %22 = arith.mulf %12, %21 : vector<4x512xf32>
    %cst_11 = arith.constant 0.000000e+00 : f32
    %23 = vector.broadcast %cst_11 : f32 to vector<4x512xf32>
    %24 = arith.cmpf oge, %22, %23 : vector<4x512xf32>
    %cst_12 = arith.constant 2.000000e-01 : f32
    %25 = vector.broadcast %cst_12 : f32 to vector<4x512xf32>
    %26 = arith.mulf %25, %22 : vector<4x512xf32>
    %27 = arith.select %24, %22, %26 : vector<4x512xi1>, vector<4x512xf32>
    %c0_13 = arith.constant 0 : index
    %c0_14 = arith.constant 0 : index
    %c0_15 = arith.constant 0 : index
    %28 = vector.load %arg4[%c0_13, %c0_14, %c0_15] : memref<4x4x512xf32, #tpu.memory_space<vmem>>, vector<1x4x512xf32>
    %29 = vector.shape_cast %28 : vector<1x4x512xf32> to vector<4x512xf32>
    %30 = arith.mulf %29, %27 : vector<4x512xf32>
    %cst_16 = arith.constant dense<0.000000e+00> : vector<4xf32>
    %31 = vector.multi_reduction <add>, %30, %cst_16 [1] : vector<4x512xf32> to vector<4xf32>
    %32 = vector.shape_cast %31 : vector<4xf32> to vector<4x1xf32>
    %cst_17 = arith.constant dense<0.000000e+00> : vector<1xf32>
    %33 = vector.multi_reduction <add>, %32, %cst_17 [0] : vector<4x1xf32> to vector<1xf32>
    %34 = vector.shape_cast %33 : vector<1xf32> to vector<1x1xf32>
    %c1 = arith.constant 1 : index
    %c0_18 = arith.constant 0 : index
    %c0_19 = arith.constant 0 : index
    %35 = vector.load %arg4[%c1, %c0_18, %c0_19] : memref<4x4x512xf32, #tpu.memory_space<vmem>>, vector<1x4x512xf32>
    %36 = vector.shape_cast %35 : vector<1x4x512xf32> to vector<4x512xf32>
    %37 = arith.mulf %36, %27 : vector<4x512xf32>
    %cst_20 = arith.constant dense<0.000000e+00> : vector<4xf32>
    %38 = vector.multi_reduction <add>, %37, %cst_20 [1] : vector<4x512xf32> to vector<4xf32>
    %39 = vector.shape_cast %38 : vector<4xf32> to vector<4x1xf32>
    %cst_21 = arith.constant dense<0.000000e+00> : vector<1xf32>
    %40 = vector.multi_reduction <add>, %39, %cst_21 [0] : vector<4x1xf32> to vector<1xf32>
    %41 = vector.shape_cast %40 : vector<1xf32> to vector<1x1xf32>
    %c2 = arith.constant 2 : index
    %c0_22 = arith.constant 0 : index
    %c0_23 = arith.constant 0 : index
    %42 = vector.load %arg4[%c2, %c0_22, %c0_23] : memref<4x4x512xf32, #tpu.memory_space<vmem>>, vector<1x4x512xf32>
    %43 = vector.shape_cast %42 : vector<1x4x512xf32> to vector<4x512xf32>
    %44 = arith.mulf %43, %27 : vector<4x512xf32>
    %cst_24 = arith.constant dense<0.000000e+00> : vector<4xf32>
    %45 = vector.multi_reduction <add>, %44, %cst_24 [1] : vector<4x512xf32> to vector<4xf32>
    %46 = vector.shape_cast %45 : vector<4xf32> to vector<4x1xf32>
    %cst_25 = arith.constant dense<0.000000e+00> : vector<1xf32>
    %47 = vector.multi_reduction <add>, %46, %cst_25 [0] : vector<4x1xf32> to vector<1xf32>
    %48 = vector.shape_cast %47 : vector<1xf32> to vector<1x1xf32>
    %c3 = arith.constant 3 : index
    %c0_26 = arith.constant 0 : index
    %c0_27 = arith.constant 0 : index
    %49 = vector.load %arg4[%c3, %c0_26, %c0_27] : memref<4x4x512xf32, #tpu.memory_space<vmem>>, vector<1x4x512xf32>
    %50 = vector.shape_cast %49 : vector<1x4x512xf32> to vector<4x512xf32>
    %51 = arith.mulf %50, %27 : vector<4x512xf32>
    %cst_28 = arith.constant dense<0.000000e+00> : vector<4xf32>
    %52 = vector.multi_reduction <add>, %51, %cst_28 [1] : vector<4x512xf32> to vector<4xf32>
    %53 = vector.shape_cast %52 : vector<4xf32> to vector<4x1xf32>
    %cst_29 = arith.constant dense<0.000000e+00> : vector<1xf32>
    %54 = vector.multi_reduction <add>, %53, %cst_29 [0] : vector<4x1xf32> to vector<1xf32>
    %55 = vector.shape_cast %54 : vector<1xf32> to vector<1x1xf32>
    %56 = tpu.concatenate %34, %41, %48, %55 in 0 : vector<1x1xf32>, vector<1x1xf32>, vector<1x1xf32>, vector<1x1xf32> -> vector<4x1xf32>
    %c0_30 = arith.constant 0 : index
    %c0_31 = arith.constant 0 : index
    %c0_32 = arith.constant 0 : index
    %57 = vector.load %arg5[%c0_30, %c0_31, %c0_32] : memref<1x4x1xf32, #tpu.memory_space<vmem>>, vector<1x4x1xf32>
    %58 = vector.shape_cast %57 : vector<1x4x1xf32> to vector<4x1xf32>
    %59 = vector.shape_cast %56 : vector<4x1xf32> to vector<1x4x1xf32>
    tpu.vector_store %arg5[%c0_30, %c0_31, %c0_32], %59 {strides = array<i32>} : memref<1x4x1xf32, #tpu.memory_space<vmem>>, vector<1x4x1xf32>,
    return
  }
  func.func @transform_0(%arg0: i32) -> (i32, i32, i32) {
    %c0_i32 = arith.constant 0 : i32
    %c0_i32_0 = arith.constant 0 : i32
    %c0_i32_1 = arith.constant 0 : i32
    return %arg0, %c0_i32, %c0_i32_0 : i32, i32, i32
  }
  func.func @transform_1(%arg0: i32) -> (i32, i32) {
    %c0_i32 = arith.constant 0 : i32
    %c0_i32_0 = arith.constant 0 : i32
    %c0_i32_1 = arith.constant 0 : i32
    return %c0_i32, %c0_i32_0 : i32, i32
  }
  func.func @transform_2(%arg0: i32) -> (i32, i32) {
    %c0_i32 = arith.constant 0 : i32
    %c0_i32_0 = arith.constant 0 : i32
    %c0_i32_1 = arith.constant 0 : i32
    return %c0_i32, %c0_i32_0 : i32, i32
  }
  func.func @transform_3(%arg0: i32) -> (i32, i32, i32) {
    %c0_i32 = arith.constant 0 : i32
    %c0_i32_0 = arith.constant 0 : i32
    %c0_i32_1 = arith.constant 0 : i32
    %c0_i32_2 = arith.constant 0 : i32
    return %c0_i32, %c0_i32_0, %c0_i32_1 : i32, i32, i32
  }
  func.func @transform_4(%arg0: i32) -> (i32, i32, i32) {
    %c0_i32 = arith.constant 0 : i32
    %c0_i32_0 = arith.constant 0 : i32
    %c0_i32_1 = arith.constant 0 : i32
    return %arg0, %c0_i32, %c0_i32_0 : i32, i32, i32
  }
}

</mosaic_0001>

<bundles_post_ra>
// kernel: discriminator_pallas.4
= control target key start
LH: loop header
LB: loop body
LE: loop exit
PB: predicated region body
PF: predicated region fallthrough
CT: control target
= control target key end

     0   :  { %s1083_s12 = smov 0   ;;  %s1258_s0 = inlined_call_operand.vmem [shape: bf16[2,256,64], index: 0, kind: input, shape index: {}]   ;;  %s1259_s1 = inlined_call_operand.vmem [shape: bf16[64,64], index: 1, kind: input, shape index: {}]   ;;  %s1260_s2 = inlined_call_operand.vmem [shape: f32[1,64], index: 2, kind: input, shape index: {}]   ;;  %s1261_s3 = inlined_call_operand.vmem [shape: bf16[2,256,64], index: 3, kind: output, shape index: {}]  }
   0x1 LB: > { %s845_s13 = sadd.s32 4294967295, %s1061_s12   ;;  %p849_p0 = scmp.ge.s32.totalorder %s1061_s12, 1  ;;  %s1061_s12 = sphi %s1083_s12, %s13_s12  }
   0x2   : > { %p137_p1 = scmp.lt.s32.totalorder %s1061_s12, 3 }
   0x4   : > { %p138_p2 = pnand %p849_p0, %p137_p1 }
   0x5   : > { %p161_p3 = scmp.lt.s32.totalorder (!%p138_p2), %s845_s13, 1 }
   0x6   : > { %141 = sbr.rel (%p138_p2) target bundleno = 268 (0x10c), region = 32 }
   0xb   : > { %v1035_v0 = vld [vmem:[%s1259_s1 + $0x18] sm:$0xff]   ;;  %v1036_v1 = vld [vmem:[%s1259_s1 + $0x10] sm:$0xff]   ;;  %s1263_s13 = smov (!%p161_p3, %s845_s13), 1  ;;  %v1037_v2 = vld [vmem:[%s1259_s1 + $0x8] sm:$0xff]   ;;  %vm323_vm0 = vcmask 523264   ;;  %vm757_vm3 = vcmask 519168  }
   0xc   : > { %979 = vmatprep.subr.bf16.mxu0 %v1035_v0  ;;  %1019 = vmatprep.subr.bf16.mxu1 %v1035_v0  ;;  %s925_s20 = sshll.u32 %s1263_s13, 7  ;;  %v1038_v5 = vld [vmem:[%s1259_s1] sm:$0xff]  }
   0xd   : > { %980 = vmatpush3.bf16.msra.mxu0 %v1035_v0  ;;  %1023 = vmatpush3.bf16.msra.mxu1 %v1035_v0  ;;  %s1108_s23 = scalar_lea.vmem %s1258_s0, %s925_s20  ;;  %v1148_v20 = vld [vmem:[%s1260_s2] ss:$0 sm:$0xff]  ;;  %s1159_s30 = scalar_lea.vmem %s1261_s3, %s925_s20 }
   0xe   : > { %981 = vmatprep.subr.bf16.mxu0 %v1036_v1  ;;  %1020 = vmatprep.subr.bf16.mxu1 %v1036_v1  ;;  %v1039_v3 = vld [vmem:[%s1108_s23] sm:$0xff]   ;;  %v1041_v6 = vld [vmem:[%s1108_s23 + $0x8] sm:$0xff]   ;;  %v1043_v8 = vld [vmem:[%s1108_s23 + $0x10] sm:$0xff]  }
   0xf   : > { %v1040_v4 = vld [vmem:[%s1108_s23 + $0x40] sm:$0xff]   ;;  %987 = vmatprep.mubr.msk.bf16.mxu0 %vm323_vm0, %v1039_v3  ;;  %v1042_v7 = vld [vmem:[%s1108_s23 + $0x48] sm:$0xff]   ;;  %v1044_v9 = vld [vmem:[%s1108_s23 + $0x50] sm:$0xff]  }
  0x10   : > { %1003 = vmatprep.mubr.msk.bf16.mxu1 %vm323_vm0, %v1040_v4  ;;  %v1045_v10 = vld [vmem:[%s1108_s23 + $0x18] sm:$0xff]   ;;  %v1047_v12 = vld [vmem:[%s1108_s23 + $0x20] sm:$0xff]   ;;  %v1049_v14 = vld [vmem:[%s1108_s23 + $0x28] sm:$0xff]  }
  0x11   : > { %982 = vmatpush3.bf16.msra.mxu0 %v1036_v1  ;;  %1024 = vmatpush3.bf16.msra.mxu1 %v1036_v1  ;;  %v1046_v11 = vld [vmem:[%s1108_s23 + $0x58] sm:$0xff]   ;;  %v1048_v13 = vld [vmem:[%s1108_s23 + $0x60] sm:$0xff]   ;;  %v1050_v15 = vld [vmem:[%s1108_s23 + $0x68] sm:$0xff]  }
  0x12   : > { %983 = vmatprep.subr.bf16.mxu0 %v1037_v2  ;;  %1021 = vmatprep.subr.bf16.mxu1 %v1037_v2  ;;  %v1051_v16 = vld [vmem:[%s1108_s23 + $0x30] sm:$0xff]   ;;  %v1053_v18 = vld [vmem:[%s1108_s23 + $0x38] sm:$0xff]  }
  0x13   : > { %v1052_v17 = vld [vmem:[%s1108_s23 + $0x70] sm:$0xff]   ;;  %v1054_v19 = vld [vmem:[%s1108_s23 + $0x78] sm:$0xff]  }
  0x15   : > { %984 = vmatpush3.bf16.msra.mxu0 %v1037_v2  ;;  %1025 = vmatpush3.bf16.msra.mxu1 %v1037_v2 }
  0x16   : > { %985 = vmatprep.subr.bf16.mxu0 %v1038_v5  ;;  %1022 = vmatprep.subr.bf16.mxu1 %v1038_v5 }
  0x19   : > { %986 = vmatpush3.bf16.msra.mxu0 %v1038_v5  ;;  %1026 = vmatpush3.bf16.msra.mxu1 %v1038_v5 }
  0x1c   : > { %988 = vmatmul.mubr.msk.bf16.vlgmr.msra.gmra.mxu0 %vm323_vm0, %v1041_v6  ;;  %1004 = vmatmul.mubr.msk.bf16.vlgmr.msra.gmra.mxu1 %vm323_vm0, %v1042_v7 }
  0x1d   : > { %991 = vmatprep.mubr.msk.bf16.mxu0 %vm323_vm0, %v1043_v8  ;;  %1007 = vmatprep.mubr.msk.bf16.mxu1 %vm323_vm0, %v1044_v9 }
  0x24   : > { %992 = vmatmul.mubr.msk.bf16.gmra.mxu0 %vm323_vm0, %v1045_v10  ;;  %1008 = vmatmul.mubr.msk.bf16.gmra.mxu1 %vm323_vm0, %v1046_v11 }
  0x25   : > { %995 = vmatprep.mubr.msk.bf16.mxu0 %vm323_vm0, %v1047_v12  ;;  %1011 = vmatprep.mubr.msk.bf16.mxu1 %vm323_vm0, %v1048_v13 }
  0x2c   : > { %996 = vmatmul.mubr.msk.bf16.gmra.mxu0 %vm323_vm0, %v1049_v14  ;;  %1012 = vmatmul.mubr.msk.bf16.gmra.mxu1 %vm323_vm0, %v1050_v15 }
  0x2d   : > { %999 = vmatprep.mubr.msk.bf16.mxu0 %vm323_vm0, %v1051_v16  ;;  %1015 = vmatprep.mubr.msk.bf16.mxu1 %vm323_vm0, %v1052_v17 }
  0x34   : > { %1000 = vmatmul.mubr.msk.bf16.gmra.mxu0 %vm323_vm0, %v1053_v18  ;;  %1016 = vmatmul.mubr.msk.bf16.gmra.mxu1 %vm323_vm0, %v1054_v19 }
  0xdc   : > { %v989_v21 = vpop.f32.mrf.mxu0  ;;  %v1005_v22 = vpop.f32.mrf.mxu1 }
  0xdd   : > { %v415_v23 = vadd.f32 %v989_v21, %v1148_v20  ;;  %v479_v24 = vadd.f32 %v1005_v22, %v1148_v20 }
  0xde   : > { %v406_v25 = vpop.f32.mrf.mxu0  ;;  %v470_v26 = vpop.f32.mrf.mxu1 }
  0xdf   : > { %vm535_vm1 = vcmp.ge.f32.partialorder %v415_v23, 0.0  ;;  %v567_v27 = vmul.f32 0.2, %v415_v23  ;;  %vm551_vm2 = vcmp.ge.f32.partialorder %v479_v24, 0.0  ;;  %v583_v28 = vmul.f32 0.2, %v479_v24 }
  0xe0   : > { %v407_v29 = vadd.f32 %v1148_v20, %v406_v25  ;;  %v471_v30 = vadd.f32 %v1148_v20, %v470_v26  ;;  %v990_v31 = vpop.f32.mrf.mxu0  ;;  %v1006_v32 = vpop.f32.mrf.mxu1 }
  0xe1   : > { %v599_v33 = vsel %vm535_vm1, %v415_v23, %v567_v27  ;;  %v615_v34 = vsel %vm551_vm2, %v479_v24, %v583_v28  ;;  %v418_v35 = vadd.f32 %v990_v31, %v1148_v20  ;;  %v482_v36 = vadd.f32 %v1006_v32, %v1148_v20 }
  0xe2   : > { %v929_v37 = vpack.c.bf16 %v599_v33, %v599_v33  ;;  %v945_v38 = vpack.c.bf16 %v615_v34, %v615_v34  ;;  %vm533_vm4 = vcmp.ge.f32.partialorder %v407_v29, 0.0  ;;  %v565_v39 = vmul.f32 0.2, %v407_v29  ;;  %v409_v40 = vpop.f32.mrf.mxu0  ;;  %v473_v41 = vpop.f32.mrf.mxu1 }
  0xe3   : > { %vm549_vm5 = vcmp.ge.f32.partialorder %v471_v30, 0.0  ;;  %v581_v42 = vmul.f32 0.2, %v471_v30  ;;  %vm536_vm6 = vcmp.ge.f32.partialorder %v418_v35, 0.0  ;;  %v568_v43 = vmul.f32 0.2, %v418_v35 }
  0xe4   : > { %760 = vst.msk [vmem:[%s1159_s30 + $0x8] sm:$0xf] %vm757_vm3, %v929_v37  ;;  %776 = vst.msk [vmem:[%s1159_s30 + $0x48] sm:$0xf] %vm757_vm3, %v945_v38  ;;  %v597_v44 = vsel %vm533_vm4, %v407_v29, %v565_v39  ;;  %vm552_vm7 = vcmp.ge.f32.partialorder %v482_v36, 0.0  ;;  %v410_v46 = vadd.f32 %v1148_v20, %v409_v40  ;;  %v993_v47 = vpop.f32.mrf.mxu0  ;;  %v1009_v48 = vpop.f32.mrf.mxu1  ;;  %v474_v52 = vadd.f32 %v1148_v20, %v473_v41 }
  0xe5   : > { %v584_v45 = vmul.f32 0.2, %v482_v36  ;;  %v927_v49 = vpack.c.bf16 %v597_v44, %v597_v44  ;;  %v613_v50 = vsel %vm549_vm5, %v471_v30, %v581_v42  ;;  %v600_v51 = vsel %vm536_vm6, %v418_v35, %v568_v43 }
  0xe6   : > { %v943_v53 = vpack.c.bf16 %v613_v50, %v613_v50  ;;  %v930_v54 = vpack.c.bf16 %v600_v51, %v600_v51  ;;  %vm534_vm8 = vcmp.ge.f32.partialorder %v410_v46, 0.0  ;;  %v422_v56 = vpop.f32.mrf.mxu0  ;;  %v486_v57 = vpop.f32.mrf.mxu1  ;;  %v566_v59 = vmul.f32 0.2, %v410_v46 }
  0xe7   : > { %v616_v55 = vsel %vm552_vm7, %v482_v36, %v584_v45  ;;  %758 = vst.msk [vmem:[%s1159_s30] sm:$0xf] %vm757_vm3, %v927_v49  ;;  %vm550_vm9 = vcmp.ge.f32.partialorder %v474_v52, 0.0  ;;  %v582_v60 = vmul.f32 0.2, %v474_v52  ;;  %v431_v61 = vadd.f32 %v993_v47, %v1148_v20 }
  0xe8   : > { %v946_v58 = vpack.c.bf16 %v616_v55, %v616_v55  ;;  %774 = vst.msk [vmem:[%s1159_s30 + $0x40] sm:$0xf] %vm757_vm3, %v943_v53  ;;  %761 = vst.msk [vmem:[%s1159_s30 + $0xc] sm:$0xf] %vm757_vm3, %v930_v54  ;;  %v495_v62 = vadd.f32 %v1009_v48, %v1148_v20  ;;  %v423_v63 = vadd.f32 %v1148_v20, %v422_v56  ;;  %v994_v1 = vpop.f32.mrf.mxu0  ;;  %v1010_v2 = vpop.f32.mrf.mxu1 }
  0xe9   : > { %v487_v0 = vadd.f32 %v1148_v20, %v486_v57  ;;  %v598_v3 = vsel %vm534_vm8, %v410_v46, %v566_v59  ;;  %v614_v4 = vsel %vm550_vm9, %v474_v52, %v582_v60  ;;  %v434_v5 = vadd.f32 %v994_v1, %v1148_v20 }
  0xea   : > { %777 = vst.msk [vmem:[%s1159_s30 + $0x4c] sm:$0xf] %vm757_vm3, %v946_v58  ;;  %v498_v6 = vadd.f32 %v1010_v2, %v1148_v20  ;;  %v928_v7 = vpack.c.bf16 %v598_v3, %v598_v3  ;;  %v944_v8 = vpack.c.bf16 %v614_v4, %v614_v4  ;;  %vm539_vm10 = vcmp.ge.f32.partialorder %v431_v61, 0.0  ;;  %v425_v10 = vpop.f32.mrf.mxu0  ;;  %v489_v11 = vpop.f32.mrf.mxu1 }
  0xeb   : > { %v571_v9 = vmul.f32 0.2, %v431_v61  ;;  %vm555_vm11 = vcmp.ge.f32.partialorder %v495_v62, 0.0  ;;  %v587_v12 = vmul.f32 0.2, %v495_v62  ;;  %vm537_vm12 = vcmp.ge.f32.partialorder %v423_v63, 0.0 }
  0xec   : > { %v569_v13 = vmul.f32 0.2, %v423_v63  ;;  %759 = vst.msk [vmem:[%s1159_s30 + $0x4] sm:$0xf] %vm757_vm3, %v928_v7  ;;  %775 = vst.msk [vmem:[%s1159_s30 + $0x44] sm:$0xf] %vm757_vm3, %v944_v8  ;;  %v997_v16 = vpop.f32.mrf.mxu0  ;;  %v1013_v17 = vpop.f32.mrf.mxu1  ;;  %v426_v31 = vadd.f32 %v1148_v20, %v425_v10  ;;  %v490_v33 = vadd.f32 %v1148_v20, %v489_v11 }
  0xed   : > { %v603_v14 = vsel %vm539_vm10, %v431_v61, %v571_v9  ;;  %vm553_vm13 = vcmp.ge.f32.partialorder %v487_v0, 0.0  ;;  %v585_v15 = vmul.f32 0.2, %v487_v0  ;;  %vm540_vm14 = vcmp.ge.f32.partialorder %v434_v5, 0.0 }
  0xee   : > { %v933_v18 = vpack.c.bf16 %v603_v14, %v603_v14  ;;  %v619_v19 = vsel %vm555_vm11, %v495_v62, %v587_v12  ;;  %v601_v21 = vsel %vm537_vm12, %v423_v63, %v569_v13  ;;  %v572_v22 = vmul.f32 0.2, %v434_v5  ;;  %v438_v26 = vpop.f32.mrf.mxu0  ;;  %v502_v27 = vpop.f32.mrf.mxu1 }
  0xef   : > { %v949_v23 = vpack.c.bf16 %v619_v19, %v619_v19  ;;  %v931_v24 = vpack.c.bf16 %v601_v21, %v601_v21  ;;  %v617_v25 = vsel %vm553_vm13, %v487_v0, %v585_v15  ;;  %vm556_vm15 = vcmp.ge.f32.partialorder %v498_v6, 0.0 }
  0xf0   : > { %764 = vst.msk [vmem:[%s1159_s30 + $0x18] sm:$0xf] %vm757_vm3, %v933_v18  ;;  %v947_v28 = vpack.c.bf16 %v617_v25, %v617_v25  ;;  %v604_v29 = vsel %vm540_vm14, %v434_v5, %v572_v22  ;;  %v588_v30 = vmul.f32 0.2, %v498_v6  ;;  %v447_v34 = vadd.f32 %v997_v16, %v1148_v20  ;;  %v998_v36 = vpop.f32.mrf.mxu0  ;;  %v1014_v37 = vpop.f32.mrf.mxu1 }
  0xf1   : > { %780 = vst.msk [vmem:[%s1159_s30 + $0x58] sm:$0xf] %vm757_vm3, %v949_v23  ;;  %762 = vst.msk [vmem:[%s1159_s30 + $0x10] sm:$0xf] %vm757_vm3, %v931_v24  ;;  %v934_v32 = vpack.c.bf16 %v604_v29, %v604_v29  ;;  %v511_v35 = vadd.f32 %v1013_v17, %v1148_v20  ;;  %vm538_vm0 = vcmp.ge.f32.partialorder %v426_v31, 0.0  ;;  %v439_v40 = vadd.f32 %v1148_v20, %v438_v26 }
  0xf2   : > { %778 = vst.msk [vmem:[%s1159_s30 + $0x50] sm:$0xf] %vm757_vm3, %v947_v28  ;;  %v620_v38 = vsel %vm556_vm15, %v498_v6, %v588_v30  ;;  %v570_v39 = vmul.f32 0.2, %v426_v31  ;;  %vm554_vm1 = vcmp.ge.f32.partialorder %v490_v33, 0.0  ;;  %vm543_vm2 = vcmp.ge.f32.partialorder %v447_v34, 0.0  ;;  %v441_v43 = vpop.f32.mrf.mxu0  ;;  %v505_v44 = vpop.f32.mrf.mxu1 }
  0xf3   : > { %765 = vst.msk [vmem:[%s1159_s30 + $0x1c] sm:$0xf] %vm757_vm3, %v934_v32  ;;  %v950_v41 = vpack.c.bf16 %v620_v38, %v620_v38  ;;  %v586_v42 = vmul.f32 0.2, %v490_v33  ;;  %v575_v46 = vmul.f32 0.2, %v447_v34  ;;  %v503_v56 = vadd.f32 %v1148_v20, %v502_v27 }
  0xf4   : > { %v602_v45 = vsel %vm538_vm0, %v426_v31, %v570_v39  ;;  %vm559_vm4 = vcmp.ge.f32.partialorder %v511_v35, 0.0  ;;  %v591_v47 = vmul.f32 0.2, %v511_v35  ;;  %vm541_vm5 = vcmp.ge.f32.partialorder %v439_v40, 0.0  ;;  %v1001_v51 = vpop.f32.mrf.mxu0  ;;  %v1017_v52 = vpop.f32.mrf.mxu1 }
  0xf5   : > { %781 = vst.msk [vmem:[%s1159_s30 + $0x5c] sm:$0xf] %vm757_vm3, %v950_v41  ;;  %v932_v48 = vpack.c.bf16 %v602_v45, %v602_v45  ;;  %v618_v49 = vsel %vm554_vm1, %v490_v33, %v586_v42  ;;  %v573_v50 = vmul.f32 0.2, %v439_v40  ;;  %v607_v54 = vsel %vm543_vm2, %v447_v34, %v575_v46 }
  0xf6   : > { %v948_v53 = vpack.c.bf16 %v618_v49, %v618_v49  ;;  %v623_v55 = vsel %vm559_vm4, %v511_v35, %v591_v47  ;;  %v937_v57 = vpack.c.bf16 %v607_v54, %v607_v54  ;;  %v450_v60 = vadd.f32 %v998_v36, %v1148_v20  ;;  %v454_v61 = vpop.f32.mrf.mxu0  ;;  %v518_v1 = vpop.f32.mrf.mxu1 }
  0xf7   : > { %763 = vst.msk [vmem:[%s1159_s30 + $0x14] sm:$0xf] %vm757_vm3, %v932_v48  ;;  %v953_v58 = vpack.c.bf16 %v623_v55, %v623_v55  ;;  %v605_v59 = vsel %vm541_vm5, %v439_v40, %v573_v50  ;;  %vm557_vm6 = vcmp.ge.f32.partialorder %v503_v56, 0.0  ;;  %v589_v63 = vmul.f32 0.2, %v503_v56 }
  0xf8   : > { %779 = vst.msk [vmem:[%s1159_s30 + $0x54] sm:$0xf] %vm757_vm3, %v948_v53  ;;  %v935_v62 = vpack.c.bf16 %v605_v59, %v605_v59  ;;  %v514_v0 = vadd.f32 %v1014_v37, %v1148_v20  ;;  %768 = vst.msk [vmem:[%s1159_s30 + $0x28] sm:$0xf] %vm757_vm3, %v937_v57  ;;  %vm544_vm7 = vcmp.ge.f32.partialorder %v450_v60, 0.0  ;;  %v442_v3 = vadd.f32 %v1148_v20, %v441_v43  ;;  %v1002_v11 = vpop.f32.mrf.mxu0  ;;  %v1018_v15 = vpop.f32.mrf.mxu1 }
  0xf9   : > { %784 = vst.msk [vmem:[%s1159_s30 + $0x68] sm:$0xf] %vm757_vm3, %v953_v58  ;;  %v576_v2 = vmul.f32 0.2, %v450_v60  ;;  %v506_v4 = vadd.f32 %v1148_v20, %v505_v44  ;;  %v621_v5 = vsel %vm557_vm6, %v503_v56, %v589_v63  ;;  %v463_v7 = vadd.f32 %v1001_v51, %v1148_v20 }
  0xfa   : > { %766 = vst.msk [vmem:[%s1159_s30 + $0x20] sm:$0xf] %vm757_vm3, %v935_v62  ;;  %vm560_vm8 = vcmp.ge.f32.partialorder %v514_v0, 0.0  ;;  %v592_v6 = vmul.f32 0.2, %v514_v0  ;;  %v951_v8 = vpack.c.bf16 %v621_v5, %v621_v5  ;;  %vm542_vm9 = vcmp.ge.f32.partialorder %v442_v3, 0.0  ;;  %v457_v28 = vpop.f32.mrf.mxu0  ;;  %v521_v31 = vpop.f32.mrf.mxu1 }
  0xfb   : > { %v608_v9 = vsel %vm544_vm7, %v450_v60, %v576_v2  ;;  %v574_v10 = vmul.f32 0.2, %v442_v3  ;;  %vm558_vm10 = vcmp.ge.f32.partialorder %v506_v4, 0.0  ;;  %v590_v14 = vmul.f32 0.2, %v506_v4 }
  0xfc   : > { %v938_v12 = vpack.c.bf16 %v608_v9, %v608_v9  ;;  %v624_v13 = vsel %vm560_vm8, %v514_v0, %v592_v6  ;;  %782 = vst.msk [vmem:[%s1159_s30 + $0x60] sm:$0xf] %vm757_vm3, %v951_v8  ;;  %vm547_vm11 = vcmp.ge.f32.partialorder %v463_v7, 0.0  ;;  %v579_v18 = vmul.f32 0.2, %v463_v7 }
  0xfd   : > { %v954_v16 = vpack.c.bf16 %v624_v13, %v624_v13  ;;  %v606_v17 = vsel %vm542_vm9, %v442_v3, %v574_v10  ;;  %v622_v21 = vsel %vm558_vm10, %v506_v4, %v590_v14  ;;  %v527_v22 = vadd.f32 %v1017_v52, %v1148_v20 }
  0xfe   : > { %769 = vst.msk [vmem:[%s1159_s30 + $0x2c] sm:$0xf] %vm757_vm3, %v938_v12  ;;  %v936_v19 = vpack.c.bf16 %v606_v17, %v606_v17  ;;  %v455_v23 = vadd.f32 %v1148_v20, %v454_v61  ;;  %v952_v24 = vpack.c.bf16 %v622_v21, %v622_v21  ;;  %v611_v25 = vsel %vm547_vm11, %v463_v7, %v579_v18 }
  0xff   : > { %785 = vst.msk [vmem:[%s1159_s30 + $0x6c] sm:$0xf] %vm757_vm3, %v954_v16  ;;  %v519_v26 = vadd.f32 %v1148_v20, %v518_v1  ;;  %v466_v27 = vadd.f32 %v1002_v11, %v1148_v20  ;;  %v941_v29 = vpack.c.bf16 %v611_v25, %v611_v25  ;;  %vm563_vm12 = vcmp.ge.f32.partialorder %v527_v22, 0.0 }
 0x100   : > { %767 = vst.msk [vmem:[%s1159_s30 + $0x24] sm:$0xf] %vm757_vm3, %v936_v19  ;;  %v595_v30 = vmul.f32 0.2, %v527_v22  ;;  %vm545_vm13 = vcmp.ge.f32.partialorder %v455_v23, 0.0  ;;  %v530_v36 = vadd.f32 %v1018_v15, %v1148_v20  ;;  %v458_v37 = vadd.f32 %v1148_v20, %v457_v28 }
 0x101   : > { %783 = vst.msk [vmem:[%s1159_s30 + $0x64] sm:$0xf] %vm757_vm3, %v952_v24  ;;  %v577_v32 = vmul.f32 0.2, %v455_v23  ;;  %vm561_vm14 = vcmp.ge.f32.partialorder %v519_v26, 0.0  ;;  %vm548_vm15 = vcmp.ge.f32.partialorder %v466_v27, 0.0  ;;  %v522_v41 = vadd.f32 %v1148_v20, %v521_v31 }
 0x102   : > { %v593_v33 = vmul.f32 0.2, %v519_v26  ;;  %772 = vst.msk [vmem:[%s1159_s30 + $0x38] sm:$0xf] %vm757_vm3, %v941_v29  ;;  %v627_v34 = vsel %vm563_vm12, %v527_v22, %v595_v30  ;;  %v580_v35 = vmul.f32 0.2, %v466_v27 }
 0x103   : > { %v957_v38 = vpack.c.bf16 %v627_v34, %v627_v34  ;;  %v609_v39 = vsel %vm545_vm13, %v455_v23, %v577_v32  ;;  %vm564_vm0 = vcmp.ge.f32.partialorder %v530_v36, 0.0  ;;  %v596_v46 = vmul.f32 0.2, %v530_v36 }
 0x104   : > { %v625_v40 = vsel %vm561_vm14, %v519_v26, %v593_v33  ;;  %v939_v42 = vpack.c.bf16 %v609_v39, %v609_v39  ;;  %v612_v44 = vsel %vm548_vm15, %v466_v27, %v580_v35  ;;  %vm546_vm1 = vcmp.ge.f32.partialorder %v458_v37, 0.0 }
 0x105   : > { %v955_v43 = vpack.c.bf16 %v625_v40, %v625_v40  ;;  %788 = vst.msk [vmem:[%s1159_s30 + $0x78] sm:$0xf] %vm757_vm3, %v957_v38  ;;  %v942_v45 = vpack.c.bf16 %v612_v44, %v612_v44  ;;  %v578_v47 = vmul.f32 0.2, %v458_v37  ;;  %vm562_vm2 = vcmp.ge.f32.partialorder %v522_v41, 0.0 }
 0x106   : > { %770 = vst.msk [vmem:[%s1159_s30 + $0x30] sm:$0xf] %vm757_vm3, %v939_v42  ;;  %v594_v48 = vmul.f32 0.2, %v522_v41  ;;  %v628_v20 = vsel %vm564_vm0, %v530_v36, %v596_v46 }
 0x107   : > { %786 = vst.msk [vmem:[%s1159_s30 + $0x70] sm:$0xf] %vm757_vm3, %v955_v43  ;;  %773 = vst.msk [vmem:[%s1159_s30 + $0x3c] sm:$0xf] %vm757_vm3, %v942_v45  ;;  %v610_v49 = vsel %vm546_vm1, %v458_v37, %v578_v47  ;;  %v958_v50 = vpack.c.bf16 %v628_v20, %v628_v20 }
 0x108   : > { %v940_v51 = vpack.c.bf16 %v610_v49, %v610_v49  ;;  %v626_v52 = vsel %vm562_vm2, %v522_v41, %v594_v48 }
 0x109   : > { %v956_v53 = vpack.c.bf16 %v626_v52, %v626_v52  ;;  %789 = vst.msk [vmem:[%s1159_s30 + $0x7c] sm:$0xf] %vm757_vm3, %v958_v50 }
 0x10a   : > { %771 = vst.msk [vmem:[%s1159_s30 + $0x34] sm:$0xf] %vm757_vm3, %v940_v51 }
 0x10b   : > { %787 = vst.msk [vmem:[%s1159_s30 + $0x74] sm:$0xf] %vm757_vm3, %v956_v53 }
 0x10c PF: > { %s13_s12 = sadd.s32 1, %s1061_s12  }
 0x10d   : > { %p10_p4 = scmp.ge.s32.totalorder %s13_s12, 4  }
 0x10f   :  { %12 = sbr.rel (!%p10_p4) target bundleno = 1 (0x1), region = 62 }

// kernel: discriminator_pallas.5
= control target key start
LH: loop header
LB: loop body
LE: loop exit
PB: predicated region body
PF: predicated region fallthrough
CT: control target
= control target key end

     0   :  { %s1728_s12 = smov 0   ;;  %s2021_s0 = inlined_call_operand.vmem [shape: bf16[2,64,1024], index: 0, kind: input, shape index: {}]   ;;  %s2022_s1 = inlined_call_operand.vmem [shape: bf16[1024,128], index: 1, kind: input, shape index: {}]   ;;  %s2023_s2 = inlined_call_operand.vmem [shape: f32[1,128], index: 2, kind: input, shape index: {}]   ;;  %s2024_s3 = inlined_call_operand.vmem [shape: bf16[2,64,128], index: 3, kind: output, shape index: {}]  }
   0x1 LB: > { %s1317_s13 = sadd.s32 4294967295, %s1706_s12   ;;  %p1321_p0 = scmp.ge.s32.totalorder %s1706_s12, 1  ;;  %s1706_s12 = sphi %s1728_s12, %s13_s12  }
   0x2   : > { %p137_p1 = scmp.lt.s32.totalorder %s1706_s12, 3 }
   0x4   : > { %p138_p2 = pnand %p1321_p0, %p137_p1 }
   0x5   : > { %p161_p3 = scmp.lt.s32.totalorder (!%p138_p2), %s1317_s13, 1 }
   0x6   : > { %141 = sbr.rel (%p138_p2) target bundleno = 382 (0x17e), region = 32 }
   0xb   : > { %v1634_v0 = vld [vmem:[%s2022_s1 + $0x78] sm:$0xff]   ;;  %v1638_v4 = vld [vmem:[%s2022_s1 + $0x70] sm:$0xff]   ;;  %v1642_v8 = vld [vmem:[%s2022_s1 + $0x68] sm:$0xff]   ;;  %s2026_s13 = smov (!%p161_p3, %s1317_s13), 1 }
   0xc   : > { %v1635_v1 = vld [vmem:[%s2022_s1 + $0xf8] sm:$0xff]   ;;  %1466 = vmatprep.subr.bf16.mxu0 %v1634_v0  ;;  %v1639_v5 = vld [vmem:[%s2022_s1 + $0xf0] sm:$0xff]   ;;  %v1643_v9 = vld [vmem:[%s2022_s1 + $0xe8] sm:$0xff]   ;;  %s1433_s18 = sshll.u32 %s2026_s13, 8  ;;  %s1434_s24 = sshll.u32 %s2026_s13, 5 }
   0xd   : > { %v1636_v2 = vld [vmem:[%s2022_s1 + $0x38] sm:$0xff]   ;;  %1506 = vmatprep.subr.bf16.mxu1 %v1635_v1  ;;  %v1640_v6 = vld [vmem:[%s2022_s1 + $0x30] sm:$0xff]   ;;  %v1644_v10 = vld [vmem:[%s2022_s1 + $0x28] sm:$0xff]   ;;  %s1836_s27 = scalar_lea.vmem %s2021_s0, %s1433_s18  ;;  %s170_s13 = scalar_lea.vmem %s2024_s3, %s1434_s24 }
   0xe   : > { %v1637_v3 = vld [vmem:[%s2022_s1 + $0xb8] sm:$0xff]   ;;  %1467 = vmatpush3.bf16.msra.mxu0 %v1636_v2  ;;  %v1641_v7 = vld [vmem:[%s2022_s1 + $0xb0] sm:$0xff]   ;;  %v1645_v11 = vld [vmem:[%s2022_s1 + $0xa8] sm:$0xff]  }
   0xf   : > { %1507 = vmatpush3.bf16.msra.mxu1 %v1637_v3  ;;  %1468 = vmatprep.subr.bf16.mxu0 %v1638_v4  ;;  %v1646_v12 = vld [vmem:[%s2022_s1 + $0x60] sm:$0xff]   ;;  %v1650_v16 = vld [vmem:[%s2022_s1 + $0x58] sm:$0xff]   ;;  %v1654_v20 = vld [vmem:[%s2022_s1 + $0x50] sm:$0xff]  }
  0x10   : > { %1508 = vmatprep.subr.bf16.mxu1 %v1639_v5  ;;  %v1647_v13 = vld [vmem:[%s2022_s1 + $0xe0] sm:$0xff]   ;;  %v1651_v17 = vld [vmem:[%s2022_s1 + $0xd8] sm:$0xff]   ;;  %v1655_v21 = vld [vmem:[%s2022_s1 + $0xd0] sm:$0xff]  }
  0x11   : > { %v1648_v14 = vld [vmem:[%s2022_s1 + $0x20] sm:$0xff]   ;;  %v1652_v18 = vld [vmem:[%s2022_s1 + $0x18] sm:$0xff]   ;;  %v1656_v22 = vld [vmem:[%s2022_s1 + $0x10] sm:$0xff]  }
  0x12   : > { %1469 = vmatpush3.bf16.msra.mxu0 %v1640_v6  ;;  %v1649_v15 = vld [vmem:[%s2022_s1 + $0xa0] sm:$0xff]   ;;  %v1653_v19 = vld [vmem:[%s2022_s1 + $0x98] sm:$0xff]   ;;  %v1657_v23 = vld [vmem:[%s2022_s1 + $0x90] sm:$0xff]  }
  0x13   : > { %1509 = vmatpush3.bf16.msra.mxu1 %v1641_v7  ;;  %1470 = vmatprep.subr.bf16.mxu0 %v1642_v8  ;;  %v1658_v24 = vld [vmem:[%s2022_s1 + $0x48] sm:$0xff]   ;;  %v1662_v28 = vld [vmem:[%s2022_s1 + $0x40] sm:$0xff]   ;;  %v1666_v40 = vld [vmem:[%s2022_s1 + $0x178] sm:$0xff]  }
  0x14   : > { %1510 = vmatprep.subr.bf16.mxu1 %v1643_v9  ;;  %v1659_v25 = vld [vmem:[%s2022_s1 + $0xc8] sm:$0xff]   ;;  %v1663_v29 = vld [vmem:[%s2022_s1 + $0xc0] sm:$0xff]   ;;  %v1667_v41 = vld [vmem:[%s2022_s1 + $0x1f8] sm:$0xff]  }
  0x15   : > { %v1660_v26 = vld [vmem:[%s2022_s1 + $0x8] sm:$0xff]   ;;  %v1664_v30 = vld [vmem:[%s2022_s1] sm:$0xff]   ;;  %v1668_v42 = vld [vmem:[%s2022_s1 + $0x138] sm:$0xff]  }
  0x16   : > { %1471 = vmatpush3.bf16.msra.mxu0 %v1644_v10  ;;  %v1661_v27 = vld [vmem:[%s2022_s1 + $0x88] sm:$0xff]   ;;  %v1665_v31 = vld [vmem:[%s2022_s1 + $0x80] sm:$0xff]   ;;  %v1669_v43 = vld [vmem:[%s2022_s1 + $0x1b8] sm:$0xff]  }
  0x17   : > { %1511 = vmatpush3.bf16.msra.mxu1 %v1645_v11  ;;  %1472 = vmatprep.subr.bf16.mxu0 %v1646_v12  ;;  %v172_v32 = vld [vmem:[%s1836_s27] sm:$0xff]  ;;  %v173_v34 = vld [vmem:[%s1836_s27 + $0x8] sm:$0xff]  ;;  %v1670_v44 = vld [vmem:[%s2022_s1 + $0x170] sm:$0xff]  }
  0x18   : > { %1512 = vmatprep.subr.bf16.mxu1 %v1647_v13  ;;  %v176_v33 = vld [vmem:[%s1836_s27 + $0x20] sm:$0xff]  ;;  %v177_v37 = vld [vmem:[%s1836_s27 + $0x28] sm:$0xff]  ;;  %v1671_v45 = vld [vmem:[%s2022_s1 + $0x1f0] sm:$0xff]  }
  0x19   : > { %v1327_v35 = vcombine.low %v172_v32, %v176_v33  ;;  %v1328_v36 = vcombine.high %v172_v32, %v176_v33  ;;  %v1329_v38 = vcombine.low %v173_v34, %v177_v37  ;;  %v1330_v39 = vcombine.high %v173_v34, %v177_v37  ;;  %v1672_v46 = vld [vmem:[%s2022_s1 + $0x130] sm:$0xff]   ;;  %v180_v48 = vld [vmem:[%s1836_s27 + $0x40] sm:$0xff]  ;;  %v181_v51 = vld [vmem:[%s1836_s27 + $0x48] sm:$0xff] }
  0x1a   : > { %1473 = vmatpush3.bf16.msra.mxu0 %v1648_v14  ;;  %v1673_v47 = vld [vmem:[%s2022_s1 + $0x1b0] sm:$0xff]   ;;  %v184_v49 = vld [vmem:[%s1836_s27 + $0x60] sm:$0xff]  ;;  %v185_v52 = vld [vmem:[%s1836_s27 + $0x68] sm:$0xff] }
  0x1b   : > { %1513 = vmatpush3.bf16.msra.mxu1 %v1649_v15  ;;  %1474 = vmatprep.subr.bf16.mxu0 %v1650_v16  ;;  %v1336_v50 = vcombine.high %v180_v48, %v184_v49  ;;  %v1335_v53 = vcombine.low %v180_v48, %v184_v49  ;;  %v1338_v54 = vcombine.high %v181_v51, %v185_v52  ;;  %v1674_v56 = vld [vmem:[%s2022_s1 + $0x168] sm:$0xff]   ;;  %v1678_v60 = vld [vmem:[%s2022_s1 + $0x160] sm:$0xff]   ;;  %v1682_v8 = vld [vmem:[%s2022_s1 + $0x158] sm:$0xff]  }
  0x1c   : > { %1514 = vmatprep.subr.bf16.mxu1 %v1651_v17  ;;  %915 = vmatprep.mubr.bf16.mxu0 %v1328_v36  ;;  %v1337_v55 = vcombine.low %v181_v51, %v185_v52  ;;  %v1675_v57 = vld [vmem:[%s2022_s1 + $0x1e8] sm:$0xff]   ;;  %v1679_v61 = vld [vmem:[%s2022_s1 + $0x1e0] sm:$0xff]   ;;  %v1683_v9 = vld [vmem:[%s2022_s1 + $0x1d8] sm:$0xff]  }
  0x1d   : > { %980 = vmatprep.mubr.bf16.mxu1 %v1330_v39  ;;  %v1676_v58 = vld [vmem:[%s2022_s1 + $0x128] sm:$0xff]   ;;  %v1680_v62 = vld [vmem:[%s2022_s1 + $0x120] sm:$0xff]   ;;  %v1684_v10 = vld [vmem:[%s2022_s1 + $0x118] sm:$0xff]  }
  0x1e   : > { %1475 = vmatpush3.bf16.msra.mxu0 %v1652_v18  ;;  %v1677_v59 = vld [vmem:[%s2022_s1 + $0x1a8] sm:$0xff]   ;;  %v1681_v63 = vld [vmem:[%s2022_s1 + $0x1a0] sm:$0xff]   ;;  %v1685_v11 = vld [vmem:[%s2022_s1 + $0x198] sm:$0xff]  }
  0x1f   : > { %1515 = vmatpush3.bf16.msra.mxu1 %v1653_v19  ;;  %1476 = vmatprep.subr.bf16.mxu0 %v1654_v20  ;;  %v188_v0 = vld [vmem:[%s1836_s27 + $0x80] sm:$0xff]  ;;  %v189_v2 = vld [vmem:[%s1836_s27 + $0x88] sm:$0xff]  ;;  %v1686_v12 = vld [vmem:[%s2022_s1 + $0x150] sm:$0xff]  }
  0x20   : > { %1516 = vmatprep.subr.bf16.mxu1 %v1655_v21  ;;  %v192_v1 = vld [vmem:[%s1836_s27 + $0xa0] sm:$0xff]  ;;  %v193_v3 = vld [vmem:[%s1836_s27 + $0xa8] sm:$0xff]  ;;  %v1687_v13 = vld [vmem:[%s2022_s1 + $0x1d0] sm:$0xff]  }
  0x21   : > { %v1344_v4 = vcombine.high %v188_v0, %v192_v1  ;;  %v1346_v5 = vcombine.high %v189_v2, %v193_v3  ;;  %v1343_v6 = vcombine.low %v188_v0, %v192_v1  ;;  %v1345_v7 = vcombine.low %v189_v2, %v193_v3  ;;  %v1688_v14 = vld [vmem:[%s2022_s1 + $0x110] sm:$0xff]   ;;  %v196_v16 = vld [vmem:[%s1836_s27 + $0xc0] sm:$0xff]  ;;  %v197_v18 = vld [vmem:[%s1836_s27 + $0xc8] sm:$0xff] }
  0x22   : > { %1477 = vmatpush3.bf16.msra.mxu0 %v1656_v22  ;;  %v1689_v15 = vld [vmem:[%s2022_s1 + $0x190] sm:$0xff]   ;;  %v200_v17 = vld [vmem:[%s1836_s27 + $0xe0] sm:$0xff]  ;;  %v201_v20 = vld [vmem:[%s1836_s27 + $0xe8] sm:$0xff] }
  0x23   : > { %1517 = vmatpush3.bf16.msra.mxu1 %v1657_v23  ;;  %1478 = vmatprep.subr.bf16.mxu0 %v1658_v24  ;;  %v1352_v19 = vcombine.high %v196_v16, %v200_v17  ;;  %v1351_v21 = vcombine.low %v196_v16, %v200_v17  ;;  %v1354_v22 = vcombine.high %v197_v18, %v201_v20  ;;  %v1690_v24 = vld [vmem:[%s2022_s1 + $0x148] sm:$0xff]   ;;  %v174_v32 = vld [vmem:[%s1836_s27 + $0x10] sm:$0xff]  ;;  %v175_v36 = vld [vmem:[%s1836_s27 + $0x18] sm:$0xff] }
  0x24   : > { %1518 = vmatprep.subr.bf16.mxu1 %v1659_v25  ;;  %v1353_v23 = vcombine.low %v197_v18, %v201_v20  ;;  %v1691_v25 = vld [vmem:[%s2022_s1 + $0x1c8] sm:$0xff]   ;;  %v178_v33 = vld [vmem:[%s1836_s27 + $0x30] sm:$0xff]  ;;  %v179_v37 = vld [vmem:[%s1836_s27 + $0x38] sm:$0xff] }
  0x25   : > { %v1331_v34 = vcombine.low %v174_v32, %v178_v33  ;;  %v1333_v39 = vcombine.low %v175_v36, %v179_v37  ;;  %v191_v48 = vld [vmem:[%s1836_s27 + $0x98] sm:$0xff] }
  0x26   : > { %1479 = vmatpush3.bf16.msra.mxu0 %v1660_v26  ;;  %v1692_v26 = vld [vmem:[%s2022_s1 + $0x108] sm:$0xff]   ;;  %v195_v49 = vld [vmem:[%s1836_s27 + $0xb8] sm:$0xff] }
  0x27   : > { %1519 = vmatpush3.bf16.msra.mxu1 %v1661_v27  ;;  %1480 = vmatprep.subr.bf16.mxu0 %v1662_v28  ;;  %v1693_v27 = vld [vmem:[%s2022_s1 + $0x188] sm:$0xff]   ;;  %v1694_v28 = vld [vmem:[%s2022_s1 + $0x140] sm:$0xff]  }
  0x28   : > { %1520 = vmatprep.subr.bf16.mxu1 %v1663_v29  ;;  %v1695_v29 = vld [vmem:[%s2022_s1 + $0x1c0] sm:$0xff]  }
  0x2a   : > { %1481 = vmatpush3.bf16.msra.mxu0 %v1664_v30  ;;  %v1696_v30 = vld [vmem:[%s2022_s1 + $0x100] sm:$0xff]  }
  0x2b   : > { %1521 = vmatpush3.bf16.msra.mxu1 %v1665_v31  ;;  %1546 = vmatprep.subr.bf16.mxu0 %v1666_v40  ;;  %v1697_v31 = vld [vmem:[%s2022_s1 + $0x180] sm:$0xff]   ;;  %v1334_v40 = vcombine.high %v175_v36, %v179_v37 }
  0x2c   : > { %1586 = vmatprep.subr.bf16.mxu1 %v1667_v41  ;;  %v186_v41 = vld [vmem:[%s1836_s27 + $0x70] sm:$0xff] }
  0x2d   : > { %916 = vmatmul.mubr.bf16.vlgmr.msra.gmra.mxu0 %v1327_v35  ;;  %v1332_v35 = vcombine.high %v174_v32, %v178_v33 }
  0x2e   : > { %981 = vmatmul.mubr.bf16.vlgmr.msra.gmra.mxu1 %v1329_v38  ;;  %1547 = vmatpush3.bf16.msra.mxu0 %v1668_v42  ;;  %v182_v38 = vld [vmem:[%s1836_s27 + $0x50] sm:$0xff]  ;;  %v183_v42 = vld [vmem:[%s1836_s27 + $0x58] sm:$0xff] }
  0x2f   : > { %1587 = vmatpush3.bf16.msra.mxu1 %v1669_v43  ;;  %1548 = vmatprep.subr.bf16.mxu0 %v1670_v44  ;;  %v187_v43 = vld [vmem:[%s1836_s27 + $0x78] sm:$0xff]  ;;  %v1340_v44 = vcombine.high %v182_v38, %v186_v41 }
  0x30   : > { %1588 = vmatprep.subr.bf16.mxu1 %v1671_v45  ;;  %923 = vmatprep.mubr.bf16.mxu0 %v1336_v50  ;;  %v1342_v45 = vcombine.high %v183_v42, %v187_v43  ;;  %v1339_v50 = vcombine.low %v182_v38, %v186_v41  ;;  %v1341_v51 = vcombine.low %v183_v42, %v187_v43  ;;  %v1989_v43 = vld [vmem:[%s2023_s2] ss:$0 sm:$0xff] }
  0x31   : > { %988 = vmatprep.mubr.bf16.mxu1 %v1338_v54  ;;  %v198_v54 = vld [vmem:[%s1836_s27 + $0xd0] sm:$0xff] }
  0x32   : > { %1549 = vmatpush3.bf16.msra.mxu0 %v1672_v46  ;;  %v190_v46 = vld [vmem:[%s1836_s27 + $0x90] sm:$0xff] }
  0x33   : > { %1589 = vmatpush3.bf16.msra.mxu1 %v1673_v47  ;;  %1550 = vmatprep.subr.bf16.mxu0 %v1674_v56  ;;  %v194_v47 = vld [vmem:[%s1836_s27 + $0xb0] sm:$0xff]  ;;  %v199_v56 = vld [vmem:[%s1836_s27 + $0xd8] sm:$0xff] }
  0x34   : > { %1590 = vmatprep.subr.bf16.mxu1 %v1675_v57  ;;  %v1348_v52 = vcombine.high %v190_v46, %v194_v47  ;;  %v203_v57 = vld [vmem:[%s1836_s27 + $0xf8] sm:$0xff] }
  0x35   : > { %924 = vmatmul.mubr.bf16.gmra.mxu0 %v1335_v53  ;;  %v1350_v53 = vcombine.high %v191_v48, %v195_v49 }
  0x36   : > { %989 = vmatmul.mubr.bf16.gmra.mxu1 %v1337_v55  ;;  %1551 = vmatpush3.bf16.msra.mxu0 %v1676_v58  ;;  %v202_v55 = vld [vmem:[%s1836_s27 + $0xf0] sm:$0xff]  ;;  %v1347_v58 = vcombine.low %v190_v46, %v194_v47 }
  0x37   : > { %1591 = vmatpush3.bf16.msra.mxu1 %v1677_v59  ;;  %1552 = vmatprep.subr.bf16.mxu0 %v1678_v60  ;;  %v1349_v59 = vcombine.low %v191_v48, %v195_v49  ;;  %v1356_v60 = vcombine.high %v198_v54, %v202_v55 }
  0x38   : > { %1592 = vmatprep.subr.bf16.mxu1 %v1679_v61  ;;  %931 = vmatprep.mubr.bf16.mxu0 %v1344_v4  ;;  %v1358_v61 = vcombine.high %v199_v56, %v203_v57 }
  0x39   : > { %996 = vmatprep.mubr.bf16.mxu1 %v1346_v5 }
  0x3a   : > { %1553 = vmatpush3.bf16.msra.mxu0 %v1680_v62  ;;  %v1355_v62 = vcombine.low %v198_v54, %v202_v55 }
  0x3b   : > { %1593 = vmatpush3.bf16.msra.mxu1 %v1681_v63  ;;  %1554 = vmatprep.subr.bf16.mxu0 %v1682_v8  ;;  %v1357_v63 = vcombine.low %v199_v56, %v203_v57 }
  0x3c   : > { %1594 = vmatprep.subr.bf16.mxu1 %v1683_v9 }
  0x3d   : > { %932 = vmatmul.mubr.bf16.gmra.mxu0 %v1343_v6 }
  0x3e   : > { %997 = vmatmul.mubr.bf16.gmra.mxu1 %v1345_v7  ;;  %1555 = vmatpush3.bf16.msra.mxu0 %v1684_v10 }
  0x3f   : > { %1595 = vmatpush3.bf16.msra.mxu1 %v1685_v11  ;;  %1556 = vmatprep.subr.bf16.mxu0 %v1686_v12 }
  0x40   : > { %1596 = vmatprep.subr.bf16.mxu1 %v1687_v13  ;;  %939 = vmatprep.mubr.bf16.mxu0 %v1352_v19 }
  0x41   : > { %1004 = vmatprep.mubr.bf16.mxu1 %v1354_v22 }
  0x42   : > { %1557 = vmatpush3.bf16.msra.mxu0 %v1688_v14 }
  0x43   : > { %1597 = vmatpush3.bf16.msra.mxu1 %v1689_v15  ;;  %1558 = vmatprep.subr.bf16.mxu0 %v1690_v24 }
  0x44   : > { %1598 = vmatprep.subr.bf16.mxu1 %v1691_v25 }
  0x45   : > { %940 = vmatmul.mubr.bf16.gmra.mxu0 %v1351_v21 }
  0x46   : > { %1005 = vmatmul.mubr.bf16.gmra.mxu1 %v1353_v23  ;;  %1559 = vmatpush3.bf16.msra.mxu0 %v1692_v26 }
  0x47   : > { %1599 = vmatpush3.bf16.msra.mxu1 %v1693_v27  ;;  %1560 = vmatprep.subr.bf16.mxu0 %v1694_v28 }
  0x48   : > { %1600 = vmatprep.subr.bf16.mxu1 %v1695_v29  ;;  %1045 = vmatprep.mubr.bf16.mxu0 %v1332_v35 }
  0x49   : > { %1110 = vmatprep.mubr.bf16.mxu1 %v1334_v40 }
  0x4a   : > { %1561 = vmatpush3.bf16.msra.mxu0 %v1696_v30 }
  0x4b   : > { %1601 = vmatpush3.bf16.msra.mxu1 %v1697_v31 }
  0x4d   : > { %1046 = vmatmul.mubr.bf16.vlgmr.msra.gmra.mxu0 %v1331_v34 }
  0x4e   : > { %1111 = vmatmul.mubr.bf16.vlgmr.msra.gmra.mxu1 %v1333_v39  ;;  %1053 = vmatprep.mubr.bf16.mxu0 %v1340_v44 }
  0x4f   : > { %1118 = vmatprep.mubr.bf16.mxu1 %v1342_v45 }
  0x55   : > { %1054 = vmatmul.mubr.bf16.gmra.mxu0 %v1339_v50 }
  0x56   : > { %1119 = vmatmul.mubr.bf16.gmra.mxu1 %v1341_v51  ;;  %1061 = vmatprep.mubr.bf16.mxu0 %v1348_v52 }
  0x57   : > { %1126 = vmatprep.mubr.bf16.mxu1 %v1350_v53 }
  0x5d   : > { %1062 = vmatmul.mubr.bf16.gmra.mxu0 %v1347_v58 }
  0x5e   : > { %1127 = vmatmul.mubr.bf16.gmra.mxu1 %v1349_v59  ;;  %1069 = vmatprep.mubr.bf16.mxu0 %v1356_v60 }
  0x5f   : > { %1134 = vmatprep.mubr.bf16.mxu1 %v1358_v61 }
  0x65   : > { %1070 = vmatmul.mubr.bf16.gmra.mxu0 %v1355_v62 }
  0x66   : > { %1135 = vmatmul.mubr.bf16.gmra.mxu1 %v1357_v63 }
  0xed   : > { %v1482_v0 = vpop.f32.mrf.mxu0 }
  0xee   : > { %v1522_v1 = vpop.f32.mrf.mxu1 }
  0xef   : > { %v1483_v2 = vpop.f32.mrf.mxu0 }
  0xf0   : > { %v1523_v3 = vpop.f32.mrf.mxu1  ;;  %v1484_v41 = vadd.f32 %v1483_v2, %v1482_v0 }
  0xf1   : > { %v1485_v4 = vpop.f32.mrf.mxu0  ;;  %v1524_v57 = vadd.f32 %v1523_v3, %v1522_v1 }
  0xf2   : > { %v1525_v5 = vpop.f32.mrf.mxu1  ;;  %v918_v50 = vadd.f32 %v1484_v41, %v1989_v43 }
  0xf3   : > { %v1486_v6 = vpop.f32.mrf.mxu0 }
  0xf4   : > { %v1526_v7 = vpop.f32.mrf.mxu1  ;;  %v1487_v39 = vadd.f32 %v1486_v6, %v1485_v4  ;;  %v983_v4 = vadd.f32 %v1524_v57, %v918_v50 }
  0xf5   : > { %v1488_v8 = vpop.f32.mrf.mxu0  ;;  %v1527_v52 = vadd.f32 %v1526_v7, %v1525_v5 }
  0xf6   : > { %v1528_v9 = vpop.f32.mrf.mxu1  ;;  %v921_v48 = vadd.f32 %v1487_v39, %v1989_v43 }
  0xf7   : > { %v1489_v10 = vpop.f32.mrf.mxu0 }
  0xf8   : > { %v1529_v11 = vpop.f32.mrf.mxu1  ;;  %v1490_v44 = vadd.f32 %v1489_v10, %v1488_v8  ;;  %v986_v62 = vadd.f32 %v1527_v52, %v921_v48 }
  0xf9   : > { %v1491_v12 = vpop.f32.mrf.mxu0  ;;  %v1530_v63 = vadd.f32 %v1529_v11, %v1528_v9 }
  0xfa   : > { %v1531_v13 = vpop.f32.mrf.mxu1  ;;  %v926_v53 = vadd.f32 %v1490_v44, %v1989_v43 }
  0xfb   : > { %v1492_v14 = vpop.f32.mrf.mxu0 }
  0xfc   : > { %v1532_v15 = vpop.f32.mrf.mxu1  ;;  %v1493_v46 = vadd.f32 %v1492_v14, %v1491_v12  ;;  %v991_v10 = vadd.f32 %v1530_v63, %v926_v53 }
  0xfd   : > { %v1494_v16 = vpop.f32.mrf.mxu0  ;;  %v1533_v6 = vadd.f32 %v1532_v15, %v1531_v13 }
  0xfe   : > { %v1534_v17 = vpop.f32.mrf.mxu1  ;;  %v929_v58 = vadd.f32 %v1493_v46, %v1989_v43 }
  0xff   : > { %v1495_v18 = vpop.f32.mrf.mxu0 }
 0x100   : > { %v1535_v19 = vpop.f32.mrf.mxu1  ;;  %v1496_v54 = vadd.f32 %v1495_v18, %v1494_v16  ;;  %v994_v16 = vadd.f32 %v1533_v6, %v929_v58 }
 0x101   : > { %v1497_v20 = vpop.f32.mrf.mxu0 }
 0x102   : > { %v1972_v21 = vpop.f32.mrf.mxu1  ;;  %v934_v5 = vadd.f32 %v1496_v54, %v1989_v43 }
 0x103   : > { %v1498_v22 = vpop.f32.mrf.mxu0 }
 0x104   : > { %v1538_v23 = vpop.f32.mrf.mxu1  ;;  %v1499_v59 = vadd.f32 %v1498_v22, %v1497_v20  ;;  %v1536_v22 = vadd.f32 %v1535_v19, %v1534_v17 }
 0x105   : > { %v1500_v24 = vpop.f32.mrf.mxu0  ;;  %v1539_v13 = vadd.f32 %v1538_v23, %v1972_v21 }
 0x106   : > { %v1974_v25 = vpop.f32.mrf.mxu1  ;;  %v937_v1 = vadd.f32 %v1499_v59, %v1989_v43 }
 0x107   : > { %v1501_v26 = vpop.f32.mrf.mxu0 }
 0x108   : > { %v1976_v27 = vpop.f32.mrf.mxu1  ;;  %v1502_v3 = vadd.f32 %v1501_v26, %v1500_v24  ;;  %v1002_v46 = vadd.f32 %v1539_v13, %v937_v1 }
 0x109   : > { %v1978_v28 = vpop.f32.mrf.mxu0  ;;  %v1542_v23 = vadd.f32 %v1976_v27, %v1974_v25 }
 0x10a   : > { %v1980_v29 = vpop.f32.mrf.mxu1 }
 0x10b   : > { %v1982_v30 = vpop.f32.mrf.mxu0 }
 0x10c   : > { %v1984_v31 = vpop.f32.mrf.mxu1  ;;  %v1505_v24 = vadd.f32 %v1982_v30, %v1978_v28 }
 0x10d   : > { %v1562_v32 = vpop.f32.mrf.mxu0  ;;  %v1545_v58 = vadd.f32 %v1984_v31, %v1980_v29 }
 0x10e   : > { %v1602_v33 = vpop.f32.mrf.mxu1  ;;  %v945_v53 = vadd.f32 %v1505_v24, %v1989_v43 }
 0x10f   : > { %v1563_v34 = vpop.f32.mrf.mxu0 }
 0x110   : > { %v1603_v35 = vpop.f32.mrf.mxu1  ;;  %v1564_v60 = vadd.f32 %v1563_v34, %v1562_v32 }
 0x111   : > { %v1565_v36 = vpop.f32.mrf.mxu0  ;;  %v1604_v15 = vadd.f32 %v1603_v35, %v1602_v33 }
 0x112   : > { %v1605_v37 = vpop.f32.mrf.mxu1  ;;  %v1048_v18 = vadd.f32 %v1564_v60, %v983_v4 }
 0x113   : > { %v1566_v38 = vpop.f32.mrf.mxu0 }
 0x114   : > { %v1606_v40 = vpop.f32.mrf.mxu1  ;;  %v1567_v55 = vadd.f32 %v1566_v38, %v1565_v36  ;;  %v999_v38 = vadd.f32 %v1536_v22, %v934_v5  ;;  %v1113_v17 = vadd.f32 %v1604_v15, %v1048_v18 }
 0x115   : > { %v1568_v42 = vpop.f32.mrf.mxu0  ;;  %v1607_v32 = vadd.f32 %v1606_v40, %v1605_v37 }
 0x116   : > { %v1608_v45 = vpop.f32.mrf.mxu1  ;;  %v1051_v7 = vadd.f32 %v1567_v55, %v986_v62 }
 0x117   : > { %v1569_v47 = vpop.f32.mrf.mxu0 }
 0x118   : > { %v1609_v49 = vpop.f32.mrf.mxu1  ;;  %v1570_v0 = vadd.f32 %v1569_v47, %v1568_v42  ;;  %v1116_v39 = vadd.f32 %v1607_v32, %v1051_v7  ;;  %v942_v47 = vadd.f32 %v1502_v3, %v1989_v43 }
 0x119   : > { %v1571_v51 = vpop.f32.mrf.mxu0  ;;  %v1610_v41 = vadd.f32 %v1609_v49, %v1608_v45 }
 0x11a   : > { %v1611_v56 = vpop.f32.mrf.mxu1  ;;  %v1056_v9 = vadd.f32 %v1570_v0, %v991_v10  ;;  %v1143_v35 = vadd.f32 %v1116_v39, %v1113_v17  ;;  %v1007_v52 = vadd.f32 %v1542_v23, %v942_v47  ;;  %v1010_v0 = vadd.f32 %v1545_v58, %v945_v53 }
 0x11b   : > { %v1572_v61 = vpop.f32.mrf.mxu0 }
 0x11c   : > { %v1612_v2 = vpop.f32.mrf.mxu1  ;;  %v1573_v12 = vadd.f32 %v1572_v61, %v1571_v51  ;;  %v1121_v26 = vadd.f32 %v1610_v41, %v1056_v9 }
 0x11d   : > { %v1574_v8 = vpop.f32.mrf.mxu0  ;;  %v1613_v37 = vadd.f32 %v1612_v2, %v1611_v56 }
 0x11e   : > { %v1614_v14 = vpop.f32.mrf.mxu1  ;;  %v1059_v42 = vadd.f32 %v1573_v12, %v994_v16  ;;  %v1144_v30 = vadd.f32 %v1143_v35, %v1121_v26 }
 0x11f   : > { %v1575_v20 = vpop.f32.mrf.mxu0 }
 0x120   : > { %v1576_v11 = vadd.f32 %v1575_v20, %v1574_v8  ;;  %v1615_v34 = vpop.f32.mrf.mxu1  ;;  %v1124_v45 = vadd.f32 %v1613_v37, %v1059_v42 }
 0x121   : > { %v1577_v36 = vpop.f32.mrf.mxu0  ;;  %v1616_v49 = vadd.f32 %v1615_v34, %v1614_v14 }
 0x122   : > { %v1617_v44 = vpop.f32.mrf.mxu1  ;;  %v1064_v40 = vadd.f32 %v1576_v11, %v999_v38  ;;  %v1145_v25 = vadd.f32 %v1144_v30, %v1124_v45 }
 0x123   : > { %v1578_v19 = vpop.f32.mrf.mxu0 }
 0x124   : > { %v1579_v48 = vadd.f32 %v1578_v19, %v1577_v36  ;;  %v1618_v21 = vpop.f32.mrf.mxu1  ;;  %v1129_v54 = vadd.f32 %v1616_v49, %v1064_v40 }
 0x125   : > { %v1580_v33 = vpop.f32.mrf.mxu0  ;;  %v1619_v55 = vadd.f32 %v1618_v21, %v1617_v44 }
 0x126   : > { %v1067_v50 = vadd.f32 %v1579_v48, %v1002_v46  ;;  %v1620_v51 = vpop.f32.mrf.mxu1  ;;  %v1146_v2 = vadd.f32 %v1145_v25, %v1129_v54 }
 0x127   : > { %v1581_v28 = vpop.f32.mrf.mxu0 }
 0x128   : > { %v1582_v56 = vadd.f32 %v1581_v28, %v1580_v33  ;;  %v1621_v57 = vpop.f32.mrf.mxu1  ;;  %v1132_v27 = vadd.f32 %v1619_v55, %v1067_v50 }
 0x129   : > { %v1583_v59 = vpop.f32.mrf.mxu0  ;;  %v1622_v61 = vadd.f32 %v1621_v57, %v1620_v51 }
 0x12a   : > { %v1072_v60 = vadd.f32 %v1582_v56, %v1007_v52  ;;  %v1623_v62 = vpop.f32.mrf.mxu1  ;;  %v1147_v8 = vadd.f32 %v1146_v2, %v1132_v27 }
 0x12b   : > { %v1584_v63 = vpop.f32.mrf.mxu0 }
 0x12c   : > { %v1137_v4 = vadd.f32 %v1622_v61, %v1072_v60  ;;  %v1585_v43 = vadd.f32 %v1584_v63, %v1583_v59  ;;  %v1624_v6 = vpop.f32.mrf.mxu1 }
 0x12d   : > { %v1625_v5 = vadd.f32 %v1624_v6, %v1623_v62 }
 0x12e   : > { %v1075_v10 = vadd.f32 %v1585_v43, %v1010_v0  ;;  %v1148_v7 = vadd.f32 %v1147_v8, %v1137_v4 }
 0x130   : > { %v1140_v12 = vadd.f32 %v1625_v5, %v1075_v10 }
 0x132   : > { %v1149_v14 = vadd.f32 %v1148_v7, %v1140_v12 }
 0x134   : > { %v1150_v16 = vrot.slane %v1149_v14, 4 }
 0x136   : > { %v1151_v29 = vadd.f32 %v1150_v16, %v1149_v14 }
 0x138   : > { %v1152_v31 = vrot.slane %v1151_v29, 2 }
 0x13a   : > { %v1153_v1 = vadd.f32 %v1152_v31, %v1151_v29 }
 0x13c   : > { %v1154_v3 = vrot.slane %v1153_v1, 1 }
 0x13e   : > { %v1155_v18 = vadd.f32 %v1154_v3, %v1153_v1 }
 0x140   : > { %v1157_v20 = vmul.f32 0.015625, %v1155_v18 }
 0x142   : > { %v1158_v22 = vsub.f32 %v1113_v17, %v1157_v20  ;;  %v1159_v32 = vsub.f32 %v1116_v39, %v1157_v20  ;;  %v1160_v9 = vsub.f32 %v1121_v26, %v1157_v20  ;;  %v1161_v11 = vsub.f32 %v1124_v45, %v1157_v20 }
 0x143   : > { %v1162_v15 = vsub.f32 %v1129_v54, %v1157_v20  ;;  %v1163_v41 = vsub.f32 %v1132_v27, %v1157_v20  ;;  %v1164_v46 = vsub.f32 %v1137_v4, %v1157_v20  ;;  %v1165_v19 = vsub.f32 %v1140_v12, %v1157_v20 }
 0x144   : > { %v1166_v34 = vmul.f32 %v1158_v22, %v1158_v22  ;;  %v1167_v13 = vmul.f32 %v1159_v32, %v1159_v32  ;;  %v1168_v36 = vmul.f32 %v1160_v9, %v1160_v9  ;;  %v1169_v42 = vmul.f32 %v1161_v11, %v1161_v11 }
 0x145   : > { %v1170_v47 = vmul.f32 %v1162_v15, %v1162_v15  ;;  %v1171_v37 = vmul.f32 %v1163_v41, %v1163_v41  ;;  %v1172_v48 = vmul.f32 %v1164_v46, %v1164_v46  ;;  %v1173_v17 = vmul.f32 %v1165_v19, %v1165_v19 }
 0x146   : > { %v1174_v38 = vadd.f32 %v1167_v13, %v1166_v34 }
 0x148   : > { %v1175_v44 = vadd.f32 %v1174_v38, %v1168_v36 }
 0x14a   : > { %v1176_v24 = vadd.f32 %v1175_v44, %v1169_v42 }
 0x14c   : > { %v1177_v40 = vadd.f32 %v1176_v24, %v1170_v47 }
 0x14e   : > { %v1178_v21 = vadd.f32 %v1177_v40, %v1171_v37 }
 0x150   : > { %v1179_v39 = vadd.f32 %v1178_v21, %v1172_v48 }
 0x152   : > { %v1180_v26 = vadd.f32 %v1179_v39, %v1173_v17 }
 0x154   : > { %v1181_v23 = vrot.slane %v1180_v26, 4 }
 0x156   : > { %v1182_v33 = vadd.f32 %v1181_v23, %v1180_v26 }
 0x158   : > { %v1183_v35 = vrot.slane %v1182_v33, 2 }
 0x15a   : > { %v1184_v45 = vadd.f32 %v1183_v35, %v1182_v33 }
 0x15c   : > { %v1185_v49 = vrot.slane %v1184_v45, 1 }
 0x15e   : > { %v1186_v50 = vadd.f32 %v1185_v49, %v1184_v45 }
 0x160   : > { %v1187_v51 = vmul.f32 0.015625, %v1186_v50 }
 0x162   : > { %v1188_v52 = vadd.f32 1e-05, %v1187_v51 }
 0x164   : > { %1698 = vrsqrt.f32 %v1188_v52 }
 0x171   : > { %v1699_v53 = vpop.eup %1698 }
 0x172   : > { %v1190_v28 = vmul.f32 %v1699_v53, %v1158_v22  ;;  %v1191_v30 = vmul.f32 %v1699_v53, %v1159_v32  ;;  %v1192_v54 = vmul.f32 %v1699_v53, %v1160_v9  ;;  %v1193_v55 = vmul.f32 %v1699_v53, %v1161_v11 }
 0x173   : > { %v1194_v56 = vmul.f32 %v1699_v53, %v1162_v15  ;;  %v1195_v57 = vmul.f32 %v1699_v53, %v1163_v41  ;;  %v1196_v58 = vmul.f32 %v1699_v53, %v1164_v46  ;;  %v1197_v59 = vmul.f32 %v1699_v53, %v1165_v19 }
 0x174   : > { %vm1198_vm0 = vcmp.ge.f32.partialorder %v1190_v28, 0.0  ;;  %vm1199_vm1 = vcmp.ge.f32.partialorder %v1191_v30, 0.0  ;;  %vm1200_vm2 = vcmp.ge.f32.partialorder %v1192_v54, 0.0  ;;  %vm1201_vm3 = vcmp.ge.f32.partialorder %v1193_v55, 0.0 }
 0x175   : > { %vm1202_vm4 = vcmp.ge.f32.partialorder %v1194_v56, 0.0  ;;  %vm1203_vm5 = vcmp.ge.f32.partialorder %v1195_v57, 0.0  ;;  %vm1204_vm6 = vcmp.ge.f32.partialorder %v1196_v58, 0.0  ;;  %vm1205_vm7 = vcmp.ge.f32.partialorder %v1197_v59, 0.0 }
 0x176   : > { %v1206_v25 = vmul.f32 0.2, %v1190_v28  ;;  %v1207_v27 = vmul.f32 0.2, %v1191_v30  ;;  %v1208_v60 = vmul.f32 0.2, %v1192_v54 }
 0x177   : > { %v1209_v61 = vmul.f32 0.2, %v1193_v55  ;;  %v1210_v62 = vmul.f32 0.2, %v1194_v56  ;;  %v1211_v63 = vmul.f32 0.2, %v1195_v57 }
 0x178   : > { %v1212_v0 = vmul.f32 0.2, %v1196_v58  ;;  %v1213_v2 = vmul.f32 0.2, %v1197_v59  ;;  %v1214_v4 = vsel %vm1198_vm0, %v1190_v28, %v1206_v25  ;;  %v1215_v43 = vsel %vm1199_vm1, %v1191_v30, %v1207_v27 }
 0x179   : > { %v1216_v6 = vsel %vm1200_vm2, %v1192_v54, %v1208_v60  ;;  %v1217_v8 = vsel %vm1201_vm3, %v1193_v55, %v1209_v61  ;;  %v1218_v10 = vsel %vm1202_vm4, %v1194_v56, %v1210_v62  ;;  %v1219_v5 = vsel %vm1203_vm5, %v1195_v57, %v1211_v63 }
 0x17a   : > { %v1220_v7 = vsel %vm1204_vm6, %v1196_v58, %v1212_v0  ;;  %v1221_v12 = vsel %vm1205_vm7, %v1197_v59, %v1213_v2  ;;  %v1446_v14 = vpack.c.bf16 %v1215_v43, %v1214_v4  ;;  %v1451_v16 = vpack.c.bf16 %v1217_v8, %v1216_v6 }
 0x17b   : > { %v1456_v29 = vpack.c.bf16 %v1219_v5, %v1218_v10  ;;  %v1461_v31 = vpack.c.bf16 %v1221_v12, %v1220_v7 }
 0x17c   : > { %1447 = vst [vmem:[%s170_s13] sm:$0xff] %v1446_v14   ;;  %1463 = vst [vmem:[%s170_s13 + $0x8] sm:$0xff] %v1451_v16  }
 0x17d   : > { %1464 = vst [vmem:[%s170_s13 + $0x10] sm:$0xff] %v1456_v29   ;;  %1465 = vst [vmem:[%s170_s13 + $0x18] sm:$0xff] %v1461_v31  }
 0x17e PF: > { %s13_s12 = sadd.s32 1, %s1706_s12  }
 0x17f   : > { %p10_p4 = scmp.ge.s32.totalorder %s13_s12, 4  }
 0x181   :  { %12 = sbr.rel (!%p10_p4) target bundleno = 1 (0x1), region = 62 }

// kernel: discriminator_pallas.6
= control target key start
LH: loop header
LB: loop body
LE: loop exit
PB: predicated region body
PF: predicated region fallthrough
CT: control target
= control target key end

     0   :  { %s3002_s12 = smov 0   ;;  %s3864_s0 = inlined_call_operand.vmem [shape: bf16[2,16,2048], index: 0, kind: input, shape index: {}]   ;;  %s3865_s1 = inlined_call_operand.vmem [shape: bf16[2048,256], index: 1, kind: input, shape index: {}]   ;;  %s3866_s2 = inlined_call_operand.vmem [shape: f32[1,256], index: 2, kind: input, shape index: {}]   ;;  %s3867_s3 = inlined_call_operand.vmem [shape: bf16[2,16,256], index: 3, kind: output, shape index: {}]  }
   0x1 LB: > { %s2289_s13 = sadd.s32 4294967295, %s2980_s12   ;;  %p2293_p0 = scmp.ge.s32.totalorder %s2980_s12, 1  ;;  %s2980_s12 = sphi %s3002_s12, %s13_s12  }
   0x2   : > { %p137_p1 = scmp.lt.s32.totalorder %s2980_s12, 3 }
   0x4   : > { %p138_p2 = pnand %p2293_p0, %p137_p1 }
   0x5   : > { %p161_p3 = scmp.lt.s32.totalorder (!%p138_p2), %s2289_s13, 1 }
   0x6   : > { %141 = sbr.rel (%p138_p2) target bundleno = 531 (0x213), region = 32 }
   0xb   : > { %v2586_v0 = vld [vmem:[%s3865_s1 + $0x74] ss:$8 sps:$4 sm:$0xff]   ;;  %v2590_v2 = vld [vmem:[%s3865_s1 + $0x70] ss:$8 sps:$4 sm:$0xff]   ;;  %v2592_v4 = vld [vmem:[%s3865_s1 + $0x64] ss:$8 sps:$4 sm:$0xff]  }
   0xc   : > { %v2588_v1 = vld [vmem:[%s3865_s1 + $0x174] ss:$8 sps:$4 sm:$0xff]   ;;  %1815 = vmatprep.subr.bf16.mxu0 %v2586_v0  ;;  %v2591_v3 = vld [vmem:[%s3865_s1 + $0x170] ss:$8 sps:$4 sm:$0xff]   ;;  %v2594_v5 = vld [vmem:[%s3865_s1 + $0x164] ss:$8 sps:$4 sm:$0xff]  }
   0xd   : > { %1858 = vmatprep.subr.bf16.mxu1 %v2588_v1  ;;  %1816 = vmatpush1.bf16.msra.mxu0 %v2590_v2  ;;  %v2596_v6 = vld [vmem:[%s3865_s1 + $0x60] ss:$8 sps:$4 sm:$0xff]   ;;  %v2598_v8 = vld [vmem:[%s3865_s1 + $0x54] ss:$8 sps:$4 sm:$0xff]   ;;  %v2602_v10 = vld [vmem:[%s3865_s1 + $0x50] ss:$8 sps:$4 sm:$0xff]  }
   0xe   : > { %1859 = vmatpush1.bf16.msra.mxu1 %v2591_v3  ;;  %1817 = vmatprep.subr.bf16.mxu0 %v2592_v4  ;;  %v2597_v7 = vld [vmem:[%s3865_s1 + $0x160] ss:$8 sps:$4 sm:$0xff]   ;;  %v2600_v9 = vld [vmem:[%s3865_s1 + $0x154] ss:$8 sps:$4 sm:$0xff]   ;;  %v2603_v11 = vld [vmem:[%s3865_s1 + $0x150] ss:$8 sps:$4 sm:$0xff]  }
   0xf   : > { %1860 = vmatprep.subr.bf16.mxu1 %v2594_v5  ;;  %v2604_v12 = vld [vmem:[%s3865_s1 + $0x44] ss:$8 sps:$4 sm:$0xff]   ;;  %v2608_v14 = vld [vmem:[%s3865_s1 + $0x40] ss:$8 sps:$4 sm:$0xff]   ;;  %v2610_v16 = vld [vmem:[%s3865_s1 + $0x34] ss:$8 sps:$4 sm:$0xff]  }
  0x10   : > { %v2606_v13 = vld [vmem:[%s3865_s1 + $0x144] ss:$8 sps:$4 sm:$0xff]   ;;  %v2609_v15 = vld [vmem:[%s3865_s1 + $0x140] ss:$8 sps:$4 sm:$0xff]   ;;  %v2612_v17 = vld [vmem:[%s3865_s1 + $0x134] ss:$8 sps:$4 sm:$0xff]  }
  0x11   : > { %1818 = vmatpush1.bf16.msra.mxu0 %v2596_v6  ;;  %v2614_v18 = vld [vmem:[%s3865_s1 + $0x30] ss:$8 sps:$4 sm:$0xff]   ;;  %v2616_v20 = vld [vmem:[%s3865_s1 + $0x24] ss:$8 sps:$4 sm:$0xff]   ;;  %v2620_v22 = vld [vmem:[%s3865_s1 + $0x20] ss:$8 sps:$4 sm:$0xff]  }
  0x12   : > { %1861 = vmatpush1.bf16.msra.mxu1 %v2597_v7  ;;  %1819 = vmatprep.subr.bf16.mxu0 %v2598_v8  ;;  %v2615_v19 = vld [vmem:[%s3865_s1 + $0x130] ss:$8 sps:$4 sm:$0xff]   ;;  %v2618_v21 = vld [vmem:[%s3865_s1 + $0x124] ss:$8 sps:$4 sm:$0xff]   ;;  %v2621_v23 = vld [vmem:[%s3865_s1 + $0x120] ss:$8 sps:$4 sm:$0xff]  }
  0x13   : > { %1862 = vmatprep.subr.bf16.mxu1 %v2600_v9  ;;  %v2622_v24 = vld [vmem:[%s3865_s1 + $0x14] ss:$8 sps:$4 sm:$0xff]   ;;  %v2626_v26 = vld [vmem:[%s3865_s1 + $0x10] ss:$8 sps:$4 sm:$0xff]   ;;  %v2628_v28 = vld [vmem:[%s3865_s1 + $0x4] ss:$8 sps:$4 sm:$0xff]  }
  0x14   : > { %v2624_v25 = vld [vmem:[%s3865_s1 + $0x114] ss:$8 sps:$4 sm:$0xff]   ;;  %v2627_v27 = vld [vmem:[%s3865_s1 + $0x110] ss:$8 sps:$4 sm:$0xff]   ;;  %v2630_v29 = vld [vmem:[%s3865_s1 + $0x104] ss:$8 sps:$4 sm:$0xff]  }
  0x15   : > { %1820 = vmatpush1.bf16.msra.mxu0 %v2602_v10  ;;  %v2632_v30 = vld [vmem:[%s3865_s1] ss:$8 sps:$4 sm:$0xff]   ;;  %v2634_v32 = vld [vmem:[%s3865_s1 + $0xf4] ss:$8 sps:$4 sm:$0xff]   ;;  %v2638_v34 = vld [vmem:[%s3865_s1 + $0xf0] ss:$8 sps:$4 sm:$0xff]  }
  0x16   : > { %1863 = vmatpush1.bf16.msra.mxu1 %v2603_v11  ;;  %1821 = vmatprep.subr.bf16.mxu0 %v2604_v12  ;;  %v2633_v31 = vld [vmem:[%s3865_s1 + $0x100] ss:$8 sps:$4 sm:$0xff]   ;;  %v2636_v33 = vld [vmem:[%s3865_s1 + $0x1f4] ss:$8 sps:$4 sm:$0xff]   ;;  %v2639_v35 = vld [vmem:[%s3865_s1 + $0x1f0] ss:$8 sps:$4 sm:$0xff]  }
  0x17   : > { %1864 = vmatprep.subr.bf16.mxu1 %v2606_v13  ;;  %v2640_v36 = vld [vmem:[%s3865_s1 + $0xe4] ss:$8 sps:$4 sm:$0xff]   ;;  %s3869_s13 = smov (!%p161_p3, %s2289_s13), 1  ;;  %v2644_v38 = vld [vmem:[%s3865_s1 + $0xe0] ss:$8 sps:$4 sm:$0xff]  }
  0x18   : > { %v2642_v37 = vld [vmem:[%s3865_s1 + $0x1e4] ss:$8 sps:$4 sm:$0xff]   ;;  %v2645_v39 = vld [vmem:[%s3865_s1 + $0x1e0] ss:$8 sps:$4 sm:$0xff]   ;;  %v2646_v40 = vld [vmem:[%s3865_s1 + $0xd4] ss:$8 sps:$4 sm:$0xff]  }
  0x19   : > { %1822 = vmatpush1.bf16.msra.mxu0 %v2608_v14  ;;  %s2574_s21 = sshll.u32 %s3869_s13, 7  ;;  %v2648_v41 = vld [vmem:[%s3865_s1 + $0x1d4] ss:$8 sps:$4 sm:$0xff]   ;;  %v2650_v42 = vld [vmem:[%s3865_s1 + $0xd0] ss:$8 sps:$4 sm:$0xff]   ;;  %s2575_s19 = sshll.u32 %s3869_s13, 4 }
  0x1a   : > { %1865 = vmatpush1.bf16.msra.mxu1 %v2609_v15  ;;  %1823 = vmatprep.subr.bf16.mxu0 %v2610_v16  ;;  %v2651_v43 = vld [vmem:[%s3865_s1 + $0x1d0] ss:$8 sps:$4 sm:$0xff]   ;;  %s3152_s30 = scalar_lea.vmem %s3864_s0, %s2574_s21  ;;  %v2652_v44 = vld [vmem:[%s3865_s1 + $0xc4] ss:$8 sps:$4 sm:$0xff]   ;;  %v2656_v46 = vld [vmem:[%s3865_s1 + $0xc0] ss:$8 sps:$4 sm:$0xff]   ;;  %s170_s22 = scalar_lea.vmem %s3867_s3, %s2575_s19 }
  0x1b   : > { %1866 = vmatprep.subr.bf16.mxu1 %v2612_v17  ;;  %v2654_v45 = vld [vmem:[%s3865_s1 + $0x1c4] ss:$8 sps:$4 sm:$0xff]   ;;  %v2657_v47 = vld [vmem:[%s3865_s1 + $0x1c0] ss:$8 sps:$4 sm:$0xff]   ;;  %v2658_v52 = vld [vmem:[%s3865_s1 + $0xb4] ss:$8 sps:$4 sm:$0xff]  }
  0x1c   : > { %v171_v48 = vld [vmem:[%s3152_s30] sm:$0xff]  ;;  %v172_v50 = vld [vmem:[%s3152_s30 + $0x8] sm:$0xff]  ;;  %v2660_v54 = vld [vmem:[%s3865_s1 + $0x1b4] ss:$8 sps:$4 sm:$0xff]  }
  0x1d   : > { %1824 = vmatpush1.bf16.msra.mxu0 %v2614_v18  ;;  %v179_v49 = vld [vmem:[%s3152_s30 + $0x40] sm:$0xff]  ;;  %v180_v51 = vld [vmem:[%s3152_s30 + $0x48] sm:$0xff]  ;;  %v2662_v56 = vld [vmem:[%s3865_s1 + $0xb0] ss:$8 sps:$4 sm:$0xff]  }
  0x1e   : > { %1867 = vmatpush1.bf16.msra.mxu1 %v2615_v19  ;;  %1825 = vmatprep.subr.bf16.mxu0 %v2616_v20  ;;  %v2299_v53 = vcombine.high %v171_v48, %v179_v49  ;;  %v2301_v55 = vcombine.high %v172_v50, %v180_v51  ;;  %v2663_v57 = vld [vmem:[%s3865_s1 + $0x1b0] ss:$8 sps:$4 sm:$0xff]   ;;  %v2664_v58 = vld [vmem:[%s3865_s1 + $0xa4] ss:$8 sps:$4 sm:$0xff]   ;;  %v2668_v60 = vld [vmem:[%s3865_s1 + $0xa0] ss:$8 sps:$4 sm:$0xff]   ;;  %v2298_v8 = vcombine.low %v171_v48, %v179_v49 }
  0x1f   : > { %1868 = vmatprep.subr.bf16.mxu1 %v2618_v21  ;;  %v2666_v59 = vld [vmem:[%s3865_s1 + $0x1a4] ss:$8 sps:$4 sm:$0xff]   ;;  %v2669_v61 = vld [vmem:[%s3865_s1 + $0x1a0] ss:$8 sps:$4 sm:$0xff]   ;;  %v2670_v62 = vld [vmem:[%s3865_s1 + $0x94] ss:$8 sps:$4 sm:$0xff]   ;;  %v2300_v9 = vcombine.low %v172_v50, %v180_v51 }
  0x20   : > { %1847 = vmatprep.mubr.bf16.mxu0 %v2299_v53  ;;  %1890 = vmatprep.mubr.bf16.mxu1 %v2301_v55  ;;  %v2672_v63 = vld [vmem:[%s3865_s1 + $0x194] ss:$8 sps:$4 sm:$0xff]   ;;  %v2674_v0 = vld [vmem:[%s3865_s1 + $0x90] ss:$8 sps:$4 sm:$0xff]   ;;  %v2676_v2 = vld [vmem:[%s3865_s1 + $0x84] ss:$8 sps:$4 sm:$0xff]  }
  0x21   : > { %1826 = vmatpush1.bf16.msra.mxu0 %v2620_v22  ;;  %v2675_v1 = vld [vmem:[%s3865_s1 + $0x190] ss:$8 sps:$4 sm:$0xff]   ;;  %v2678_v3 = vld [vmem:[%s3865_s1 + $0x184] ss:$8 sps:$4 sm:$0xff]   ;;  %v2680_v4 = vld [vmem:[%s3865_s1 + $0x80] ss:$8 sps:$4 sm:$0xff]  }
  0x22   : > { %1869 = vmatpush1.bf16.msra.mxu1 %v2621_v23  ;;  %1827 = vmatprep.subr.bf16.mxu0 %v2622_v24  ;;  %v2681_v5 = vld [vmem:[%s3865_s1 + $0x180] ss:$8 sps:$4 sm:$0xff]   ;;  %v2684_v6 = vld [vmem:[%s3865_s1 + $0x274] ss:$8 sps:$4 sm:$0xff]   ;;  %v2682_v10 = vld [vmem:[%s3865_s1 + $0x270] ss:$8 sps:$4 sm:$0xff]  }
  0x23   : > { %1870 = vmatprep.subr.bf16.mxu1 %v2624_v25  ;;  %v2687_v7 = vld [vmem:[%s3865_s1 + $0x374] ss:$8 sps:$4 sm:$0xff]   ;;  %v2685_v11 = vld [vmem:[%s3865_s1 + $0x370] ss:$8 sps:$4 sm:$0xff]   ;;  %v2690_v12 = vld [vmem:[%s3865_s1 + $0x264] ss:$8 sps:$4 sm:$0xff]  }
  0x24   : > { %v2693_v13 = vld [vmem:[%s3865_s1 + $0x364] ss:$8 sps:$4 sm:$0xff]   ;;  %v2688_v14 = vld [vmem:[%s3865_s1 + $0x260] ss:$8 sps:$4 sm:$0xff]   ;;  %v2696_v16 = vld [vmem:[%s3865_s1 + $0x254] ss:$8 sps:$4 sm:$0xff]  }
  0x25   : > { %1828 = vmatpush1.bf16.msra.mxu0 %v2626_v26  ;;  %v2691_v15 = vld [vmem:[%s3865_s1 + $0x360] ss:$8 sps:$4 sm:$0xff]   ;;  %v2699_v17 = vld [vmem:[%s3865_s1 + $0x354] ss:$8 sps:$4 sm:$0xff]   ;;  %v2694_v18 = vld [vmem:[%s3865_s1 + $0x250] ss:$8 sps:$4 sm:$0xff]  }
  0x26   : > { %1871 = vmatpush1.bf16.msra.mxu1 %v2627_v27  ;;  %1829 = vmatprep.subr.bf16.mxu0 %v2628_v28  ;;  %v2697_v19 = vld [vmem:[%s3865_s1 + $0x350] ss:$8 sps:$4 sm:$0xff]   ;;  %v2702_v20 = vld [vmem:[%s3865_s1 + $0x244] ss:$8 sps:$4 sm:$0xff]   ;;  %v2700_v22 = vld [vmem:[%s3865_s1 + $0x240] ss:$8 sps:$4 sm:$0xff]  }
  0x27   : > { %1872 = vmatprep.subr.bf16.mxu1 %v2630_v29  ;;  %v2705_v21 = vld [vmem:[%s3865_s1 + $0x344] ss:$8 sps:$4 sm:$0xff]   ;;  %v2703_v23 = vld [vmem:[%s3865_s1 + $0x340] ss:$8 sps:$4 sm:$0xff]   ;;  %v2708_v24 = vld [vmem:[%s3865_s1 + $0x234] ss:$8 sps:$4 sm:$0xff]  }
  0x28   : > { %v2711_v25 = vld [vmem:[%s3865_s1 + $0x334] ss:$8 sps:$4 sm:$0xff]   ;;  %v2706_v26 = vld [vmem:[%s3865_s1 + $0x230] ss:$8 sps:$4 sm:$0xff]   ;;  %v2714_v28 = vld [vmem:[%s3865_s1 + $0x224] ss:$8 sps:$4 sm:$0xff]  }
  0x29   : > { %1830 = vmatpush1.bf16.msra.mxu0 %v2632_v30  ;;  %v2709_v27 = vld [vmem:[%s3865_s1 + $0x330] ss:$8 sps:$4 sm:$0xff]   ;;  %v2717_v29 = vld [vmem:[%s3865_s1 + $0x324] ss:$8 sps:$4 sm:$0xff]   ;;  %v2712_v30 = vld [vmem:[%s3865_s1 + $0x220] ss:$8 sps:$4 sm:$0xff]  }
  0x2a   : > { %1873 = vmatpush1.bf16.msra.mxu1 %v2633_v31  ;;  %1831 = vmatprep.subr.bf16.mxu0 %v2634_v32  ;;  %v2715_v31 = vld [vmem:[%s3865_s1 + $0x320] ss:$8 sps:$4 sm:$0xff]   ;;  %v2720_v32 = vld [vmem:[%s3865_s1 + $0x214] ss:$8 sps:$4 sm:$0xff]   ;;  %v2730_v48 = vld [vmem:[%s3865_s1 + $0x2f0] ss:$8 sps:$4 sm:$0xff]  }
  0x2b   : > { %1874 = vmatprep.subr.bf16.mxu1 %v2636_v33  ;;  %v2723_v33 = vld [vmem:[%s3865_s1 + $0x314] ss:$8 sps:$4 sm:$0xff]   ;;  %v2733_v49 = vld [vmem:[%s3865_s1 + $0x3f0] ss:$8 sps:$4 sm:$0xff]   ;;  %v2738_v50 = vld [vmem:[%s3865_s1 + $0x2e4] ss:$8 sps:$4 sm:$0xff]  }
  0x2c   : > { %v2741_v51 = vld [vmem:[%s3865_s1 + $0x3e4] ss:$8 sps:$4 sm:$0xff]   ;;  %v2739_v53 = vld [vmem:[%s3865_s1 + $0x3e0] ss:$8 sps:$4 sm:$0xff]   ;;  %v2747_v55 = vld [vmem:[%s3865_s1 + $0x3d4] ss:$8 sps:$4 sm:$0xff]  }
  0x2d   : > { %1832 = vmatpush2.bf16.msra.mxu0 %v2638_v34  ;;  %v2718_v34 = vld [vmem:[%s3865_s1 + $0x210] ss:$8 sps:$4 sm:$0xff]  }
  0x2e   : > { %1875 = vmatpush2.bf16.msra.mxu1 %v2639_v35  ;;  %1833 = vmatprep.subr.bf16.mxu0 %v2640_v36  ;;  %v2721_v35 = vld [vmem:[%s3865_s1 + $0x310] ss:$8 sps:$4 sm:$0xff]  }
  0x2f   : > { %1876 = vmatprep.subr.bf16.mxu1 %v2642_v37  ;;  %v3303_v36 = vld [vmem:[%s3152_s30 + $0x10] sm:$0xff] }
  0x30   : > { %v3306_v37 = vld [vmem:[%s3152_s30 + $0x50] sm:$0xff] }
  0x31   : > { %1834 = vmatpush2.bf16.msra.mxu0 %v2644_v38  ;;  %v3309_v38 = vld [vmem:[%s3152_s30 + $0x18] sm:$0xff] }
  0x32   : > { %1877 = vmatpush2.bf16.msra.mxu1 %v2645_v39  ;;  %1835 = vmatprep.subr.bf16.mxu0 %v2646_v40  ;;  %v3312_v39 = vld [vmem:[%s3152_s30 + $0x58] sm:$0xff]  ;;  %v2726_v40 = vld [vmem:[%s3865_s1 + $0x204] ss:$8 sps:$4 sm:$0xff]  }
  0x33   : > { %1878 = vmatprep.subr.bf16.mxu1 %v2648_v41  ;;  %v2303_v41 = vcombine.high %v3303_v36, %v3306_v37 }
  0x35   : > { %1836 = vmatpush2.bf16.msra.mxu0 %v2650_v42  ;;  %v2729_v42 = vld [vmem:[%s3865_s1 + $0x304] ss:$8 sps:$4 sm:$0xff]  }
  0x36   : > { %1879 = vmatpush2.bf16.msra.mxu1 %v2651_v43  ;;  %1837 = vmatprep.subr.bf16.mxu0 %v2652_v44  ;;  %v2305_v43 = vcombine.high %v3309_v38, %v3312_v39  ;;  %v2724_v44 = vld [vmem:[%s3865_s1 + $0x200] ss:$8 sps:$4 sm:$0xff]  }
  0x37   : > { %1880 = vmatprep.subr.bf16.mxu1 %v2654_v45  ;;  %v2727_v45 = vld [vmem:[%s3865_s1 + $0x300] ss:$8 sps:$4 sm:$0xff]  }
  0x39   : > { %1838 = vmatpush2.bf16.msra.mxu0 %v2656_v46  ;;  %v2732_v46 = vld [vmem:[%s3865_s1 + $0x2f4] ss:$8 sps:$4 sm:$0xff]  }
  0x3a   : > { %1881 = vmatpush2.bf16.msra.mxu1 %v2657_v47  ;;  %1839 = vmatprep.subr.bf16.mxu0 %v2658_v52  ;;  %v2735_v47 = vld [vmem:[%s3865_s1 + $0x3f4] ss:$8 sps:$4 sm:$0xff]   ;;  %v2736_v52 = vld [vmem:[%s3865_s1 + $0x2e0] ss:$8 sps:$4 sm:$0xff]  }
  0x3b   : > { %1882 = vmatprep.subr.bf16.mxu1 %v2660_v54  ;;  %v2744_v54 = vld [vmem:[%s3865_s1 + $0x2d4] ss:$8 sps:$4 sm:$0xff]  }
  0x3d   : > { %1840 = vmatpush2.bf16.msra.mxu0 %v2662_v56  ;;  %v2742_v56 = vld [vmem:[%s3865_s1 + $0x2d0] ss:$8 sps:$4 sm:$0xff]  }
  0x3e   : > { %1883 = vmatpush2.bf16.msra.mxu1 %v2663_v57  ;;  %1841 = vmatprep.subr.bf16.mxu0 %v2664_v58  ;;  %v2745_v57 = vld [vmem:[%s3865_s1 + $0x3d0] ss:$8 sps:$4 sm:$0xff]   ;;  %v2750_v58 = vld [vmem:[%s3865_s1 + $0x2c4] ss:$8 sps:$4 sm:$0xff]  }
  0x3f   : > { %1884 = vmatprep.subr.bf16.mxu1 %v2666_v59  ;;  %v2753_v59 = vld [vmem:[%s3865_s1 + $0x3c4] ss:$8 sps:$4 sm:$0xff]  }
  0x41   : > { %1842 = vmatpush2.bf16.msra.mxu0 %v2668_v60  ;;  %v2748_v60 = vld [vmem:[%s3865_s1 + $0x2c0] ss:$8 sps:$4 sm:$0xff]  }
  0x42   : > { %1885 = vmatpush2.bf16.msra.mxu1 %v2669_v61  ;;  %1843 = vmatprep.subr.bf16.mxu0 %v2670_v62  ;;  %v2751_v61 = vld [vmem:[%s3865_s1 + $0x3c0] ss:$8 sps:$4 sm:$0xff]   ;;  %v2756_v62 = vld [vmem:[%s3865_s1 + $0x2b4] ss:$8 sps:$4 sm:$0xff]  }
  0x43   : > { %1886 = vmatprep.subr.bf16.mxu1 %v2672_v63  ;;  %v2759_v63 = vld [vmem:[%s3865_s1 + $0x3b4] ss:$8 sps:$4 sm:$0xff]  }
  0x45   : > { %1844 = vmatpush2.bf16.msra.mxu0 %v2674_v0  ;;  %v2754_v0 = vld [vmem:[%s3865_s1 + $0x2b0] ss:$8 sps:$4 sm:$0xff]  }
  0x46   : > { %1887 = vmatpush2.bf16.msra.mxu1 %v2675_v1  ;;  %1845 = vmatprep.subr.bf16.mxu0 %v2676_v2  ;;  %v2757_v1 = vld [vmem:[%s3865_s1 + $0x3b0] ss:$8 sps:$4 sm:$0xff]   ;;  %v2762_v2 = vld [vmem:[%s3865_s1 + $0x2a4] ss:$8 sps:$4 sm:$0xff]  }
  0x47   : > { %1888 = vmatprep.subr.bf16.mxu1 %v2678_v3  ;;  %v2765_v3 = vld [vmem:[%s3865_s1 + $0x3a4] ss:$8 sps:$4 sm:$0xff]  }
  0x49   : > { %1846 = vmatpush2.bf16.msra.mxu0 %v2680_v4  ;;  %v2760_v4 = vld [vmem:[%s3865_s1 + $0x2a0] ss:$8 sps:$4 sm:$0xff]  }
  0x4a   : > { %1889 = vmatpush2.bf16.msra.mxu1 %v2681_v5  ;;  %1901 = vmatprep.subr.bf16.mxu0 %v2684_v6  ;;  %v2763_v5 = vld [vmem:[%s3865_s1 + $0x3a0] ss:$8 sps:$4 sm:$0xff]   ;;  %v2768_v6 = vld [vmem:[%s3865_s1 + $0x294] ss:$8 sps:$4 sm:$0xff]  }
  0x4b   : > { %1944 = vmatprep.subr.bf16.mxu1 %v2687_v7  ;;  %v2771_v7 = vld [vmem:[%s3865_s1 + $0x394] ss:$8 sps:$4 sm:$0xff]  }
  0x4c   : > { %1848 = vmatmul.mubr.bf16.vlgmr.msra.gmra.mxu0 %v2298_v8  ;;  %v2766_v8 = vld [vmem:[%s3865_s1 + $0x290] ss:$8 sps:$4 sm:$0xff]  }
  0x4d   : > { %1891 = vmatmul.mubr.bf16.vlgmr.msra.gmra.mxu1 %v2300_v9  ;;  %1902 = vmatpush1.bf16.msra.mxu0 %v2682_v10  ;;  %v2769_v9 = vld [vmem:[%s3865_s1 + $0x390] ss:$8 sps:$4 sm:$0xff]   ;;  %v2774_v10 = vld [vmem:[%s3865_s1 + $0x284] ss:$8 sps:$4 sm:$0xff]  }
  0x4e   : > { %1945 = vmatpush1.bf16.msra.mxu1 %v2685_v11  ;;  %1903 = vmatprep.subr.bf16.mxu0 %v2690_v12  ;;  %v2777_v11 = vld [vmem:[%s3865_s1 + $0x384] ss:$8 sps:$4 sm:$0xff]   ;;  %v2772_v12 = vld [vmem:[%s3865_s1 + $0x280] ss:$8 sps:$4 sm:$0xff]  }
  0x4f   : > { %1946 = vmatprep.subr.bf16.mxu1 %v2693_v13  ;;  %1933 = vmatprep.mubr.bf16.mxu0 %v2303_v41  ;;  %v2775_v13 = vld [vmem:[%s3865_s1 + $0x380] ss:$8 sps:$4 sm:$0xff]   ;;  %v2805_v41 = vld [vmem:[%s3865_s1 + $0x530] ss:$8 sps:$4 sm:$0xff]  }
  0x50   : > { %1976 = vmatprep.mubr.bf16.mxu1 %v2305_v43  ;;  %v2813_v43 = vld [vmem:[%s3865_s1 + $0x524] ss:$8 sps:$4 sm:$0xff]  }
  0x51   : > { %1904 = vmatpush1.bf16.msra.mxu0 %v2688_v14  ;;  %v2780_v14 = vld [vmem:[%s3865_s1 + $0x474] ss:$8 sps:$4 sm:$0xff]  }
  0x52   : > { %1947 = vmatpush1.bf16.msra.mxu1 %v2691_v15  ;;  %1905 = vmatprep.subr.bf16.mxu0 %v2696_v16  ;;  %v2783_v15 = vld [vmem:[%s3865_s1 + $0x574] ss:$8 sps:$4 sm:$0xff]   ;;  %v2302_v16 = vcombine.low %v3303_v36, %v3306_v37  ;;  %v2796_v36 = vld [vmem:[%s3865_s1 + $0x440] ss:$8 sps:$4 sm:$0xff]  }
  0x53   : > { %1948 = vmatprep.subr.bf16.mxu1 %v2699_v17  ;;  %v2304_v17 = vcombine.low %v3309_v38, %v3312_v39  ;;  %v2799_v37 = vld [vmem:[%s3865_s1 + $0x540] ss:$8 sps:$4 sm:$0xff]   ;;  %v2804_v38 = vld [vmem:[%s3865_s1 + $0x434] ss:$8 sps:$4 sm:$0xff]  }
  0x54   : > { %v2807_v39 = vld [vmem:[%s3865_s1 + $0x534] ss:$8 sps:$4 sm:$0xff]  }
  0x55   : > { %1906 = vmatpush1.bf16.msra.mxu0 %v2694_v18  ;;  %v2778_v18 = vld [vmem:[%s3865_s1 + $0x470] ss:$8 sps:$4 sm:$0xff]  }
  0x56   : > { %1949 = vmatpush1.bf16.msra.mxu1 %v2697_v19  ;;  %1907 = vmatprep.subr.bf16.mxu0 %v2702_v20  ;;  %v2781_v19 = vld [vmem:[%s3865_s1 + $0x570] ss:$8 sps:$4 sm:$0xff]   ;;  %v2786_v20 = vld [vmem:[%s3865_s1 + $0x464] ss:$8 sps:$4 sm:$0xff]  }
  0x57   : > { %1950 = vmatprep.subr.bf16.mxu1 %v2705_v21  ;;  %v2789_v21 = vld [vmem:[%s3865_s1 + $0x564] ss:$8 sps:$4 sm:$0xff]  }
  0x59   : > { %1908 = vmatpush1.bf16.msra.mxu0 %v2700_v22  ;;  %v2784_v22 = vld [vmem:[%s3865_s1 + $0x460] ss:$8 sps:$4 sm:$0xff]  }
  0x5a   : > { %1951 = vmatpush1.bf16.msra.mxu1 %v2703_v23  ;;  %1909 = vmatprep.subr.bf16.mxu0 %v2708_v24  ;;  %v2787_v23 = vld [vmem:[%s3865_s1 + $0x560] ss:$8 sps:$4 sm:$0xff]  }
  0x5b   : > { %1952 = vmatprep.subr.bf16.mxu1 %v2711_v25  ;;  %v3455_v24 = vld [vmem:[%s3152_s30 + $0x20] sm:$0xff] }
  0x5c   : > { %v3458_v25 = vld [vmem:[%s3152_s30 + $0x60] sm:$0xff] }
  0x5d   : > { %1910 = vmatpush1.bf16.msra.mxu0 %v2706_v26  ;;  %v3461_v26 = vld [vmem:[%s3152_s30 + $0x28] sm:$0xff] }
  0x5e   : > { %1953 = vmatpush1.bf16.msra.mxu1 %v2709_v27  ;;  %1911 = vmatprep.subr.bf16.mxu0 %v2714_v28  ;;  %v3464_v27 = vld [vmem:[%s3152_s30 + $0x68] sm:$0xff]  ;;  %v2792_v28 = vld [vmem:[%s3865_s1 + $0x454] ss:$8 sps:$4 sm:$0xff]  }
  0x5f   : > { %1954 = vmatprep.subr.bf16.mxu1 %v2717_v29  ;;  %v2307_v29 = vcombine.high %v3455_v24, %v3458_v25 }
  0x61   : > { %1912 = vmatpush1.bf16.msra.mxu0 %v2712_v30  ;;  %v2795_v30 = vld [vmem:[%s3865_s1 + $0x554] ss:$8 sps:$4 sm:$0xff]  }
  0x62   : > { %1955 = vmatpush1.bf16.msra.mxu1 %v2715_v31  ;;  %1913 = vmatprep.subr.bf16.mxu0 %v2720_v32  ;;  %v2309_v31 = vcombine.high %v3461_v26, %v3464_v27  ;;  %v2790_v32 = vld [vmem:[%s3865_s1 + $0x450] ss:$8 sps:$4 sm:$0xff]  }
  0x63   : > { %1956 = vmatprep.subr.bf16.mxu1 %v2723_v33  ;;  %v2793_v33 = vld [vmem:[%s3865_s1 + $0x550] ss:$8 sps:$4 sm:$0xff]  }
  0x65   : > { %1914 = vmatpush1.bf16.msra.mxu0 %v2718_v34  ;;  %v2798_v34 = vld [vmem:[%s3865_s1 + $0x444] ss:$8 sps:$4 sm:$0xff]  }
  0x66   : > { %1957 = vmatpush1.bf16.msra.mxu1 %v2721_v35  ;;  %1915 = vmatprep.subr.bf16.mxu0 %v2726_v40  ;;  %v2801_v35 = vld [vmem:[%s3865_s1 + $0x544] ss:$8 sps:$4 sm:$0xff]   ;;  %v2802_v40 = vld [vmem:[%s3865_s1 + $0x430] ss:$8 sps:$4 sm:$0xff]  }
  0x67   : > { %1958 = vmatprep.subr.bf16.mxu1 %v2729_v42  ;;  %v2810_v42 = vld [vmem:[%s3865_s1 + $0x424] ss:$8 sps:$4 sm:$0xff]  }
  0x69   : > { %1916 = vmatpush1.bf16.msra.mxu0 %v2724_v44  ;;  %v2808_v44 = vld [vmem:[%s3865_s1 + $0x420] ss:$8 sps:$4 sm:$0xff]  }
  0x6a   : > { %1959 = vmatpush1.bf16.msra.mxu1 %v2727_v45  ;;  %1917 = vmatprep.subr.bf16.mxu0 %v2732_v46  ;;  %v2811_v45 = vld [vmem:[%s3865_s1 + $0x520] ss:$8 sps:$4 sm:$0xff]   ;;  %v2816_v46 = vld [vmem:[%s3865_s1 + $0x414] ss:$8 sps:$4 sm:$0xff]  }
  0x6b   : > { %1960 = vmatprep.subr.bf16.mxu1 %v2735_v47  ;;  %v2819_v47 = vld [vmem:[%s3865_s1 + $0x514] ss:$8 sps:$4 sm:$0xff]  }
  0x6d   : > { %1918 = vmatpush2.bf16.msra.mxu0 %v2730_v48  ;;  %v2814_v48 = vld [vmem:[%s3865_s1 + $0x410] ss:$8 sps:$4 sm:$0xff]  }
  0x6e   : > { %1961 = vmatpush2.bf16.msra.mxu1 %v2733_v49  ;;  %1919 = vmatprep.subr.bf16.mxu0 %v2738_v50  ;;  %v2817_v49 = vld [vmem:[%s3865_s1 + $0x510] ss:$8 sps:$4 sm:$0xff]   ;;  %v2822_v50 = vld [vmem:[%s3865_s1 + $0x404] ss:$8 sps:$4 sm:$0xff]  }
  0x6f   : > { %1962 = vmatprep.subr.bf16.mxu1 %v2741_v51  ;;  %v2825_v51 = vld [vmem:[%s3865_s1 + $0x504] ss:$8 sps:$4 sm:$0xff]  }
  0x71   : > { %1920 = vmatpush2.bf16.msra.mxu0 %v2736_v52  ;;  %v2820_v52 = vld [vmem:[%s3865_s1 + $0x400] ss:$8 sps:$4 sm:$0xff]  }
  0x72   : > { %1963 = vmatpush2.bf16.msra.mxu1 %v2739_v53  ;;  %1921 = vmatprep.subr.bf16.mxu0 %v2744_v54  ;;  %v2823_v53 = vld [vmem:[%s3865_s1 + $0x500] ss:$8 sps:$4 sm:$0xff]   ;;  %v2828_v54 = vld [vmem:[%s3865_s1 + $0x4f4] ss:$8 sps:$4 sm:$0xff]  }
  0x73   : > { %1964 = vmatprep.subr.bf16.mxu1 %v2747_v55  ;;  %v2831_v55 = vld [vmem:[%s3865_s1 + $0x5f4] ss:$8 sps:$4 sm:$0xff]  }
  0x75   : > { %1922 = vmatpush2.bf16.msra.mxu0 %v2742_v56  ;;  %v2826_v56 = vld [vmem:[%s3865_s1 + $0x4f0] ss:$8 sps:$4 sm:$0xff]  }
  0x76   : > { %1965 = vmatpush2.bf16.msra.mxu1 %v2745_v57  ;;  %1923 = vmatprep.subr.bf16.mxu0 %v2750_v58  ;;  %v2829_v57 = vld [vmem:[%s3865_s1 + $0x5f0] ss:$8 sps:$4 sm:$0xff]   ;;  %v2834_v58 = vld [vmem:[%s3865_s1 + $0x4e4] ss:$8 sps:$4 sm:$0xff]  }
  0x77   : > { %1966 = vmatprep.subr.bf16.mxu1 %v2753_v59  ;;  %v2837_v59 = vld [vmem:[%s3865_s1 + $0x5e4] ss:$8 sps:$4 sm:$0xff]  }
  0x79   : > { %1924 = vmatpush2.bf16.msra.mxu0 %v2748_v60  ;;  %v2832_v60 = vld [vmem:[%s3865_s1 + $0x4e0] ss:$8 sps:$4 sm:$0xff]  }
  0x7a   : > { %1967 = vmatpush2.bf16.msra.mxu1 %v2751_v61  ;;  %1925 = vmatprep.subr.bf16.mxu0 %v2756_v62  ;;  %v2835_v61 = vld [vmem:[%s3865_s1 + $0x5e0] ss:$8 sps:$4 sm:$0xff]   ;;  %v2840_v62 = vld [vmem:[%s3865_s1 + $0x4d4] ss:$8 sps:$4 sm:$0xff]  }
  0x7b   : > { %1968 = vmatprep.subr.bf16.mxu1 %v2759_v63  ;;  %v2843_v63 = vld [vmem:[%s3865_s1 + $0x5d4] ss:$8 sps:$4 sm:$0xff]  }
  0x7d   : > { %1926 = vmatpush2.bf16.msra.mxu0 %v2754_v0  ;;  %v2838_v0 = vld [vmem:[%s3865_s1 + $0x4d0] ss:$8 sps:$4 sm:$0xff]  }
  0x7e   : > { %1969 = vmatpush2.bf16.msra.mxu1 %v2757_v1  ;;  %1927 = vmatprep.subr.bf16.mxu0 %v2762_v2  ;;  %v2841_v1 = vld [vmem:[%s3865_s1 + $0x5d0] ss:$8 sps:$4 sm:$0xff]   ;;  %v2846_v2 = vld [vmem:[%s3865_s1 + $0x4c4] ss:$8 sps:$4 sm:$0xff]  }
  0x7f   : > { %1970 = vmatprep.subr.bf16.mxu1 %v2765_v3  ;;  %v2849_v3 = vld [vmem:[%s3865_s1 + $0x5c4] ss:$8 sps:$4 sm:$0xff]  }
  0x81   : > { %1928 = vmatpush2.bf16.msra.mxu0 %v2760_v4  ;;  %v2844_v4 = vld [vmem:[%s3865_s1 + $0x4c0] ss:$8 sps:$4 sm:$0xff]  }
  0x82   : > { %1971 = vmatpush2.bf16.msra.mxu1 %v2763_v5  ;;  %1929 = vmatprep.subr.bf16.mxu0 %v2768_v6  ;;  %v2847_v5 = vld [vmem:[%s3865_s1 + $0x5c0] ss:$8 sps:$4 sm:$0xff]   ;;  %v2852_v6 = vld [vmem:[%s3865_s1 + $0x4b4] ss:$8 sps:$4 sm:$0xff]  }
  0x83   : > { %1972 = vmatprep.subr.bf16.mxu1 %v2771_v7  ;;  %v2855_v7 = vld [vmem:[%s3865_s1 + $0x5b4] ss:$8 sps:$4 sm:$0xff]  }
  0x85   : > { %1930 = vmatpush2.bf16.msra.mxu0 %v2766_v8  ;;  %v2850_v8 = vld [vmem:[%s3865_s1 + $0x4b0] ss:$8 sps:$4 sm:$0xff]  }
  0x86   : > { %1973 = vmatpush2.bf16.msra.mxu1 %v2769_v9  ;;  %1931 = vmatprep.subr.bf16.mxu0 %v2774_v10  ;;  %v2853_v9 = vld [vmem:[%s3865_s1 + $0x5b0] ss:$8 sps:$4 sm:$0xff]   ;;  %v2858_v10 = vld [vmem:[%s3865_s1 + $0x4a4] ss:$8 sps:$4 sm:$0xff]  }
  0x87   : > { %1974 = vmatprep.subr.bf16.mxu1 %v2777_v11  ;;  %v2861_v11 = vld [vmem:[%s3865_s1 + $0x5a4] ss:$8 sps:$4 sm:$0xff]  }
  0x89   : > { %1932 = vmatpush2.bf16.msra.mxu0 %v2772_v12  ;;  %v2856_v12 = vld [vmem:[%s3865_s1 + $0x4a0] ss:$8 sps:$4 sm:$0xff]  }
  0x8a   : > { %1975 = vmatpush2.bf16.msra.mxu1 %v2775_v13  ;;  %1987 = vmatprep.subr.bf16.mxu0 %v2780_v14  ;;  %v2859_v13 = vld [vmem:[%s3865_s1 + $0x5a0] ss:$8 sps:$4 sm:$0xff]   ;;  %v2864_v14 = vld [vmem:[%s3865_s1 + $0x494] ss:$8 sps:$4 sm:$0xff]  }
  0x8b   : > { %2030 = vmatprep.subr.bf16.mxu1 %v2783_v15  ;;  %v2867_v15 = vld [vmem:[%s3865_s1 + $0x594] ss:$8 sps:$4 sm:$0xff]  }
  0x8c   : > { %1934 = vmatmul.mubr.bf16.vlgmr.msra.gmra.mxu0 %v2302_v16  ;;  %v2862_v16 = vld [vmem:[%s3865_s1 + $0x490] ss:$8 sps:$4 sm:$0xff]  }
  0x8d   : > { %1977 = vmatmul.mubr.bf16.vlgmr.msra.gmra.mxu1 %v2304_v17  ;;  %1988 = vmatpush1.bf16.msra.mxu0 %v2778_v18  ;;  %v2865_v17 = vld [vmem:[%s3865_s1 + $0x590] ss:$8 sps:$4 sm:$0xff]   ;;  %v2870_v18 = vld [vmem:[%s3865_s1 + $0x484] ss:$8 sps:$4 sm:$0xff]  }
  0x8e   : > { %2031 = vmatpush1.bf16.msra.mxu1 %v2781_v19  ;;  %1989 = vmatprep.subr.bf16.mxu0 %v2786_v20  ;;  %v2873_v19 = vld [vmem:[%s3865_s1 + $0x584] ss:$8 sps:$4 sm:$0xff]   ;;  %v2868_v20 = vld [vmem:[%s3865_s1 + $0x480] ss:$8 sps:$4 sm:$0xff]  }
  0x8f   : > { %2032 = vmatprep.subr.bf16.mxu1 %v2789_v21  ;;  %2019 = vmatprep.mubr.bf16.mxu0 %v2307_v29  ;;  %v2871_v21 = vld [vmem:[%s3865_s1 + $0x580] ss:$8 sps:$4 sm:$0xff]   ;;  %v2306_v29 = vcombine.low %v3455_v24, %v3458_v25  ;;  %v2882_v24 = vld [vmem:[%s3865_s1 + $0x664] ss:$8 sps:$4 sm:$0xff]  }
  0x90   : > { %2062 = vmatprep.mubr.bf16.mxu1 %v2309_v31  ;;  %v3652_v31 = vld [vmem:[%s3152_s30 + $0x70] sm:$0xff]  ;;  %v2885_v25 = vld [vmem:[%s3865_s1 + $0x764] ss:$8 sps:$4 sm:$0xff]  }
  0x91   : > { %1990 = vmatpush1.bf16.msra.mxu0 %v2784_v22  ;;  %v2876_v22 = vld [vmem:[%s3865_s1 + $0x674] ss:$8 sps:$4 sm:$0xff]  }
  0x92   : > { %2033 = vmatpush1.bf16.msra.mxu1 %v2787_v23  ;;  %1991 = vmatprep.subr.bf16.mxu0 %v2792_v28  ;;  %v2879_v23 = vld [vmem:[%s3865_s1 + $0x774] ss:$8 sps:$4 sm:$0xff]  }
  0x93   : > { %2034 = vmatprep.subr.bf16.mxu1 %v2795_v30  ;;  %v3645_v28 = vld [vmem:[%s3152_s30 + $0x30] sm:$0xff]  ;;  %v2308_v30 = vcombine.low %v3461_v26, %v3464_v27 }
  0x94   : > { %v2311_v26 = vcombine.high %v3645_v28, %v3652_v31 }
  0x95   : > { %1992 = vmatpush1.bf16.msra.mxu0 %v2790_v32  ;;  %v3655_v32 = vld [vmem:[%s3152_s30 + $0x38] sm:$0xff] }
  0x96   : > { %2035 = vmatpush1.bf16.msra.mxu1 %v2793_v33  ;;  %1993 = vmatprep.subr.bf16.mxu0 %v2798_v34  ;;  %v3658_v33 = vld [vmem:[%s3152_s30 + $0x78] sm:$0xff] }
  0x97   : > { %2036 = vmatprep.subr.bf16.mxu1 %v2801_v35  ;;  %v2874_v34 = vld [vmem:[%s3865_s1 + $0x670] ss:$8 sps:$4 sm:$0xff]   ;;  %v2313_v27 = vcombine.high %v3655_v32, %v3658_v33 }
  0x98   : > { %v2877_v35 = vld [vmem:[%s3865_s1 + $0x770] ss:$8 sps:$4 sm:$0xff]  }
  0x99   : > { %1994 = vmatpush1.bf16.msra.mxu0 %v2796_v36  ;;  %v2880_v36 = vld [vmem:[%s3865_s1 + $0x660] ss:$8 sps:$4 sm:$0xff]  }
  0x9a   : > { %2037 = vmatpush1.bf16.msra.mxu1 %v2799_v37  ;;  %1995 = vmatprep.subr.bf16.mxu0 %v2804_v38  ;;  %v2883_v37 = vld [vmem:[%s3865_s1 + $0x760] ss:$8 sps:$4 sm:$0xff]   ;;  %v2888_v38 = vld [vmem:[%s3865_s1 + $0x654] ss:$8 sps:$4 sm:$0xff]  }
  0x9b   : > { %2038 = vmatprep.subr.bf16.mxu1 %v2807_v39  ;;  %v2891_v39 = vld [vmem:[%s3865_s1 + $0x754] ss:$8 sps:$4 sm:$0xff]  }
  0x9d   : > { %1996 = vmatpush1.bf16.msra.mxu0 %v2802_v40  ;;  %v2886_v40 = vld [vmem:[%s3865_s1 + $0x650] ss:$8 sps:$4 sm:$0xff]  }
  0x9e   : > { %2039 = vmatpush1.bf16.msra.mxu1 %v2805_v41  ;;  %1997 = vmatprep.subr.bf16.mxu0 %v2810_v42  ;;  %v2889_v41 = vld [vmem:[%s3865_s1 + $0x750] ss:$8 sps:$4 sm:$0xff]   ;;  %v2894_v42 = vld [vmem:[%s3865_s1 + $0x644] ss:$8 sps:$4 sm:$0xff]  }
  0x9f   : > { %2040 = vmatprep.subr.bf16.mxu1 %v2813_v43  ;;  %v2897_v43 = vld [vmem:[%s3865_s1 + $0x744] ss:$8 sps:$4 sm:$0xff]  }
  0xa1   : > { %1998 = vmatpush1.bf16.msra.mxu0 %v2808_v44  ;;  %v2892_v44 = vld [vmem:[%s3865_s1 + $0x640] ss:$8 sps:$4 sm:$0xff]  }
  0xa2   : > { %2041 = vmatpush1.bf16.msra.mxu1 %v2811_v45  ;;  %1999 = vmatprep.subr.bf16.mxu0 %v2816_v46  ;;  %v2895_v45 = vld [vmem:[%s3865_s1 + $0x740] ss:$8 sps:$4 sm:$0xff]   ;;  %v2900_v46 = vld [vmem:[%s3865_s1 + $0x634] ss:$8 sps:$4 sm:$0xff]  }
  0xa3   : > { %2042 = vmatprep.subr.bf16.mxu1 %v2819_v47  ;;  %v2903_v47 = vld [vmem:[%s3865_s1 + $0x734] ss:$8 sps:$4 sm:$0xff]  }
  0xa5   : > { %2000 = vmatpush1.bf16.msra.mxu0 %v2814_v48  ;;  %v2898_v48 = vld [vmem:[%s3865_s1 + $0x630] ss:$8 sps:$4 sm:$0xff]  }
  0xa6   : > { %2043 = vmatpush1.bf16.msra.mxu1 %v2817_v49  ;;  %2001 = vmatprep.subr.bf16.mxu0 %v2822_v50  ;;  %v2901_v49 = vld [vmem:[%s3865_s1 + $0x730] ss:$8 sps:$4 sm:$0xff]   ;;  %v2906_v50 = vld [vmem:[%s3865_s1 + $0x624] ss:$8 sps:$4 sm:$0xff]  }
  0xa7   : > { %2044 = vmatprep.subr.bf16.mxu1 %v2825_v51  ;;  %v2909_v51 = vld [vmem:[%s3865_s1 + $0x724] ss:$8 sps:$4 sm:$0xff]  }
  0xa9   : > { %2002 = vmatpush1.bf16.msra.mxu0 %v2820_v52  ;;  %v2904_v52 = vld [vmem:[%s3865_s1 + $0x620] ss:$8 sps:$4 sm:$0xff]  }
  0xaa   : > { %2045 = vmatpush1.bf16.msra.mxu1 %v2823_v53  ;;  %2003 = vmatprep.subr.bf16.mxu0 %v2828_v54  ;;  %v2907_v53 = vld [vmem:[%s3865_s1 + $0x720] ss:$8 sps:$4 sm:$0xff]   ;;  %v2912_v54 = vld [vmem:[%s3865_s1 + $0x614] ss:$8 sps:$4 sm:$0xff]  }
  0xab   : > { %2046 = vmatprep.subr.bf16.mxu1 %v2831_v55  ;;  %v2915_v55 = vld [vmem:[%s3865_s1 + $0x714] ss:$8 sps:$4 sm:$0xff]  }
  0xad   : > { %2004 = vmatpush2.bf16.msra.mxu0 %v2826_v56  ;;  %v2910_v56 = vld [vmem:[%s3865_s1 + $0x610] ss:$8 sps:$4 sm:$0xff]  }
  0xae   : > { %2047 = vmatpush2.bf16.msra.mxu1 %v2829_v57  ;;  %2005 = vmatprep.subr.bf16.mxu0 %v2834_v58  ;;  %v2913_v57 = vld [vmem:[%s3865_s1 + $0x710] ss:$8 sps:$4 sm:$0xff]   ;;  %v2918_v58 = vld [vmem:[%s3865_s1 + $0x604] ss:$8 sps:$4 sm:$0xff]  }
  0xaf   : > { %2048 = vmatprep.subr.bf16.mxu1 %v2837_v59  ;;  %v2921_v59 = vld [vmem:[%s3865_s1 + $0x704] ss:$8 sps:$4 sm:$0xff]  }
  0xb1   : > { %2006 = vmatpush2.bf16.msra.mxu0 %v2832_v60  ;;  %v2916_v60 = vld [vmem:[%s3865_s1 + $0x600] ss:$8 sps:$4 sm:$0xff]  }
  0xb2   : > { %2049 = vmatpush2.bf16.msra.mxu1 %v2835_v61  ;;  %2007 = vmatprep.subr.bf16.mxu0 %v2840_v62  ;;  %v2919_v61 = vld [vmem:[%s3865_s1 + $0x700] ss:$8 sps:$4 sm:$0xff]   ;;  %v2924_v62 = vld [vmem:[%s3865_s1 + $0x6f4] ss:$8 sps:$4 sm:$0xff]  }
  0xb3   : > { %2050 = vmatprep.subr.bf16.mxu1 %v2843_v63  ;;  %v2927_v63 = vld [vmem:[%s3865_s1 + $0x7f4] ss:$8 sps:$4 sm:$0xff]  }
  0xb5   : > { %2008 = vmatpush2.bf16.msra.mxu0 %v2838_v0  ;;  %v2922_v0 = vld [vmem:[%s3865_s1 + $0x6f0] ss:$8 sps:$4 sm:$0xff]  }
  0xb6   : > { %2051 = vmatpush2.bf16.msra.mxu1 %v2841_v1  ;;  %2009 = vmatprep.subr.bf16.mxu0 %v2846_v2  ;;  %v2925_v1 = vld [vmem:[%s3865_s1 + $0x7f0] ss:$8 sps:$4 sm:$0xff]   ;;  %v2930_v2 = vld [vmem:[%s3865_s1 + $0x6e4] ss:$8 sps:$4 sm:$0xff]  }
  0xb7   : > { %2052 = vmatprep.subr.bf16.mxu1 %v2849_v3  ;;  %v2933_v3 = vld [vmem:[%s3865_s1 + $0x7e4] ss:$8 sps:$4 sm:$0xff]  }
  0xb9   : > { %2010 = vmatpush2.bf16.msra.mxu0 %v2844_v4  ;;  %v2928_v4 = vld [vmem:[%s3865_s1 + $0x6e0] ss:$8 sps:$4 sm:$0xff]  }
  0xba   : > { %2053 = vmatpush2.bf16.msra.mxu1 %v2847_v5  ;;  %2011 = vmatprep.subr.bf16.mxu0 %v2852_v6  ;;  %v2931_v5 = vld [vmem:[%s3865_s1 + $0x7e0] ss:$8 sps:$4 sm:$0xff]   ;;  %v2936_v6 = vld [vmem:[%s3865_s1 + $0x6d4] ss:$8 sps:$4 sm:$0xff]  }
  0xbb   : > { %2054 = vmatprep.subr.bf16.mxu1 %v2855_v7  ;;  %v2939_v7 = vld [vmem:[%s3865_s1 + $0x7d4] ss:$8 sps:$4 sm:$0xff]  }
  0xbd   : > { %2012 = vmatpush2.bf16.msra.mxu0 %v2850_v8  ;;  %v2934_v8 = vld [vmem:[%s3865_s1 + $0x6d0] ss:$8 sps:$4 sm:$0xff]  }
  0xbe   : > { %2055 = vmatpush2.bf16.msra.mxu1 %v2853_v9  ;;  %2013 = vmatprep.subr.bf16.mxu0 %v2858_v10  ;;  %v2937_v9 = vld [vmem:[%s3865_s1 + $0x7d0] ss:$8 sps:$4 sm:$0xff]   ;;  %v2942_v10 = vld [vmem:[%s3865_s1 + $0x6c4] ss:$8 sps:$4 sm:$0xff]  }
  0xbf   : > { %2056 = vmatprep.subr.bf16.mxu1 %v2861_v11  ;;  %v2945_v11 = vld [vmem:[%s3865_s1 + $0x7c4] ss:$8 sps:$4 sm:$0xff]  }
  0xc1   : > { %2014 = vmatpush2.bf16.msra.mxu0 %v2856_v12  ;;  %v2940_v12 = vld [vmem:[%s3865_s1 + $0x6c0] ss:$8 sps:$4 sm:$0xff]  }
  0xc2   : > { %2057 = vmatpush2.bf16.msra.mxu1 %v2859_v13  ;;  %2015 = vmatprep.subr.bf16.mxu0 %v2864_v14  ;;  %v2943_v13 = vld [vmem:[%s3865_s1 + $0x7c0] ss:$8 sps:$4 sm:$0xff]   ;;  %v2948_v14 = vld [vmem:[%s3865_s1 + $0x6b4] ss:$8 sps:$4 sm:$0xff]  }
  0xc3   : > { %2058 = vmatprep.subr.bf16.mxu1 %v2867_v15  ;;  %v2951_v15 = vld [vmem:[%s3865_s1 + $0x7b4] ss:$8 sps:$4 sm:$0xff]  }
  0xc5   : > { %2016 = vmatpush2.bf16.msra.mxu0 %v2862_v16  ;;  %v2946_v16 = vld [vmem:[%s3865_s1 + $0x6b0] ss:$8 sps:$4 sm:$0xff]  }
  0xc6   : > { %2059 = vmatpush2.bf16.msra.mxu1 %v2865_v17  ;;  %2017 = vmatprep.subr.bf16.mxu0 %v2870_v18  ;;  %v2949_v17 = vld [vmem:[%s3865_s1 + $0x7b0] ss:$8 sps:$4 sm:$0xff]   ;;  %v2954_v18 = vld [vmem:[%s3865_s1 + $0x6a4] ss:$8 sps:$4 sm:$0xff]  }
  0xc7   : > { %2060 = vmatprep.subr.bf16.mxu1 %v2873_v19  ;;  %v2957_v19 = vld [vmem:[%s3865_s1 + $0x7a4] ss:$8 sps:$4 sm:$0xff]  }
  0xc9   : > { %2018 = vmatpush2.bf16.msra.mxu0 %v2868_v20  ;;  %v2952_v20 = vld [vmem:[%s3865_s1 + $0x6a0] ss:$8 sps:$4 sm:$0xff]  }
  0xca   : > { %2061 = vmatpush2.bf16.msra.mxu1 %v2871_v21  ;;  %2073 = vmatprep.subr.bf16.mxu0 %v2876_v22  ;;  %v2955_v21 = vld [vmem:[%s3865_s1 + $0x7a0] ss:$8 sps:$4 sm:$0xff]   ;;  %v2960_v22 = vld [vmem:[%s3865_s1 + $0x694] ss:$8 sps:$4 sm:$0xff]  }
  0xcb   : > { %2116 = vmatprep.subr.bf16.mxu1 %v2879_v23  ;;  %v2963_v23 = vld [vmem:[%s3865_s1 + $0x794] ss:$8 sps:$4 sm:$0xff]  }
  0xcc   : > { %2020 = vmatmul.mubr.bf16.vlgmr.msra.gmra.mxu0 %v2306_v29  ;;  %v2958_v29 = vld [vmem:[%s3865_s1 + $0x690] ss:$8 sps:$4 sm:$0xff]  }
  0xcd   : > { %2063 = vmatmul.mubr.bf16.vlgmr.msra.gmra.mxu1 %v2308_v30  ;;  %2074 = vmatpush1.bf16.msra.mxu0 %v2874_v34  ;;  %v2961_v30 = vld [vmem:[%s3865_s1 + $0x790] ss:$8 sps:$4 sm:$0xff]   ;;  %v2966_v34 = vld [vmem:[%s3865_s1 + $0x684] ss:$8 sps:$4 sm:$0xff]  }
  0xce   : > { %2117 = vmatpush1.bf16.msra.mxu1 %v2877_v35  ;;  %2075 = vmatprep.subr.bf16.mxu0 %v2882_v24  ;;  %v2969_v35 = vld [vmem:[%s3865_s1 + $0x784] ss:$8 sps:$4 sm:$0xff]   ;;  %v2964_v24 = vld [vmem:[%s3865_s1 + $0x680] ss:$8 sps:$4 sm:$0xff]  }
  0xcf   : > { %2118 = vmatprep.subr.bf16.mxu1 %v2885_v25  ;;  %2105 = vmatprep.mubr.bf16.mxu0 %v2311_v26  ;;  %v2967_v25 = vld [vmem:[%s3865_s1 + $0x780] ss:$8 sps:$4 sm:$0xff]   ;;  %v2310_v26 = vcombine.low %v3645_v28, %v3652_v31 }
  0xd0   : > { %2148 = vmatprep.mubr.bf16.mxu1 %v2313_v27  ;;  %v2312_v27 = vcombine.low %v3655_v32, %v3658_v33  ;;  %v443_v32 = vld [vmem:[%s3866_s2] sm:$0x3] }
  0xd1   : > { %2076 = vmatpush1.bf16.msra.mxu0 %v2880_v36 }
  0xd2   : > { %2119 = vmatpush1.bf16.msra.mxu1 %v2883_v37  ;;  %2077 = vmatprep.subr.bf16.mxu0 %v2888_v38 }
  0xd3   : > { %2120 = vmatprep.subr.bf16.mxu1 %v2891_v39 }
  0xd5   : > { %2078 = vmatpush1.bf16.msra.mxu0 %v2886_v40 }
  0xd6   : > { %2121 = vmatpush1.bf16.msra.mxu1 %v2889_v41  ;;  %2079 = vmatprep.subr.bf16.mxu0 %v2894_v42  ;;  %v445_v42 = vlaneseq }
  0xd7   : > { %2122 = vmatprep.subr.bf16.mxu1 %v2897_v43 }
  0xd9   : > { %2080 = vmatpush1.bf16.msra.mxu0 %v2892_v44 }
  0xda   : > { %2123 = vmatpush1.bf16.msra.mxu1 %v2895_v45  ;;  %2081 = vmatprep.subr.bf16.mxu0 %v2900_v46 }
  0xdb   : > { %2124 = vmatprep.subr.bf16.mxu1 %v2903_v47  ;;  %v446_v47 = vshrl.u32 %v445_v42, 7 }
  0xdd   : > { %2082 = vmatpush1.bf16.msra.mxu0 %v2898_v48  ;;  %v447_v48 = vsub.s32 0, %v446_v47  ;;  %v451_v33 = vsub.s32 1, %v446_v47 }
  0xde   : > { %2125 = vmatpush1.bf16.msra.mxu1 %v2901_v49  ;;  %2083 = vmatprep.subr.bf16.mxu0 %v2906_v50 }
  0xdf   : > { %2126 = vmatprep.subr.bf16.mxu1 %v2909_v51  ;;  %v448_v51 = vrot.slane %v443_v32, %v447_v48 }
  0xe1   : > { %2084 = vmatpush1.bf16.msra.mxu0 %v2904_v52  ;;  %v452_v52 = vrot.slane %v443_v32, %v451_v33 }
  0xe2   : > { %2127 = vmatpush1.bf16.msra.mxu1 %v2907_v53  ;;  %2085 = vmatprep.subr.bf16.mxu0 %v2912_v54 }
  0xe3   : > { %2128 = vmatprep.subr.bf16.mxu1 %v2915_v55 }
  0xe5   : > { %2086 = vmatpush1.bf16.msra.mxu0 %v2910_v56 }
  0xe6   : > { %2129 = vmatpush1.bf16.msra.mxu1 %v2913_v57  ;;  %2087 = vmatprep.subr.bf16.mxu0 %v2918_v58 }
  0xe7   : > { %2130 = vmatprep.subr.bf16.mxu1 %v2921_v59 }
  0xe9   : > { %2088 = vmatpush1.bf16.msra.mxu0 %v2916_v60 }
  0xea   : > { %2131 = vmatpush1.bf16.msra.mxu1 %v2919_v61  ;;  %2089 = vmatprep.subr.bf16.mxu0 %v2924_v62 }
  0xeb   : > { %2132 = vmatprep.subr.bf16.mxu1 %v2927_v63 }
  0xed   : > { %2090 = vmatpush2.bf16.msra.mxu0 %v2922_v0 }
  0xee   : > { %2133 = vmatpush2.bf16.msra.mxu1 %v2925_v1  ;;  %2091 = vmatprep.subr.bf16.mxu0 %v2930_v2 }
  0xef   : > { %2134 = vmatprep.subr.bf16.mxu1 %v2933_v3 }
  0xf1   : > { %2092 = vmatpush2.bf16.msra.mxu0 %v2928_v4 }
  0xf2   : > { %2135 = vmatpush2.bf16.msra.mxu1 %v2931_v5  ;;  %2093 = vmatprep.subr.bf16.mxu0 %v2936_v6 }
  0xf3   : > { %2136 = vmatprep.subr.bf16.mxu1 %v2939_v7 }
  0xf5   : > { %2094 = vmatpush2.bf16.msra.mxu0 %v2934_v8 }
  0xf6   : > { %2137 = vmatpush2.bf16.msra.mxu1 %v2937_v9  ;;  %2095 = vmatprep.subr.bf16.mxu0 %v2942_v10 }
  0xf7   : > { %2138 = vmatprep.subr.bf16.mxu1 %v2945_v11 }
  0xf9   : > { %2096 = vmatpush2.bf16.msra.mxu0 %v2940_v12 }
  0xfa   : > { %2139 = vmatpush2.bf16.msra.mxu1 %v2943_v13  ;;  %2097 = vmatprep.subr.bf16.mxu0 %v2948_v14 }
  0xfb   : > { %2140 = vmatprep.subr.bf16.mxu1 %v2951_v15 }
  0xfd   : > { %2098 = vmatpush2.bf16.msra.mxu0 %v2946_v16 }
  0xfe   : > { %2141 = vmatpush2.bf16.msra.mxu1 %v2949_v17  ;;  %2099 = vmatprep.subr.bf16.mxu0 %v2954_v18 }
  0xff   : > { %2142 = vmatprep.subr.bf16.mxu1 %v2957_v19 }
 0x101   : > { %2100 = vmatpush2.bf16.msra.mxu0 %v2952_v20 }
 0x102   : > { %2143 = vmatpush2.bf16.msra.mxu1 %v2955_v21  ;;  %2101 = vmatprep.subr.bf16.mxu0 %v2960_v22 }
 0x103   : > { %2144 = vmatprep.subr.bf16.mxu1 %v2963_v23 }
 0x105   : > { %2102 = vmatpush2.bf16.msra.mxu0 %v2958_v29 }
 0x106   : > { %2145 = vmatpush2.bf16.msra.mxu1 %v2961_v30  ;;  %2103 = vmatprep.subr.bf16.mxu0 %v2966_v34 }
 0x107   : > { %2146 = vmatprep.subr.bf16.mxu1 %v2969_v35 }
 0x109   : > { %2104 = vmatpush2.bf16.msra.mxu0 %v2964_v24 }
 0x10a   : > { %2147 = vmatpush2.bf16.msra.mxu1 %v2967_v25 }
 0x10c   : > { %2106 = vmatmul.mubr.bf16.vlgmr.msra.gmra.mxu0 %v2310_v26  ;;  %v1849_v36 = vpop.f32.mrf.mxu0 }
 0x10d   : > { %2149 = vmatmul.mubr.bf16.vlgmr.msra.gmra.mxu1 %v2312_v27  ;;  %v1892_v37 = vpop.f32.mrf.mxu1  ;;  %v1850_v55 = vadd.f32 %v1849_v36, %v448_v51 }
 0x10e   : > { %v1851_v38 = vpop.f32.mrf.mxu0 }
 0x10f   : > { %v1894_v39 = vpop.f32.mrf.mxu1  ;;  %v1852_v58 = vadd.f32 %v1851_v38, %v452_v52  ;;  %v1893_v60 = vadd.f32 %v1892_v37, %v1850_v55 }
 0x110   : > { %v1853_v40 = vpop.f32.mrf.mxu0 }
 0x111   : > { %v1896_v41 = vpop.f32.mrf.mxu1  ;;  %v1854_v59 = vadd.f32 %v1853_v40, %v448_v51  ;;  %v1895_v0 = vadd.f32 %v1894_v39, %v1852_v58 }
 0x112   : > { %v1855_v43 = vpop.f32.mrf.mxu0 }
 0x113   : > { %v1898_v44 = vpop.f32.mrf.mxu1  ;;  %v1856_v61 = vadd.f32 %v1855_v43, %v452_v52  ;;  %v1897_v1 = vadd.f32 %v1896_v41, %v1854_v59 }
 0x115   : > { %v1899_v3 = vadd.f32 %v1898_v44, %v1856_v61 }
 0x14c   : > { %v1935_v45 = vpop.f32.mrf.mxu0 }
 0x14d   : > { %v1978_v46 = vpop.f32.mrf.mxu1  ;;  %v1936_v2 = vadd.f32 %v1935_v45, %v1893_v60 }
 0x14e   : > { %v1937_v28 = vpop.f32.mrf.mxu0 }
 0x14f   : > { %v1980_v31 = vpop.f32.mrf.mxu1  ;;  %v1938_v4 = vadd.f32 %v1937_v28, %v1895_v0  ;;  %v1979_v8 = vadd.f32 %v1978_v46, %v1936_v2 }
 0x150   : > { %v1939_v49 = vpop.f32.mrf.mxu0 }
 0x151   : > { %v1982_v50 = vpop.f32.mrf.mxu1  ;;  %v1940_v5 = vadd.f32 %v1939_v49, %v1897_v1  ;;  %v1981_v10 = vadd.f32 %v1980_v31, %v1938_v4 }
 0x152   : > { %v1941_v53 = vpop.f32.mrf.mxu0 }
 0x153   : > { %v1984_v54 = vpop.f32.mrf.mxu1  ;;  %v1942_v9 = vadd.f32 %v1941_v53, %v1899_v3  ;;  %v1983_v11 = vadd.f32 %v1982_v50, %v1940_v5 }
 0x155   : > { %v1985_v15 = vadd.f32 %v1984_v54, %v1942_v9 }
 0x18c   : > { %v2021_v56 = vpop.f32.mrf.mxu0 }
 0x18d   : > { %v2064_v57 = vpop.f32.mrf.mxu1  ;;  %v2022_v12 = vadd.f32 %v2021_v56, %v1979_v8 }
 0x18e   : > { %v2023_v62 = vpop.f32.mrf.mxu0 }
 0x18f   : > { %v2066_v63 = vpop.f32.mrf.mxu1  ;;  %v2024_v16 = vadd.f32 %v2023_v62, %v1981_v10  ;;  %v2065_v20 = vadd.f32 %v2064_v57, %v2022_v12 }
 0x190   : > { %v2025_v6 = vpop.f32.mrf.mxu0 }
 0x191   : > { %v2068_v7 = vpop.f32.mrf.mxu1  ;;  %v2026_v17 = vadd.f32 %v2025_v6, %v1983_v11  ;;  %v2067_v29 = vadd.f32 %v2066_v63, %v2024_v16 }
 0x192   : > { %v2027_v13 = vpop.f32.mrf.mxu0 }
 0x193   : > { %v2070_v14 = vpop.f32.mrf.mxu1  ;;  %v2028_v21 = vadd.f32 %v2027_v13, %v1985_v15  ;;  %v2069_v30 = vadd.f32 %v2068_v7, %v2026_v17 }
 0x195   : > { %v2071_v25 = vadd.f32 %v2070_v14, %v2028_v21 }
 0x1cc   : > { %v2107_v18 = vpop.f32.mrf.mxu0 }
 0x1cd   : > { %v2150_v19 = vpop.f32.mrf.mxu1  ;;  %v2108_v34 = vadd.f32 %v2107_v18, %v2065_v20 }
 0x1ce   : > { %v2109_v22 = vpop.f32.mrf.mxu0 }
 0x1cf   : > { %v2152_v23 = vpop.f32.mrf.mxu1  ;;  %v2110_v26 = vadd.f32 %v2109_v22, %v2067_v29  ;;  %v2151_v37 = vadd.f32 %v2150_v19, %v2108_v34 }
 0x1d0   : > { %v2111_v35 = vpop.f32.mrf.mxu0 }
 0x1d1   : > { %v2154_v24 = vpop.f32.mrf.mxu1  ;;  %v2112_v27 = vadd.f32 %v2111_v35, %v2069_v30  ;;  %v2153_v41 = vadd.f32 %v2152_v23, %v2110_v26 }
 0x1d2   : > { %v2113_v36 = vpop.f32.mrf.mxu0 }
 0x1d3   : > { %v2155_v38 = vadd.f32 %v2154_v24, %v2112_v27  ;;  %v2114_v39 = vadd.f32 %v2113_v36, %v2071_v25  ;;  %v2156_v40 = vpop.f32.mrf.mxu1 }
 0x1d5   : > { %v2159_v42 = vadd.f32 %v2155_v38, %v2151_v37  ;;  %v2157_v43 = vadd.f32 %v2156_v40, %v2114_v39 }
 0x1d7   : > { %v2160_v44 = vrot.slane %v2159_v42, 4  ;;  %v2166_v45 = vadd.f32 %v2157_v43, %v2153_v41 }
 0x1d9   : > { %v2161_v46 = vadd.f32 %v2160_v44, %v2159_v42  ;;  %v2167_v47 = vrot.slane %v2166_v45, 4 }
 0x1db   : > { %v2162_v28 = vrot.slane %v2161_v46, 2  ;;  %v2168_v31 = vadd.f32 %v2167_v47, %v2166_v45 }
 0x1dd   : > { %v2163_v48 = vadd.f32 %v2162_v28, %v2161_v46  ;;  %v2169_v32 = vrot.slane %v2168_v31, 2 }
 0x1df   : > { %v2164_v33 = vrot.slane %v2163_v48, 1  ;;  %v2170_v49 = vadd.f32 %v2169_v32, %v2168_v31 }
 0x1e1   : > { %v2165_v50 = vadd.f32 %v2164_v33, %v2163_v48  ;;  %v2171_v51 = vrot.slane %v2170_v49, 1 }
 0x1e3   : > { %v2174_v52 = vmul.f32 0.0625, %v2165_v50  ;;  %v2172_v53 = vadd.f32 %v2171_v51, %v2170_v49 }
 0x1e5   : > { %v2176_v54 = vsub.f32 %v2151_v37, %v2174_v52  ;;  %v2178_v55 = vsub.f32 %v2155_v38, %v2174_v52  ;;  %v2175_v56 = vmul.f32 0.0625, %v2172_v53 }
 0x1e7   : > { %v2180_v57 = vmul.f32 %v2176_v54, %v2176_v54  ;;  %v2182_v58 = vmul.f32 %v2178_v55, %v2178_v55  ;;  %v2177_v59 = vsub.f32 %v2153_v41, %v2175_v56  ;;  %v2179_v60 = vsub.f32 %v2157_v43, %v2175_v56 }
 0x1e9   : > { %v2184_v61 = vadd.f32 %v2182_v58, %v2180_v57  ;;  %v2181_v62 = vmul.f32 %v2177_v59, %v2177_v59  ;;  %v2183_v63 = vmul.f32 %v2179_v60, %v2179_v60 }
 0x1eb   : > { %v2185_v0 = vrot.slane %v2184_v61, 4  ;;  %v2191_v1 = vadd.f32 %v2183_v63, %v2181_v62 }
 0x1ed   : > { %v2186_v2 = vadd.f32 %v2185_v0, %v2184_v61  ;;  %v2192_v3 = vrot.slane %v2191_v1, 4 }
 0x1ef   : > { %v2187_v4 = vrot.slane %v2186_v2, 2  ;;  %v2193_v5 = vadd.f32 %v2192_v3, %v2191_v1 }
 0x1f1   : > { %v2188_v6 = vadd.f32 %v2187_v4, %v2186_v2  ;;  %v2194_v7 = vrot.slane %v2193_v5, 2 }
 0x1f3   : > { %v2189_v8 = vrot.slane %v2188_v6, 1  ;;  %v2195_v9 = vadd.f32 %v2194_v7, %v2193_v5 }
 0x1f5   : > { %v2190_v10 = vadd.f32 %v2189_v8, %v2188_v6  ;;  %v2196_v11 = vrot.slane %v2195_v9, 1 }
 0x1f7   : > { %v2198_v12 = vmul.f32 0.0625, %v2190_v10  ;;  %v2197_v13 = vadd.f32 %v2196_v11, %v2195_v9 }
 0x1f9   : > { %v2200_v14 = vadd.f32 1e-05, %v2198_v12  ;;  %v2199_v15 = vmul.f32 0.0625, %v2197_v13 }
 0x1fb   : > { %2970 = vrsqrt.f32 %v2200_v14  ;;  %v2201_v16 = vadd.f32 1e-05, %v2199_v15 }
 0x1fd   : > { %2972 = vrsqrt.f32 %v2201_v16 }
 0x208   : > { %v2971_v17 = vpop.eup %2970 }
 0x209   : > { %v2204_v18 = vmul.f32 %v2971_v17, %v2176_v54  ;;  %v2206_v19 = vmul.f32 %v2971_v17, %v2178_v55 }
 0x20a   : > { %v2973_v20 = vpop.eup %2972 }
 0x20b   : > { %v2212_v21 = vmul.f32 0.2, %v2204_v18  ;;  %v2214_v22 = vmul.f32 0.2, %v2206_v19  ;;  %v2205_v23 = vmul.f32 %v2973_v20, %v2177_v59  ;;  %v2207_v29 = vmul.f32 %v2973_v20, %v2179_v60 }
 0x20c   : > { %vm2208_vm0 = vcmp.ge.f32.partialorder %v2204_v18, 0.0  ;;  %vm2210_vm1 = vcmp.ge.f32.partialorder %v2206_v19, 0.0 }
 0x20d   : > { %vm2209_vm2 = vcmp.ge.f32.partialorder %v2205_v23, 0.0  ;;  %vm2211_vm3 = vcmp.ge.f32.partialorder %v2207_v29, 0.0  ;;  %v2213_v30 = vmul.f32 0.2, %v2205_v23  ;;  %v2215_v34 = vmul.f32 0.2, %v2207_v29 }
 0x20e   : > { %v2216_v35 = vsel %vm2208_vm0, %v2204_v18, %v2212_v21  ;;  %v2218_v24 = vsel %vm2210_vm1, %v2206_v19, %v2214_v22 }
 0x20f   : > { %v2217_v25 = vsel %vm2209_vm2, %v2205_v23, %v2213_v30  ;;  %v2219_v26 = vsel %vm2211_vm3, %v2207_v29, %v2215_v34 }
 0x210   : > { %v2576_v27 = vpack.c.bf16 %v2217_v25, %v2216_v35  ;;  %v2577_v36 = vpack.c.bf16 %v2219_v26, %v2218_v24 }
 0x212   : > { %2232 = vst [vmem:[%s170_s22] sm:$0xff] %v2576_v27  ;;  %2233 = vst [vmem:[%s170_s22 + $0x8] sm:$0xff] %v2577_v36 }
 0x213 PF: > { %s13_s12 = sadd.s32 1, %s2980_s12  }
 0x214   : > { %p10_p4 = scmp.ge.s32.totalorder %s13_s12, 4  }
 0x216   :  { %12 = sbr.rel (!%p10_p4) target bundleno = 1 (0x1), region = 62 }

// kernel: discriminator_pallas.7
= control target key start
LH: loop header
LB: loop body
LE: loop exit
PB: predicated region body
PF: predicated region fallthrough
CT: control target
= control target key end

     0   :  { %s10769_s15 = smov 0   ;;  %s14201_s0 = inlined_call_operand.vmem [shape: bf16[2,4,4096], index: 0, kind: input, shape index: {}]   ;;  %s14202_s1 = inlined_call_operand.vmem [shape: bf16[4096,512], index: 1, kind: input, shape index: {}]   ;;  %s14203_s2 = inlined_call_operand.vmem [shape: f32[1,512], index: 2, kind: input, shape index: {}]   ;;  %s14204_s3 = inlined_call_operand.vmem [shape: f32[4,4,512], index: 3, kind: input, shape index: {}]   ;;  %s14205_s4 = inlined_call_operand.vmem [shape: f32[2,4,1], index: 4, kind: output, shape index: {}]  }
   0x1 LB: > { %s8132_s16 = sadd.s32 4294967295, %s10741_s15   ;;  %p8136_p0 = scmp.ge.s32.totalorder %s10741_s15, 1  ;;  %s10741_s15 = sphi %s10769_s15, %s14_s15  }
   0x2   : > { %p162_p1 = scmp.lt.s32.totalorder %s10741_s15, 3 }
   0x4   : > { %p163_p2 = pnand %p8136_p0, %p162_p1 }
   0x5   : > { %p187_p3 = scmp.lt.s32.totalorder (!%p163_p2), %s8132_s16, 1 }
   0x6   : > { %166 = sbr.rel (%p163_p2) target bundleno = 1458 (0x5b2), region = 36 }
   0xb   : > { %v9182_v0 = vld [vmem:[%s14202_s1 + $0xe4] ss:$16 sps:$4 sm:$0xff]   ;;  %v9186_v2 = vld [vmem:[%s14202_s1 + $0xe0] ss:$16 sps:$4 sm:$0xff]   ;;  %v1230_v36 = vlaneseq  ;;  %v10743_v37 = vmov 1983009808  }
   0xc   : > { %v9184_v1 = vld [vmem:[%s14202_s1 + $0x2e4] ss:$16 sps:$4 sm:$0xff]   ;;  %6546 = vmatprep.subr.bf16.mxu0 %v9182_v0  ;;  %v9187_v3 = vld [vmem:[%s14202_s1 + $0x2e0] ss:$16 sps:$4 sm:$0xff]   ;;  %v1260_v38 = vunpack.c.l.s4 %v10743_v37  ;;  %s14207_s16 = smov (!%p187_p3, %s8132_s16), 1  ;;  %vm7858_vm0 = vcmask 1043456  }
   0xd   : > { %6587 = vmatprep.subr.bf16.mxu1 %v9184_v1  ;;  %v9188_v4 = vld [vmem:[%s14202_s1 + $0xc4] ss:$16 sps:$4 sm:$0xff]   ;;  %6547 = vmatpush1.bf16.msra.mxu0 %v9186_v2  ;;  %v9192_v6 = vld [vmem:[%s14202_s1 + $0xc0] ss:$16 sps:$4 sm:$0xff]   ;;  %v10900_v42 = vshrl.u32 %v1230_v36, 7  ;;  %s9172_s27 = sshll.u32 %s14207_s16, 6 }
   0xe   : > { %6588 = vmatpush1.bf16.msra.mxu1 %v9187_v3  ;;  %v9190_v5 = vld [vmem:[%s14202_s1 + $0x2c4] ss:$16 sps:$4 sm:$0xff]   ;;  %6548 = vmatprep.subr.bf16.mxu0 %v9188_v4  ;;  %v9193_v7 = vld [vmem:[%s14202_s1 + $0x2c0] ss:$16 sps:$4 sm:$0xff]   ;;  %v1261_v43 = vunpack.c.0.s8 %v1260_v38  ;;  %s10921_s10 = scalar_lea.vmem %s14201_s0, %s9172_s27  ;;  %s8139_s9 = sshll.u32 %s14207_s16, 2  ;;  %vm8071_vm5 = vcmask 1040384  }
   0xf   : > { %6589 = vmatprep.subr.bf16.mxu1 %v9190_v5  ;;  %v9194_v8 = vld [vmem:[%s14202_s1 + $0xa4] ss:$16 sps:$4 sm:$0xff]   ;;  %v9198_v10 = vld [vmem:[%s14202_s1 + $0xa0] ss:$16 sps:$4 sm:$0xff]   ;;  %v197_v38 = vld [vmem:[%s10921_s10 + $0x8] sm:$0xff]  ;;  %vm8073_vm6 = vcmask 1041408   ;;  %s195_s12 = scalar_lea.vmem %s14205_s4, %s8139_s9 }
  0x10   : > { %v9196_v9 = vld [vmem:[%s14202_s1 + $0x2a4] ss:$16 sps:$4 sm:$0xff]   ;;  %v9199_v11 = vld [vmem:[%s14202_s1 + $0x2a0] ss:$16 sps:$4 sm:$0xff]   ;;  %v10924_v49 = vsub.s32 %v1261_v43, %v10900_v42  ;;  %vm8075_vm7 = vcmask 1042432   ;;  %vm8077_vm8 = vcmask 3072  }
  0x11   : > { %6549 = vmatpush1.bf16.msra.mxu0 %v9192_v6  ;;  %v9200_v12 = vld [vmem:[%s14202_s1 + $0x84] ss:$16 sps:$4 sm:$0xff]   ;;  %v9204_v14 = vld [vmem:[%s14202_s1 + $0x80] ss:$16 sps:$4 sm:$0xff]  }
  0x12   : > { %6590 = vmatpush1.bf16.msra.mxu1 %v9193_v7  ;;  %6550 = vmatprep.subr.bf16.mxu0 %v9194_v8  ;;  %v9202_v13 = vld [vmem:[%s14202_s1 + $0x284] ss:$16 sps:$4 sm:$0xff]   ;;  %v9205_v15 = vld [vmem:[%s14202_s1 + $0x280] ss:$16 sps:$4 sm:$0xff]  }
  0x13   : > { %6591 = vmatprep.subr.bf16.mxu1 %v9196_v9  ;;  %v9206_v16 = vld [vmem:[%s14202_s1 + $0x64] ss:$16 sps:$4 sm:$0xff]   ;;  %v9210_v18 = vld [vmem:[%s14202_s1 + $0x60] ss:$16 sps:$4 sm:$0xff]  }
  0x14   : > { %v9208_v17 = vld [vmem:[%s14202_s1 + $0x264] ss:$16 sps:$4 sm:$0xff]   ;;  %v9211_v19 = vld [vmem:[%s14202_s1 + $0x260] ss:$16 sps:$4 sm:$0xff]  }
  0x15   : > { %6551 = vmatpush1.bf16.msra.mxu0 %v9198_v10  ;;  %v9212_v20 = vld [vmem:[%s14202_s1 + $0x44] ss:$16 sps:$4 sm:$0xff]   ;;  %v9216_v22 = vld [vmem:[%s14202_s1 + $0x40] ss:$16 sps:$4 sm:$0xff]  }
  0x16   : > { %6592 = vmatpush1.bf16.msra.mxu1 %v9199_v11  ;;  %6552 = vmatprep.subr.bf16.mxu0 %v9200_v12  ;;  %v9214_v21 = vld [vmem:[%s14202_s1 + $0x244] ss:$16 sps:$4 sm:$0xff]   ;;  %v9217_v23 = vld [vmem:[%s14202_s1 + $0x240] ss:$16 sps:$4 sm:$0xff]  }
  0x17   : > { %6593 = vmatprep.subr.bf16.mxu1 %v9202_v13  ;;  %v9218_v24 = vld [vmem:[%s14202_s1 + $0x24] ss:$16 sps:$4 sm:$0xff]   ;;  %v9222_v26 = vld [vmem:[%s14202_s1 + $0x20] ss:$16 sps:$4 sm:$0xff]  }
  0x18   : > { %v9220_v25 = vld [vmem:[%s14202_s1 + $0x224] ss:$16 sps:$4 sm:$0xff]   ;;  %v9223_v27 = vld [vmem:[%s14202_s1 + $0x220] ss:$16 sps:$4 sm:$0xff]  }
  0x19   : > { %6553 = vmatpush1.bf16.msra.mxu0 %v9204_v14  ;;  %v9224_v28 = vld [vmem:[%s14202_s1 + $0x4] ss:$16 sps:$4 sm:$0xff]   ;;  %v9228_v30 = vld [vmem:[%s14202_s1] ss:$16 sps:$4 sm:$0xff]  }
  0x1a   : > { %6594 = vmatpush1.bf16.msra.mxu1 %v9205_v15  ;;  %6554 = vmatprep.subr.bf16.mxu0 %v9206_v16  ;;  %v9226_v29 = vld [vmem:[%s14202_s1 + $0x204] ss:$16 sps:$4 sm:$0xff]   ;;  %v9229_v31 = vld [vmem:[%s14202_s1 + $0x200] ss:$16 sps:$4 sm:$0xff]  }
  0x1b   : > { %6595 = vmatprep.subr.bf16.mxu1 %v9208_v17  ;;  %v9230_v32 = vld [vmem:[%s14202_s1 + $0x1e4] ss:$16 sps:$4 sm:$0xff]   ;;  %v9234_v34 = vld [vmem:[%s14202_s1 + $0x1e0] ss:$16 sps:$4 sm:$0xff]  }
  0x1c   : > { %v9232_v33 = vld [vmem:[%s14202_s1 + $0x3e4] ss:$16 sps:$4 sm:$0xff]   ;;  %v9235_v35 = vld [vmem:[%s14202_s1 + $0x3e0] ss:$16 sps:$4 sm:$0xff]  }
  0x1d   : > { %6555 = vmatpush1.bf16.msra.mxu0 %v9210_v18  ;;  %v9236_v39 = vld [vmem:[%s14202_s1 + $0x1c4] ss:$16 sps:$4 sm:$0xff]   ;;  %v9240_v41 = vld [vmem:[%s14202_s1 + $0x1c0] ss:$16 sps:$4 sm:$0xff]  }
  0x1e   : > { %6596 = vmatpush1.bf16.msra.mxu1 %v9211_v19  ;;  %6556 = vmatprep.subr.bf16.mxu0 %v9212_v20  ;;  %v9238_v40 = vld [vmem:[%s14202_s1 + $0x3c4] ss:$16 sps:$4 sm:$0xff]   ;;  %v9241_v44 = vld [vmem:[%s14202_s1 + $0x3c0] ss:$16 sps:$4 sm:$0xff]  }
  0x1f   : > { %6597 = vmatprep.subr.bf16.mxu1 %v9214_v21  ;;  %v9242_v45 = vld [vmem:[%s14202_s1 + $0x1a4] ss:$16 sps:$4 sm:$0xff]   ;;  %v9246_v47 = vld [vmem:[%s14202_s1 + $0x1a0] ss:$16 sps:$4 sm:$0xff]  }
  0x20   : > { %v9244_v46 = vld [vmem:[%s14202_s1 + $0x3a4] ss:$16 sps:$4 sm:$0xff]   ;;  %v9247_v48 = vld [vmem:[%s14202_s1 + $0x3a0] ss:$16 sps:$4 sm:$0xff]  }
  0x21   : > { %6557 = vmatpush1.bf16.msra.mxu0 %v9216_v22  ;;  %v9248_v50 = vld [vmem:[%s14202_s1 + $0x184] ss:$16 sps:$4 sm:$0xff]   ;;  %v9252_v53 = vld [vmem:[%s14202_s1 + $0x180] ss:$16 sps:$4 sm:$0xff]  }
  0x22   : > { %6598 = vmatpush1.bf16.msra.mxu1 %v9217_v23  ;;  %6558 = vmatprep.subr.bf16.mxu0 %v9218_v24  ;;  %v9250_v51 = vld [vmem:[%s14202_s1 + $0x384] ss:$16 sps:$4 sm:$0xff]   ;;  %v9253_v56 = vld [vmem:[%s14202_s1 + $0x380] ss:$16 sps:$4 sm:$0xff]  }
  0x23   : > { %6599 = vmatprep.subr.bf16.mxu1 %v9220_v25  ;;  %v196_v52 = vld [vmem:[%s10921_s10] sm:$0xff] }
  0x24   : > { %v10937_v54 = vrot.slane %v196_v52, %v10924_v49  ;;  %v1258_v55 = vcombine.high %v196_v52, %v196_v52  ;;  %v9254_v57 = vld [vmem:[%s14202_s1 + $0x164] ss:$16 sps:$4 sm:$0xff]   ;;  %v9258_v61 = vld [vmem:[%s14202_s1 + $0x160] ss:$16 sps:$4 sm:$0xff]  }
  0x25   : > { %6559 = vmatpush1.bf16.msra.mxu0 %v9222_v26  ;;  %v9256_v58 = vld [vmem:[%s14202_s1 + $0x364] ss:$16 sps:$4 sm:$0xff]   ;;  %v9259_v63 = vld [vmem:[%s14202_s1 + $0x360] ss:$16 sps:$4 sm:$0xff]  }
  0x26   : > { %6600 = vmatpush1.bf16.msra.mxu1 %v9223_v27  ;;  %6560 = vmatprep.subr.bf16.mxu0 %v9224_v28  ;;  %v10950_v59 = vcombine.high %v10937_v54, %v10937_v54  ;;  %v10953_v60 = vrot.slane %v1258_v55, %v10924_v49  ;;  %v9260_v0 = vld [vmem:[%s14202_s1 + $0x144] ss:$16 sps:$4 sm:$0xff]   ;;  %v9264_v2 = vld [vmem:[%s14202_s1 + $0x140] ss:$16 sps:$4 sm:$0xff]  }
  0x27   : > { %6601 = vmatprep.subr.bf16.mxu1 %v9226_v29  ;;  %v9262_v1 = vld [vmem:[%s14202_s1 + $0x344] ss:$16 sps:$4 sm:$0xff]   ;;  %v9265_v3 = vld [vmem:[%s14202_s1 + $0x340] ss:$16 sps:$4 sm:$0xff]  }
  0x28   : > { %6578 = vmatprep.mubr.bf16.mxu0 %v10950_v59  ;;  %v10961_v62 = vcombine.high %v10953_v60, %v10953_v60  ;;  %v9266_v4 = vld [vmem:[%s14202_s1 + $0x124] ss:$16 sps:$4 sm:$0xff]   ;;  %v9270_v6 = vld [vmem:[%s14202_s1 + $0x120] ss:$16 sps:$4 sm:$0xff]  }
  0x29   : > { %6561 = vmatpush1.bf16.msra.mxu0 %v9228_v30  ;;  %v9268_v5 = vld [vmem:[%s14202_s1 + $0x324] ss:$16 sps:$4 sm:$0xff]   ;;  %v9271_v7 = vld [vmem:[%s14202_s1 + $0x320] ss:$16 sps:$4 sm:$0xff]  }
  0x2a   : > { %6602 = vmatpush1.bf16.msra.mxu1 %v9229_v31  ;;  %6562 = vmatprep.subr.bf16.mxu0 %v9230_v32  ;;  %v9272_v8 = vld [vmem:[%s14202_s1 + $0x104] ss:$16 sps:$4 sm:$0xff]   ;;  %v9276_v10 = vld [vmem:[%s14202_s1 + $0x100] ss:$16 sps:$4 sm:$0xff]  }
  0x2b   : > { %6603 = vmatprep.subr.bf16.mxu1 %v9232_v33  ;;  %6619 = vmatprep.mubr.bf16.mxu1 %v10961_v62  ;;  %v9274_v9 = vld [vmem:[%s14202_s1 + $0x304] ss:$16 sps:$4 sm:$0xff]   ;;  %v9277_v11 = vld [vmem:[%s14202_s1 + $0x300] ss:$16 sps:$4 sm:$0xff]  }
  0x2c   : > { %v9281_v12 = vld [vmem:[%s14202_s1 + $0x4e4] ss:$16 sps:$4 sm:$0xff]   ;;  %v9279_v14 = vld [vmem:[%s14202_s1 + $0x4e0] ss:$16 sps:$4 sm:$0xff]  }
  0x2d   : > { %6563 = vmatpush2.bf16.msra.mxu0 %v9234_v34  ;;  %v9284_v13 = vld [vmem:[%s14202_s1 + $0x6e4] ss:$16 sps:$4 sm:$0xff]   ;;  %v9282_v15 = vld [vmem:[%s14202_s1 + $0x6e0] ss:$16 sps:$4 sm:$0xff]  }
  0x2e   : > { %6604 = vmatpush2.bf16.msra.mxu1 %v9235_v35  ;;  %6564 = vmatprep.subr.bf16.mxu0 %v9236_v39  ;;  %v9287_v16 = vld [vmem:[%s14202_s1 + $0x4c4] ss:$16 sps:$4 sm:$0xff]   ;;  %v9285_v18 = vld [vmem:[%s14202_s1 + $0x4c0] ss:$16 sps:$4 sm:$0xff]   ;;  %v11085_v39 = vrot.slane %v197_v38, %v10924_v49 }
  0x2f   : > { %6605 = vmatprep.subr.bf16.mxu1 %v9238_v40  ;;  %v9290_v17 = vld [vmem:[%s14202_s1 + $0x6c4] ss:$16 sps:$4 sm:$0xff]   ;;  %v9288_v19 = vld [vmem:[%s14202_s1 + $0x6c0] ss:$16 sps:$4 sm:$0xff]   ;;  %v1275_v40 = vcombine.high %v197_v38, %v197_v38 }
  0x30   : > { %v9293_v20 = vld [vmem:[%s14202_s1 + $0x4a4] ss:$16 sps:$4 sm:$0xff]   ;;  %v9291_v22 = vld [vmem:[%s14202_s1 + $0x4a0] ss:$16 sps:$4 sm:$0xff]  }
  0x31   : > { %6565 = vmatpush2.bf16.msra.mxu0 %v9240_v41  ;;  %v9296_v21 = vld [vmem:[%s14202_s1 + $0x6a4] ss:$16 sps:$4 sm:$0xff]   ;;  %v9294_v23 = vld [vmem:[%s14202_s1 + $0x6a0] ss:$16 sps:$4 sm:$0xff]  }
  0x32   : > { %6606 = vmatpush2.bf16.msra.mxu1 %v9241_v44  ;;  %6566 = vmatprep.subr.bf16.mxu0 %v9242_v45  ;;  %v9299_v24 = vld [vmem:[%s14202_s1 + $0x484] ss:$16 sps:$4 sm:$0xff]   ;;  %v9297_v26 = vld [vmem:[%s14202_s1 + $0x480] ss:$16 sps:$4 sm:$0xff]   ;;  %v11095_v44 = vcombine.high %v11085_v39, %v11085_v39  ;;  %v11098_v45 = vrot.slane %v1275_v40, %v10924_v49 }
  0x33   : > { %6607 = vmatprep.subr.bf16.mxu1 %v9244_v46  ;;  %v9302_v25 = vld [vmem:[%s14202_s1 + $0x684] ss:$16 sps:$4 sm:$0xff]   ;;  %v9300_v27 = vld [vmem:[%s14202_s1 + $0x680] ss:$16 sps:$4 sm:$0xff]  }
  0x34   : > { %v9305_v28 = vld [vmem:[%s14202_s1 + $0x464] ss:$16 sps:$4 sm:$0xff]   ;;  %v9303_v30 = vld [vmem:[%s14202_s1 + $0x460] ss:$16 sps:$4 sm:$0xff]  }
  0x35   : > { %6567 = vmatpush2.bf16.msra.mxu0 %v9246_v47  ;;  %v9308_v29 = vld [vmem:[%s14202_s1 + $0x664] ss:$16 sps:$4 sm:$0xff]   ;;  %v9306_v31 = vld [vmem:[%s14202_s1 + $0x660] ss:$16 sps:$4 sm:$0xff]  }
  0x36   : > { %6608 = vmatpush2.bf16.msra.mxu1 %v9247_v48  ;;  %6568 = vmatprep.subr.bf16.mxu0 %v9248_v50  ;;  %v9311_v32 = vld [vmem:[%s14202_s1 + $0x444] ss:$16 sps:$4 sm:$0xff]   ;;  %v9309_v34 = vld [vmem:[%s14202_s1 + $0x440] ss:$16 sps:$4 sm:$0xff]   ;;  %v11109_v48 = vcombine.high %v11098_v45, %v11098_v45 }
  0x37   : > { %6609 = vmatprep.subr.bf16.mxu1 %v9250_v51  ;;  %v9314_v33 = vld [vmem:[%s14202_s1 + $0x644] ss:$16 sps:$4 sm:$0xff]   ;;  %v9312_v35 = vld [vmem:[%s14202_s1 + $0x640] ss:$16 sps:$4 sm:$0xff]  }
  0x38   : > { %v9317_v36 = vld [vmem:[%s14202_s1 + $0x424] ss:$16 sps:$4 sm:$0xff]   ;;  %v9315_v41 = vld [vmem:[%s14202_s1 + $0x420] ss:$16 sps:$4 sm:$0xff]  }
  0x39   : > { %6569 = vmatpush2.bf16.msra.mxu0 %v9252_v53  ;;  %v9320_v37 = vld [vmem:[%s14202_s1 + $0x624] ss:$16 sps:$4 sm:$0xff]   ;;  %v9318_v43 = vld [vmem:[%s14202_s1 + $0x620] ss:$16 sps:$4 sm:$0xff]  }
  0x3a   : > { %6610 = vmatpush2.bf16.msra.mxu1 %v9253_v56  ;;  %6570 = vmatprep.subr.bf16.mxu0 %v9254_v57  ;;  %v9323_v46 = vld [vmem:[%s14202_s1 + $0x404] ss:$16 sps:$4 sm:$0xff]   ;;  %v9321_v50 = vld [vmem:[%s14202_s1 + $0x400] ss:$16 sps:$4 sm:$0xff]  }
  0x3b   : > { %6611 = vmatprep.subr.bf16.mxu1 %v9256_v58  ;;  %v9326_v47 = vld [vmem:[%s14202_s1 + $0x604] ss:$16 sps:$4 sm:$0xff]   ;;  %v9324_v51 = vld [vmem:[%s14202_s1 + $0x600] ss:$16 sps:$4 sm:$0xff]  }
  0x3c   : > { %v9329_v52 = vld [vmem:[%s14202_s1 + $0x5e4] ss:$16 sps:$4 sm:$0xff]   ;;  %v9327_v55 = vld [vmem:[%s14202_s1 + $0x5e0] ss:$16 sps:$4 sm:$0xff]  }
  0x3d   : > { %6571 = vmatpush2.bf16.msra.mxu0 %v9258_v61  ;;  %v9332_v53 = vld [vmem:[%s14202_s1 + $0x7e4] ss:$16 sps:$4 sm:$0xff]   ;;  %v9330_v56 = vld [vmem:[%s14202_s1 + $0x7e0] ss:$16 sps:$4 sm:$0xff]  }
  0x3e   : > { %6612 = vmatpush2.bf16.msra.mxu1 %v9259_v63  ;;  %6572 = vmatprep.subr.bf16.mxu0 %v9260_v0  ;;  %v9335_v57 = vld [vmem:[%s14202_s1 + $0x5c4] ss:$16 sps:$4 sm:$0xff]   ;;  %v9333_v61 = vld [vmem:[%s14202_s1 + $0x5c0] ss:$16 sps:$4 sm:$0xff]  }
  0x3f   : > { %6613 = vmatprep.subr.bf16.mxu1 %v9262_v1  ;;  %v9338_v58 = vld [vmem:[%s14202_s1 + $0x7c4] ss:$16 sps:$4 sm:$0xff]   ;;  %v9336_v63 = vld [vmem:[%s14202_s1 + $0x7c0] ss:$16 sps:$4 sm:$0xff]  }
  0x40   : > { %v9341_v0 = vld [vmem:[%s14202_s1 + $0x5a4] ss:$16 sps:$4 sm:$0xff]  }
  0x41   : > { %6573 = vmatpush2.bf16.msra.mxu0 %v9264_v2  ;;  %v9344_v1 = vld [vmem:[%s14202_s1 + $0x7a4] ss:$16 sps:$4 sm:$0xff]   ;;  %v9339_v2 = vld [vmem:[%s14202_s1 + $0x5a0] ss:$16 sps:$4 sm:$0xff]  }
  0x42   : > { %6614 = vmatpush2.bf16.msra.mxu1 %v9265_v3  ;;  %6574 = vmatprep.subr.bf16.mxu0 %v9266_v4  ;;  %v9342_v3 = vld [vmem:[%s14202_s1 + $0x7a0] ss:$16 sps:$4 sm:$0xff]   ;;  %v9347_v4 = vld [vmem:[%s14202_s1 + $0x584] ss:$16 sps:$4 sm:$0xff]  }
  0x43   : > { %6615 = vmatprep.subr.bf16.mxu1 %v9268_v5  ;;  %v9350_v5 = vld [vmem:[%s14202_s1 + $0x784] ss:$16 sps:$4 sm:$0xff]  }
  0x44   : > { %v9393_v38 = vld [vmem:[%s14202_s1 + $0xaa4] ss:$16 sps:$4 sm:$0xff]  }
  0x45   : > { %6575 = vmatpush2.bf16.msra.mxu0 %v9270_v6  ;;  %v9345_v6 = vld [vmem:[%s14202_s1 + $0x580] ss:$16 sps:$4 sm:$0xff]  }
  0x46   : > { %6616 = vmatpush2.bf16.msra.mxu1 %v9271_v7  ;;  %6576 = vmatprep.subr.bf16.mxu0 %v9272_v8  ;;  %v9348_v7 = vld [vmem:[%s14202_s1 + $0x780] ss:$16 sps:$4 sm:$0xff]   ;;  %v9353_v8 = vld [vmem:[%s14202_s1 + $0x564] ss:$16 sps:$4 sm:$0xff]  }
  0x47   : > { %6617 = vmatprep.subr.bf16.mxu1 %v9274_v9  ;;  %v9356_v9 = vld [vmem:[%s14202_s1 + $0x764] ss:$16 sps:$4 sm:$0xff]  }
  0x49   : > { %6577 = vmatpush2.bf16.msra.mxu0 %v9276_v10  ;;  %v9351_v10 = vld [vmem:[%s14202_s1 + $0x560] ss:$16 sps:$4 sm:$0xff]  }
  0x4a   : > { %6618 = vmatpush2.bf16.msra.mxu1 %v9277_v11  ;;  %6628 = vmatprep.subr.bf16.mxu0 %v9281_v12  ;;  %v9354_v11 = vld [vmem:[%s14202_s1 + $0x760] ss:$16 sps:$4 sm:$0xff]   ;;  %v9359_v12 = vld [vmem:[%s14202_s1 + $0x544] ss:$16 sps:$4 sm:$0xff]  }
  0x4b   : > { %6669 = vmatprep.subr.bf16.mxu1 %v9284_v13  ;;  %v9362_v13 = vld [vmem:[%s14202_s1 + $0x744] ss:$16 sps:$4 sm:$0xff]  }
  0x4c   : > { %6579 = vmatmul.mubr.bf16.vlgmr.msra.gmra.mxu0 %v10937_v54 }
  0x4d   : > { %6620 = vmatmul.mubr.bf16.vlgmr.msra.gmra.mxu1 %v10953_v60  ;;  %6629 = vmatpush1.bf16.msra.mxu0 %v9279_v14  ;;  %v9357_v14 = vld [vmem:[%s14202_s1 + $0x540] ss:$16 sps:$4 sm:$0xff]  }
  0x4e   : > { %6670 = vmatpush1.bf16.msra.mxu1 %v9282_v15  ;;  %6630 = vmatprep.subr.bf16.mxu0 %v9287_v16  ;;  %v9360_v15 = vld [vmem:[%s14202_s1 + $0x740] ss:$16 sps:$4 sm:$0xff]   ;;  %v9365_v16 = vld [vmem:[%s14202_s1 + $0x524] ss:$16 sps:$4 sm:$0xff]  }
  0x4f   : > { %6671 = vmatprep.subr.bf16.mxu1 %v9290_v17  ;;  %6660 = vmatprep.mubr.bf16.mxu0 %v11095_v44  ;;  %v9368_v17 = vld [vmem:[%s14202_s1 + $0x724] ss:$16 sps:$4 sm:$0xff]  }
  0x50   : > { %6701 = vmatprep.mubr.bf16.mxu1 %v11109_v48 }
  0x51   : > { %6631 = vmatpush1.bf16.msra.mxu0 %v9285_v18  ;;  %v9363_v18 = vld [vmem:[%s14202_s1 + $0x520] ss:$16 sps:$4 sm:$0xff]  }
  0x52   : > { %6672 = vmatpush1.bf16.msra.mxu1 %v9288_v19  ;;  %6632 = vmatprep.subr.bf16.mxu0 %v9293_v20  ;;  %v9366_v19 = vld [vmem:[%s14202_s1 + $0x720] ss:$16 sps:$4 sm:$0xff]   ;;  %v9371_v20 = vld [vmem:[%s14202_s1 + $0x504] ss:$16 sps:$4 sm:$0xff]  }
  0x53   : > { %6673 = vmatprep.subr.bf16.mxu1 %v9296_v21  ;;  %v9374_v21 = vld [vmem:[%s14202_s1 + $0x704] ss:$16 sps:$4 sm:$0xff]  }
  0x55   : > { %6633 = vmatpush1.bf16.msra.mxu0 %v9291_v22  ;;  %v9369_v22 = vld [vmem:[%s14202_s1 + $0x500] ss:$16 sps:$4 sm:$0xff]  }
  0x56   : > { %6674 = vmatpush1.bf16.msra.mxu1 %v9294_v23  ;;  %6634 = vmatprep.subr.bf16.mxu0 %v9299_v24  ;;  %v9372_v23 = vld [vmem:[%s14202_s1 + $0x700] ss:$16 sps:$4 sm:$0xff]   ;;  %v9378_v24 = vld [vmem:[%s14202_s1 + $0x8e4] ss:$16 sps:$4 sm:$0xff]  }
  0x57   : > { %6675 = vmatprep.subr.bf16.mxu1 %v9302_v25  ;;  %v9381_v25 = vld [vmem:[%s14202_s1 + $0xae4] ss:$16 sps:$4 sm:$0xff]  }
  0x59   : > { %6635 = vmatpush1.bf16.msra.mxu0 %v9297_v26  ;;  %v9376_v26 = vld [vmem:[%s14202_s1 + $0x8e0] ss:$16 sps:$4 sm:$0xff]  }
  0x5a   : > { %6676 = vmatpush1.bf16.msra.mxu1 %v9300_v27  ;;  %6636 = vmatprep.subr.bf16.mxu0 %v9305_v28  ;;  %v9379_v27 = vld [vmem:[%s14202_s1 + $0xae0] ss:$16 sps:$4 sm:$0xff]   ;;  %v9384_v28 = vld [vmem:[%s14202_s1 + $0x8c4] ss:$16 sps:$4 sm:$0xff]  }
  0x5b   : > { %6677 = vmatprep.subr.bf16.mxu1 %v9308_v29  ;;  %v198_v29 = vld [vmem:[%s10921_s10 + $0x10] sm:$0xff] }
  0x5d   : > { %6637 = vmatpush1.bf16.msra.mxu0 %v9303_v30  ;;  %v9387_v30 = vld [vmem:[%s14202_s1 + $0xac4] ss:$16 sps:$4 sm:$0xff]  }
  0x5e   : > { %6678 = vmatpush1.bf16.msra.mxu1 %v9306_v31  ;;  %6638 = vmatprep.subr.bf16.mxu0 %v9311_v32  ;;  %v11234_v31 = vrot.slane %v198_v29, %v10924_v49  ;;  %v1292_v32 = vcombine.high %v198_v29, %v198_v29  ;;  %v9459_v29 = vld [vmem:[%s14202_s1 + $0xb44] ss:$16 sps:$4 sm:$0xff]  }
  0x5f   : > { %6679 = vmatprep.subr.bf16.mxu1 %v9314_v33  ;;  %v9382_v33 = vld [vmem:[%s14202_s1 + $0x8c0] ss:$16 sps:$4 sm:$0xff]  }
  0x61   : > { %6639 = vmatpush1.bf16.msra.mxu0 %v9309_v34  ;;  %v11243_v34 = vcombine.high %v11234_v31, %v11234_v31 }
  0x62   : > { %6680 = vmatpush1.bf16.msra.mxu1 %v9312_v35  ;;  %6640 = vmatprep.subr.bf16.mxu0 %v9317_v36  ;;  %v11246_v35 = vrot.slane %v1292_v32, %v10924_v49  ;;  %v9385_v36 = vld [vmem:[%s14202_s1 + $0xac0] ss:$16 sps:$4 sm:$0xff]  }
  0x63   : > { %6681 = vmatprep.subr.bf16.mxu1 %v9320_v37  ;;  %v9390_v37 = vld [vmem:[%s14202_s1 + $0x8a4] ss:$16 sps:$4 sm:$0xff]   ;;  %v9457_v32 = vld [vmem:[%s14202_s1 + $0xb40] ss:$16 sps:$4 sm:$0xff]  }
  0x64   : > { %v11259_v40 = vcombine.high %v11246_v35, %v11246_v35 }
  0x65   : > { %6641 = vmatpush1.bf16.msra.mxu0 %v9315_v41  ;;  %v9388_v41 = vld [vmem:[%s14202_s1 + $0x8a0] ss:$16 sps:$4 sm:$0xff]  }
  0x66   : > { %6682 = vmatpush1.bf16.msra.mxu1 %v9318_v43  ;;  %6642 = vmatprep.subr.bf16.mxu0 %v9323_v46  ;;  %v9391_v43 = vld [vmem:[%s14202_s1 + $0xaa0] ss:$16 sps:$4 sm:$0xff]   ;;  %v9396_v46 = vld [vmem:[%s14202_s1 + $0x884] ss:$16 sps:$4 sm:$0xff]  }
  0x67   : > { %6683 = vmatprep.subr.bf16.mxu1 %v9326_v47  ;;  %v9399_v47 = vld [vmem:[%s14202_s1 + $0xa84] ss:$16 sps:$4 sm:$0xff]  }
  0x69   : > { %6643 = vmatpush1.bf16.msra.mxu0 %v9321_v50  ;;  %v9394_v50 = vld [vmem:[%s14202_s1 + $0x880] ss:$16 sps:$4 sm:$0xff]  }
  0x6a   : > { %6684 = vmatpush1.bf16.msra.mxu1 %v9324_v51  ;;  %6644 = vmatprep.subr.bf16.mxu0 %v9329_v52  ;;  %v9397_v51 = vld [vmem:[%s14202_s1 + $0xa80] ss:$16 sps:$4 sm:$0xff]   ;;  %v9402_v52 = vld [vmem:[%s14202_s1 + $0x864] ss:$16 sps:$4 sm:$0xff]  }
  0x6b   : > { %6685 = vmatprep.subr.bf16.mxu1 %v9332_v53  ;;  %v9405_v53 = vld [vmem:[%s14202_s1 + $0xa64] ss:$16 sps:$4 sm:$0xff]  }
  0x6d   : > { %6645 = vmatpush2.bf16.msra.mxu0 %v9327_v55  ;;  %v9400_v55 = vld [vmem:[%s14202_s1 + $0x860] ss:$16 sps:$4 sm:$0xff]  }
  0x6e   : > { %6686 = vmatpush2.bf16.msra.mxu1 %v9330_v56  ;;  %6646 = vmatprep.subr.bf16.mxu0 %v9335_v57  ;;  %v9403_v56 = vld [vmem:[%s14202_s1 + $0xa60] ss:$16 sps:$4 sm:$0xff]   ;;  %v9408_v57 = vld [vmem:[%s14202_s1 + $0x844] ss:$16 sps:$4 sm:$0xff]  }
  0x6f   : > { %6687 = vmatprep.subr.bf16.mxu1 %v9338_v58  ;;  %v9411_v58 = vld [vmem:[%s14202_s1 + $0xa44] ss:$16 sps:$4 sm:$0xff]  }
  0x71   : > { %6647 = vmatpush2.bf16.msra.mxu0 %v9333_v61  ;;  %v9406_v61 = vld [vmem:[%s14202_s1 + $0x840] ss:$16 sps:$4 sm:$0xff]  }
  0x72   : > { %6688 = vmatpush2.bf16.msra.mxu1 %v9336_v63  ;;  %6648 = vmatprep.subr.bf16.mxu0 %v9341_v0  ;;  %v9409_v63 = vld [vmem:[%s14202_s1 + $0xa40] ss:$16 sps:$4 sm:$0xff]   ;;  %v9414_v0 = vld [vmem:[%s14202_s1 + $0x824] ss:$16 sps:$4 sm:$0xff]  }
  0x73   : > { %6689 = vmatprep.subr.bf16.mxu1 %v9344_v1  ;;  %v9417_v1 = vld [vmem:[%s14202_s1 + $0xa24] ss:$16 sps:$4 sm:$0xff]  }
  0x75   : > { %6649 = vmatpush2.bf16.msra.mxu0 %v9339_v2  ;;  %v9412_v2 = vld [vmem:[%s14202_s1 + $0x820] ss:$16 sps:$4 sm:$0xff]  }
  0x76   : > { %6690 = vmatpush2.bf16.msra.mxu1 %v9342_v3  ;;  %6650 = vmatprep.subr.bf16.mxu0 %v9347_v4  ;;  %v9415_v3 = vld [vmem:[%s14202_s1 + $0xa20] ss:$16 sps:$4 sm:$0xff]   ;;  %v9420_v4 = vld [vmem:[%s14202_s1 + $0x804] ss:$16 sps:$4 sm:$0xff]  }
  0x77   : > { %6691 = vmatprep.subr.bf16.mxu1 %v9350_v5  ;;  %v9423_v5 = vld [vmem:[%s14202_s1 + $0xa04] ss:$16 sps:$4 sm:$0xff]  }
  0x79   : > { %6651 = vmatpush2.bf16.msra.mxu0 %v9345_v6  ;;  %v9418_v6 = vld [vmem:[%s14202_s1 + $0x800] ss:$16 sps:$4 sm:$0xff]  }
  0x7a   : > { %6692 = vmatpush2.bf16.msra.mxu1 %v9348_v7  ;;  %6652 = vmatprep.subr.bf16.mxu0 %v9353_v8  ;;  %v9421_v7 = vld [vmem:[%s14202_s1 + $0xa00] ss:$16 sps:$4 sm:$0xff]   ;;  %v9426_v8 = vld [vmem:[%s14202_s1 + $0x9e4] ss:$16 sps:$4 sm:$0xff]  }
  0x7b   : > { %6693 = vmatprep.subr.bf16.mxu1 %v9356_v9  ;;  %v9429_v9 = vld [vmem:[%s14202_s1 + $0xbe4] ss:$16 sps:$4 sm:$0xff]  }
  0x7d   : > { %6653 = vmatpush2.bf16.msra.mxu0 %v9351_v10  ;;  %v9424_v10 = vld [vmem:[%s14202_s1 + $0x9e0] ss:$16 sps:$4 sm:$0xff]  }
  0x7e   : > { %6694 = vmatpush2.bf16.msra.mxu1 %v9354_v11  ;;  %6654 = vmatprep.subr.bf16.mxu0 %v9359_v12  ;;  %v9427_v11 = vld [vmem:[%s14202_s1 + $0xbe0] ss:$16 sps:$4 sm:$0xff]   ;;  %v9432_v12 = vld [vmem:[%s14202_s1 + $0x9c4] ss:$16 sps:$4 sm:$0xff]  }
  0x7f   : > { %6695 = vmatprep.subr.bf16.mxu1 %v9362_v13  ;;  %v9435_v13 = vld [vmem:[%s14202_s1 + $0xbc4] ss:$16 sps:$4 sm:$0xff]  }
  0x81   : > { %6655 = vmatpush2.bf16.msra.mxu0 %v9357_v14  ;;  %v9430_v14 = vld [vmem:[%s14202_s1 + $0x9c0] ss:$16 sps:$4 sm:$0xff]  }
  0x82   : > { %6696 = vmatpush2.bf16.msra.mxu1 %v9360_v15  ;;  %6656 = vmatprep.subr.bf16.mxu0 %v9365_v16  ;;  %v9433_v15 = vld [vmem:[%s14202_s1 + $0xbc0] ss:$16 sps:$4 sm:$0xff]   ;;  %v9438_v16 = vld [vmem:[%s14202_s1 + $0x9a4] ss:$16 sps:$4 sm:$0xff]  }
  0x83   : > { %6697 = vmatprep.subr.bf16.mxu1 %v9368_v17  ;;  %v9441_v17 = vld [vmem:[%s14202_s1 + $0xba4] ss:$16 sps:$4 sm:$0xff]  }
  0x85   : > { %6657 = vmatpush2.bf16.msra.mxu0 %v9363_v18  ;;  %v9436_v18 = vld [vmem:[%s14202_s1 + $0x9a0] ss:$16 sps:$4 sm:$0xff]  }
  0x86   : > { %6698 = vmatpush2.bf16.msra.mxu1 %v9366_v19  ;;  %6658 = vmatprep.subr.bf16.mxu0 %v9371_v20  ;;  %v9439_v19 = vld [vmem:[%s14202_s1 + $0xba0] ss:$16 sps:$4 sm:$0xff]   ;;  %v9444_v20 = vld [vmem:[%s14202_s1 + $0x984] ss:$16 sps:$4 sm:$0xff]  }
  0x87   : > { %6699 = vmatprep.subr.bf16.mxu1 %v9374_v21  ;;  %v9447_v21 = vld [vmem:[%s14202_s1 + $0xb84] ss:$16 sps:$4 sm:$0xff]  }
  0x89   : > { %6659 = vmatpush2.bf16.msra.mxu0 %v9369_v22  ;;  %v9442_v22 = vld [vmem:[%s14202_s1 + $0x980] ss:$16 sps:$4 sm:$0xff]  }
  0x8a   : > { %6700 = vmatpush2.bf16.msra.mxu1 %v9372_v23  ;;  %6710 = vmatprep.subr.bf16.mxu0 %v9378_v24  ;;  %v9445_v23 = vld [vmem:[%s14202_s1 + $0xb80] ss:$16 sps:$4 sm:$0xff]   ;;  %v9450_v24 = vld [vmem:[%s14202_s1 + $0x964] ss:$16 sps:$4 sm:$0xff]  }
  0x8b   : > { %6751 = vmatprep.subr.bf16.mxu1 %v9381_v25  ;;  %v9453_v25 = vld [vmem:[%s14202_s1 + $0xb64] ss:$16 sps:$4 sm:$0xff]  }
  0x8c   : > { %6661 = vmatmul.mubr.bf16.vlgmr.msra.gmra.mxu0 %v11085_v39 }
  0x8d   : > { %6702 = vmatmul.mubr.bf16.vlgmr.msra.gmra.mxu1 %v11098_v45  ;;  %6711 = vmatpush1.bf16.msra.mxu0 %v9376_v26  ;;  %v9448_v26 = vld [vmem:[%s14202_s1 + $0x960] ss:$16 sps:$4 sm:$0xff]  }
  0x8e   : > { %6752 = vmatpush1.bf16.msra.mxu1 %v9379_v27  ;;  %6712 = vmatprep.subr.bf16.mxu0 %v9384_v28  ;;  %v9451_v27 = vld [vmem:[%s14202_s1 + $0xb60] ss:$16 sps:$4 sm:$0xff]   ;;  %v9456_v28 = vld [vmem:[%s14202_s1 + $0x944] ss:$16 sps:$4 sm:$0xff]  }
  0x8f   : > { %6753 = vmatprep.subr.bf16.mxu1 %v9387_v30  ;;  %6742 = vmatprep.mubr.bf16.mxu0 %v11243_v34  ;;  %v9454_v30 = vld [vmem:[%s14202_s1 + $0x940] ss:$16 sps:$4 sm:$0xff]  }
  0x90   : > { %6783 = vmatprep.mubr.bf16.mxu1 %v11259_v40 }
  0x91   : > { %6713 = vmatpush1.bf16.msra.mxu0 %v9382_v33  ;;  %v9462_v33 = vld [vmem:[%s14202_s1 + $0x924] ss:$16 sps:$4 sm:$0xff]  }
  0x92   : > { %6754 = vmatpush1.bf16.msra.mxu1 %v9385_v36  ;;  %6714 = vmatprep.subr.bf16.mxu0 %v9390_v37  ;;  %v9465_v36 = vld [vmem:[%s14202_s1 + $0xb24] ss:$16 sps:$4 sm:$0xff]   ;;  %v9460_v37 = vld [vmem:[%s14202_s1 + $0x920] ss:$16 sps:$4 sm:$0xff]  }
  0x93   : > { %6755 = vmatprep.subr.bf16.mxu1 %v9393_v38  ;;  %v199_v38 = vld [vmem:[%s10921_s10 + $0x18] sm:$0xff] }
  0x95   : > { %6715 = vmatpush1.bf16.msra.mxu0 %v9388_v41  ;;  %v9463_v41 = vld [vmem:[%s14202_s1 + $0xb20] ss:$16 sps:$4 sm:$0xff]  }
  0x96   : > { %6756 = vmatpush1.bf16.msra.mxu1 %v9391_v43  ;;  %6716 = vmatprep.subr.bf16.mxu0 %v9396_v46  ;;  %v9468_v43 = vld [vmem:[%s14202_s1 + $0x904] ss:$16 sps:$4 sm:$0xff]  }
  0x97   : > { %6757 = vmatprep.subr.bf16.mxu1 %v9399_v47  ;;  %v9471_v46 = vld [vmem:[%s14202_s1 + $0xb04] ss:$16 sps:$4 sm:$0xff]   ;;  %v1309_v47 = vcombine.high %v199_v38, %v199_v38 }
  0x99   : > { %6717 = vmatpush1.bf16.msra.mxu0 %v9394_v50  ;;  %v9466_v50 = vld [vmem:[%s14202_s1 + $0x900] ss:$16 sps:$4 sm:$0xff]  }
  0x9a   : > { %6758 = vmatpush1.bf16.msra.mxu1 %v9397_v51  ;;  %6718 = vmatprep.subr.bf16.mxu0 %v9402_v52  ;;  %v9469_v51 = vld [vmem:[%s14202_s1 + $0xb00] ss:$16 sps:$4 sm:$0xff]   ;;  %v9475_v52 = vld [vmem:[%s14202_s1 + $0xce4] ss:$16 sps:$4 sm:$0xff]  }
  0x9b   : > { %6759 = vmatprep.subr.bf16.mxu1 %v9405_v53  ;;  %v9478_v53 = vld [vmem:[%s14202_s1 + $0xee4] ss:$16 sps:$4 sm:$0xff]  }
  0x9d   : > { %6719 = vmatpush1.bf16.msra.mxu0 %v9400_v55  ;;  %v11433_v55 = vrot.slane %v199_v38, %v10924_v49  ;;  %v9530_v38 = vld [vmem:[%s14202_s1 + $0xfc0] ss:$16 sps:$4 sm:$0xff]  }
  0x9e   : > { %6760 = vmatpush1.bf16.msra.mxu1 %v9403_v56  ;;  %6720 = vmatprep.subr.bf16.mxu0 %v9408_v57  ;;  %v11436_v56 = vrot.slane %v1309_v47, %v10924_v49  ;;  %v9473_v57 = vld [vmem:[%s14202_s1 + $0xce0] ss:$16 sps:$4 sm:$0xff]  }
  0x9f   : > { %6761 = vmatprep.subr.bf16.mxu1 %v9411_v58  ;;  %v9476_v58 = vld [vmem:[%s14202_s1 + $0xee0] ss:$16 sps:$4 sm:$0xff]  }
  0xa0   : > { %v9536_v47 = vld [vmem:[%s14202_s1 + $0xfa0] ss:$16 sps:$4 sm:$0xff]  }
  0xa1   : > { %6721 = vmatpush1.bf16.msra.mxu0 %v9406_v61  ;;  %v9481_v61 = vld [vmem:[%s14202_s1 + $0xcc4] ss:$16 sps:$4 sm:$0xff]  }
  0xa2   : > { %6762 = vmatpush1.bf16.msra.mxu1 %v9409_v63  ;;  %6722 = vmatprep.subr.bf16.mxu0 %v9414_v0  ;;  %v9484_v63 = vld [vmem:[%s14202_s1 + $0xec4] ss:$16 sps:$4 sm:$0xff]   ;;  %v11452_v0 = vcombine.high %v11433_v55, %v11433_v55 }
  0xa3   : > { %6763 = vmatprep.subr.bf16.mxu1 %v9417_v1  ;;  %v11456_v1 = vcombine.high %v11436_v56, %v11436_v56 }
  0xa5   : > { %6723 = vmatpush1.bf16.msra.mxu0 %v9412_v2  ;;  %v9479_v2 = vld [vmem:[%s14202_s1 + $0xcc0] ss:$16 sps:$4 sm:$0xff]  }
  0xa6   : > { %6764 = vmatpush1.bf16.msra.mxu1 %v9415_v3  ;;  %6724 = vmatprep.subr.bf16.mxu0 %v9420_v4  ;;  %v9482_v3 = vld [vmem:[%s14202_s1 + $0xec0] ss:$16 sps:$4 sm:$0xff]   ;;  %v9487_v4 = vld [vmem:[%s14202_s1 + $0xca4] ss:$16 sps:$4 sm:$0xff]  }
  0xa7   : > { %6765 = vmatprep.subr.bf16.mxu1 %v9423_v5  ;;  %v9490_v5 = vld [vmem:[%s14202_s1 + $0xea4] ss:$16 sps:$4 sm:$0xff]  }
  0xa9   : > { %6725 = vmatpush1.bf16.msra.mxu0 %v9418_v6  ;;  %v9485_v6 = vld [vmem:[%s14202_s1 + $0xca0] ss:$16 sps:$4 sm:$0xff]  }
  0xaa   : > { %6766 = vmatpush1.bf16.msra.mxu1 %v9421_v7  ;;  %6726 = vmatprep.subr.bf16.mxu0 %v9426_v8  ;;  %v9488_v7 = vld [vmem:[%s14202_s1 + $0xea0] ss:$16 sps:$4 sm:$0xff]   ;;  %v9493_v8 = vld [vmem:[%s14202_s1 + $0xc84] ss:$16 sps:$4 sm:$0xff]  }
  0xab   : > { %6767 = vmatprep.subr.bf16.mxu1 %v9429_v9  ;;  %v9496_v9 = vld [vmem:[%s14202_s1 + $0xe84] ss:$16 sps:$4 sm:$0xff]  }
  0xad   : > { %6727 = vmatpush2.bf16.msra.mxu0 %v9424_v10  ;;  %v9491_v10 = vld [vmem:[%s14202_s1 + $0xc80] ss:$16 sps:$4 sm:$0xff]  }
  0xae   : > { %6768 = vmatpush2.bf16.msra.mxu1 %v9427_v11  ;;  %6728 = vmatprep.subr.bf16.mxu0 %v9432_v12  ;;  %v9494_v11 = vld [vmem:[%s14202_s1 + $0xe80] ss:$16 sps:$4 sm:$0xff]   ;;  %v9499_v12 = vld [vmem:[%s14202_s1 + $0xc64] ss:$16 sps:$4 sm:$0xff]  }
  0xaf   : > { %6769 = vmatprep.subr.bf16.mxu1 %v9435_v13  ;;  %v9502_v13 = vld [vmem:[%s14202_s1 + $0xe64] ss:$16 sps:$4 sm:$0xff]  }
  0xb1   : > { %6729 = vmatpush2.bf16.msra.mxu0 %v9430_v14  ;;  %v9497_v14 = vld [vmem:[%s14202_s1 + $0xc60] ss:$16 sps:$4 sm:$0xff]  }
  0xb2   : > { %6770 = vmatpush2.bf16.msra.mxu1 %v9433_v15  ;;  %6730 = vmatprep.subr.bf16.mxu0 %v9438_v16  ;;  %v9500_v15 = vld [vmem:[%s14202_s1 + $0xe60] ss:$16 sps:$4 sm:$0xff]   ;;  %v9505_v16 = vld [vmem:[%s14202_s1 + $0xc44] ss:$16 sps:$4 sm:$0xff]  }
  0xb3   : > { %6771 = vmatprep.subr.bf16.mxu1 %v9441_v17  ;;  %v9508_v17 = vld [vmem:[%s14202_s1 + $0xe44] ss:$16 sps:$4 sm:$0xff]  }
  0xb5   : > { %6731 = vmatpush2.bf16.msra.mxu0 %v9436_v18  ;;  %v9503_v18 = vld [vmem:[%s14202_s1 + $0xc40] ss:$16 sps:$4 sm:$0xff]  }
  0xb6   : > { %6772 = vmatpush2.bf16.msra.mxu1 %v9439_v19  ;;  %6732 = vmatprep.subr.bf16.mxu0 %v9444_v20  ;;  %v9506_v19 = vld [vmem:[%s14202_s1 + $0xe40] ss:$16 sps:$4 sm:$0xff]   ;;  %v9511_v20 = vld [vmem:[%s14202_s1 + $0xc24] ss:$16 sps:$4 sm:$0xff]  }
  0xb7   : > { %6773 = vmatprep.subr.bf16.mxu1 %v9447_v21  ;;  %v9514_v21 = vld [vmem:[%s14202_s1 + $0xe24] ss:$16 sps:$4 sm:$0xff]  }
  0xb9   : > { %6733 = vmatpush2.bf16.msra.mxu0 %v9442_v22  ;;  %v9509_v22 = vld [vmem:[%s14202_s1 + $0xc20] ss:$16 sps:$4 sm:$0xff]  }
  0xba   : > { %6774 = vmatpush2.bf16.msra.mxu1 %v9445_v23  ;;  %6734 = vmatprep.subr.bf16.mxu0 %v9450_v24  ;;  %v9512_v23 = vld [vmem:[%s14202_s1 + $0xe20] ss:$16 sps:$4 sm:$0xff]   ;;  %v9517_v24 = vld [vmem:[%s14202_s1 + $0xc04] ss:$16 sps:$4 sm:$0xff]  }
  0xbb   : > { %6775 = vmatprep.subr.bf16.mxu1 %v9453_v25  ;;  %v9520_v25 = vld [vmem:[%s14202_s1 + $0xe04] ss:$16 sps:$4 sm:$0xff]  }
  0xbd   : > { %6735 = vmatpush2.bf16.msra.mxu0 %v9448_v26  ;;  %v9515_v26 = vld [vmem:[%s14202_s1 + $0xc00] ss:$16 sps:$4 sm:$0xff]  }
  0xbe   : > { %6776 = vmatpush2.bf16.msra.mxu1 %v9451_v27  ;;  %6736 = vmatprep.subr.bf16.mxu0 %v9456_v28  ;;  %v9518_v27 = vld [vmem:[%s14202_s1 + $0xe00] ss:$16 sps:$4 sm:$0xff]   ;;  %v9523_v28 = vld [vmem:[%s14202_s1 + $0xde4] ss:$16 sps:$4 sm:$0xff]  }
  0xbf   : > { %6777 = vmatprep.subr.bf16.mxu1 %v9459_v29  ;;  %v9526_v29 = vld [vmem:[%s14202_s1 + $0xfe4] ss:$16 sps:$4 sm:$0xff]  }
  0xc1   : > { %6737 = vmatpush2.bf16.msra.mxu0 %v9454_v30  ;;  %v9521_v30 = vld [vmem:[%s14202_s1 + $0xde0] ss:$16 sps:$4 sm:$0xff]  }
  0xc2   : > { %6778 = vmatpush2.bf16.msra.mxu1 %v9457_v32  ;;  %6738 = vmatprep.subr.bf16.mxu0 %v9462_v33  ;;  %v9524_v32 = vld [vmem:[%s14202_s1 + $0xfe0] ss:$16 sps:$4 sm:$0xff]   ;;  %v9529_v33 = vld [vmem:[%s14202_s1 + $0xdc4] ss:$16 sps:$4 sm:$0xff]  }
  0xc3   : > { %6779 = vmatprep.subr.bf16.mxu1 %v9465_v36  ;;  %v9532_v36 = vld [vmem:[%s14202_s1 + $0xfc4] ss:$16 sps:$4 sm:$0xff]  }
  0xc5   : > { %6739 = vmatpush2.bf16.msra.mxu0 %v9460_v37  ;;  %v9527_v37 = vld [vmem:[%s14202_s1 + $0xdc0] ss:$16 sps:$4 sm:$0xff]  }
  0xc6   : > { %6780 = vmatpush2.bf16.msra.mxu1 %v9463_v41  ;;  %6740 = vmatprep.subr.bf16.mxu0 %v9468_v43  ;;  %v9535_v41 = vld [vmem:[%s14202_s1 + $0xda4] ss:$16 sps:$4 sm:$0xff]  }
  0xc7   : > { %6781 = vmatprep.subr.bf16.mxu1 %v9471_v46  ;;  %v9538_v43 = vld [vmem:[%s14202_s1 + $0xfa4] ss:$16 sps:$4 sm:$0xff]   ;;  %v9533_v46 = vld [vmem:[%s14202_s1 + $0xda0] ss:$16 sps:$4 sm:$0xff]  }
  0xc9   : > { %6741 = vmatpush2.bf16.msra.mxu0 %v9466_v50  ;;  %v9541_v50 = vld [vmem:[%s14202_s1 + $0xd84] ss:$16 sps:$4 sm:$0xff]  }
  0xca   : > { %6782 = vmatpush2.bf16.msra.mxu1 %v9469_v51  ;;  %6792 = vmatprep.subr.bf16.mxu0 %v9475_v52  ;;  %v9544_v51 = vld [vmem:[%s14202_s1 + $0xf84] ss:$16 sps:$4 sm:$0xff]   ;;  %v9539_v52 = vld [vmem:[%s14202_s1 + $0xd80] ss:$16 sps:$4 sm:$0xff]  }
  0xcb   : > { %6833 = vmatprep.subr.bf16.mxu1 %v9478_v53  ;;  %v9542_v53 = vld [vmem:[%s14202_s1 + $0xf80] ss:$16 sps:$4 sm:$0xff]  }
  0xcc   : > { %6743 = vmatmul.mubr.bf16.vlgmr.msra.gmra.mxu0 %v11234_v31 }
  0xcd   : > { %6784 = vmatmul.mubr.bf16.vlgmr.msra.gmra.mxu1 %v11246_v35  ;;  %6793 = vmatpush1.bf16.msra.mxu0 %v9473_v57  ;;  %v9547_v57 = vld [vmem:[%s14202_s1 + $0xd64] ss:$16 sps:$4 sm:$0xff]  }
  0xce   : > { %6834 = vmatpush1.bf16.msra.mxu1 %v9476_v58  ;;  %6794 = vmatprep.subr.bf16.mxu0 %v9481_v61  ;;  %v9550_v58 = vld [vmem:[%s14202_s1 + $0xf64] ss:$16 sps:$4 sm:$0xff]   ;;  %v9545_v61 = vld [vmem:[%s14202_s1 + $0xd60] ss:$16 sps:$4 sm:$0xff]  }
  0xcf   : > { %6835 = vmatprep.subr.bf16.mxu1 %v9484_v63  ;;  %6824 = vmatprep.mubr.bf16.mxu0 %v11452_v0  ;;  %v9548_v63 = vld [vmem:[%s14202_s1 + $0xf60] ss:$16 sps:$4 sm:$0xff]  }
  0xd0   : > { %6865 = vmatprep.mubr.bf16.mxu1 %v11456_v1 }
  0xd1   : > { %6795 = vmatpush1.bf16.msra.mxu0 %v9479_v2  ;;  %v9553_v2 = vld [vmem:[%s14202_s1 + $0xd44] ss:$16 sps:$4 sm:$0xff]  }
  0xd2   : > { %6836 = vmatpush1.bf16.msra.mxu1 %v9482_v3  ;;  %6796 = vmatprep.subr.bf16.mxu0 %v9487_v4  ;;  %v9556_v3 = vld [vmem:[%s14202_s1 + $0xf44] ss:$16 sps:$4 sm:$0xff]   ;;  %v9551_v4 = vld [vmem:[%s14202_s1 + $0xd40] ss:$16 sps:$4 sm:$0xff]  }
  0xd3   : > { %6837 = vmatprep.subr.bf16.mxu1 %v9490_v5  ;;  %v9554_v5 = vld [vmem:[%s14202_s1 + $0xf40] ss:$16 sps:$4 sm:$0xff]  }
  0xd5   : > { %6797 = vmatpush1.bf16.msra.mxu0 %v9485_v6  ;;  %v9559_v6 = vld [vmem:[%s14202_s1 + $0xd24] ss:$16 sps:$4 sm:$0xff]  }
  0xd6   : > { %6838 = vmatpush1.bf16.msra.mxu1 %v9488_v7  ;;  %6798 = vmatprep.subr.bf16.mxu0 %v9493_v8  ;;  %v9562_v7 = vld [vmem:[%s14202_s1 + $0xf24] ss:$16 sps:$4 sm:$0xff]  }
  0xd7   : > { %6839 = vmatprep.subr.bf16.mxu1 %v9496_v9  ;;  %v200_v8 = vld [vmem:[%s10921_s10 + $0x20] sm:$0xff] }
  0xd8   : > { %v9557_v9 = vld [vmem:[%s14202_s1 + $0xd20] ss:$16 sps:$4 sm:$0xff]  }
  0xd9   : > { %6799 = vmatpush1.bf16.msra.mxu0 %v9491_v10  ;;  %v9560_v10 = vld [vmem:[%s14202_s1 + $0xf20] ss:$16 sps:$4 sm:$0xff]  }
  0xda   : > { %6840 = vmatpush1.bf16.msra.mxu1 %v9494_v11  ;;  %6800 = vmatprep.subr.bf16.mxu0 %v9499_v12  ;;  %v9565_v11 = vld [vmem:[%s14202_s1 + $0xd04] ss:$16 sps:$4 sm:$0xff]  }
  0xdb   : > { %6841 = vmatprep.subr.bf16.mxu1 %v9502_v13  ;;  %v9568_v12 = vld [vmem:[%s14202_s1 + $0xf04] ss:$16 sps:$4 sm:$0xff]   ;;  %v1326_v13 = vcombine.high %v200_v8, %v200_v8 }
  0xdd   : > { %6801 = vmatpush1.bf16.msra.mxu0 %v9497_v14  ;;  %v9563_v14 = vld [vmem:[%s14202_s1 + $0xd00] ss:$16 sps:$4 sm:$0xff]  }
  0xde   : > { %6842 = vmatpush1.bf16.msra.mxu1 %v9500_v15  ;;  %6802 = vmatprep.subr.bf16.mxu0 %v9505_v16  ;;  %v9566_v15 = vld [vmem:[%s14202_s1 + $0xf00] ss:$16 sps:$4 sm:$0xff]  }
  0xdf   : > { %6843 = vmatprep.subr.bf16.mxu1 %v9508_v17  ;;  %v1228_v16 = vld [vmem:[%s14203_s2] sm:$0xf]  ;;  %v1232_v17 = vsub.s32 0, %v10900_v42 }
  0xe1   : > { %6803 = vmatpush1.bf16.msra.mxu0 %v9503_v18  ;;  %v9572_v18 = vld [vmem:[%s14202_s1 + $0x10e4] ss:$16 sps:$4 sm:$0xff]  }
  0xe2   : > { %6844 = vmatpush1.bf16.msra.mxu1 %v9506_v19  ;;  %6804 = vmatprep.subr.bf16.mxu0 %v9511_v20  ;;  %v9575_v19 = vld [vmem:[%s14202_s1 + $0x12e4] ss:$16 sps:$4 sm:$0xff]   ;;  %v1236_v20 = vsub.s32 1, %v10900_v42 }
  0xe3   : > { %6845 = vmatprep.subr.bf16.mxu1 %v9514_v21  ;;  %v11649_v21 = vrot.slane %v200_v8, %v10924_v49  ;;  %v9599_v8 = vld [vmem:[%s14202_s1 + $0x1264] ss:$16 sps:$4 sm:$0xff]  }
  0xe5   : > { %6805 = vmatpush1.bf16.msra.mxu0 %v9509_v22  ;;  %v11652_v22 = vrot.slane %v1326_v13, %v10924_v49  ;;  %v9600_v13 = vld [vmem:[%s14202_s1 + $0x1040] ss:$16 sps:$4 sm:$0xff]  }
  0xe6   : > { %6846 = vmatpush1.bf16.msra.mxu1 %v9512_v23  ;;  %6806 = vmatprep.subr.bf16.mxu0 %v9517_v24  ;;  %v1233_v23 = vrot.slane %v1228_v16, %v1232_v17  ;;  %v9570_v24 = vld [vmem:[%s14202_s1 + $0x10e0] ss:$16 sps:$4 sm:$0xff]  }
  0xe7   : > { %6847 = vmatprep.subr.bf16.mxu1 %v9520_v25  ;;  %v9573_v25 = vld [vmem:[%s14202_s1 + $0x12e0] ss:$16 sps:$4 sm:$0xff]  }
  0xe8   : > { %v9606_v17 = vld [vmem:[%s14202_s1 + $0x1020] ss:$16 sps:$4 sm:$0xff]  }
  0xe9   : > { %6807 = vmatpush1.bf16.msra.mxu0 %v9515_v26  ;;  %v9578_v26 = vld [vmem:[%s14202_s1 + $0x10c4] ss:$16 sps:$4 sm:$0xff]  }
  0xea   : > { %6848 = vmatpush1.bf16.msra.mxu1 %v9518_v27  ;;  %6808 = vmatprep.subr.bf16.mxu0 %v9523_v28  ;;  %v9581_v27 = vld [vmem:[%s14202_s1 + $0x12c4] ss:$16 sps:$4 sm:$0xff]   ;;  %v1237_v28 = vrot.slane %v1228_v16, %v1236_v20 }
  0xeb   : > { %6849 = vmatprep.subr.bf16.mxu1 %v9526_v29  ;;  %v11668_v29 = vcombine.high %v11649_v21, %v11649_v21  ;;  %v9611_v16 = vld [vmem:[%s14202_s1 + $0x1224] ss:$16 sps:$4 sm:$0xff]  }
  0xec   : > { %v9617_v20 = vld [vmem:[%s14202_s1 + $0x1204] ss:$16 sps:$4 sm:$0xff]  }
  0xed   : > { %6809 = vmatpush2.bf16.msra.mxu0 %v9521_v30  ;;  %v11672_v30 = vcombine.high %v11652_v22, %v11652_v22 }
  0xee   : > { %6850 = vmatpush2.bf16.msra.mxu1 %v9524_v32  ;;  %6810 = vmatprep.subr.bf16.mxu0 %v9529_v33 }
  0xef   : > { %6851 = vmatprep.subr.bf16.mxu1 %v9532_v36  ;;  %v9576_v36 = vld [vmem:[%s14202_s1 + $0x10c0] ss:$16 sps:$4 sm:$0xff]  }
  0xf1   : > { %6811 = vmatpush2.bf16.msra.mxu0 %v9527_v37 }
  0xf2   : > { %6852 = vmatpush2.bf16.msra.mxu1 %v9530_v38  ;;  %6812 = vmatprep.subr.bf16.mxu0 %v9535_v41  ;;  %v9579_v38 = vld [vmem:[%s14202_s1 + $0x12c0] ss:$16 sps:$4 sm:$0xff]   ;;  %v9584_v41 = vld [vmem:[%s14202_s1 + $0x10a4] ss:$16 sps:$4 sm:$0xff]  }
  0xf3   : > { %6853 = vmatprep.subr.bf16.mxu1 %v9538_v43 }
  0xf5   : > { %6813 = vmatpush2.bf16.msra.mxu0 %v9533_v46 }
  0xf6   : > { %6854 = vmatpush2.bf16.msra.mxu1 %v9536_v47  ;;  %6814 = vmatprep.subr.bf16.mxu0 %v9541_v50  ;;  %v9587_v47 = vld [vmem:[%s14202_s1 + $0x12a4] ss:$16 sps:$4 sm:$0xff]  }
  0xf7   : > { %6855 = vmatprep.subr.bf16.mxu1 %v9544_v51 }
  0xf9   : > { %6815 = vmatpush2.bf16.msra.mxu0 %v9539_v52 }
  0xfa   : > { %6856 = vmatpush2.bf16.msra.mxu1 %v9542_v53  ;;  %6816 = vmatprep.subr.bf16.mxu0 %v9547_v57  ;;  %v9582_v57 = vld [vmem:[%s14202_s1 + $0x10a0] ss:$16 sps:$4 sm:$0xff]  }
  0xfb   : > { %6857 = vmatprep.subr.bf16.mxu1 %v9550_v58  ;;  %v9585_v58 = vld [vmem:[%s14202_s1 + $0x12a0] ss:$16 sps:$4 sm:$0xff]  }
  0xfd   : > { %6817 = vmatpush2.bf16.msra.mxu0 %v9545_v61 }
  0xfe   : > { %6858 = vmatpush2.bf16.msra.mxu1 %v9548_v63  ;;  %6818 = vmatprep.subr.bf16.mxu0 %v9553_v2 }
  0xff   : > { %6859 = vmatprep.subr.bf16.mxu1 %v9556_v3  ;;  %v9590_v3 = vld [vmem:[%s14202_s1 + $0x1084] ss:$16 sps:$4 sm:$0xff]  }
 0x101   : > { %6819 = vmatpush2.bf16.msra.mxu0 %v9551_v4  ;;  %v9593_v4 = vld [vmem:[%s14202_s1 + $0x1284] ss:$16 sps:$4 sm:$0xff]  }
 0x102   : > { %6860 = vmatpush2.bf16.msra.mxu1 %v9554_v5  ;;  %6820 = vmatprep.subr.bf16.mxu0 %v9559_v6  ;;  %v9588_v5 = vld [vmem:[%s14202_s1 + $0x1080] ss:$16 sps:$4 sm:$0xff]  }
 0x103   : > { %6861 = vmatprep.subr.bf16.mxu1 %v9562_v7  ;;  %v9591_v6 = vld [vmem:[%s14202_s1 + $0x1280] ss:$16 sps:$4 sm:$0xff]   ;;  %v9596_v7 = vld [vmem:[%s14202_s1 + $0x1064] ss:$16 sps:$4 sm:$0xff]  }
 0x105   : > { %6821 = vmatpush2.bf16.msra.mxu0 %v9557_v9  ;;  %v9594_v9 = vld [vmem:[%s14202_s1 + $0x1060] ss:$16 sps:$4 sm:$0xff]  }
 0x106   : > { %6862 = vmatpush2.bf16.msra.mxu1 %v9560_v10  ;;  %6822 = vmatprep.subr.bf16.mxu0 %v9565_v11  ;;  %v9597_v10 = vld [vmem:[%s14202_s1 + $0x1260] ss:$16 sps:$4 sm:$0xff]   ;;  %v9602_v11 = vld [vmem:[%s14202_s1 + $0x1044] ss:$16 sps:$4 sm:$0xff]  }
 0x107   : > { %6863 = vmatprep.subr.bf16.mxu1 %v9568_v12  ;;  %v9605_v12 = vld [vmem:[%s14202_s1 + $0x1244] ss:$16 sps:$4 sm:$0xff]  }
 0x109   : > { %6823 = vmatpush2.bf16.msra.mxu0 %v9563_v14  ;;  %v9603_v14 = vld [vmem:[%s14202_s1 + $0x1240] ss:$16 sps:$4 sm:$0xff]  }
 0x10a   : > { %6864 = vmatpush2.bf16.msra.mxu1 %v9566_v15  ;;  %6874 = vmatprep.subr.bf16.mxu0 %v9572_v18  ;;  %v9608_v15 = vld [vmem:[%s14202_s1 + $0x1024] ss:$16 sps:$4 sm:$0xff]   ;;  %v9609_v18 = vld [vmem:[%s14202_s1 + $0x1220] ss:$16 sps:$4 sm:$0xff]  }
 0x10b   : > { %6915 = vmatprep.subr.bf16.mxu1 %v9575_v19  ;;  %v9614_v19 = vld [vmem:[%s14202_s1 + $0x1004] ss:$16 sps:$4 sm:$0xff]  }
 0x10c   : > { %v6580_v32 = vpop.f32.mrf.mxu0  ;;  %6825 = vmatmul.mubr.bf16.vlgmr.msra.gmra.mxu0 %v11433_v55 }
 0x10d   : > { %v6621_v33 = vpop.f32.mrf.mxu1  ;;  %6866 = vmatmul.mubr.bf16.vlgmr.msra.gmra.mxu1 %v11436_v56  ;;  %v6581_v37 = vadd.f32 %v6580_v32, %v1233_v23  ;;  %6875 = vmatpush1.bf16.msra.mxu0 %v9570_v24  ;;  %v9612_v23 = vld [vmem:[%s14202_s1 + $0x1000] ss:$16 sps:$4 sm:$0xff]   ;;  %v9626_v32 = vld [vmem:[%s14202_s1 + $0x11c4] ss:$16 sps:$4 sm:$0xff]  }
 0x10e   : > { %6916 = vmatpush1.bf16.msra.mxu1 %v9573_v25  ;;  %v6582_v43 = vpop.f32.mrf.mxu0  ;;  %6876 = vmatprep.subr.bf16.mxu0 %v9578_v26  ;;  %v9615_v24 = vld [vmem:[%s14202_s1 + $0x1200] ss:$16 sps:$4 sm:$0xff]   ;;  %v9620_v25 = vld [vmem:[%s14202_s1 + $0x11e4] ss:$16 sps:$4 sm:$0xff]  }
 0x10f   : > { %v6623_v46 = vpop.f32.mrf.mxu1  ;;  %6917 = vmatprep.subr.bf16.mxu1 %v9581_v27  ;;  %v11688_v50 = vadd.f32 %v6621_v33, %v6581_v37  ;;  %v6583_v51 = vadd.f32 %v6582_v43, %v1237_v28  ;;  %6906 = vmatprep.mubr.bf16.mxu0 %v11668_v29  ;;  %v9623_v26 = vld [vmem:[%s14202_s1 + $0x13e4] ss:$16 sps:$4 sm:$0xff]   ;;  %v9618_v27 = vld [vmem:[%s14202_s1 + $0x11e0] ss:$16 sps:$4 sm:$0xff]  }
 0x110   : > { %6947 = vmatprep.mubr.bf16.mxu1 %v11672_v30  ;;  %v6584_v52 = vpop.f32.mrf.mxu0  ;;  %v9621_v28 = vld [vmem:[%s14202_s1 + $0x13e0] ss:$16 sps:$4 sm:$0xff]   ;;  %v9629_v33 = vld [vmem:[%s14202_s1 + $0x13c4] ss:$16 sps:$4 sm:$0xff]  }
 0x111   : > { %v6625_v53 = vpop.f32.mrf.mxu1  ;;  %v11698_v61 = vadd.f32 %v6623_v46, %v6583_v51  ;;  %6877 = vmatpush1.bf16.msra.mxu0 %v9576_v36  ;;  %v9624_v36 = vld [vmem:[%s14202_s1 + $0x11c0] ss:$16 sps:$4 sm:$0xff]   ;;  %v9641_v51 = vld [vmem:[%s14202_s1 + $0x1384] ss:$16 sps:$4 sm:$0xff]  }
 0x112   : > { %6918 = vmatpush1.bf16.msra.mxu1 %v9579_v38  ;;  %v6585_v63 = vpop.f32.mrf.mxu0  ;;  %6878 = vmatprep.subr.bf16.mxu0 %v9584_v41  ;;  %v9627_v37 = vld [vmem:[%s14202_s1 + $0x13c0] ss:$16 sps:$4 sm:$0xff]   ;;  %v9632_v38 = vld [vmem:[%s14202_s1 + $0x11a4] ss:$16 sps:$4 sm:$0xff]  }
 0x113   : > { %v6626_v2 = vpop.f32.mrf.mxu1  ;;  %6919 = vmatprep.subr.bf16.mxu1 %v9587_v47  ;;  %v9635_v41 = vld [vmem:[%s14202_s1 + $0x13a4] ss:$16 sps:$4 sm:$0xff]   ;;  %v9630_v43 = vld [vmem:[%s14202_s1 + $0x11a0] ss:$16 sps:$4 sm:$0xff]  }
 0x114   : > { %v9633_v46 = vld [vmem:[%s14202_s1 + $0x13a0] ss:$16 sps:$4 sm:$0xff]   ;;  %v9638_v47 = vld [vmem:[%s14202_s1 + $0x1184] ss:$16 sps:$4 sm:$0xff]  }
 0x115   : > { %6879 = vmatpush1.bf16.msra.mxu0 %v9582_v57  ;;  %v9636_v52 = vld [vmem:[%s14202_s1 + $0x1180] ss:$16 sps:$4 sm:$0xff]   ;;  %v9644_v57 = vld [vmem:[%s14202_s1 + $0x1164] ss:$16 sps:$4 sm:$0xff]  }
 0x116   : > { %6920 = vmatpush1.bf16.msra.mxu1 %v9585_v58  ;;  %6880 = vmatprep.subr.bf16.mxu0 %v9590_v3  ;;  %v9639_v53 = vld [vmem:[%s14202_s1 + $0x1380] ss:$16 sps:$4 sm:$0xff]   ;;  %v9647_v58 = vld [vmem:[%s14202_s1 + $0x1364] ss:$16 sps:$4 sm:$0xff]  }
 0x117   : > { %6921 = vmatprep.subr.bf16.mxu1 %v9593_v4  ;;  %v9642_v63 = vld [vmem:[%s14202_s1 + $0x1160] ss:$16 sps:$4 sm:$0xff]   ;;  %v9650_v3 = vld [vmem:[%s14202_s1 + $0x1144] ss:$16 sps:$4 sm:$0xff]  }
 0x118   : > { %v9645_v2 = vld [vmem:[%s14202_s1 + $0x1360] ss:$16 sps:$4 sm:$0xff]   ;;  %v9653_v4 = vld [vmem:[%s14202_s1 + $0x1344] ss:$16 sps:$4 sm:$0xff]  }
 0x119   : > { %6881 = vmatpush1.bf16.msra.mxu0 %v9588_v5  ;;  %v9648_v5 = vld [vmem:[%s14202_s1 + $0x1140] ss:$16 sps:$4 sm:$0xff]  }
 0x11a   : > { %6922 = vmatpush1.bf16.msra.mxu1 %v9591_v6  ;;  %6882 = vmatprep.subr.bf16.mxu0 %v9596_v7  ;;  %v9651_v6 = vld [vmem:[%s14202_s1 + $0x1340] ss:$16 sps:$4 sm:$0xff]   ;;  %v9656_v7 = vld [vmem:[%s14202_s1 + $0x1124] ss:$16 sps:$4 sm:$0xff]  }
 0x11b   : > { %6923 = vmatprep.subr.bf16.mxu1 %v9599_v8  ;;  %v9659_v8 = vld [vmem:[%s14202_s1 + $0x1324] ss:$16 sps:$4 sm:$0xff]  }
 0x11d   : > { %6883 = vmatpush1.bf16.msra.mxu0 %v9594_v9  ;;  %v201_v9 = vld [vmem:[%s10921_s10 + $0x28] sm:$0xff] }
 0x11e   : > { %6924 = vmatpush1.bf16.msra.mxu1 %v9597_v10  ;;  %6884 = vmatprep.subr.bf16.mxu0 %v9602_v11  ;;  %v9654_v10 = vld [vmem:[%s14202_s1 + $0x1120] ss:$16 sps:$4 sm:$0xff]  }
 0x11f   : > { %6925 = vmatprep.subr.bf16.mxu1 %v9605_v12  ;;  %v9657_v11 = vld [vmem:[%s14202_s1 + $0x1320] ss:$16 sps:$4 sm:$0xff]   ;;  %v9662_v12 = vld [vmem:[%s14202_s1 + $0x1104] ss:$16 sps:$4 sm:$0xff]  }
 0x121   : > { %6885 = vmatpush1.bf16.msra.mxu0 %v9600_v13  ;;  %v9665_v13 = vld [vmem:[%s14202_s1 + $0x1304] ss:$16 sps:$4 sm:$0xff]  }
 0x122   : > { %6926 = vmatpush1.bf16.msra.mxu1 %v9603_v14  ;;  %6886 = vmatprep.subr.bf16.mxu0 %v9608_v15  ;;  %v1343_v14 = vcombine.high %v201_v9, %v201_v9  ;;  %v9660_v15 = vld [vmem:[%s14202_s1 + $0x1100] ss:$16 sps:$4 sm:$0xff]  }
 0x123   : > { %6927 = vmatprep.subr.bf16.mxu1 %v9611_v16  ;;  %v9663_v16 = vld [vmem:[%s14202_s1 + $0x1300] ss:$16 sps:$4 sm:$0xff]  }
 0x125   : > { %6887 = vmatpush1.bf16.msra.mxu0 %v9606_v17  ;;  %v9669_v17 = vld [vmem:[%s14202_s1 + $0x14e4] ss:$16 sps:$4 sm:$0xff]  }
 0x126   : > { %6928 = vmatpush1.bf16.msra.mxu1 %v9609_v18  ;;  %6888 = vmatprep.subr.bf16.mxu0 %v9614_v19  ;;  %v9672_v18 = vld [vmem:[%s14202_s1 + $0x16e4] ss:$16 sps:$4 sm:$0xff]   ;;  %v9667_v19 = vld [vmem:[%s14202_s1 + $0x14e0] ss:$16 sps:$4 sm:$0xff]  }
 0x127   : > { %6929 = vmatprep.subr.bf16.mxu1 %v9617_v20  ;;  %v9670_v20 = vld [vmem:[%s14202_s1 + $0x16e0] ss:$16 sps:$4 sm:$0xff]  }
 0x129   : > { %6889 = vmatpush1.bf16.msra.mxu0 %v9612_v23  ;;  %v11870_v23 = vrot.slane %v201_v9, %v10924_v49  ;;  %v9691_v9 = vld [vmem:[%s14202_s1 + $0x1460] ss:$16 sps:$4 sm:$0xff]  }
 0x12a   : > { %6930 = vmatpush1.bf16.msra.mxu1 %v9615_v24  ;;  %6890 = vmatprep.subr.bf16.mxu0 %v9620_v25  ;;  %v11873_v24 = vrot.slane %v1343_v14, %v10924_v49  ;;  %v9675_v25 = vld [vmem:[%s14202_s1 + $0x14c4] ss:$16 sps:$4 sm:$0xff]   ;;  %v9700_v14 = vld [vmem:[%s14202_s1 + $0x1640] ss:$16 sps:$4 sm:$0xff]  }
 0x12b   : > { %6931 = vmatprep.subr.bf16.mxu1 %v9623_v26  ;;  %v9678_v26 = vld [vmem:[%s14202_s1 + $0x16c4] ss:$16 sps:$4 sm:$0xff]  }
 0x12d   : > { %6891 = vmatpush2.bf16.msra.mxu0 %v9618_v27  ;;  %v9673_v27 = vld [vmem:[%s14202_s1 + $0x14c0] ss:$16 sps:$4 sm:$0xff]  }
 0x12e   : > { %6932 = vmatpush2.bf16.msra.mxu1 %v9621_v28  ;;  %6892 = vmatprep.subr.bf16.mxu0 %v9626_v32  ;;  %v9676_v28 = vld [vmem:[%s14202_s1 + $0x16c0] ss:$16 sps:$4 sm:$0xff]   ;;  %v11889_v32 = vcombine.high %v11870_v23, %v11870_v23 }
 0x12f   : > { %6933 = vmatprep.subr.bf16.mxu1 %v9629_v33  ;;  %v11893_v33 = vcombine.high %v11873_v24, %v11873_v24 }
 0x131   : > { %6893 = vmatpush2.bf16.msra.mxu0 %v9624_v36 }
 0x132   : > { %6934 = vmatpush2.bf16.msra.mxu1 %v9627_v37  ;;  %6894 = vmatprep.subr.bf16.mxu0 %v9632_v38 }
 0x133   : > { %6935 = vmatprep.subr.bf16.mxu1 %v9635_v41 }
 0x135   : > { %6895 = vmatpush2.bf16.msra.mxu0 %v9630_v43 }
 0x136   : > { %6936 = vmatpush2.bf16.msra.mxu1 %v9633_v46  ;;  %6896 = vmatprep.subr.bf16.mxu0 %v9638_v47  ;;  %v9681_v46 = vld [vmem:[%s14202_s1 + $0x14a4] ss:$16 sps:$4 sm:$0xff]  }
 0x137   : > { %6937 = vmatprep.subr.bf16.mxu1 %v9641_v51  ;;  %v9684_v47 = vld [vmem:[%s14202_s1 + $0x16a4] ss:$16 sps:$4 sm:$0xff]  }
 0x139   : > { %6897 = vmatpush2.bf16.msra.mxu0 %v9636_v52 }
 0x13a   : > { %6938 = vmatpush2.bf16.msra.mxu1 %v9639_v53  ;;  %6898 = vmatprep.subr.bf16.mxu0 %v9644_v57  ;;  %v9682_v53 = vld [vmem:[%s14202_s1 + $0x16a0] ss:$16 sps:$4 sm:$0xff]  }
 0x13b   : > { %6939 = vmatprep.subr.bf16.mxu1 %v9647_v58 }
 0x13d   : > { %6899 = vmatpush2.bf16.msra.mxu0 %v9642_v63 }
 0x13e   : > { %6940 = vmatpush2.bf16.msra.mxu1 %v9645_v2  ;;  %6900 = vmatprep.subr.bf16.mxu0 %v9650_v3  ;;  %v9687_v3 = vld [vmem:[%s14202_s1 + $0x1484] ss:$16 sps:$4 sm:$0xff]  }
 0x13f   : > { %6941 = vmatprep.subr.bf16.mxu1 %v9653_v4  ;;  %v9690_v4 = vld [vmem:[%s14202_s1 + $0x1684] ss:$16 sps:$4 sm:$0xff]  }
 0x141   : > { %6901 = vmatpush2.bf16.msra.mxu0 %v9648_v5  ;;  %v9685_v5 = vld [vmem:[%s14202_s1 + $0x1480] ss:$16 sps:$4 sm:$0xff]  }
 0x142   : > { %6942 = vmatpush2.bf16.msra.mxu1 %v9651_v6  ;;  %6902 = vmatprep.subr.bf16.mxu0 %v9656_v7  ;;  %v9688_v6 = vld [vmem:[%s14202_s1 + $0x1680] ss:$16 sps:$4 sm:$0xff]   ;;  %v9693_v7 = vld [vmem:[%s14202_s1 + $0x1464] ss:$16 sps:$4 sm:$0xff]  }
 0x143   : > { %6943 = vmatprep.subr.bf16.mxu1 %v9659_v8  ;;  %v9696_v8 = vld [vmem:[%s14202_s1 + $0x1664] ss:$16 sps:$4 sm:$0xff]  }
 0x145   : > { %6903 = vmatpush2.bf16.msra.mxu0 %v9654_v10  ;;  %v9694_v10 = vld [vmem:[%s14202_s1 + $0x1660] ss:$16 sps:$4 sm:$0xff]  }
 0x146   : > { %6944 = vmatpush2.bf16.msra.mxu1 %v9657_v11  ;;  %6904 = vmatprep.subr.bf16.mxu0 %v9662_v12  ;;  %v9699_v11 = vld [vmem:[%s14202_s1 + $0x1444] ss:$16 sps:$4 sm:$0xff]  }
 0x147   : > { %6945 = vmatprep.subr.bf16.mxu1 %v9665_v13  ;;  %v9702_v12 = vld [vmem:[%s14202_s1 + $0x1644] ss:$16 sps:$4 sm:$0xff]   ;;  %v9697_v13 = vld [vmem:[%s14202_s1 + $0x1440] ss:$16 sps:$4 sm:$0xff]  }
 0x149   : > { %6905 = vmatpush2.bf16.msra.mxu0 %v9660_v15  ;;  %v9705_v15 = vld [vmem:[%s14202_s1 + $0x1424] ss:$16 sps:$4 sm:$0xff]  }
 0x14a   : > { %6946 = vmatpush2.bf16.msra.mxu1 %v9663_v16  ;;  %6956 = vmatprep.subr.bf16.mxu0 %v9669_v17  ;;  %v9708_v16 = vld [vmem:[%s14202_s1 + $0x1624] ss:$16 sps:$4 sm:$0xff]   ;;  %v9703_v17 = vld [vmem:[%s14202_s1 + $0x1420] ss:$16 sps:$4 sm:$0xff]  }
 0x14b   : > { %6997 = vmatprep.subr.bf16.mxu1 %v9672_v18  ;;  %v9706_v18 = vld [vmem:[%s14202_s1 + $0x1620] ss:$16 sps:$4 sm:$0xff]  }
 0x14c   : > { %v6662_v36 = vpop.f32.mrf.mxu0  ;;  %6907 = vmatmul.mubr.bf16.vlgmr.msra.gmra.mxu0 %v11649_v21 }
 0x14d   : > { %v6703_v37 = vpop.f32.mrf.mxu1  ;;  %6948 = vmatmul.mubr.bf16.vlgmr.msra.gmra.mxu1 %v11652_v22  ;;  %v6663_v38 = vadd.f32 %v6662_v36, %v11688_v50  ;;  %6957 = vmatpush1.bf16.msra.mxu0 %v9667_v19  ;;  %v9679_v50 = vld [vmem:[%s14202_s1 + $0x14a0] ss:$16 sps:$4 sm:$0xff]   ;;  %v9711_v19 = vld [vmem:[%s14202_s1 + $0x1404] ss:$16 sps:$4 sm:$0xff]  }
 0x14e   : > { %6998 = vmatpush1.bf16.msra.mxu1 %v9670_v20  ;;  %v6664_v41 = vpop.f32.mrf.mxu0  ;;  %6958 = vmatprep.subr.bf16.mxu0 %v9675_v25  ;;  %v9714_v20 = vld [vmem:[%s14202_s1 + $0x1604] ss:$16 sps:$4 sm:$0xff]   ;;  %v9709_v25 = vld [vmem:[%s14202_s1 + $0x1400] ss:$16 sps:$4 sm:$0xff]  }
 0x14f   : > { %v6705_v43 = vpop.f32.mrf.mxu1  ;;  %6999 = vmatprep.subr.bf16.mxu1 %v9678_v26  ;;  %v11904_v51 = vadd.f32 %v6703_v37, %v6663_v38  ;;  %v6665_v52 = vadd.f32 %v6664_v41, %v11698_v61  ;;  %6988 = vmatprep.mubr.bf16.mxu0 %v11889_v32  ;;  %v9712_v26 = vld [vmem:[%s14202_s1 + $0x1600] ss:$16 sps:$4 sm:$0xff]   ;;  %v9723_v38 = vld [vmem:[%s14202_s1 + $0x15c4] ss:$16 sps:$4 sm:$0xff]  }
 0x150   : > { %7029 = vmatprep.mubr.bf16.mxu1 %v11893_v33  ;;  %v6666_v57 = vpop.f32.mrf.mxu0  ;;  %v9715_v36 = vld [vmem:[%s14202_s1 + $0x15e0] ss:$16 sps:$4 sm:$0xff]   ;;  %v9726_v41 = vld [vmem:[%s14202_s1 + $0x17c4] ss:$16 sps:$4 sm:$0xff]  }
 0x151   : > { %v6707_v58 = vpop.f32.mrf.mxu1  ;;  %v11915_v63 = vadd.f32 %v6705_v43, %v6665_v52  ;;  %6959 = vmatpush1.bf16.msra.mxu0 %v9673_v27  ;;  %v9717_v27 = vld [vmem:[%s14202_s1 + $0x15e4] ss:$16 sps:$4 sm:$0xff]   ;;  %v9718_v37 = vld [vmem:[%s14202_s1 + $0x17e0] ss:$16 sps:$4 sm:$0xff]  }
 0x152   : > { %7000 = vmatpush1.bf16.msra.mxu1 %v9676_v28  ;;  %v6667_v2 = vpop.f32.mrf.mxu0  ;;  %6960 = vmatprep.subr.bf16.mxu0 %v9681_v46  ;;  %v9720_v28 = vld [vmem:[%s14202_s1 + $0x17e4] ss:$16 sps:$4 sm:$0xff]   ;;  %v9721_v43 = vld [vmem:[%s14202_s1 + $0x15c0] ss:$16 sps:$4 sm:$0xff]  }
 0x153   : > { %v6708_v61 = vpop.f32.mrf.mxu1  ;;  %7001 = vmatprep.subr.bf16.mxu1 %v9684_v47  ;;  %v9724_v46 = vld [vmem:[%s14202_s1 + $0x17c0] ss:$16 sps:$4 sm:$0xff]   ;;  %v9729_v47 = vld [vmem:[%s14202_s1 + $0x15a4] ss:$16 sps:$4 sm:$0xff]  }
 0x154   : > { %v9732_v52 = vld [vmem:[%s14202_s1 + $0x17a4] ss:$16 sps:$4 sm:$0xff]   ;;  %v9733_v2 = vld [vmem:[%s14202_s1 + $0x1580] ss:$16 sps:$4 sm:$0xff]  }
 0x155   : > { %6961 = vmatpush1.bf16.msra.mxu0 %v9679_v50  ;;  %v9727_v50 = vld [vmem:[%s14202_s1 + $0x15a0] ss:$16 sps:$4 sm:$0xff]   ;;  %v9735_v57 = vld [vmem:[%s14202_s1 + $0x1584] ss:$16 sps:$4 sm:$0xff]  }
 0x156   : > { %7002 = vmatpush1.bf16.msra.mxu1 %v9682_v53  ;;  %6962 = vmatprep.subr.bf16.mxu0 %v9687_v3  ;;  %v9730_v53 = vld [vmem:[%s14202_s1 + $0x17a0] ss:$16 sps:$4 sm:$0xff]   ;;  %v9738_v58 = vld [vmem:[%s14202_s1 + $0x1784] ss:$16 sps:$4 sm:$0xff]  }
 0x157   : > { %7003 = vmatprep.subr.bf16.mxu1 %v9690_v4  ;;  %v9736_v61 = vld [vmem:[%s14202_s1 + $0x1780] ss:$16 sps:$4 sm:$0xff]   ;;  %v9741_v3 = vld [vmem:[%s14202_s1 + $0x1564] ss:$16 sps:$4 sm:$0xff]  }
 0x158   : > { %v9744_v4 = vld [vmem:[%s14202_s1 + $0x1764] ss:$16 sps:$4 sm:$0xff]  }
 0x159   : > { %6963 = vmatpush1.bf16.msra.mxu0 %v9685_v5  ;;  %v9739_v5 = vld [vmem:[%s14202_s1 + $0x1560] ss:$16 sps:$4 sm:$0xff]  }
 0x15a   : > { %7004 = vmatpush1.bf16.msra.mxu1 %v9688_v6  ;;  %6964 = vmatprep.subr.bf16.mxu0 %v9693_v7  ;;  %v9742_v6 = vld [vmem:[%s14202_s1 + $0x1760] ss:$16 sps:$4 sm:$0xff]   ;;  %v9747_v7 = vld [vmem:[%s14202_s1 + $0x1544] ss:$16 sps:$4 sm:$0xff]  }
 0x15b   : > { %7005 = vmatprep.subr.bf16.mxu1 %v9696_v8  ;;  %v9750_v8 = vld [vmem:[%s14202_s1 + $0x1744] ss:$16 sps:$4 sm:$0xff]  }
 0x15d   : > { %6965 = vmatpush1.bf16.msra.mxu0 %v9691_v9  ;;  %v9745_v9 = vld [vmem:[%s14202_s1 + $0x1540] ss:$16 sps:$4 sm:$0xff]  }
 0x15e   : > { %7006 = vmatpush1.bf16.msra.mxu1 %v9694_v10  ;;  %6966 = vmatprep.subr.bf16.mxu0 %v9699_v11  ;;  %v9748_v10 = vld [vmem:[%s14202_s1 + $0x1740] ss:$16 sps:$4 sm:$0xff]   ;;  %v9753_v11 = vld [vmem:[%s14202_s1 + $0x1524] ss:$16 sps:$4 sm:$0xff]  }
 0x15f   : > { %7007 = vmatprep.subr.bf16.mxu1 %v9702_v12  ;;  %v9756_v12 = vld [vmem:[%s14202_s1 + $0x1724] ss:$16 sps:$4 sm:$0xff]  }
 0x161   : > { %6967 = vmatpush1.bf16.msra.mxu0 %v9697_v13  ;;  %v202_v13 = vld [vmem:[%s10921_s10 + $0x30] sm:$0xff] }
 0x162   : > { %7008 = vmatpush1.bf16.msra.mxu1 %v9700_v14  ;;  %6968 = vmatprep.subr.bf16.mxu0 %v9705_v15  ;;  %v9751_v14 = vld [vmem:[%s14202_s1 + $0x1520] ss:$16 sps:$4 sm:$0xff]  }
 0x163   : > { %7009 = vmatprep.subr.bf16.mxu1 %v9708_v16  ;;  %v9754_v15 = vld [vmem:[%s14202_s1 + $0x1720] ss:$16 sps:$4 sm:$0xff]   ;;  %v9759_v16 = vld [vmem:[%s14202_s1 + $0x1504] ss:$16 sps:$4 sm:$0xff]  }
 0x165   : > { %6969 = vmatpush1.bf16.msra.mxu0 %v9703_v17  ;;  %v9762_v17 = vld [vmem:[%s14202_s1 + $0x1704] ss:$16 sps:$4 sm:$0xff]  }
 0x166   : > { %7010 = vmatpush1.bf16.msra.mxu1 %v9706_v18  ;;  %6970 = vmatprep.subr.bf16.mxu0 %v9711_v19  ;;  %v1360_v18 = vcombine.high %v202_v13, %v202_v13  ;;  %v9757_v19 = vld [vmem:[%s14202_s1 + $0x1500] ss:$16 sps:$4 sm:$0xff]  }
 0x167   : > { %7011 = vmatprep.subr.bf16.mxu1 %v9714_v20  ;;  %v9760_v20 = vld [vmem:[%s14202_s1 + $0x1700] ss:$16 sps:$4 sm:$0xff]  }
 0x169   : > { %6971 = vmatpush1.bf16.msra.mxu0 %v9709_v25  ;;  %v9766_v25 = vld [vmem:[%s14202_s1 + $0x18e4] ss:$16 sps:$4 sm:$0xff]  }
 0x16a   : > { %7012 = vmatpush1.bf16.msra.mxu1 %v9712_v26  ;;  %6972 = vmatprep.subr.bf16.mxu0 %v9717_v27  ;;  %v9769_v26 = vld [vmem:[%s14202_s1 + $0x1ae4] ss:$16 sps:$4 sm:$0xff]   ;;  %v9764_v27 = vld [vmem:[%s14202_s1 + $0x18e0] ss:$16 sps:$4 sm:$0xff]  }
 0x16b   : > { %7013 = vmatprep.subr.bf16.mxu1 %v9720_v28  ;;  %v9767_v28 = vld [vmem:[%s14202_s1 + $0x1ae0] ss:$16 sps:$4 sm:$0xff]  }
 0x16d   : > { %6973 = vmatpush2.bf16.msra.mxu0 %v9715_v36  ;;  %v12087_v36 = vrot.slane %v202_v13, %v10924_v49  ;;  %v9782_v13 = vld [vmem:[%s14202_s1 + $0x1880] ss:$16 sps:$4 sm:$0xff]  }
 0x16e   : > { %7014 = vmatpush2.bf16.msra.mxu1 %v9718_v37  ;;  %6974 = vmatprep.subr.bf16.mxu0 %v9723_v38  ;;  %v12090_v37 = vrot.slane %v1360_v18, %v10924_v49  ;;  %v9772_v38 = vld [vmem:[%s14202_s1 + $0x18c4] ss:$16 sps:$4 sm:$0xff]   ;;  %v9791_v18 = vld [vmem:[%s14202_s1 + $0x1a60] ss:$16 sps:$4 sm:$0xff]  }
 0x16f   : > { %7015 = vmatprep.subr.bf16.mxu1 %v9726_v41  ;;  %v9775_v41 = vld [vmem:[%s14202_s1 + $0x1ac4] ss:$16 sps:$4 sm:$0xff]  }
 0x171   : > { %6975 = vmatpush2.bf16.msra.mxu0 %v9721_v43  ;;  %v9770_v43 = vld [vmem:[%s14202_s1 + $0x18c0] ss:$16 sps:$4 sm:$0xff]  }
 0x172   : > { %7016 = vmatpush2.bf16.msra.mxu1 %v9724_v46  ;;  %6976 = vmatprep.subr.bf16.mxu0 %v9729_v47  ;;  %v9773_v46 = vld [vmem:[%s14202_s1 + $0x1ac0] ss:$16 sps:$4 sm:$0xff]   ;;  %v12106_v47 = vcombine.high %v12087_v36, %v12087_v36 }
 0x173   : > { %7017 = vmatprep.subr.bf16.mxu1 %v9732_v52  ;;  %v12110_v52 = vcombine.high %v12090_v37, %v12090_v37 }
 0x175   : > { %6977 = vmatpush2.bf16.msra.mxu0 %v9727_v50 }
 0x176   : > { %7018 = vmatpush2.bf16.msra.mxu1 %v9730_v53  ;;  %6978 = vmatprep.subr.bf16.mxu0 %v9735_v57 }
 0x177   : > { %7019 = vmatprep.subr.bf16.mxu1 %v9738_v58 }
 0x179   : > { %6979 = vmatpush2.bf16.msra.mxu0 %v9733_v2 }
 0x17a   : > { %7020 = vmatpush2.bf16.msra.mxu1 %v9736_v61  ;;  %6980 = vmatprep.subr.bf16.mxu0 %v9741_v3  ;;  %v9778_v61 = vld [vmem:[%s14202_s1 + $0x18a4] ss:$16 sps:$4 sm:$0xff]  }
 0x17b   : > { %7021 = vmatprep.subr.bf16.mxu1 %v9744_v4  ;;  %v9781_v3 = vld [vmem:[%s14202_s1 + $0x1aa4] ss:$16 sps:$4 sm:$0xff]  }
 0x17d   : > { %6981 = vmatpush2.bf16.msra.mxu0 %v9739_v5 }
 0x17e   : > { %7022 = vmatpush2.bf16.msra.mxu1 %v9742_v6  ;;  %6982 = vmatprep.subr.bf16.mxu0 %v9747_v7  ;;  %v9779_v6 = vld [vmem:[%s14202_s1 + $0x1aa0] ss:$16 sps:$4 sm:$0xff]  }
 0x17f   : > { %7023 = vmatprep.subr.bf16.mxu1 %v9750_v8 }
 0x181   : > { %6983 = vmatpush2.bf16.msra.mxu0 %v9745_v9 }
 0x182   : > { %7024 = vmatpush2.bf16.msra.mxu1 %v9748_v10  ;;  %6984 = vmatprep.subr.bf16.mxu0 %v9753_v11  ;;  %v9784_v11 = vld [vmem:[%s14202_s1 + $0x1884] ss:$16 sps:$4 sm:$0xff]  }
 0x183   : > { %7025 = vmatprep.subr.bf16.mxu1 %v9756_v12  ;;  %v9787_v12 = vld [vmem:[%s14202_s1 + $0x1a84] ss:$16 sps:$4 sm:$0xff]  }
 0x185   : > { %6985 = vmatpush2.bf16.msra.mxu0 %v9751_v14  ;;  %v9785_v14 = vld [vmem:[%s14202_s1 + $0x1a80] ss:$16 sps:$4 sm:$0xff]  }
 0x186   : > { %7026 = vmatpush2.bf16.msra.mxu1 %v9754_v15  ;;  %6986 = vmatprep.subr.bf16.mxu0 %v9759_v16  ;;  %v9790_v15 = vld [vmem:[%s14202_s1 + $0x1864] ss:$16 sps:$4 sm:$0xff]  }
 0x187   : > { %7027 = vmatprep.subr.bf16.mxu1 %v9762_v17  ;;  %v9793_v16 = vld [vmem:[%s14202_s1 + $0x1a64] ss:$16 sps:$4 sm:$0xff]   ;;  %v9788_v17 = vld [vmem:[%s14202_s1 + $0x1860] ss:$16 sps:$4 sm:$0xff]  }
 0x189   : > { %6987 = vmatpush2.bf16.msra.mxu0 %v9757_v19  ;;  %v9796_v19 = vld [vmem:[%s14202_s1 + $0x1844] ss:$16 sps:$4 sm:$0xff]  }
 0x18a   : > { %7028 = vmatpush2.bf16.msra.mxu1 %v9760_v20  ;;  %7038 = vmatprep.subr.bf16.mxu0 %v9766_v25  ;;  %v9799_v20 = vld [vmem:[%s14202_s1 + $0x1a44] ss:$16 sps:$4 sm:$0xff]   ;;  %v9794_v25 = vld [vmem:[%s14202_s1 + $0x1840] ss:$16 sps:$4 sm:$0xff]  }
 0x18b   : > { %7079 = vmatprep.subr.bf16.mxu1 %v9769_v26  ;;  %v9797_v26 = vld [vmem:[%s14202_s1 + $0x1a40] ss:$16 sps:$4 sm:$0xff]  }
 0x18c   : > { %v6744_v50 = vpop.f32.mrf.mxu0  ;;  %6989 = vmatmul.mubr.bf16.vlgmr.msra.gmra.mxu0 %v11870_v23 }
 0x18d   : > { %v6785_v53 = vpop.f32.mrf.mxu1  ;;  %7030 = vmatmul.mubr.bf16.vlgmr.msra.gmra.mxu1 %v11873_v24  ;;  %v6745_v57 = vadd.f32 %v6744_v50, %v11904_v51  ;;  %7039 = vmatpush1.bf16.msra.mxu0 %v9764_v27  ;;  %v9776_v51 = vld [vmem:[%s14202_s1 + $0x18a0] ss:$16 sps:$4 sm:$0xff]   ;;  %v9802_v27 = vld [vmem:[%s14202_s1 + $0x1824] ss:$16 sps:$4 sm:$0xff]  }
 0x18e   : > { %7080 = vmatpush1.bf16.msra.mxu1 %v9767_v28  ;;  %v6746_v58 = vpop.f32.mrf.mxu0  ;;  %7040 = vmatprep.subr.bf16.mxu0 %v9772_v38  ;;  %v9805_v28 = vld [vmem:[%s14202_s1 + $0x1a24] ss:$16 sps:$4 sm:$0xff]   ;;  %v9800_v38 = vld [vmem:[%s14202_s1 + $0x1820] ss:$16 sps:$4 sm:$0xff]  }
 0x18f   : > { %v6787_v2 = vpop.f32.mrf.mxu1  ;;  %7081 = vmatprep.subr.bf16.mxu1 %v9775_v41  ;;  %v12121_v4 = vadd.f32 %v6785_v53, %v6745_v57  ;;  %v6747_v5 = vadd.f32 %v6746_v58, %v11915_v63  ;;  %7070 = vmatprep.mubr.bf16.mxu0 %v12106_v47  ;;  %v9803_v41 = vld [vmem:[%s14202_s1 + $0x1a20] ss:$16 sps:$4 sm:$0xff]   ;;  %v9814_v57 = vld [vmem:[%s14202_s1 + $0x19e4] ss:$16 sps:$4 sm:$0xff]  }
 0x190   : > { %7111 = vmatprep.mubr.bf16.mxu1 %v12110_v52  ;;  %v6748_v7 = vpop.f32.mrf.mxu0  ;;  %v9806_v50 = vld [vmem:[%s14202_s1 + $0x1800] ss:$16 sps:$4 sm:$0xff]   ;;  %v9817_v58 = vld [vmem:[%s14202_s1 + $0x1be4] ss:$16 sps:$4 sm:$0xff]  }
 0x191   : > { %v6789_v8 = vpop.f32.mrf.mxu1  ;;  %v12132_v9 = vadd.f32 %v6787_v2, %v6747_v5  ;;  %7041 = vmatpush1.bf16.msra.mxu0 %v9770_v43  ;;  %v9808_v43 = vld [vmem:[%s14202_s1 + $0x1804] ss:$16 sps:$4 sm:$0xff]   ;;  %v9809_v53 = vld [vmem:[%s14202_s1 + $0x1a00] ss:$16 sps:$4 sm:$0xff]  }
 0x192   : > { %7082 = vmatpush1.bf16.msra.mxu1 %v9773_v46  ;;  %v6749_v10 = vpop.f32.mrf.mxu0  ;;  %7042 = vmatprep.subr.bf16.mxu0 %v9778_v61  ;;  %v9811_v46 = vld [vmem:[%s14202_s1 + $0x1a04] ss:$16 sps:$4 sm:$0xff]   ;;  %v9812_v2 = vld [vmem:[%s14202_s1 + $0x19e0] ss:$16 sps:$4 sm:$0xff]  }
 0x193   : > { %v6790_v63 = vpop.f32.mrf.mxu1  ;;  %7083 = vmatprep.subr.bf16.mxu1 %v9781_v3  ;;  %v9815_v61 = vld [vmem:[%s14202_s1 + $0x1be0] ss:$16 sps:$4 sm:$0xff]   ;;  %v9820_v3 = vld [vmem:[%s14202_s1 + $0x19c4] ss:$16 sps:$4 sm:$0xff]  }
 0x194   : > { %v9823_v5 = vld [vmem:[%s14202_s1 + $0x1bc4] ss:$16 sps:$4 sm:$0xff]   ;;  %v9824_v10 = vld [vmem:[%s14202_s1 + $0x19a0] ss:$16 sps:$4 sm:$0xff]  }
 0x195   : > { %7043 = vmatpush1.bf16.msra.mxu0 %v9776_v51  ;;  %v9818_v51 = vld [vmem:[%s14202_s1 + $0x19c0] ss:$16 sps:$4 sm:$0xff]   ;;  %v9826_v7 = vld [vmem:[%s14202_s1 + $0x19a4] ss:$16 sps:$4 sm:$0xff]  }
 0x196   : > { %7084 = vmatpush1.bf16.msra.mxu1 %v9779_v6  ;;  %7044 = vmatprep.subr.bf16.mxu0 %v9784_v11  ;;  %v9821_v6 = vld [vmem:[%s14202_s1 + $0x1bc0] ss:$16 sps:$4 sm:$0xff]   ;;  %v9829_v8 = vld [vmem:[%s14202_s1 + $0x1ba4] ss:$16 sps:$4 sm:$0xff]  }
 0x197   : > { %7085 = vmatprep.subr.bf16.mxu1 %v9787_v12  ;;  %v9827_v63 = vld [vmem:[%s14202_s1 + $0x1ba0] ss:$16 sps:$4 sm:$0xff]   ;;  %v9832_v11 = vld [vmem:[%s14202_s1 + $0x1984] ss:$16 sps:$4 sm:$0xff]  }
 0x198   : > { %v9835_v12 = vld [vmem:[%s14202_s1 + $0x1b84] ss:$16 sps:$4 sm:$0xff]  }
 0x199   : > { %7045 = vmatpush1.bf16.msra.mxu0 %v9782_v13  ;;  %v9830_v13 = vld [vmem:[%s14202_s1 + $0x1980] ss:$16 sps:$4 sm:$0xff]  }
 0x19a   : > { %7086 = vmatpush1.bf16.msra.mxu1 %v9785_v14  ;;  %7046 = vmatprep.subr.bf16.mxu0 %v9790_v15  ;;  %v9833_v14 = vld [vmem:[%s14202_s1 + $0x1b80] ss:$16 sps:$4 sm:$0xff]   ;;  %v9838_v15 = vld [vmem:[%s14202_s1 + $0x1964] ss:$16 sps:$4 sm:$0xff]  }
 0x19b   : > { %7087 = vmatprep.subr.bf16.mxu1 %v9793_v16  ;;  %v9841_v16 = vld [vmem:[%s14202_s1 + $0x1b64] ss:$16 sps:$4 sm:$0xff]  }
 0x19d   : > { %7047 = vmatpush1.bf16.msra.mxu0 %v9788_v17  ;;  %v9836_v17 = vld [vmem:[%s14202_s1 + $0x1960] ss:$16 sps:$4 sm:$0xff]  }
 0x19e   : > { %7088 = vmatpush1.bf16.msra.mxu1 %v9791_v18  ;;  %7048 = vmatprep.subr.bf16.mxu0 %v9796_v19  ;;  %v9839_v18 = vld [vmem:[%s14202_s1 + $0x1b60] ss:$16 sps:$4 sm:$0xff]   ;;  %v9844_v19 = vld [vmem:[%s14202_s1 + $0x1944] ss:$16 sps:$4 sm:$0xff]  }
 0x19f   : > { %7089 = vmatprep.subr.bf16.mxu1 %v9799_v20  ;;  %v9847_v20 = vld [vmem:[%s14202_s1 + $0x1b44] ss:$16 sps:$4 sm:$0xff]  }
 0x1a1   : > { %7049 = vmatpush1.bf16.msra.mxu0 %v9794_v25  ;;  %v9842_v25 = vld [vmem:[%s14202_s1 + $0x1940] ss:$16 sps:$4 sm:$0xff]  }
 0x1a2   : > { %7090 = vmatpush1.bf16.msra.mxu1 %v9797_v26  ;;  %7050 = vmatprep.subr.bf16.mxu0 %v9802_v27  ;;  %v9845_v26 = vld [vmem:[%s14202_s1 + $0x1b40] ss:$16 sps:$4 sm:$0xff]   ;;  %v9850_v27 = vld [vmem:[%s14202_s1 + $0x1924] ss:$16 sps:$4 sm:$0xff]  }
 0x1a3   : > { %7091 = vmatprep.subr.bf16.mxu1 %v9805_v28  ;;  %v9853_v28 = vld [vmem:[%s14202_s1 + $0x1b24] ss:$16 sps:$4 sm:$0xff]  }
 0x1a5   : > { %7051 = vmatpush1.bf16.msra.mxu0 %v9800_v38  ;;  %v203_v38 = vld [vmem:[%s10921_s10 + $0x38] sm:$0xff] }
 0x1a6   : > { %7092 = vmatpush1.bf16.msra.mxu1 %v9803_v41  ;;  %7052 = vmatprep.subr.bf16.mxu0 %v9808_v43  ;;  %v9848_v41 = vld [vmem:[%s14202_s1 + $0x1920] ss:$16 sps:$4 sm:$0xff]  }
 0x1a7   : > { %7093 = vmatprep.subr.bf16.mxu1 %v9811_v46  ;;  %v9851_v43 = vld [vmem:[%s14202_s1 + $0x1b20] ss:$16 sps:$4 sm:$0xff]   ;;  %v9856_v46 = vld [vmem:[%s14202_s1 + $0x1904] ss:$16 sps:$4 sm:$0xff]  }
 0x1a9   : > { %7053 = vmatpush1.bf16.msra.mxu0 %v9806_v50  ;;  %v9859_v50 = vld [vmem:[%s14202_s1 + $0x1b04] ss:$16 sps:$4 sm:$0xff]  }
 0x1aa   : > { %7094 = vmatpush1.bf16.msra.mxu1 %v9809_v53  ;;  %7054 = vmatprep.subr.bf16.mxu0 %v9814_v57  ;;  %v1377_v53 = vcombine.high %v203_v38, %v203_v38  ;;  %v9854_v57 = vld [vmem:[%s14202_s1 + $0x1900] ss:$16 sps:$4 sm:$0xff]  }
 0x1ab   : > { %7095 = vmatprep.subr.bf16.mxu1 %v9817_v58  ;;  %v9857_v58 = vld [vmem:[%s14202_s1 + $0x1b00] ss:$16 sps:$4 sm:$0xff]  }
 0x1ad   : > { %7055 = vmatpush2.bf16.msra.mxu0 %v9812_v2  ;;  %v9863_v2 = vld [vmem:[%s14202_s1 + $0x1ce4] ss:$16 sps:$4 sm:$0xff]  }
 0x1ae   : > { %7096 = vmatpush2.bf16.msra.mxu1 %v9815_v61  ;;  %7056 = vmatprep.subr.bf16.mxu0 %v9820_v3  ;;  %v9866_v61 = vld [vmem:[%s14202_s1 + $0x1ee4] ss:$16 sps:$4 sm:$0xff]   ;;  %v9861_v3 = vld [vmem:[%s14202_s1 + $0x1ce0] ss:$16 sps:$4 sm:$0xff]  }
 0x1af   : > { %7097 = vmatprep.subr.bf16.mxu1 %v9823_v5  ;;  %v9864_v5 = vld [vmem:[%s14202_s1 + $0x1ee0] ss:$16 sps:$4 sm:$0xff]  }
 0x1b1   : > { %7057 = vmatpush2.bf16.msra.mxu0 %v9818_v51  ;;  %v12304_v51 = vrot.slane %v203_v38, %v10924_v49 }
 0x1b2   : > { %7098 = vmatpush2.bf16.msra.mxu1 %v9821_v6  ;;  %7058 = vmatprep.subr.bf16.mxu0 %v9826_v7  ;;  %v12307_v6 = vrot.slane %v1377_v53, %v10924_v49  ;;  %v9869_v7 = vld [vmem:[%s14202_s1 + $0x1cc4] ss:$16 sps:$4 sm:$0xff]   ;;  %v9870_v49 = vld [vmem:[%s14202_s1 + $0x1ec0] ss:$16 sps:$4 sm:$0xff]  }
 0x1b3   : > { %7099 = vmatprep.subr.bf16.mxu1 %v9829_v8  ;;  %v9872_v8 = vld [vmem:[%s14202_s1 + $0x1ec4] ss:$16 sps:$4 sm:$0xff]  }
 0x1b4   : > { %v9887_v53 = vld [vmem:[%s14202_s1 + $0x1c64] ss:$16 sps:$4 sm:$0xff]  }
 0x1b5   : > { %7059 = vmatpush2.bf16.msra.mxu0 %v9824_v10  ;;  %v9867_v10 = vld [vmem:[%s14202_s1 + $0x1cc0] ss:$16 sps:$4 sm:$0xff]  }
 0x1b6   : > { %7100 = vmatpush2.bf16.msra.mxu1 %v9827_v63  ;;  %7060 = vmatprep.subr.bf16.mxu0 %v9832_v11  ;;  %v12323_v63 = vcombine.high %v12304_v51, %v12304_v51  ;;  %v12327_v11 = vcombine.high %v12307_v6, %v12307_v6 }
 0x1b7   : > { %7101 = vmatprep.subr.bf16.mxu1 %v9835_v12 }
 0x1b9   : > { %7061 = vmatpush2.bf16.msra.mxu0 %v9830_v13 }
 0x1ba   : > { %7102 = vmatpush2.bf16.msra.mxu1 %v9833_v14  ;;  %7062 = vmatprep.subr.bf16.mxu0 %v9838_v15 }
 0x1bb   : > { %7103 = vmatprep.subr.bf16.mxu1 %v9841_v16 }
 0x1bd   : > { %7063 = vmatpush2.bf16.msra.mxu0 %v9836_v17  ;;  %v9875_v17 = vld [vmem:[%s14202_s1 + $0x1ca4] ss:$16 sps:$4 sm:$0xff]  }
 0x1be   : > { %7104 = vmatpush2.bf16.msra.mxu1 %v9839_v18  ;;  %7064 = vmatprep.subr.bf16.mxu0 %v9844_v19  ;;  %v9878_v18 = vld [vmem:[%s14202_s1 + $0x1ea4] ss:$16 sps:$4 sm:$0xff]  }
 0x1bf   : > { %7105 = vmatprep.subr.bf16.mxu1 %v9847_v20 }
 0x1c1   : > { %7065 = vmatpush2.bf16.msra.mxu0 %v9842_v25  ;;  %v9876_v25 = vld [vmem:[%s14202_s1 + $0x1ea0] ss:$16 sps:$4 sm:$0xff]  }
 0x1c2   : > { %7106 = vmatpush2.bf16.msra.mxu1 %v9845_v26  ;;  %7066 = vmatprep.subr.bf16.mxu0 %v9850_v27 }
 0x1c3   : > { %7107 = vmatprep.subr.bf16.mxu1 %v9853_v28 }
 0x1c5   : > { %7067 = vmatpush2.bf16.msra.mxu0 %v9848_v41  ;;  %v9881_v41 = vld [vmem:[%s14202_s1 + $0x1c84] ss:$16 sps:$4 sm:$0xff]  }
 0x1c6   : > { %7108 = vmatpush2.bf16.msra.mxu1 %v9851_v43  ;;  %7068 = vmatprep.subr.bf16.mxu0 %v9856_v46  ;;  %v9884_v43 = vld [vmem:[%s14202_s1 + $0x1e84] ss:$16 sps:$4 sm:$0xff]   ;;  %v9879_v46 = vld [vmem:[%s14202_s1 + $0x1c80] ss:$16 sps:$4 sm:$0xff]  }
 0x1c7   : > { %7109 = vmatprep.subr.bf16.mxu1 %v9859_v50  ;;  %v9882_v50 = vld [vmem:[%s14202_s1 + $0x1e80] ss:$16 sps:$4 sm:$0xff]  }
 0x1c9   : > { %7069 = vmatpush2.bf16.msra.mxu0 %v9854_v57  ;;  %v9890_v57 = vld [vmem:[%s14202_s1 + $0x1e64] ss:$16 sps:$4 sm:$0xff]  }
 0x1ca   : > { %7110 = vmatpush2.bf16.msra.mxu1 %v9857_v58  ;;  %7120 = vmatprep.subr.bf16.mxu0 %v9863_v2  ;;  %v9885_v58 = vld [vmem:[%s14202_s1 + $0x1c60] ss:$16 sps:$4 sm:$0xff]  }
 0x1cb   : > { %7161 = vmatprep.subr.bf16.mxu1 %v9866_v61  ;;  %v9888_v2 = vld [vmem:[%s14202_s1 + $0x1e60] ss:$16 sps:$4 sm:$0xff]   ;;  %v9893_v61 = vld [vmem:[%s14202_s1 + $0x1c44] ss:$16 sps:$4 sm:$0xff]  }
 0x1cc   : > { %v6826_v12 = vpop.f32.mrf.mxu0  ;;  %7071 = vmatmul.mubr.bf16.vlgmr.msra.gmra.mxu0 %v12087_v36 }
 0x1cd   : > { %v6867_v13 = vpop.f32.mrf.mxu1  ;;  %7112 = vmatmul.mubr.bf16.vlgmr.msra.gmra.mxu1 %v12090_v37  ;;  %v6827_v14 = vadd.f32 %v6826_v12, %v12121_v4  ;;  %7121 = vmatpush1.bf16.msra.mxu0 %v9861_v3  ;;  %v9873_v4 = vld [vmem:[%s14202_s1 + $0x1ca0] ss:$16 sps:$4 sm:$0xff]   ;;  %v9896_v3 = vld [vmem:[%s14202_s1 + $0x1e44] ss:$16 sps:$4 sm:$0xff]  }
 0x1ce   : > { %7162 = vmatpush1.bf16.msra.mxu1 %v9864_v5  ;;  %v6828_v15 = vpop.f32.mrf.mxu0  ;;  %7122 = vmatprep.subr.bf16.mxu0 %v9869_v7  ;;  %v9891_v5 = vld [vmem:[%s14202_s1 + $0x1c40] ss:$16 sps:$4 sm:$0xff]  }
 0x1cf   : > { %v6869_v16 = vpop.f32.mrf.mxu1  ;;  %7163 = vmatprep.subr.bf16.mxu1 %v9872_v8  ;;  %v12338_v19 = vadd.f32 %v6867_v13, %v6827_v14  ;;  %v6829_v20 = vadd.f32 %v6828_v15, %v12132_v9  ;;  %7152 = vmatprep.mubr.bf16.mxu0 %v12323_v63  ;;  %v9894_v7 = vld [vmem:[%s14202_s1 + $0x1e40] ss:$16 sps:$4 sm:$0xff]   ;;  %v9899_v8 = vld [vmem:[%s14202_s1 + $0x1c24] ss:$16 sps:$4 sm:$0xff]  }
 0x1d0   : > { %7193 = vmatprep.mubr.bf16.mxu1 %v12327_v11  ;;  %v6830_v26 = vpop.f32.mrf.mxu0  ;;  %v9900_v12 = vld [vmem:[%s14202_s1 + $0x1e20] ss:$16 sps:$4 sm:$0xff]   ;;  %v9905_v13 = vld [vmem:[%s14202_s1 + $0x1c04] ss:$16 sps:$4 sm:$0xff]  }
 0x1d1   : > { %v6871_v27 = vpop.f32.mrf.mxu1  ;;  %v12349_v28 = vadd.f32 %v6869_v16, %v6829_v20  ;;  %7123 = vmatpush1.bf16.msra.mxu0 %v9867_v10  ;;  %v9902_v10 = vld [vmem:[%s14202_s1 + $0x1e24] ss:$16 sps:$4 sm:$0xff]   ;;  %v9903_v15 = vld [vmem:[%s14202_s1 + $0x1c00] ss:$16 sps:$4 sm:$0xff]  }
 0x1d2   : > { %7164 = vmatpush1.bf16.msra.mxu1 %v9870_v49  ;;  %v6831_v38 = vpop.f32.mrf.mxu0  ;;  %7124 = vmatprep.subr.bf16.mxu0 %v9875_v17  ;;  %v9897_v49 = vld [vmem:[%s14202_s1 + $0x1c20] ss:$16 sps:$4 sm:$0xff]   ;;  %v9908_v14 = vld [vmem:[%s14202_s1 + $0x1e04] ss:$16 sps:$4 sm:$0xff]  }
 0x1d3   : > { %v6872_v9 = vpop.f32.mrf.mxu1  ;;  %7165 = vmatprep.subr.bf16.mxu1 %v9878_v18  ;;  %v9906_v16 = vld [vmem:[%s14202_s1 + $0x1e00] ss:$16 sps:$4 sm:$0xff]   ;;  %v9911_v17 = vld [vmem:[%s14202_s1 + $0x1de4] ss:$16 sps:$4 sm:$0xff]  }
 0x1d4   : > { %v9914_v18 = vld [vmem:[%s14202_s1 + $0x1fe4] ss:$16 sps:$4 sm:$0xff]   ;;  %v9909_v20 = vld [vmem:[%s14202_s1 + $0x1de0] ss:$16 sps:$4 sm:$0xff]  }
 0x1d5   : > { %7125 = vmatpush1.bf16.msra.mxu0 %v9873_v4  ;;  %v9912_v4 = vld [vmem:[%s14202_s1 + $0x1fe0] ss:$16 sps:$4 sm:$0xff]   ;;  %v9920_v26 = vld [vmem:[%s14202_s1 + $0x1fc4] ss:$16 sps:$4 sm:$0xff]  }
 0x1d6   : > { %7166 = vmatpush1.bf16.msra.mxu1 %v9876_v25  ;;  %7126 = vmatprep.subr.bf16.mxu0 %v9881_v41  ;;  %v9917_v25 = vld [vmem:[%s14202_s1 + $0x1dc4] ss:$16 sps:$4 sm:$0xff]   ;;  %v9915_v27 = vld [vmem:[%s14202_s1 + $0x1dc0] ss:$16 sps:$4 sm:$0xff]  }
 0x1d7   : > { %7167 = vmatprep.subr.bf16.mxu1 %v9884_v43  ;;  %v9918_v38 = vld [vmem:[%s14202_s1 + $0x1fc0] ss:$16 sps:$4 sm:$0xff]   ;;  %v9923_v9 = vld [vmem:[%s14202_s1 + $0x1da4] ss:$16 sps:$4 sm:$0xff]  }
 0x1d8   : > { %v9926_v41 = vld [vmem:[%s14202_s1 + $0x1fa4] ss:$16 sps:$4 sm:$0xff]   ;;  %v9921_v43 = vld [vmem:[%s14202_s1 + $0x1da0] ss:$16 sps:$4 sm:$0xff]  }
 0x1d9   : > { %7127 = vmatpush1.bf16.msra.mxu0 %v9879_v46  ;;  %v9924_v46 = vld [vmem:[%s14202_s1 + $0x1fa0] ss:$16 sps:$4 sm:$0xff]  }
 0x1da   : > { %7168 = vmatpush1.bf16.msra.mxu1 %v9882_v50  ;;  %7128 = vmatprep.subr.bf16.mxu0 %v9887_v53  ;;  %v9929_v50 = vld [vmem:[%s14202_s1 + $0x1d84] ss:$16 sps:$4 sm:$0xff]  }
 0x1db   : > { %7169 = vmatprep.subr.bf16.mxu1 %v9890_v57  ;;  %v9932_v53 = vld [vmem:[%s14202_s1 + $0x1f84] ss:$16 sps:$4 sm:$0xff]   ;;  %v9927_v57 = vld [vmem:[%s14202_s1 + $0x1d80] ss:$16 sps:$4 sm:$0xff]  }
 0x1dd   : > { %7129 = vmatpush1.bf16.msra.mxu0 %v9885_v58  ;;  %v9930_v58 = vld [vmem:[%s14202_s1 + $0x1f80] ss:$16 sps:$4 sm:$0xff]  }
 0x1de   : > { %7170 = vmatpush1.bf16.msra.mxu1 %v9888_v2  ;;  %7130 = vmatprep.subr.bf16.mxu0 %v9893_v61  ;;  %v9935_v2 = vld [vmem:[%s14202_s1 + $0x1d64] ss:$16 sps:$4 sm:$0xff]  }
 0x1df   : > { %7171 = vmatprep.subr.bf16.mxu1 %v9896_v3  ;;  %v9938_v61 = vld [vmem:[%s14202_s1 + $0x1f64] ss:$16 sps:$4 sm:$0xff]   ;;  %v9933_v3 = vld [vmem:[%s14202_s1 + $0x1d60] ss:$16 sps:$4 sm:$0xff]  }
 0x1e1   : > { %7131 = vmatpush1.bf16.msra.mxu0 %v9891_v5  ;;  %v9936_v5 = vld [vmem:[%s14202_s1 + $0x1f60] ss:$16 sps:$4 sm:$0xff]  }
 0x1e2   : > { %7172 = vmatpush1.bf16.msra.mxu1 %v9894_v7  ;;  %7132 = vmatprep.subr.bf16.mxu0 %v9899_v8  ;;  %v9941_v7 = vld [vmem:[%s14202_s1 + $0x1d44] ss:$16 sps:$4 sm:$0xff]  }
 0x1e3   : > { %7173 = vmatprep.subr.bf16.mxu1 %v9902_v10  ;;  %v9944_v8 = vld [vmem:[%s14202_s1 + $0x1f44] ss:$16 sps:$4 sm:$0xff]   ;;  %v9939_v10 = vld [vmem:[%s14202_s1 + $0x1d40] ss:$16 sps:$4 sm:$0xff]  }
 0x1e5   : > { %7133 = vmatpush1.bf16.msra.mxu0 %v9897_v49  ;;  %v9942_v49 = vld [vmem:[%s14202_s1 + $0x1f40] ss:$16 sps:$4 sm:$0xff]  }
 0x1e6   : > { %7174 = vmatpush1.bf16.msra.mxu1 %v9900_v12  ;;  %7134 = vmatprep.subr.bf16.mxu0 %v9905_v13  ;;  %v9947_v12 = vld [vmem:[%s14202_s1 + $0x1d24] ss:$16 sps:$4 sm:$0xff]  }
 0x1e7   : > { %7175 = vmatprep.subr.bf16.mxu1 %v9908_v14  ;;  %v9950_v13 = vld [vmem:[%s14202_s1 + $0x1f24] ss:$16 sps:$4 sm:$0xff]   ;;  %v9945_v14 = vld [vmem:[%s14202_s1 + $0x1d20] ss:$16 sps:$4 sm:$0xff]  }
 0x1e9   : > { %7135 = vmatpush1.bf16.msra.mxu0 %v9903_v15  ;;  %v9948_v15 = vld [vmem:[%s14202_s1 + $0x1f20] ss:$16 sps:$4 sm:$0xff]  }
 0x1ea   : > { %7176 = vmatpush1.bf16.msra.mxu1 %v9906_v16  ;;  %7136 = vmatprep.subr.bf16.mxu0 %v9911_v17  ;;  %v9953_v16 = vld [vmem:[%s14202_s1 + $0x1d04] ss:$16 sps:$4 sm:$0xff]  }
 0x1eb   : > { %7177 = vmatprep.subr.bf16.mxu1 %v9914_v18  ;;  %v9956_v17 = vld [vmem:[%s14202_s1 + $0x1f04] ss:$16 sps:$4 sm:$0xff]   ;;  %v9951_v18 = vld [vmem:[%s14202_s1 + $0x1d00] ss:$16 sps:$4 sm:$0xff]  }
 0x1ed   : > { %7137 = vmatpush2.bf16.msra.mxu0 %v9909_v20  ;;  %v9954_v20 = vld [vmem:[%s14202_s1 + $0x1f00] ss:$16 sps:$4 sm:$0xff]  }
 0x1ee   : > { %7178 = vmatpush2.bf16.msra.mxu1 %v9912_v4  ;;  %7138 = vmatprep.subr.bf16.mxu0 %v9917_v25  ;;  %v9960_v4 = vld [vmem:[%s14202_s1 + $0xec] ss:$16 sps:$4 sm:$0xff]  }
 0x1ef   : > { %7179 = vmatprep.subr.bf16.mxu1 %v9920_v26  ;;  %v9963_v25 = vld [vmem:[%s14202_s1 + $0x2ec] ss:$16 sps:$4 sm:$0xff]   ;;  %v9958_v26 = vld [vmem:[%s14202_s1 + $0xe8] ss:$16 sps:$4 sm:$0xff]  }
 0x1f1   : > { %7139 = vmatpush2.bf16.msra.mxu0 %v9915_v27  ;;  %v9961_v27 = vld [vmem:[%s14202_s1 + $0x2e8] ss:$16 sps:$4 sm:$0xff]  }
 0x1f2   : > { %7180 = vmatpush2.bf16.msra.mxu1 %v9918_v38  ;;  %7140 = vmatprep.subr.bf16.mxu0 %v9923_v9  ;;  %v9966_v38 = vld [vmem:[%s14202_s1 + $0xcc] ss:$16 sps:$4 sm:$0xff]  }
 0x1f3   : > { %7181 = vmatprep.subr.bf16.mxu1 %v9926_v41  ;;  %v9969_v9 = vld [vmem:[%s14202_s1 + $0x2cc] ss:$16 sps:$4 sm:$0xff]   ;;  %v9964_v41 = vld [vmem:[%s14202_s1 + $0xc8] ss:$16 sps:$4 sm:$0xff]  }
 0x1f5   : > { %7141 = vmatpush2.bf16.msra.mxu0 %v9921_v43  ;;  %v9967_v43 = vld [vmem:[%s14202_s1 + $0x2c8] ss:$16 sps:$4 sm:$0xff]  }
 0x1f6   : > { %7182 = vmatpush2.bf16.msra.mxu1 %v9924_v46  ;;  %7142 = vmatprep.subr.bf16.mxu0 %v9929_v50 }
 0x1f7   : > { %7183 = vmatprep.subr.bf16.mxu1 %v9932_v53 }
 0x1f9   : > { %7143 = vmatpush2.bf16.msra.mxu0 %v9927_v57 }
 0x1fa   : > { %7184 = vmatpush2.bf16.msra.mxu1 %v9930_v58  ;;  %7144 = vmatprep.subr.bf16.mxu0 %v9935_v2  ;;  %v9972_v2 = vld [vmem:[%s14202_s1 + $0xac] ss:$16 sps:$4 sm:$0xff]  }
 0x1fb   : > { %7185 = vmatprep.subr.bf16.mxu1 %v9938_v61  ;;  %v9975_v61 = vld [vmem:[%s14202_s1 + $0x2ac] ss:$16 sps:$4 sm:$0xff]  }
 0x1fd   : > { %7145 = vmatpush2.bf16.msra.mxu0 %v9933_v3 }
 0x1fe   : > { %7186 = vmatpush2.bf16.msra.mxu1 %v9936_v5  ;;  %7146 = vmatprep.subr.bf16.mxu0 %v9941_v7  ;;  %v9973_v7 = vld [vmem:[%s14202_s1 + $0x2a8] ss:$16 sps:$4 sm:$0xff]  }
 0x1ff   : > { %7187 = vmatprep.subr.bf16.mxu1 %v9944_v8 }
 0x201   : > { %7147 = vmatpush2.bf16.msra.mxu0 %v9939_v10 }
 0x202   : > { %7188 = vmatpush2.bf16.msra.mxu1 %v9942_v49  ;;  %7148 = vmatprep.subr.bf16.mxu0 %v9947_v12 }
 0x203   : > { %7189 = vmatprep.subr.bf16.mxu1 %v9950_v13  ;;  %v9978_v13 = vld [vmem:[%s14202_s1 + $0x8c] ss:$16 sps:$4 sm:$0xff]  }
 0x205   : > { %7149 = vmatpush2.bf16.msra.mxu0 %v9945_v14  ;;  %v9979_v14 = vld [vmem:[%s14202_s1 + $0x288] ss:$16 sps:$4 sm:$0xff]  }
 0x206   : > { %7190 = vmatpush2.bf16.msra.mxu1 %v9948_v15  ;;  %7150 = vmatprep.subr.bf16.mxu0 %v9953_v16  ;;  %v9984_v15 = vld [vmem:[%s14202_s1 + $0x6c] ss:$16 sps:$4 sm:$0xff]  }
 0x207   : > { %7191 = vmatprep.subr.bf16.mxu1 %v9956_v17  ;;  %v9987_v16 = vld [vmem:[%s14202_s1 + $0x26c] ss:$16 sps:$4 sm:$0xff]   ;;  %v9982_v17 = vld [vmem:[%s14202_s1 + $0x68] ss:$16 sps:$4 sm:$0xff]  }
 0x209   : > { %7151 = vmatpush2.bf16.msra.mxu0 %v9951_v18  ;;  %v9985_v18 = vld [vmem:[%s14202_s1 + $0x268] ss:$16 sps:$4 sm:$0xff]  }
 0x20a   : > { %7192 = vmatpush2.bf16.msra.mxu1 %v9954_v20  ;;  %7202 = vmatprep.subr.bf16.mxu0 %v9960_v4  ;;  %v9990_v20 = vld [vmem:[%s14202_s1 + $0x4c] ss:$16 sps:$4 sm:$0xff]  }
 0x20b   : > { %7243 = vmatprep.subr.bf16.mxu1 %v9963_v25  ;;  %v9993_v4 = vld [vmem:[%s14202_s1 + $0x24c] ss:$16 sps:$4 sm:$0xff]   ;;  %v9988_v25 = vld [vmem:[%s14202_s1 + $0x48] ss:$16 sps:$4 sm:$0xff]  }
 0x20c   : > { %v6908_v46 = vpop.f32.mrf.mxu0  ;;  %7153 = vmatmul.mubr.bf16.vlgmr.msra.gmra.mxu0 %v12304_v51 }
 0x20d   : > { %v6949_v50 = vpop.f32.mrf.mxu1  ;;  %7194 = vmatmul.mubr.bf16.vlgmr.msra.gmra.mxu1 %v12307_v6  ;;  %v6909_v53 = vadd.f32 %v6908_v46, %v12338_v19  ;;  %7203 = vmatpush1.bf16.msra.mxu0 %v9958_v26  ;;  %v9970_v19 = vld [vmem:[%s14202_s1 + $0xa8] ss:$16 sps:$4 sm:$0xff]   ;;  %v10005_v46 = vld [vmem:[%s14202_s1 + $0x20c] ss:$16 sps:$4 sm:$0xff]  }
 0x20e   : > { %7244 = vmatpush1.bf16.msra.mxu1 %v9961_v27  ;;  %v6910_v57 = vpop.f32.mrf.mxu0  ;;  %7204 = vmatprep.subr.bf16.mxu0 %v9966_v38  ;;  %v9991_v26 = vld [vmem:[%s14202_s1 + $0x248] ss:$16 sps:$4 sm:$0xff]   ;;  %v9996_v27 = vld [vmem:[%s14202_s1 + $0x2c] ss:$16 sps:$4 sm:$0xff]  }
 0x20f   : > { %v6951_v58 = vpop.f32.mrf.mxu1  ;;  %7245 = vmatprep.subr.bf16.mxu1 %v9969_v9  ;;  %v12540_v3 = vadd.f32 %v6949_v50, %v6909_v53  ;;  %v6911_v5 = vadd.f32 %v6910_v57, %v12349_v28  ;;  %7234 = vmatprep.mubr.bf16.mxu0 %v10950_v59  ;;  %v9981_v59 = vld [vmem:[%s14202_s1 + $0x28c] ss:$16 sps:$4 sm:$0xff]   ;;  %v9994_v9 = vld [vmem:[%s14202_s1 + $0x28] ss:$16 sps:$4 sm:$0xff]  }
 0x210   : > { %7275 = vmatprep.mubr.bf16.mxu1 %v10961_v62  ;;  %v6912_v8 = vpop.f32.mrf.mxu0  ;;  %v9976_v62 = vld [vmem:[%s14202_s1 + $0x88] ss:$16 sps:$4 sm:$0xff]   ;;  %v9999_v38 = vld [vmem:[%s14202_s1 + $0x22c] ss:$16 sps:$4 sm:$0xff]  }
 0x211   : > { %v6953_v10 = vpop.f32.mrf.mxu1  ;;  %v12551_v49 = vadd.f32 %v6951_v58, %v6911_v5  ;;  %7205 = vmatpush1.bf16.msra.mxu0 %v9964_v41  ;;  %v9997_v41 = vld [vmem:[%s14202_s1 + $0x228] ss:$16 sps:$4 sm:$0xff]   ;;  %v10008_v57 = vld [vmem:[%s14202_s1 + $0x1ec] ss:$16 sps:$4 sm:$0xff]  }
 0x212   : > { %7246 = vmatpush1.bf16.msra.mxu1 %v9967_v43  ;;  %v6913_v12 = vpop.f32.mrf.mxu0  ;;  %7206 = vmatprep.subr.bf16.mxu0 %v9972_v2  ;;  %v10002_v43 = vld [vmem:[%s14202_s1 + $0xc] ss:$16 sps:$4 sm:$0xff]   ;;  %v10000_v50 = vld [vmem:[%s14202_s1 + $0x8] ss:$16 sps:$4 sm:$0xff]  }
 0x213   : > { %v6954_v28 = vpop.f32.mrf.mxu1  ;;  %7247 = vmatprep.subr.bf16.mxu1 %v9975_v61  ;;  %v10003_v53 = vld [vmem:[%s14202_s1 + $0x208] ss:$16 sps:$4 sm:$0xff]   ;;  %v10011_v58 = vld [vmem:[%s14202_s1 + $0x3ec] ss:$16 sps:$4 sm:$0xff]  }
 0x214   : > { %v10006_v2 = vld [vmem:[%s14202_s1 + $0x1e8] ss:$16 sps:$4 sm:$0xff]   ;;  %v10014_v5 = vld [vmem:[%s14202_s1 + $0x1cc] ss:$16 sps:$4 sm:$0xff]  }
 0x215   : > { %7207 = vmatpush1.bf16.msra.mxu0 %v9970_v19  ;;  %v10009_v61 = vld [vmem:[%s14202_s1 + $0x3e8] ss:$16 sps:$4 sm:$0xff]   ;;  %v10017_v19 = vld [vmem:[%s14202_s1 + $0x3cc] ss:$16 sps:$4 sm:$0xff]  }
 0x216   : > { %7248 = vmatpush1.bf16.msra.mxu1 %v9973_v7  ;;  %7208 = vmatprep.subr.bf16.mxu0 %v9978_v13  ;;  %v10012_v7 = vld [vmem:[%s14202_s1 + $0x1c8] ss:$16 sps:$4 sm:$0xff]   ;;  %v10020_v10 = vld [vmem:[%s14202_s1 + $0x1ac] ss:$16 sps:$4 sm:$0xff]  }
 0x217   : > { %7249 = vmatprep.subr.bf16.mxu1 %v9981_v59  ;;  %v10015_v8 = vld [vmem:[%s14202_s1 + $0x3c8] ss:$16 sps:$4 sm:$0xff]   ;;  %v10023_v12 = vld [vmem:[%s14202_s1 + $0x3ac] ss:$16 sps:$4 sm:$0xff]  }
 0x218   : > { %v10018_v28 = vld [vmem:[%s14202_s1 + $0x1a8] ss:$16 sps:$4 sm:$0xff]   ;;  %v10026_v59 = vld [vmem:[%s14202_s1 + $0x18c] ss:$16 sps:$4 sm:$0xff]  }
 0x219   : > { %7209 = vmatpush1.bf16.msra.mxu0 %v9976_v62  ;;  %v10021_v13 = vld [vmem:[%s14202_s1 + $0x3a8] ss:$16 sps:$4 sm:$0xff]   ;;  %v10029_v62 = vld [vmem:[%s14202_s1 + $0x38c] ss:$16 sps:$4 sm:$0xff]  }
 0x21a   : > { %7250 = vmatpush1.bf16.msra.mxu1 %v9979_v14  ;;  %7210 = vmatprep.subr.bf16.mxu0 %v9984_v15  ;;  %v10024_v14 = vld [vmem:[%s14202_s1 + $0x188] ss:$16 sps:$4 sm:$0xff]  }
 0x21b   : > { %7251 = vmatprep.subr.bf16.mxu1 %v9987_v16  ;;  %v10027_v15 = vld [vmem:[%s14202_s1 + $0x388] ss:$16 sps:$4 sm:$0xff]   ;;  %v10032_v16 = vld [vmem:[%s14202_s1 + $0x16c] ss:$16 sps:$4 sm:$0xff]  }
 0x21d   : > { %7211 = vmatpush1.bf16.msra.mxu0 %v9982_v17  ;;  %v10035_v17 = vld [vmem:[%s14202_s1 + $0x36c] ss:$16 sps:$4 sm:$0xff]  }
 0x21e   : > { %7252 = vmatpush1.bf16.msra.mxu1 %v9985_v18  ;;  %7212 = vmatprep.subr.bf16.mxu0 %v9990_v20  ;;  %v10030_v18 = vld [vmem:[%s14202_s1 + $0x168] ss:$16 sps:$4 sm:$0xff]  }
 0x21f   : > { %7253 = vmatprep.subr.bf16.mxu1 %v9993_v4  ;;  %v10033_v20 = vld [vmem:[%s14202_s1 + $0x368] ss:$16 sps:$4 sm:$0xff]   ;;  %v10038_v4 = vld [vmem:[%s14202_s1 + $0x14c] ss:$16 sps:$4 sm:$0xff]  }
 0x221   : > { %7213 = vmatpush1.bf16.msra.mxu0 %v9988_v25  ;;  %v10041_v25 = vld [vmem:[%s14202_s1 + $0x34c] ss:$16 sps:$4 sm:$0xff]  }
 0x222   : > { %7254 = vmatpush1.bf16.msra.mxu1 %v9991_v26  ;;  %7214 = vmatprep.subr.bf16.mxu0 %v9996_v27  ;;  %v10036_v26 = vld [vmem:[%s14202_s1 + $0x148] ss:$16 sps:$4 sm:$0xff]  }
 0x223   : > { %7255 = vmatprep.subr.bf16.mxu1 %v9999_v38  ;;  %v10039_v27 = vld [vmem:[%s14202_s1 + $0x348] ss:$16 sps:$4 sm:$0xff]   ;;  %v10044_v38 = vld [vmem:[%s14202_s1 + $0x12c] ss:$16 sps:$4 sm:$0xff]  }
 0x225   : > { %7215 = vmatpush1.bf16.msra.mxu0 %v9994_v9  ;;  %v10047_v9 = vld [vmem:[%s14202_s1 + $0x32c] ss:$16 sps:$4 sm:$0xff]  }
 0x226   : > { %7256 = vmatpush1.bf16.msra.mxu1 %v9997_v41  ;;  %7216 = vmatprep.subr.bf16.mxu0 %v10002_v43  ;;  %v10042_v41 = vld [vmem:[%s14202_s1 + $0x128] ss:$16 sps:$4 sm:$0xff]  }
 0x227   : > { %7257 = vmatprep.subr.bf16.mxu1 %v10005_v46  ;;  %v10045_v43 = vld [vmem:[%s14202_s1 + $0x328] ss:$16 sps:$4 sm:$0xff]   ;;  %v10050_v46 = vld [vmem:[%s14202_s1 + $0x10c] ss:$16 sps:$4 sm:$0xff]  }
 0x229   : > { %7217 = vmatpush1.bf16.msra.mxu0 %v10000_v50  ;;  %v10053_v50 = vld [vmem:[%s14202_s1 + $0x30c] ss:$16 sps:$4 sm:$0xff]  }
 0x22a   : > { %7258 = vmatpush1.bf16.msra.mxu1 %v10003_v53  ;;  %7218 = vmatprep.subr.bf16.mxu0 %v10008_v57  ;;  %v10048_v53 = vld [vmem:[%s14202_s1 + $0x108] ss:$16 sps:$4 sm:$0xff]  }
 0x22b   : > { %7259 = vmatprep.subr.bf16.mxu1 %v10011_v58  ;;  %v10051_v57 = vld [vmem:[%s14202_s1 + $0x308] ss:$16 sps:$4 sm:$0xff]   ;;  %v10056_v58 = vld [vmem:[%s14202_s1 + $0x4ec] ss:$16 sps:$4 sm:$0xff]  }
 0x22d   : > { %7219 = vmatpush2.bf16.msra.mxu0 %v10006_v2  ;;  %v10059_v2 = vld [vmem:[%s14202_s1 + $0x6ec] ss:$16 sps:$4 sm:$0xff]  }
 0x22e   : > { %7260 = vmatpush2.bf16.msra.mxu1 %v10009_v61  ;;  %7220 = vmatprep.subr.bf16.mxu0 %v10014_v5  ;;  %v10054_v61 = vld [vmem:[%s14202_s1 + $0x4e8] ss:$16 sps:$4 sm:$0xff]  }
 0x22f   : > { %7261 = vmatprep.subr.bf16.mxu1 %v10017_v19  ;;  %v10057_v5 = vld [vmem:[%s14202_s1 + $0x6e8] ss:$16 sps:$4 sm:$0xff]   ;;  %v10062_v19 = vld [vmem:[%s14202_s1 + $0x4cc] ss:$16 sps:$4 sm:$0xff]  }
 0x231   : > { %7221 = vmatpush2.bf16.msra.mxu0 %v10012_v7  ;;  %v10065_v7 = vld [vmem:[%s14202_s1 + $0x6cc] ss:$16 sps:$4 sm:$0xff]  }
 0x232   : > { %7262 = vmatpush2.bf16.msra.mxu1 %v10015_v8  ;;  %7222 = vmatprep.subr.bf16.mxu0 %v10020_v10 }
 0x233   : > { %7263 = vmatprep.subr.bf16.mxu1 %v10023_v12 }
 0x235   : > { %7223 = vmatpush2.bf16.msra.mxu0 %v10018_v28  ;;  %v10060_v28 = vld [vmem:[%s14202_s1 + $0x4c8] ss:$16 sps:$4 sm:$0xff]  }
 0x236   : > { %7264 = vmatpush2.bf16.msra.mxu1 %v10021_v13  ;;  %7224 = vmatprep.subr.bf16.mxu0 %v10026_v59  ;;  %v10063_v13 = vld [vmem:[%s14202_s1 + $0x6c8] ss:$16 sps:$4 sm:$0xff]  }
 0x237   : > { %7265 = vmatprep.subr.bf16.mxu1 %v10029_v62 }
 0x239   : > { %7225 = vmatpush2.bf16.msra.mxu0 %v10024_v14 }
 0x23a   : > { %7266 = vmatpush2.bf16.msra.mxu1 %v10027_v15  ;;  %7226 = vmatprep.subr.bf16.mxu0 %v10032_v16 }
 0x23b   : > { %7267 = vmatprep.subr.bf16.mxu1 %v10035_v17 }
 0x23d   : > { %7227 = vmatpush2.bf16.msra.mxu0 %v10030_v18  ;;  %v10066_v18 = vld [vmem:[%s14202_s1 + $0x4a8] ss:$16 sps:$4 sm:$0xff]  }
 0x23e   : > { %7268 = vmatpush2.bf16.msra.mxu1 %v10033_v20  ;;  %7228 = vmatprep.subr.bf16.mxu0 %v10038_v4  ;;  %v10069_v20 = vld [vmem:[%s14202_s1 + $0x6a8] ss:$16 sps:$4 sm:$0xff]  }
 0x23f   : > { %7269 = vmatprep.subr.bf16.mxu1 %v10041_v25  ;;  %v10072_v25 = vld [vmem:[%s14202_s1 + $0x488] ss:$16 sps:$4 sm:$0xff]  }
 0x241   : > { %7229 = vmatpush2.bf16.msra.mxu0 %v10036_v26  ;;  %v10075_v26 = vld [vmem:[%s14202_s1 + $0x688] ss:$16 sps:$4 sm:$0xff]  }
 0x242   : > { %7270 = vmatpush2.bf16.msra.mxu1 %v10039_v27  ;;  %7230 = vmatprep.subr.bf16.mxu0 %v10044_v38  ;;  %v10080_v27 = vld [vmem:[%s14202_s1 + $0x46c] ss:$16 sps:$4 sm:$0xff]  }
 0x243   : > { %7271 = vmatprep.subr.bf16.mxu1 %v10047_v9  ;;  %v10083_v38 = vld [vmem:[%s14202_s1 + $0x66c] ss:$16 sps:$4 sm:$0xff]   ;;  %v10078_v9 = vld [vmem:[%s14202_s1 + $0x468] ss:$16 sps:$4 sm:$0xff]  }
 0x245   : > { %7231 = vmatpush2.bf16.msra.mxu0 %v10042_v41  ;;  %v10081_v41 = vld [vmem:[%s14202_s1 + $0x668] ss:$16 sps:$4 sm:$0xff]  }
 0x246   : > { %7272 = vmatpush2.bf16.msra.mxu1 %v10045_v43  ;;  %7232 = vmatprep.subr.bf16.mxu0 %v10050_v46  ;;  %v10086_v43 = vld [vmem:[%s14202_s1 + $0x44c] ss:$16 sps:$4 sm:$0xff]  }
 0x247   : > { %7273 = vmatprep.subr.bf16.mxu1 %v10053_v50  ;;  %v10089_v46 = vld [vmem:[%s14202_s1 + $0x64c] ss:$16 sps:$4 sm:$0xff]   ;;  %v10084_v50 = vld [vmem:[%s14202_s1 + $0x448] ss:$16 sps:$4 sm:$0xff]  }
 0x249   : > { %7233 = vmatpush2.bf16.msra.mxu0 %v10048_v53  ;;  %v10087_v53 = vld [vmem:[%s14202_s1 + $0x648] ss:$16 sps:$4 sm:$0xff]  }
 0x24a   : > { %7274 = vmatpush2.bf16.msra.mxu1 %v10051_v57  ;;  %7284 = vmatprep.subr.bf16.mxu0 %v10056_v58  ;;  %v10092_v57 = vld [vmem:[%s14202_s1 + $0x42c] ss:$16 sps:$4 sm:$0xff]  }
 0x24b   : > { %7325 = vmatprep.subr.bf16.mxu1 %v10059_v2  ;;  %v10095_v58 = vld [vmem:[%s14202_s1 + $0x62c] ss:$16 sps:$4 sm:$0xff]   ;;  %v10090_v2 = vld [vmem:[%s14202_s1 + $0x428] ss:$16 sps:$4 sm:$0xff]  }
 0x24c   : > { %v6990_v8 = vpop.f32.mrf.mxu0  ;;  %7235 = vmatmul.mubr.bf16.vlgmr.msra.gmra.mxu0 %v10937_v54  ;;  %v10068_v54 = vld [vmem:[%s14202_s1 + $0x4ac] ss:$16 sps:$4 sm:$0xff]  }
 0x24d   : > { %v7031_v10 = vpop.f32.mrf.mxu1  ;;  %7276 = vmatmul.mubr.bf16.vlgmr.msra.gmra.mxu1 %v10953_v60  ;;  %v6991_v12 = vadd.f32 %v6990_v8, %v12540_v3  ;;  %7285 = vmatpush1.bf16.msra.mxu0 %v10054_v61  ;;  %v10071_v60 = vld [vmem:[%s14202_s1 + $0x6ac] ss:$16 sps:$4 sm:$0xff]   ;;  %v10093_v61 = vld [vmem:[%s14202_s1 + $0x628] ss:$16 sps:$4 sm:$0xff]  }
 0x24e   : > { %7326 = vmatpush1.bf16.msra.mxu1 %v10057_v5  ;;  %v6992_v59 = vpop.f32.mrf.mxu0  ;;  %7286 = vmatprep.subr.bf16.mxu0 %v10062_v19  ;;  %v10098_v5 = vld [vmem:[%s14202_s1 + $0x40c] ss:$16 sps:$4 sm:$0xff]   ;;  %v10099_v8 = vld [vmem:[%s14202_s1 + $0x608] ss:$16 sps:$4 sm:$0xff]  }
 0x24f   : > { %v7033_v62 = vpop.f32.mrf.mxu1  ;;  %7327 = vmatprep.subr.bf16.mxu1 %v10065_v7  ;;  %v12742_v3 = vadd.f32 %v7031_v10, %v6991_v12  ;;  %v6993_v14 = vadd.f32 %v6992_v59, %v12551_v49  ;;  %7316 = vmatprep.mubr.bf16.mxu0 %v11095_v44  ;;  %v10074_v44 = vld [vmem:[%s14202_s1 + $0x48c] ss:$16 sps:$4 sm:$0xff]   ;;  %v10096_v7 = vld [vmem:[%s14202_s1 + $0x408] ss:$16 sps:$4 sm:$0xff]  }
 0x250   : > { %7357 = vmatprep.mubr.bf16.mxu1 %v11109_v48  ;;  %v6994_v15 = vpop.f32.mrf.mxu0  ;;  %v10077_v48 = vld [vmem:[%s14202_s1 + $0x68c] ss:$16 sps:$4 sm:$0xff]  }
 0x251   : > { %v7035_v16 = vpop.f32.mrf.mxu1  ;;  %v12747_v17 = vadd.f32 %v7033_v62, %v6993_v14  ;;  %7287 = vmatpush1.bf16.msra.mxu0 %v10060_v28  ;;  %v10101_v19 = vld [vmem:[%s14202_s1 + $0x60c] ss:$16 sps:$4 sm:$0xff]   ;;  %v10102_v28 = vld [vmem:[%s14202_s1 + $0x5e8] ss:$16 sps:$4 sm:$0xff]  }
 0x252   : > { %7328 = vmatpush1.bf16.msra.mxu1 %v10063_v13  ;;  %v6995_v4 = vpop.f32.mrf.mxu0  ;;  %7288 = vmatprep.subr.bf16.mxu0 %v10068_v54  ;;  %v10104_v10 = vld [vmem:[%s14202_s1 + $0x5ec] ss:$16 sps:$4 sm:$0xff]   ;;  %v10105_v13 = vld [vmem:[%s14202_s1 + $0x7e8] ss:$16 sps:$4 sm:$0xff]  }
 0x253   : > { %v7036_v49 = vpop.f32.mrf.mxu1  ;;  %7329 = vmatprep.subr.bf16.mxu1 %v10071_v60  ;;  %v10107_v12 = vld [vmem:[%s14202_s1 + $0x7ec] ss:$16 sps:$4 sm:$0xff]   ;;  %v10108_v54 = vld [vmem:[%s14202_s1 + $0x5c8] ss:$16 sps:$4 sm:$0xff]  }
 0x254   : > { %v10110_v59 = vld [vmem:[%s14202_s1 + $0x5cc] ss:$16 sps:$4 sm:$0xff]   ;;  %v10111_v60 = vld [vmem:[%s14202_s1 + $0x7c8] ss:$16 sps:$4 sm:$0xff]  }
 0x255   : > { %7289 = vmatpush1.bf16.msra.mxu0 %v10066_v18  ;;  %v10113_v62 = vld [vmem:[%s14202_s1 + $0x7cc] ss:$16 sps:$4 sm:$0xff]   ;;  %v10114_v16 = vld [vmem:[%s14202_s1 + $0x5a8] ss:$16 sps:$4 sm:$0xff]  }
 0x256   : > { %7330 = vmatpush1.bf16.msra.mxu1 %v10069_v20  ;;  %7290 = vmatprep.subr.bf16.mxu0 %v10074_v44  ;;  %v10116_v14 = vld [vmem:[%s14202_s1 + $0x5ac] ss:$16 sps:$4 sm:$0xff]   ;;  %v10117_v18 = vld [vmem:[%s14202_s1 + $0x7a8] ss:$16 sps:$4 sm:$0xff]  }
 0x257   : > { %7331 = vmatprep.subr.bf16.mxu1 %v10077_v48  ;;  %v10119_v15 = vld [vmem:[%s14202_s1 + $0x7ac] ss:$16 sps:$4 sm:$0xff]   ;;  %v10120_v49 = vld [vmem:[%s14202_s1 + $0x588] ss:$16 sps:$4 sm:$0xff]  }
 0x258   : > { %v10122_v20 = vld [vmem:[%s14202_s1 + $0x58c] ss:$16 sps:$4 sm:$0xff]   ;;  %v10123_v44 = vld [vmem:[%s14202_s1 + $0x788] ss:$16 sps:$4 sm:$0xff]  }
 0x259   : > { %7291 = vmatpush1.bf16.msra.mxu0 %v10072_v25  ;;  %v10125_v4 = vld [vmem:[%s14202_s1 + $0x78c] ss:$16 sps:$4 sm:$0xff]  }
 0x25a   : > { %7332 = vmatpush1.bf16.msra.mxu1 %v10075_v26  ;;  %7292 = vmatprep.subr.bf16.mxu0 %v10080_v27  ;;  %v10128_v48 = vld [vmem:[%s14202_s1 + $0x56c] ss:$16 sps:$4 sm:$0xff]   ;;  %v10126_v26 = vld [vmem:[%s14202_s1 + $0x568] ss:$16 sps:$4 sm:$0xff]  }
 0x25b   : > { %7333 = vmatprep.subr.bf16.mxu1 %v10083_v38  ;;  %v10131_v25 = vld [vmem:[%s14202_s1 + $0x76c] ss:$16 sps:$4 sm:$0xff]   ;;  %v10129_v27 = vld [vmem:[%s14202_s1 + $0x768] ss:$16 sps:$4 sm:$0xff]  }
 0x25c   : > { %v10134_v38 = vld [vmem:[%s14202_s1 + $0x54c] ss:$16 sps:$4 sm:$0xff]  }
 0x25d   : > { %7293 = vmatpush1.bf16.msra.mxu0 %v10078_v9  ;;  %v10137_v9 = vld [vmem:[%s14202_s1 + $0x74c] ss:$16 sps:$4 sm:$0xff]  }
 0x25e   : > { %7334 = vmatpush1.bf16.msra.mxu1 %v10081_v41  ;;  %7294 = vmatprep.subr.bf16.mxu0 %v10086_v43  ;;  %v10132_v41 = vld [vmem:[%s14202_s1 + $0x548] ss:$16 sps:$4 sm:$0xff]  }
 0x25f   : > { %7335 = vmatprep.subr.bf16.mxu1 %v10089_v46  ;;  %v10135_v43 = vld [vmem:[%s14202_s1 + $0x748] ss:$16 sps:$4 sm:$0xff]   ;;  %v10140_v46 = vld [vmem:[%s14202_s1 + $0x52c] ss:$16 sps:$4 sm:$0xff]  }
 0x261   : > { %7295 = vmatpush1.bf16.msra.mxu0 %v10084_v50  ;;  %v10143_v50 = vld [vmem:[%s14202_s1 + $0x72c] ss:$16 sps:$4 sm:$0xff]  }
 0x262   : > { %7336 = vmatpush1.bf16.msra.mxu1 %v10087_v53  ;;  %7296 = vmatprep.subr.bf16.mxu0 %v10092_v57  ;;  %v10138_v53 = vld [vmem:[%s14202_s1 + $0x528] ss:$16 sps:$4 sm:$0xff]  }
 0x263   : > { %7337 = vmatprep.subr.bf16.mxu1 %v10095_v58  ;;  %v10141_v57 = vld [vmem:[%s14202_s1 + $0x728] ss:$16 sps:$4 sm:$0xff]   ;;  %v10146_v58 = vld [vmem:[%s14202_s1 + $0x50c] ss:$16 sps:$4 sm:$0xff]  }
 0x265   : > { %7297 = vmatpush1.bf16.msra.mxu0 %v10090_v2  ;;  %v10149_v2 = vld [vmem:[%s14202_s1 + $0x70c] ss:$16 sps:$4 sm:$0xff]  }
 0x266   : > { %7338 = vmatpush1.bf16.msra.mxu1 %v10093_v61  ;;  %7298 = vmatprep.subr.bf16.mxu0 %v10098_v5  ;;  %v10144_v61 = vld [vmem:[%s14202_s1 + $0x508] ss:$16 sps:$4 sm:$0xff]  }
 0x267   : > { %7339 = vmatprep.subr.bf16.mxu1 %v10101_v19  ;;  %v10147_v5 = vld [vmem:[%s14202_s1 + $0x708] ss:$16 sps:$4 sm:$0xff]   ;;  %v10152_v19 = vld [vmem:[%s14202_s1 + $0x8ec] ss:$16 sps:$4 sm:$0xff]  }
 0x269   : > { %7299 = vmatpush1.bf16.msra.mxu0 %v10096_v7  ;;  %v10155_v7 = vld [vmem:[%s14202_s1 + $0xaec] ss:$16 sps:$4 sm:$0xff]  }
 0x26a   : > { %7340 = vmatpush1.bf16.msra.mxu1 %v10099_v8  ;;  %7300 = vmatprep.subr.bf16.mxu0 %v10104_v10  ;;  %v10150_v8 = vld [vmem:[%s14202_s1 + $0x8e8] ss:$16 sps:$4 sm:$0xff]  }
 0x26b   : > { %7341 = vmatprep.subr.bf16.mxu1 %v10107_v12  ;;  %v10153_v10 = vld [vmem:[%s14202_s1 + $0xae8] ss:$16 sps:$4 sm:$0xff]   ;;  %v10158_v12 = vld [vmem:[%s14202_s1 + $0x8cc] ss:$16 sps:$4 sm:$0xff]  }
 0x26d   : > { %7301 = vmatpush2.bf16.msra.mxu0 %v10102_v28  ;;  %v10161_v28 = vld [vmem:[%s14202_s1 + $0xacc] ss:$16 sps:$4 sm:$0xff]  }
 0x26e   : > { %7342 = vmatpush2.bf16.msra.mxu1 %v10105_v13  ;;  %7302 = vmatprep.subr.bf16.mxu0 %v10110_v59 }
 0x26f   : > { %7343 = vmatprep.subr.bf16.mxu1 %v10113_v62 }
 0x271   : > { %7303 = vmatpush2.bf16.msra.mxu0 %v10108_v54  ;;  %v10156_v54 = vld [vmem:[%s14202_s1 + $0x8c8] ss:$16 sps:$4 sm:$0xff]  }
 0x272   : > { %7344 = vmatpush2.bf16.msra.mxu1 %v10111_v60  ;;  %7304 = vmatprep.subr.bf16.mxu0 %v10116_v14  ;;  %v10159_v60 = vld [vmem:[%s14202_s1 + $0xac8] ss:$16 sps:$4 sm:$0xff]  }
 0x273   : > { %7345 = vmatprep.subr.bf16.mxu1 %v10119_v15 }
 0x275   : > { %7305 = vmatpush2.bf16.msra.mxu0 %v10114_v16 }
 0x276   : > { %7346 = vmatpush2.bf16.msra.mxu1 %v10117_v18  ;;  %7306 = vmatprep.subr.bf16.mxu0 %v10122_v20 }
 0x277   : > { %7347 = vmatprep.subr.bf16.mxu1 %v10125_v4 }
 0x279   : > { %7307 = vmatpush2.bf16.msra.mxu0 %v10120_v49  ;;  %v10162_v49 = vld [vmem:[%s14202_s1 + $0x8a8] ss:$16 sps:$4 sm:$0xff]  }
 0x27a   : > { %7348 = vmatpush2.bf16.msra.mxu1 %v10123_v44  ;;  %7308 = vmatprep.subr.bf16.mxu0 %v10128_v48  ;;  %v10165_v44 = vld [vmem:[%s14202_s1 + $0xaa8] ss:$16 sps:$4 sm:$0xff]  }
 0x27b   : > { %7349 = vmatprep.subr.bf16.mxu1 %v10131_v25  ;;  %v10168_v25 = vld [vmem:[%s14202_s1 + $0x888] ss:$16 sps:$4 sm:$0xff]  }
 0x27d   : > { %7309 = vmatpush2.bf16.msra.mxu0 %v10126_v26  ;;  %v10171_v26 = vld [vmem:[%s14202_s1 + $0xa88] ss:$16 sps:$4 sm:$0xff]  }
 0x27e   : > { %7350 = vmatpush2.bf16.msra.mxu1 %v10129_v27  ;;  %7310 = vmatprep.subr.bf16.mxu0 %v10134_v38  ;;  %v10176_v27 = vld [vmem:[%s14202_s1 + $0x86c] ss:$16 sps:$4 sm:$0xff]  }
 0x27f   : > { %7351 = vmatprep.subr.bf16.mxu1 %v10137_v9  ;;  %v10179_v38 = vld [vmem:[%s14202_s1 + $0xa6c] ss:$16 sps:$4 sm:$0xff]   ;;  %v10174_v9 = vld [vmem:[%s14202_s1 + $0x868] ss:$16 sps:$4 sm:$0xff]  }
 0x281   : > { %7311 = vmatpush2.bf16.msra.mxu0 %v10132_v41  ;;  %v10177_v41 = vld [vmem:[%s14202_s1 + $0xa68] ss:$16 sps:$4 sm:$0xff]  }
 0x282   : > { %7352 = vmatpush2.bf16.msra.mxu1 %v10135_v43  ;;  %7312 = vmatprep.subr.bf16.mxu0 %v10140_v46  ;;  %v10182_v43 = vld [vmem:[%s14202_s1 + $0x84c] ss:$16 sps:$4 sm:$0xff]  }
 0x283   : > { %7353 = vmatprep.subr.bf16.mxu1 %v10143_v50  ;;  %v10185_v46 = vld [vmem:[%s14202_s1 + $0xa4c] ss:$16 sps:$4 sm:$0xff]   ;;  %v10180_v50 = vld [vmem:[%s14202_s1 + $0x848] ss:$16 sps:$4 sm:$0xff]  }
 0x285   : > { %7313 = vmatpush2.bf16.msra.mxu0 %v10138_v53  ;;  %v10183_v53 = vld [vmem:[%s14202_s1 + $0xa48] ss:$16 sps:$4 sm:$0xff]  }
 0x286   : > { %7354 = vmatpush2.bf16.msra.mxu1 %v10141_v57  ;;  %7314 = vmatprep.subr.bf16.mxu0 %v10146_v58  ;;  %v10188_v57 = vld [vmem:[%s14202_s1 + $0x82c] ss:$16 sps:$4 sm:$0xff]  }
 0x287   : > { %7355 = vmatprep.subr.bf16.mxu1 %v10149_v2  ;;  %v10191_v58 = vld [vmem:[%s14202_s1 + $0xa2c] ss:$16 sps:$4 sm:$0xff]   ;;  %v10186_v2 = vld [vmem:[%s14202_s1 + $0x828] ss:$16 sps:$4 sm:$0xff]  }
 0x289   : > { %7315 = vmatpush2.bf16.msra.mxu0 %v10144_v61  ;;  %v10189_v61 = vld [vmem:[%s14202_s1 + $0xa28] ss:$16 sps:$4 sm:$0xff]  }
 0x28a   : > { %7356 = vmatpush2.bf16.msra.mxu1 %v10147_v5  ;;  %7366 = vmatprep.subr.bf16.mxu0 %v10152_v19  ;;  %v10194_v5 = vld [vmem:[%s14202_s1 + $0x80c] ss:$16 sps:$4 sm:$0xff]  }
 0x28b   : > { %7407 = vmatprep.subr.bf16.mxu1 %v10155_v7  ;;  %v10197_v19 = vld [vmem:[%s14202_s1 + $0xa0c] ss:$16 sps:$4 sm:$0xff]   ;;  %v10192_v7 = vld [vmem:[%s14202_s1 + $0x808] ss:$16 sps:$4 sm:$0xff]  }
 0x28c   : > { %v7072_v13 = vpop.f32.mrf.mxu0  ;;  %7317 = vmatmul.mubr.bf16.vlgmr.msra.gmra.mxu0 %v11085_v39  ;;  %v10164_v39 = vld [vmem:[%s14202_s1 + $0x8ac] ss:$16 sps:$4 sm:$0xff]  }
 0x28d   : > { %v7113_v59 = vpop.f32.mrf.mxu1  ;;  %7358 = vmatmul.mubr.bf16.vlgmr.msra.gmra.mxu1 %v11098_v45  ;;  %v7073_v62 = vadd.f32 %v7072_v13, %v12742_v3  ;;  %7367 = vmatpush1.bf16.msra.mxu0 %v10150_v8  ;;  %v10167_v45 = vld [vmem:[%s14202_s1 + $0xaac] ss:$16 sps:$4 sm:$0xff]   ;;  %v10195_v8 = vld [vmem:[%s14202_s1 + $0xa08] ss:$16 sps:$4 sm:$0xff]  }
 0x28e   : > { %7408 = vmatpush1.bf16.msra.mxu1 %v10153_v10  ;;  %v7074_v14 = vpop.f32.mrf.mxu0  ;;  %7368 = vmatprep.subr.bf16.mxu0 %v10158_v12  ;;  %v10200_v10 = vld [vmem:[%s14202_s1 + $0x9ec] ss:$16 sps:$4 sm:$0xff]   ;;  %v10201_v13 = vld [vmem:[%s14202_s1 + $0xbe8] ss:$16 sps:$4 sm:$0xff]  }
 0x28f   : > { %v7115_v15 = vpop.f32.mrf.mxu1  ;;  %7409 = vmatprep.subr.bf16.mxu1 %v10161_v28  ;;  %v12944_v3 = vadd.f32 %v7113_v59, %v7073_v62  ;;  %v7075_v16 = vadd.f32 %v7074_v14, %v12747_v17  ;;  %7398 = vmatprep.mubr.bf16.mxu0 %v11243_v34  ;;  %v10170_v34 = vld [vmem:[%s14202_s1 + $0x88c] ss:$16 sps:$4 sm:$0xff]   ;;  %v10198_v28 = vld [vmem:[%s14202_s1 + $0x9e8] ss:$16 sps:$4 sm:$0xff]  }
 0x290   : > { %7439 = vmatprep.mubr.bf16.mxu1 %v11259_v40  ;;  %v7076_v18 = vpop.f32.mrf.mxu0  ;;  %v10173_v40 = vld [vmem:[%s14202_s1 + $0xa8c] ss:$16 sps:$4 sm:$0xff]  }
 0x291   : > { %v7117_v20 = vpop.f32.mrf.mxu1  ;;  %v12949_v4 = vadd.f32 %v7115_v15, %v7075_v16  ;;  %7369 = vmatpush1.bf16.msra.mxu0 %v10156_v54  ;;  %v10203_v12 = vld [vmem:[%s14202_s1 + $0xbec] ss:$16 sps:$4 sm:$0xff]   ;;  %v10204_v54 = vld [vmem:[%s14202_s1 + $0x9c8] ss:$16 sps:$4 sm:$0xff]  }
 0x292   : > { %7410 = vmatpush1.bf16.msra.mxu1 %v10159_v60  ;;  %v7077_v48 = vpop.f32.mrf.mxu0  ;;  %7370 = vmatprep.subr.bf16.mxu0 %v10164_v39  ;;  %v10206_v59 = vld [vmem:[%s14202_s1 + $0x9cc] ss:$16 sps:$4 sm:$0xff]   ;;  %v10207_v60 = vld [vmem:[%s14202_s1 + $0xbc8] ss:$16 sps:$4 sm:$0xff]  }
 0x293   : > { %v7118_v17 = vpop.f32.mrf.mxu1  ;;  %7411 = vmatprep.subr.bf16.mxu1 %v10167_v45  ;;  %v10209_v62 = vld [vmem:[%s14202_s1 + $0xbcc] ss:$16 sps:$4 sm:$0xff]   ;;  %v10210_v39 = vld [vmem:[%s14202_s1 + $0x9a8] ss:$16 sps:$4 sm:$0xff]  }
 0x294   : > { %v10212_v14 = vld [vmem:[%s14202_s1 + $0x9ac] ss:$16 sps:$4 sm:$0xff]   ;;  %v10213_v45 = vld [vmem:[%s14202_s1 + $0xba8] ss:$16 sps:$4 sm:$0xff]  }
 0x295   : > { %7371 = vmatpush1.bf16.msra.mxu0 %v10162_v49  ;;  %v10215_v15 = vld [vmem:[%s14202_s1 + $0xbac] ss:$16 sps:$4 sm:$0xff]   ;;  %v10216_v20 = vld [vmem:[%s14202_s1 + $0x988] ss:$16 sps:$4 sm:$0xff]  }
 0x296   : > { %7412 = vmatpush1.bf16.msra.mxu1 %v10165_v44  ;;  %7372 = vmatprep.subr.bf16.mxu0 %v10170_v34  ;;  %v10218_v16 = vld [vmem:[%s14202_s1 + $0x98c] ss:$16 sps:$4 sm:$0xff]   ;;  %v10219_v49 = vld [vmem:[%s14202_s1 + $0xb88] ss:$16 sps:$4 sm:$0xff]  }
 0x297   : > { %7413 = vmatprep.subr.bf16.mxu1 %v10173_v40  ;;  %v10221_v18 = vld [vmem:[%s14202_s1 + $0xb8c] ss:$16 sps:$4 sm:$0xff]   ;;  %v10222_v17 = vld [vmem:[%s14202_s1 + $0x968] ss:$16 sps:$4 sm:$0xff]  }
 0x298   : > { %v10224_v44 = vld [vmem:[%s14202_s1 + $0x96c] ss:$16 sps:$4 sm:$0xff]   ;;  %v10225_v34 = vld [vmem:[%s14202_s1 + $0xb68] ss:$16 sps:$4 sm:$0xff]  }
 0x299   : > { %7373 = vmatpush1.bf16.msra.mxu0 %v10168_v25  ;;  %v10227_v48 = vld [vmem:[%s14202_s1 + $0xb6c] ss:$16 sps:$4 sm:$0xff]  }
 0x29a   : > { %7414 = vmatpush1.bf16.msra.mxu1 %v10171_v26  ;;  %7374 = vmatprep.subr.bf16.mxu0 %v10176_v27  ;;  %v10230_v40 = vld [vmem:[%s14202_s1 + $0x94c] ss:$16 sps:$4 sm:$0xff]   ;;  %v10228_v26 = vld [vmem:[%s14202_s1 + $0x948] ss:$16 sps:$4 sm:$0xff]  }
 0x29b   : > { %7415 = vmatprep.subr.bf16.mxu1 %v10179_v38  ;;  %v10233_v25 = vld [vmem:[%s14202_s1 + $0xb4c] ss:$16 sps:$4 sm:$0xff]   ;;  %v10231_v27 = vld [vmem:[%s14202_s1 + $0xb48] ss:$16 sps:$4 sm:$0xff]  }
 0x29c   : > { %v10236_v38 = vld [vmem:[%s14202_s1 + $0x92c] ss:$16 sps:$4 sm:$0xff]  }
 0x29d   : > { %7375 = vmatpush1.bf16.msra.mxu0 %v10174_v9  ;;  %v10239_v9 = vld [vmem:[%s14202_s1 + $0xb2c] ss:$16 sps:$4 sm:$0xff]  }
 0x29e   : > { %7416 = vmatpush1.bf16.msra.mxu1 %v10177_v41  ;;  %7376 = vmatprep.subr.bf16.mxu0 %v10182_v43  ;;  %v10234_v41 = vld [vmem:[%s14202_s1 + $0x928] ss:$16 sps:$4 sm:$0xff]  }
 0x29f   : > { %7417 = vmatprep.subr.bf16.mxu1 %v10185_v46  ;;  %v10237_v43 = vld [vmem:[%s14202_s1 + $0xb28] ss:$16 sps:$4 sm:$0xff]   ;;  %v10242_v46 = vld [vmem:[%s14202_s1 + $0x90c] ss:$16 sps:$4 sm:$0xff]  }
 0x2a1   : > { %7377 = vmatpush1.bf16.msra.mxu0 %v10180_v50  ;;  %v10245_v50 = vld [vmem:[%s14202_s1 + $0xb0c] ss:$16 sps:$4 sm:$0xff]  }
 0x2a2   : > { %7418 = vmatpush1.bf16.msra.mxu1 %v10183_v53  ;;  %7378 = vmatprep.subr.bf16.mxu0 %v10188_v57  ;;  %v10240_v53 = vld [vmem:[%s14202_s1 + $0x908] ss:$16 sps:$4 sm:$0xff]  }
 0x2a3   : > { %7419 = vmatprep.subr.bf16.mxu1 %v10191_v58  ;;  %v10243_v57 = vld [vmem:[%s14202_s1 + $0xb08] ss:$16 sps:$4 sm:$0xff]   ;;  %v10248_v58 = vld [vmem:[%s14202_s1 + $0xcec] ss:$16 sps:$4 sm:$0xff]  }
 0x2a5   : > { %7379 = vmatpush1.bf16.msra.mxu0 %v10186_v2  ;;  %v10251_v2 = vld [vmem:[%s14202_s1 + $0xeec] ss:$16 sps:$4 sm:$0xff]  }
 0x2a6   : > { %7420 = vmatpush1.bf16.msra.mxu1 %v10189_v61  ;;  %7380 = vmatprep.subr.bf16.mxu0 %v10194_v5  ;;  %v10246_v61 = vld [vmem:[%s14202_s1 + $0xce8] ss:$16 sps:$4 sm:$0xff]  }
 0x2a7   : > { %7421 = vmatprep.subr.bf16.mxu1 %v10197_v19  ;;  %v10249_v5 = vld [vmem:[%s14202_s1 + $0xee8] ss:$16 sps:$4 sm:$0xff]   ;;  %v10254_v19 = vld [vmem:[%s14202_s1 + $0xccc] ss:$16 sps:$4 sm:$0xff]  }
 0x2a9   : > { %7381 = vmatpush1.bf16.msra.mxu0 %v10192_v7  ;;  %v10257_v7 = vld [vmem:[%s14202_s1 + $0xecc] ss:$16 sps:$4 sm:$0xff]  }
 0x2aa   : > { %7422 = vmatpush1.bf16.msra.mxu1 %v10195_v8  ;;  %7382 = vmatprep.subr.bf16.mxu0 %v10200_v10 }
 0x2ab   : > { %7423 = vmatprep.subr.bf16.mxu1 %v10203_v12 }
 0x2ad   : > { %7383 = vmatpush2.bf16.msra.mxu0 %v10198_v28  ;;  %v10252_v28 = vld [vmem:[%s14202_s1 + $0xcc8] ss:$16 sps:$4 sm:$0xff]  }
 0x2ae   : > { %7424 = vmatpush2.bf16.msra.mxu1 %v10201_v13  ;;  %7384 = vmatprep.subr.bf16.mxu0 %v10206_v59  ;;  %v10255_v13 = vld [vmem:[%s14202_s1 + $0xec8] ss:$16 sps:$4 sm:$0xff]  }
 0x2af   : > { %7425 = vmatprep.subr.bf16.mxu1 %v10209_v62 }
 0x2b1   : > { %7385 = vmatpush2.bf16.msra.mxu0 %v10204_v54 }
 0x2b2   : > { %7426 = vmatpush2.bf16.msra.mxu1 %v10207_v60  ;;  %7386 = vmatprep.subr.bf16.mxu0 %v10212_v14 }
 0x2b3   : > { %7427 = vmatprep.subr.bf16.mxu1 %v10215_v15 }
 0x2b5   : > { %7387 = vmatpush2.bf16.msra.mxu0 %v10210_v39 }
 0x2b6   : > { %7428 = vmatpush2.bf16.msra.mxu1 %v10213_v45  ;;  %7388 = vmatprep.subr.bf16.mxu0 %v10218_v16  ;;  %v10258_v45 = vld [vmem:[%s14202_s1 + $0xca8] ss:$16 sps:$4 sm:$0xff]  }
 0x2b7   : > { %7429 = vmatprep.subr.bf16.mxu1 %v10221_v18  ;;  %v10261_v16 = vld [vmem:[%s14202_s1 + $0xea8] ss:$16 sps:$4 sm:$0xff]  }
 0x2b9   : > { %7389 = vmatpush2.bf16.msra.mxu0 %v10216_v20  ;;  %v10269_v20 = vld [vmem:[%s14202_s1 + $0xe8c] ss:$16 sps:$4 sm:$0xff]  }
 0x2ba   : > { %7430 = vmatpush2.bf16.msra.mxu1 %v10219_v49  ;;  %7390 = vmatprep.subr.bf16.mxu0 %v10224_v44 }
 0x2bb   : > { %7431 = vmatprep.subr.bf16.mxu1 %v10227_v48 }
 0x2bd   : > { %7391 = vmatpush2.bf16.msra.mxu0 %v10222_v17  ;;  %v10264_v17 = vld [vmem:[%s14202_s1 + $0xc88] ss:$16 sps:$4 sm:$0xff]  }
 0x2be   : > { %7432 = vmatpush2.bf16.msra.mxu1 %v10225_v34  ;;  %7392 = vmatprep.subr.bf16.mxu0 %v10230_v40  ;;  %v10267_v34 = vld [vmem:[%s14202_s1 + $0xe88] ss:$16 sps:$4 sm:$0xff]  }
 0x2bf   : > { %7433 = vmatprep.subr.bf16.mxu1 %v10233_v25 }
 0x2c1   : > { %7393 = vmatpush2.bf16.msra.mxu0 %v10228_v26  ;;  %v10272_v26 = vld [vmem:[%s14202_s1 + $0xc6c] ss:$16 sps:$4 sm:$0xff]  }
 0x2c2   : > { %7434 = vmatpush2.bf16.msra.mxu1 %v10231_v27  ;;  %7394 = vmatprep.subr.bf16.mxu0 %v10236_v38  ;;  %v10275_v27 = vld [vmem:[%s14202_s1 + $0xe6c] ss:$16 sps:$4 sm:$0xff]  }
 0x2c3   : > { %7435 = vmatprep.subr.bf16.mxu1 %v10239_v9 }
 0x2c5   : > { %7395 = vmatpush2.bf16.msra.mxu0 %v10234_v41  ;;  %v10270_v41 = vld [vmem:[%s14202_s1 + $0xc68] ss:$16 sps:$4 sm:$0xff]  }
 0x2c6   : > { %7436 = vmatpush2.bf16.msra.mxu1 %v10237_v43  ;;  %7396 = vmatprep.subr.bf16.mxu0 %v10242_v46  ;;  %v10273_v43 = vld [vmem:[%s14202_s1 + $0xe68] ss:$16 sps:$4 sm:$0xff]  }
 0x2c7   : > { %7437 = vmatprep.subr.bf16.mxu1 %v10245_v50 }
 0x2c9   : > { %7397 = vmatpush2.bf16.msra.mxu0 %v10240_v53  ;;  %v10278_v53 = vld [vmem:[%s14202_s1 + $0xc4c] ss:$16 sps:$4 sm:$0xff]  }
 0x2ca   : > { %7438 = vmatpush2.bf16.msra.mxu1 %v10243_v57  ;;  %7448 = vmatprep.subr.bf16.mxu0 %v10248_v58  ;;  %v10281_v57 = vld [vmem:[%s14202_s1 + $0xe4c] ss:$16 sps:$4 sm:$0xff]  }
 0x2cb   : > { %7489 = vmatprep.subr.bf16.mxu1 %v10251_v2 }
 0x2cc   : > { %v7154_v8 = vpop.f32.mrf.mxu0  ;;  %7399 = vmatmul.mubr.bf16.vlgmr.msra.gmra.mxu0 %v11234_v31  ;;  %v10260_v31 = vld [vmem:[%s14202_s1 + $0xcac] ss:$16 sps:$4 sm:$0xff]  }
 0x2cd   : > { %v7195_v10 = vpop.f32.mrf.mxu1  ;;  %7440 = vmatmul.mubr.bf16.vlgmr.msra.gmra.mxu1 %v11246_v35  ;;  %v7155_v12 = vadd.f32 %v7154_v8, %v12944_v3  ;;  %7449 = vmatpush1.bf16.msra.mxu0 %v10246_v61  ;;  %v10263_v35 = vld [vmem:[%s14202_s1 + $0xeac] ss:$16 sps:$4 sm:$0xff]   ;;  %v10276_v61 = vld [vmem:[%s14202_s1 + $0xc48] ss:$16 sps:$4 sm:$0xff]  }
 0x2ce   : > { %7490 = vmatpush1.bf16.msra.mxu1 %v10249_v5  ;;  %v7156_v59 = vpop.f32.mrf.mxu0  ;;  %7450 = vmatprep.subr.bf16.mxu0 %v10254_v19  ;;  %v10279_v5 = vld [vmem:[%s14202_s1 + $0xe48] ss:$16 sps:$4 sm:$0xff]   ;;  %v10284_v8 = vld [vmem:[%s14202_s1 + $0xc2c] ss:$16 sps:$4 sm:$0xff]  }
 0x2cf   : > { %v7197_v62 = vpop.f32.mrf.mxu1  ;;  %7491 = vmatprep.subr.bf16.mxu1 %v10257_v7  ;;  %v7196_v3 = vadd.f32 %v7195_v10, %v7155_v12  ;;  %v7157_v54 = vadd.f32 %v7156_v59, %v12949_v4  ;;  %7480 = vmatprep.mubr.bf16.mxu0 %v11452_v0  ;;  %v10287_v10 = vld [vmem:[%s14202_s1 + $0xe2c] ss:$16 sps:$4 sm:$0xff]   ;;  %v10285_v59 = vld [vmem:[%s14202_s1 + $0xe28] ss:$16 sps:$4 sm:$0xff]  }
 0x2d0   : > { %7521 = vmatprep.mubr.bf16.mxu1 %v11456_v1  ;;  %v7158_v60 = vpop.f32.mrf.mxu0  ;;  %v10266_v1 = vld [vmem:[%s14202_s1 + $0xc8c] ss:$16 sps:$4 sm:$0xff]  }
 0x2d1   : > { %v7199_v14 = vpop.f32.mrf.mxu1  ;;  %v7859_v15 = vsel %vm7858_vm0, %v7196_v3, 0.0  ;;  %v7198_v39 = vadd.f32 %v7197_v62, %v7157_v54  ;;  %7451 = vmatpush1.bf16.msra.mxu0 %v10252_v28 }
 0x2d2   : > { %7492 = vmatpush1.bf16.msra.mxu1 %v10255_v13  ;;  %v7860_v4 = vrot.slane %v7859_v15, 4  ;;  %v7159_v18 = vpop.f32.mrf.mxu0  ;;  %7452 = vmatprep.subr.bf16.mxu0 %v10260_v31  ;;  %v10282_v13 = vld [vmem:[%s14202_s1 + $0xc28] ss:$16 sps:$4 sm:$0xff]  }
 0x2d3   : > { %v7200_v0 = vpop.f32.mrf.mxu1  ;;  %7493 = vmatprep.subr.bf16.mxu1 %v10263_v35  ;;  %v7866_v49 = vsel %vm7858_vm0, %v7198_v39, 0.0  ;;  %v10290_v35 = vld [vmem:[%s14202_s1 + $0xc0c] ss:$16 sps:$4 sm:$0xff]  }
 0x2d4   : > { %v7861_v44 = vadd.f32 %v7860_v4, %v7859_v15  ;;  %v7867_v48 = vrot.slane %v7866_v49, 4  ;;  %v10288_v15 = vld [vmem:[%s14202_s1 + $0xc08] ss:$16 sps:$4 sm:$0xff]   ;;  %v10299_v4 = vld [vmem:[%s14202_s1 + $0xfec] ss:$16 sps:$4 sm:$0xff]  }
 0x2d5   : > { %7453 = vmatpush1.bf16.msra.mxu0 %v10258_v45 }
 0x2d6   : > { %7494 = vmatpush1.bf16.msra.mxu1 %v10261_v16  ;;  %v7862_v40 = vrot.slane %v7861_v44, 2  ;;  %v7868_v25 = vadd.f32 %v7867_v48, %v7866_v49  ;;  %7454 = vmatprep.subr.bf16.mxu0 %v10266_v1  ;;  %v10296_v16 = vld [vmem:[%s14202_s1 + $0xdec] ss:$16 sps:$4 sm:$0xff]   ;;  %v10294_v49 = vld [vmem:[%s14202_s1 + $0xde8] ss:$16 sps:$4 sm:$0xff]  }
 0x2d7   : > { %7495 = vmatprep.subr.bf16.mxu1 %v10269_v20  ;;  %v10302_v48 = vld [vmem:[%s14202_s1 + $0xdcc] ss:$16 sps:$4 sm:$0xff]  }
 0x2d8   : > { %v7863_v38 = vadd.f32 %v7862_v40, %v7861_v44  ;;  %v7869_v9 = vrot.slane %v7868_v25, 2  ;;  %v10297_v44 = vld [vmem:[%s14202_s1 + $0xfe8] ss:$16 sps:$4 sm:$0xff]  }
 0x2d9   : > { %7455 = vmatpush1.bf16.msra.mxu0 %v10264_v17  ;;  %v10305_v17 = vld [vmem:[%s14202_s1 + $0xfcc] ss:$16 sps:$4 sm:$0xff]  }
 0x2da   : > { %7496 = vmatpush1.bf16.msra.mxu1 %v10267_v34  ;;  %v7864_v46 = vrot.slane %v7863_v38, 1  ;;  %v7870_v50 = vadd.f32 %v7869_v9, %v7868_v25  ;;  %7456 = vmatprep.subr.bf16.mxu0 %v10272_v26  ;;  %v10308_v9 = vld [vmem:[%s14202_s1 + $0xdac] ss:$16 sps:$4 sm:$0xff]  }
 0x2db   : > { %7497 = vmatprep.subr.bf16.mxu1 %v10275_v27  ;;  %v10300_v27 = vld [vmem:[%s14202_s1 + $0xdc8] ss:$16 sps:$4 sm:$0xff]  }
 0x2dc   : > { %v7865_v58 = vadd.f32 %v7864_v46, %v7863_v38  ;;  %v7871_v2 = vrot.slane %v7870_v50, 1  ;;  %v10303_v38 = vld [vmem:[%s14202_s1 + $0xfc8] ss:$16 sps:$4 sm:$0xff]  }
 0x2dd   : > { %7457 = vmatpush1.bf16.msra.mxu0 %v10270_v41  ;;  %v10311_v41 = vld [vmem:[%s14202_s1 + $0xfac] ss:$16 sps:$4 sm:$0xff]  }
 0x2de   : > { %7498 = vmatpush1.bf16.msra.mxu1 %v10273_v43  ;;  %v7888_v19 = vmul.f32 0.25, %v7865_v58  ;;  %v7872_v7 = vadd.f32 %v7871_v2, %v7870_v50  ;;  %7458 = vmatprep.subr.bf16.mxu0 %v10278_v53  ;;  %v10309_v58 = vld [vmem:[%s14202_s1 + $0xfa8] ss:$16 sps:$4 sm:$0xff]   ;;  %v10314_v2 = vld [vmem:[%s14202_s1 + $0xd8c] ss:$16 sps:$4 sm:$0xff]  }
 0x2df   : > { %7499 = vmatprep.subr.bf16.mxu1 %v10281_v57  ;;  %v10306_v57 = vld [vmem:[%s14202_s1 + $0xda8] ss:$16 sps:$4 sm:$0xff]  }
 0x2e0   : > { %v13199_v12 = vsub.f32 %v7196_v3, %v7888_v19  ;;  %v7889_v28 = vmul.f32 0.25, %v7872_v7  ;;  %v10293_v3 = vld [vmem:[%s14202_s1 + $0xe0c] ss:$16 sps:$4 sm:$0xff]  }
 0x2e1   : > { %7459 = vmatpush1.bf16.msra.mxu0 %v10276_v61  ;;  %v10317_v61 = vld [vmem:[%s14202_s1 + $0xf8c] ss:$16 sps:$4 sm:$0xff]  }
 0x2e2   : > { %7500 = vmatpush1.bf16.msra.mxu1 %v10279_v5  ;;  %v7896_v62 = vmul.f32 %v13199_v12, %v13199_v12  ;;  %v13209_v31 = vsub.f32 %v7198_v39, %v7889_v28  ;;  %7460 = vmatprep.subr.bf16.mxu0 %v10284_v8  ;;  %v10291_v39 = vld [vmem:[%s14202_s1 + $0xe08] ss:$16 sps:$4 sm:$0xff]   ;;  %v10320_v28 = vld [vmem:[%s14202_s1 + $0xd6c] ss:$16 sps:$4 sm:$0xff]  }
 0x2e3   : > { %7501 = vmatprep.subr.bf16.mxu1 %v10287_v10  ;;  %v10312_v8 = vld [vmem:[%s14202_s1 + $0xd88] ss:$16 sps:$4 sm:$0xff]  }
 0x2e4   : > { %v7900_v54 = vsel %vm7858_vm0, %v7896_v62, 0.0  ;;  %v7897_v60 = vmul.f32 %v13209_v31, %v13209_v31  ;;  %v10315_v10 = vld [vmem:[%s14202_s1 + $0xf88] ss:$16 sps:$4 sm:$0xff]  }
 0x2e5   : > { %v7901_v14 = vrot.slane %v7900_v54, 4  ;;  %7461 = vmatpush1.bf16.msra.mxu0 %v10282_v13  ;;  %v10323_v13 = vld [vmem:[%s14202_s1 + $0xf6c] ss:$16 sps:$4 sm:$0xff]   ;;  %v10321_v62 = vld [vmem:[%s14202_s1 + $0xf68] ss:$16 sps:$4 sm:$0xff]  }
 0x2e6   : > { %7502 = vmatpush1.bf16.msra.mxu1 %v10285_v59  ;;  %v7907_v45 = vsel %vm7858_vm0, %v7897_v60, 0.0  ;;  %7462 = vmatprep.subr.bf16.mxu0 %v10290_v35  ;;  %v10318_v59 = vld [vmem:[%s14202_s1 + $0xd68] ss:$16 sps:$4 sm:$0xff]   ;;  %v10326_v35 = vld [vmem:[%s14202_s1 + $0xd4c] ss:$16 sps:$4 sm:$0xff]  }
 0x2e7   : > { %7503 = vmatprep.subr.bf16.mxu1 %v10293_v3  ;;  %v7902_v18 = vadd.f32 %v7901_v14, %v7900_v54  ;;  %v7908_v0 = vrot.slane %v7907_v45, 4  ;;  %v10329_v3 = vld [vmem:[%s14202_s1 + $0xf4c] ss:$16 sps:$4 sm:$0xff]   ;;  %v10324_v54 = vld [vmem:[%s14202_s1 + $0xd48] ss:$16 sps:$4 sm:$0xff]  }
 0x2e8   : > { %v10327_v60 = vld [vmem:[%s14202_s1 + $0xf48] ss:$16 sps:$4 sm:$0xff]   ;;  %v10332_v14 = vld [vmem:[%s14202_s1 + $0xd2c] ss:$16 sps:$4 sm:$0xff]  }
 0x2e9   : > { %v7903_v1 = vrot.slane %v7902_v18, 2  ;;  %v7909_v20 = vadd.f32 %v7908_v0, %v7907_v45  ;;  %7463 = vmatpush1.bf16.msra.mxu0 %v10288_v15  ;;  %v10335_v15 = vld [vmem:[%s14202_s1 + $0xf2c] ss:$16 sps:$4 sm:$0xff]   ;;  %v10333_v45 = vld [vmem:[%s14202_s1 + $0xf28] ss:$16 sps:$4 sm:$0xff]  }
 0x2ea   : > { %7504 = vmatpush1.bf16.msra.mxu1 %v10291_v39  ;;  %7464 = vmatprep.subr.bf16.mxu0 %v10296_v16  ;;  %v10330_v39 = vld [vmem:[%s14202_s1 + $0xd28] ss:$16 sps:$4 sm:$0xff]  }
 0x2eb   : > { %7505 = vmatprep.subr.bf16.mxu1 %v10299_v4  ;;  %v7904_v34 = vadd.f32 %v7903_v1, %v7902_v18  ;;  %v7910_v40 = vrot.slane %v7909_v20, 2  ;;  %v10338_v4 = vld [vmem:[%s14202_s1 + $0xd0c] ss:$16 sps:$4 sm:$0xff]  }
 0x2ec   : > { %v10341_v18 = vld [vmem:[%s14202_s1 + $0xf0c] ss:$16 sps:$4 sm:$0xff]  }
 0x2ed   : > { %v7905_v25 = vrot.slane %v7904_v34, 1  ;;  %v7911_v26 = vadd.f32 %v7910_v40, %v7909_v20  ;;  %7465 = vmatpush2.bf16.msra.mxu0 %v10294_v49  ;;  %v10336_v20 = vld [vmem:[%s14202_s1 + $0xd08] ss:$16 sps:$4 sm:$0xff]   ;;  %v1244_v40 = vsub.s32 3, %v10900_v42 }
 0x2ee   : > { %7506 = vmatpush2.bf16.msra.mxu1 %v10297_v44  ;;  %7466 = vmatprep.subr.bf16.mxu0 %v10302_v48  ;;  %v10339_v48 = vld [vmem:[%s14202_s1 + $0xf08] ss:$16 sps:$4 sm:$0xff]  }
 0x2ef   : > { %7507 = vmatprep.subr.bf16.mxu1 %v10305_v17  ;;  %v7906_v43 = vadd.f32 %v7905_v25, %v7904_v34  ;;  %v7912_v46 = vrot.slane %v7911_v26, 1  ;;  %v1240_v17 = vsub.s32 2, %v10900_v42  ;;  %v10347_v34 = vld [vmem:[%s14202_s1 + $0x12ec] ss:$16 sps:$4 sm:$0xff]  }
 0x2f0   : > { %v10350_v42 = vld [vmem:[%s14202_s1 + $0x10cc] ss:$16 sps:$4 sm:$0xff]  }
 0x2f1   : > { %v7928_v50 = vmul.f32 0.25, %v7906_v43  ;;  %v7913_v53 = vadd.f32 %v7912_v46, %v7911_v26  ;;  %7467 = vmatpush2.bf16.msra.mxu0 %v10300_v27  ;;  %v10734_v27 = vld [vmem:[%s14203_s2] sm:$0xf]  ;;  %v10353_v46 = vld [vmem:[%s14202_s1 + $0x12cc] ss:$16 sps:$4 sm:$0xff]  }
 0x2f2   : > { %7508 = vmatpush2.bf16.msra.mxu1 %v10303_v38  ;;  %7468 = vmatprep.subr.bf16.mxu0 %v10308_v9  ;;  %v1241_v38 = vrot.slane %v10734_v27, %v1240_v17  ;;  %v10342_v9 = vld [vmem:[%s14202_s1 + $0x10e8] ss:$16 sps:$4 sm:$0xff]   ;;  %v10389_v17 = vld [vmem:[%s14202_s1 + $0x120c] ss:$16 sps:$4 sm:$0xff]  }
 0x2f3   : > { %7509 = vmatprep.subr.bf16.mxu1 %v10311_v41  ;;  %v7932_v5 = vadd.f32 1e-05, %v7928_v50  ;;  %v7929_v19 = vmul.f32 0.25, %v7913_v53  ;;  %v10345_v41 = vld [vmem:[%s14202_s1 + $0x12e8] ss:$16 sps:$4 sm:$0xff]   ;;  %v1245_v50 = vrot.slane %v10734_v27, %v1244_v40 }
 0x2f4   : > { %v10395_v40 = vld [vmem:[%s14202_s1 + $0x13ec] ss:$16 sps:$4 sm:$0xff]  }
 0x2f5   : > { %10726 = vrsqrt.f32 %v7932_v5  ;;  %v7933_v7 = vadd.f32 1e-05, %v7929_v19  ;;  %7469 = vmatpush2.bf16.msra.mxu0 %v10306_v57  ;;  %v10398_v27 = vld [vmem:[%s14202_s1 + $0x11cc] ss:$16 sps:$4 sm:$0xff]  }
 0x2f6   : > { %7510 = vmatpush2.bf16.msra.mxu1 %v10309_v58  ;;  %7470 = vmatprep.subr.bf16.mxu0 %v10314_v2  ;;  %v10348_v2 = vld [vmem:[%s14202_s1 + $0x10c8] ss:$16 sps:$4 sm:$0xff]  }
 0x2f7   : > { %7511 = vmatprep.subr.bf16.mxu1 %v10317_v61  ;;  %10728 = vrsqrt.f32 %v7933_v7  ;;  %v10351_v61 = vld [vmem:[%s14202_s1 + $0x12c8] ss:$16 sps:$4 sm:$0xff]  }
 0x2f9   : > { %7471 = vmatpush2.bf16.msra.mxu0 %v10312_v8 }
 0x2fa   : > { %7512 = vmatpush2.bf16.msra.mxu1 %v10315_v10  ;;  %7472 = vmatprep.subr.bf16.mxu0 %v10320_v28 }
 0x2fb   : > { %7513 = vmatprep.subr.bf16.mxu1 %v10323_v13 }
 0x2fd   : > { %7473 = vmatpush2.bf16.msra.mxu0 %v10318_v59  ;;  %v10354_v59 = vld [vmem:[%s14202_s1 + $0x10a8] ss:$16 sps:$4 sm:$0xff]  }
 0x2fe   : > { %7514 = vmatpush2.bf16.msra.mxu1 %v10321_v62  ;;  %7474 = vmatprep.subr.bf16.mxu0 %v10326_v35  ;;  %v10357_v62 = vld [vmem:[%s14202_s1 + $0x12a8] ss:$16 sps:$4 sm:$0xff]  }
 0x2ff   : > { %7515 = vmatprep.subr.bf16.mxu1 %v10329_v3 }
 0x301   : > { %7475 = vmatpush2.bf16.msra.mxu0 %v10324_v54  ;;  %v10360_v54 = vld [vmem:[%s14202_s1 + $0x1088] ss:$16 sps:$4 sm:$0xff]  }
 0x302   : > { %7516 = vmatpush2.bf16.msra.mxu1 %v10327_v60  ;;  %v10727_v16 = vpop.eup %10726  ;;  %7476 = vmatprep.subr.bf16.mxu0 %v10332_v14  ;;  %v10363_v60 = vld [vmem:[%s14202_s1 + $0x1288] ss:$16 sps:$4 sm:$0xff]   ;;  %v10368_v14 = vld [vmem:[%s14202_s1 + $0x106c] ss:$16 sps:$4 sm:$0xff]  }
 0x303   : > { %7517 = vmatprep.subr.bf16.mxu1 %v10335_v15  ;;  %v7940_v0 = vmul.f32 %v10727_v16, %v13199_v12  ;;  %v10344_v12 = vld [vmem:[%s14202_s1 + $0x10ec] ss:$16 sps:$4 sm:$0xff]  }
 0x304   : > { %v10729_v1 = vpop.eup %10728  ;;  %v10371_v15 = vld [vmem:[%s14202_s1 + $0x126c] ss:$16 sps:$4 sm:$0xff]  }
 0x305   : > { %v7948_v49 = vmul.f32 0.2, %v7940_v0  ;;  %v7941_v44 = vmul.f32 %v10729_v1, %v13209_v31  ;;  %7477 = vmatpush2.bf16.msra.mxu0 %v10330_v39  ;;  %vm7944_vm1 = vcmp.ge.f32.partialorder %v7940_v0, 0.0  ;;  %v10366_v39 = vld [vmem:[%s14202_s1 + $0x1068] ss:$16 sps:$4 sm:$0xff]  }
 0x306   : > { %7518 = vmatpush2.bf16.msra.mxu1 %v10333_v45  ;;  %7478 = vmatprep.subr.bf16.mxu0 %v10338_v4  ;;  %v10369_v45 = vld [vmem:[%s14202_s1 + $0x1268] ss:$16 sps:$4 sm:$0xff]   ;;  %v10374_v16 = vld [vmem:[%s14202_s1 + $0x104c] ss:$16 sps:$4 sm:$0xff]  }
 0x307   : > { %7519 = vmatprep.subr.bf16.mxu1 %v10341_v18  ;;  %vm7945_vm2 = vcmp.ge.f32.partialorder %v7941_v44, 0.0  ;;  %v7949_v31 = vmul.f32 0.2, %v7941_v44  ;;  %v7952_v25 = vsel %vm7944_vm1, %v7940_v0, %v7948_v49  ;;  %v10377_v4 = vld [vmem:[%s14202_s1 + $0x124c] ss:$16 sps:$4 sm:$0xff]  }
 0x308   : > { %v10372_v18 = vld [vmem:[%s14202_s1 + $0x1048] ss:$16 sps:$4 sm:$0xff]   ;;  %v10380_v1 = vld [vmem:[%s14202_s1 + $0x102c] ss:$16 sps:$4 sm:$0xff]  }
 0x309   : > { %v7953_v26 = vsel %vm7945_vm2, %v7941_v44, %v7949_v31  ;;  %7479 = vmatpush2.bf16.msra.mxu0 %v10336_v20  ;;  %v10375_v0 = vld [vmem:[%s14202_s1 + $0x1248] ss:$16 sps:$4 sm:$0xff]   ;;  %v10383_v20 = vld [vmem:[%s14202_s1 + $0x122c] ss:$16 sps:$4 sm:$0xff]  }
 0x30a   : > { %7520 = vmatpush2.bf16.msra.mxu1 %v10339_v48  ;;  %v13342_v43 = vcombine.low %v7952_v25, %v7953_v26  ;;  %7530 = vmatprep.subr.bf16.mxu0 %v10344_v12  ;;  %v10378_v49 = vld [vmem:[%s14202_s1 + $0x1028] ss:$16 sps:$4 sm:$0xff]   ;;  %v10386_v48 = vld [vmem:[%s14202_s1 + $0x100c] ss:$16 sps:$4 sm:$0xff]  }
 0x30b   : > { %7571 = vmatprep.subr.bf16.mxu1 %v10347_v34  ;;  %v10381_v44 = vld [vmem:[%s14202_s1 + $0x1228] ss:$16 sps:$4 sm:$0xff]   ;;  %v10392_v31 = vld [vmem:[%s14202_s1 + $0x11ec] ss:$16 sps:$4 sm:$0xff]  }
 0x30c   : > { %v7236_v53 = vpop.f32.mrf.mxu0  ;;  %7481 = vmatmul.mubr.bf16.vlgmr.msra.gmra.mxu0 %v11433_v55  ;;  %v10356_v55 = vld [vmem:[%s14202_s1 + $0x10ac] ss:$16 sps:$4 sm:$0xff]   ;;  %v10384_v12 = vld [vmem:[%s14202_s1 + $0x1008] ss:$16 sps:$4 sm:$0xff]  }
 0x30d   : > { %v7277_v57 = vpop.f32.mrf.mxu1  ;;  %7522 = vmatmul.mubr.bf16.vlgmr.msra.gmra.mxu1 %v11436_v56  ;;  %v7237_v58 = vadd.f32 %v7236_v53, %v1241_v38  ;;  %7531 = vmatpush1.bf16.msra.mxu0 %v10342_v9  ;;  %v10359_v56 = vld [vmem:[%s14202_s1 + $0x12ac] ss:$16 sps:$4 sm:$0xff]   ;;  %v10387_v34 = vld [vmem:[%s14202_s1 + $0x1208] ss:$16 sps:$4 sm:$0xff]  }
 0x30e   : > { %7572 = vmatpush1.bf16.msra.mxu1 %v10345_v41  ;;  %v7238_v5 = vpop.f32.mrf.mxu0  ;;  %7532 = vmatprep.subr.bf16.mxu0 %v10350_v42  ;;  %v10390_v25 = vld [vmem:[%s14202_s1 + $0x11e8] ss:$16 sps:$4 sm:$0xff]   ;;  %v10401_v38 = vld [vmem:[%s14202_s1 + $0x13cc] ss:$16 sps:$4 sm:$0xff]  }
 0x30f   : > { %v7279_v19 = vpop.f32.mrf.mxu1  ;;  %7573 = vmatprep.subr.bf16.mxu1 %v10353_v46  ;;  %v13364_v7 = vadd.f32 %v7277_v57, %v7237_v58  ;;  %v7239_v8 = vadd.f32 %v7238_v5, %v1245_v50  ;;  %7562 = vmatprep.mubr.bf16.mxu0 %v11668_v29  ;;  %v10362_v29 = vld [vmem:[%s14202_s1 + $0x108c] ss:$16 sps:$4 sm:$0xff]   ;;  %v10393_v26 = vld [vmem:[%s14202_s1 + $0x13e8] ss:$16 sps:$4 sm:$0xff]  }
 0x310   : > { %7603 = vmatprep.mubr.bf16.mxu1 %v11672_v30  ;;  %v7240_v10 = vpop.f32.mrf.mxu0  ;;  %v10365_v30 = vld [vmem:[%s14202_s1 + $0x128c] ss:$16 sps:$4 sm:$0xff]   ;;  %v10396_v9 = vld [vmem:[%s14202_s1 + $0x11c8] ss:$16 sps:$4 sm:$0xff]  }
 0x311   : > { %v7281_v28 = vpop.f32.mrf.mxu1  ;;  %v13368_v13 = vadd.f32 %v7279_v19, %v7239_v8  ;;  %7533 = vmatpush1.bf16.msra.mxu0 %v10348_v2  ;;  %v10399_v41 = vld [vmem:[%s14202_s1 + $0x13c8] ss:$16 sps:$4 sm:$0xff]   ;;  %v10404_v42 = vld [vmem:[%s14202_s1 + $0x11ac] ss:$16 sps:$4 sm:$0xff]  }
 0x312   : > { %7574 = vmatpush1.bf16.msra.mxu1 %v10351_v61  ;;  %v7241_v35 = vpop.f32.mrf.mxu0  ;;  %7534 = vmatprep.subr.bf16.mxu0 %v10356_v55  ;;  %v10407_v46 = vld [vmem:[%s14202_s1 + $0x13ac] ss:$16 sps:$4 sm:$0xff]   ;;  %v10402_v50 = vld [vmem:[%s14202_s1 + $0x11a8] ss:$16 sps:$4 sm:$0xff]  }
 0x313   : > { %v7282_v3 = vpop.f32.mrf.mxu1  ;;  %7575 = vmatprep.subr.bf16.mxu1 %v10359_v56  ;;  %v10405_v53 = vld [vmem:[%s14202_s1 + $0x13a8] ss:$16 sps:$4 sm:$0xff]   ;;  %v10410_v57 = vld [vmem:[%s14202_s1 + $0x118c] ss:$16 sps:$4 sm:$0xff]  }
 0x314   : > { %v10413_v58 = vld [vmem:[%s14202_s1 + $0x138c] ss:$16 sps:$4 sm:$0xff]   ;;  %v10408_v2 = vld [vmem:[%s14202_s1 + $0x1188] ss:$16 sps:$4 sm:$0xff]  }
 0x315   : > { %7535 = vmatpush1.bf16.msra.mxu0 %v10354_v59  ;;  %v10411_v61 = vld [vmem:[%s14202_s1 + $0x1388] ss:$16 sps:$4 sm:$0xff]   ;;  %v10416_v5 = vld [vmem:[%s14202_s1 + $0x116c] ss:$16 sps:$4 sm:$0xff]  }
 0x316   : > { %7576 = vmatpush1.bf16.msra.mxu1 %v10357_v62  ;;  %7536 = vmatprep.subr.bf16.mxu0 %v10362_v29  ;;  %v10419_v19 = vld [vmem:[%s14202_s1 + $0x136c] ss:$16 sps:$4 sm:$0xff]   ;;  %v10414_v55 = vld [vmem:[%s14202_s1 + $0x1168] ss:$16 sps:$4 sm:$0xff]  }
 0x317   : > { %7577 = vmatprep.subr.bf16.mxu1 %v10365_v30  ;;  %v10417_v56 = vld [vmem:[%s14202_s1 + $0x1368] ss:$16 sps:$4 sm:$0xff]   ;;  %v10422_v8 = vld [vmem:[%s14202_s1 + $0x114c] ss:$16 sps:$4 sm:$0xff]  }
 0x318   : > { %v10425_v10 = vld [vmem:[%s14202_s1 + $0x134c] ss:$16 sps:$4 sm:$0xff]   ;;  %v10420_v28 = vld [vmem:[%s14202_s1 + $0x1148] ss:$16 sps:$4 sm:$0xff]  }
 0x319   : > { %7537 = vmatpush1.bf16.msra.mxu0 %v10360_v54  ;;  %v10423_v59 = vld [vmem:[%s14202_s1 + $0x1348] ss:$16 sps:$4 sm:$0xff]   ;;  %v10428_v62 = vld [vmem:[%s14202_s1 + $0x112c] ss:$16 sps:$4 sm:$0xff]  }
 0x31a   : > { %7578 = vmatpush1.bf16.msra.mxu1 %v10363_v60  ;;  %7538 = vmatprep.subr.bf16.mxu0 %v10368_v14  ;;  %v10431_v35 = vld [vmem:[%s14202_s1 + $0x132c] ss:$16 sps:$4 sm:$0xff]   ;;  %v10426_v3 = vld [vmem:[%s14202_s1 + $0x1128] ss:$16 sps:$4 sm:$0xff]  }
 0x31b   : > { %7579 = vmatprep.subr.bf16.mxu1 %v10371_v15  ;;  %v10429_v29 = vld [vmem:[%s14202_s1 + $0x1328] ss:$16 sps:$4 sm:$0xff]   ;;  %v10434_v30 = vld [vmem:[%s14202_s1 + $0x110c] ss:$16 sps:$4 sm:$0xff]  }
 0x31c   : > { %v10437_v54 = vld [vmem:[%s14202_s1 + $0x130c] ss:$16 sps:$4 sm:$0xff]   ;;  %v10432_v60 = vld [vmem:[%s14202_s1 + $0x1108] ss:$16 sps:$4 sm:$0xff]  }
 0x31d   : > { %7539 = vmatpush1.bf16.msra.mxu0 %v10366_v39  ;;  %v10435_v14 = vld [vmem:[%s14202_s1 + $0x1308] ss:$16 sps:$4 sm:$0xff]   ;;  %v10440_v15 = vld [vmem:[%s14202_s1 + $0x14ec] ss:$16 sps:$4 sm:$0xff]  }
 0x31e   : > { %7580 = vmatpush1.bf16.msra.mxu1 %v10369_v45  ;;  %7540 = vmatprep.subr.bf16.mxu0 %v10374_v16  ;;  %v10443_v39 = vld [vmem:[%s14202_s1 + $0x16ec] ss:$16 sps:$4 sm:$0xff]   ;;  %v10438_v45 = vld [vmem:[%s14202_s1 + $0x14e8] ss:$16 sps:$4 sm:$0xff]  }
 0x31f   : > { %7581 = vmatprep.subr.bf16.mxu1 %v10377_v4  ;;  %v10441_v16 = vld [vmem:[%s14202_s1 + $0x16e8] ss:$16 sps:$4 sm:$0xff]   ;;  %v10446_v4 = vld [vmem:[%s14202_s1 + $0x14cc] ss:$16 sps:$4 sm:$0xff]  }
 0x321   : > { %7541 = vmatpush1.bf16.msra.mxu0 %v10372_v18  ;;  %v10449_v18 = vld [vmem:[%s14202_s1 + $0x16cc] ss:$16 sps:$4 sm:$0xff]  }
 0x322   : > { %7582 = vmatpush1.bf16.msra.mxu1 %v10375_v0  ;;  %7542 = vmatprep.subr.bf16.mxu0 %v10380_v1 }
 0x323   : > { %7583 = vmatprep.subr.bf16.mxu1 %v10383_v20 }
 0x325   : > { %7543 = vmatpush1.bf16.msra.mxu0 %v10378_v49  ;;  %v10444_v49 = vld [vmem:[%s14202_s1 + $0x14c8] ss:$16 sps:$4 sm:$0xff]  }
 0x326   : > { %7584 = vmatpush1.bf16.msra.mxu1 %v10381_v44  ;;  %7544 = vmatprep.subr.bf16.mxu0 %v10386_v48  ;;  %v10447_v44 = vld [vmem:[%s14202_s1 + $0x16c8] ss:$16 sps:$4 sm:$0xff]  }
 0x327   : > { %7585 = vmatprep.subr.bf16.mxu1 %v10389_v17 }
 0x329   : > { %7545 = vmatpush1.bf16.msra.mxu0 %v10384_v12 }
 0x32a   : > { %7586 = vmatpush1.bf16.msra.mxu1 %v10387_v34  ;;  %7546 = vmatprep.subr.bf16.mxu0 %v10392_v31 }
 0x32b   : > { %7587 = vmatprep.subr.bf16.mxu1 %v10395_v40 }
 0x32d   : > { %7547 = vmatpush2.bf16.msra.mxu0 %v10390_v25  ;;  %v10450_v25 = vld [vmem:[%s14202_s1 + $0x14a8] ss:$16 sps:$4 sm:$0xff]  }
 0x32e   : > { %7588 = vmatpush2.bf16.msra.mxu1 %v10393_v26  ;;  %7548 = vmatprep.subr.bf16.mxu0 %v10398_v27  ;;  %v10453_v26 = vld [vmem:[%s14202_s1 + $0x16a8] ss:$16 sps:$4 sm:$0xff]  }
 0x32f   : > { %7589 = vmatprep.subr.bf16.mxu1 %v10401_v38  ;;  %v10456_v38 = vld [vmem:[%s14202_s1 + $0x1488] ss:$16 sps:$4 sm:$0xff]  }
 0x331   : > { %7549 = vmatpush2.bf16.msra.mxu0 %v10396_v9  ;;  %v10459_v9 = vld [vmem:[%s14202_s1 + $0x1688] ss:$16 sps:$4 sm:$0xff]  }
 0x332   : > { %7590 = vmatpush2.bf16.msra.mxu1 %v10399_v41  ;;  %7550 = vmatprep.subr.bf16.mxu0 %v10404_v42  ;;  %v10464_v41 = vld [vmem:[%s14202_s1 + $0x146c] ss:$16 sps:$4 sm:$0xff]  }
 0x333   : > { %7591 = vmatprep.subr.bf16.mxu1 %v10407_v46  ;;  %v10467_v42 = vld [vmem:[%s14202_s1 + $0x166c] ss:$16 sps:$4 sm:$0xff]   ;;  %v10462_v46 = vld [vmem:[%s14202_s1 + $0x1468] ss:$16 sps:$4 sm:$0xff]  }
 0x335   : > { %7551 = vmatpush2.bf16.msra.mxu0 %v10402_v50  ;;  %v10465_v50 = vld [vmem:[%s14202_s1 + $0x1668] ss:$16 sps:$4 sm:$0xff]  }
 0x336   : > { %7592 = vmatpush2.bf16.msra.mxu1 %v10405_v53  ;;  %7552 = vmatprep.subr.bf16.mxu0 %v10410_v57  ;;  %v10470_v53 = vld [vmem:[%s14202_s1 + $0x144c] ss:$16 sps:$4 sm:$0xff]  }
 0x337   : > { %7593 = vmatprep.subr.bf16.mxu1 %v10413_v58  ;;  %v10473_v57 = vld [vmem:[%s14202_s1 + $0x164c] ss:$16 sps:$4 sm:$0xff]   ;;  %v10468_v58 = vld [vmem:[%s14202_s1 + $0x1448] ss:$16 sps:$4 sm:$0xff]  }
 0x339   : > { %7553 = vmatpush2.bf16.msra.mxu0 %v10408_v2  ;;  %v10471_v2 = vld [vmem:[%s14202_s1 + $0x1648] ss:$16 sps:$4 sm:$0xff]  }
 0x33a   : > { %7594 = vmatpush2.bf16.msra.mxu1 %v10411_v61  ;;  %7554 = vmatprep.subr.bf16.mxu0 %v10416_v5  ;;  %v10476_v61 = vld [vmem:[%s14202_s1 + $0x142c] ss:$16 sps:$4 sm:$0xff]  }
 0x33b   : > { %7595 = vmatprep.subr.bf16.mxu1 %v10419_v19  ;;  %v10479_v5 = vld [vmem:[%s14202_s1 + $0x162c] ss:$16 sps:$4 sm:$0xff]   ;;  %v10474_v19 = vld [vmem:[%s14202_s1 + $0x1428] ss:$16 sps:$4 sm:$0xff]  }
 0x33d   : > { %7555 = vmatpush2.bf16.msra.mxu0 %v10414_v55  ;;  %v10477_v55 = vld [vmem:[%s14202_s1 + $0x1628] ss:$16 sps:$4 sm:$0xff]  }
 0x33e   : > { %7596 = vmatpush2.bf16.msra.mxu1 %v10417_v56  ;;  %7556 = vmatprep.subr.bf16.mxu0 %v10422_v8  ;;  %v10482_v56 = vld [vmem:[%s14202_s1 + $0x140c] ss:$16 sps:$4 sm:$0xff]  }
 0x33f   : > { %7597 = vmatprep.subr.bf16.mxu1 %v10425_v10  ;;  %v10485_v8 = vld [vmem:[%s14202_s1 + $0x160c] ss:$16 sps:$4 sm:$0xff]   ;;  %v10480_v10 = vld [vmem:[%s14202_s1 + $0x1408] ss:$16 sps:$4 sm:$0xff]  }
 0x341   : > { %7557 = vmatpush2.bf16.msra.mxu0 %v10420_v28  ;;  %v10483_v28 = vld [vmem:[%s14202_s1 + $0x1608] ss:$16 sps:$4 sm:$0xff]  }
 0x342   : > { %7598 = vmatpush2.bf16.msra.mxu1 %v10423_v59  ;;  %7558 = vmatprep.subr.bf16.mxu0 %v10428_v62  ;;  %v10488_v59 = vld [vmem:[%s14202_s1 + $0x15ec] ss:$16 sps:$4 sm:$0xff]  }
 0x343   : > { %7599 = vmatprep.subr.bf16.mxu1 %v10431_v35  ;;  %v10491_v62 = vld [vmem:[%s14202_s1 + $0x17ec] ss:$16 sps:$4 sm:$0xff]   ;;  %v10486_v35 = vld [vmem:[%s14202_s1 + $0x15e8] ss:$16 sps:$4 sm:$0xff]  }
 0x345   : > { %7559 = vmatpush2.bf16.msra.mxu0 %v10426_v3  ;;  %v10489_v3 = vld [vmem:[%s14202_s1 + $0x17e8] ss:$16 sps:$4 sm:$0xff]  }
 0x346   : > { %7600 = vmatpush2.bf16.msra.mxu1 %v10429_v29  ;;  %7560 = vmatprep.subr.bf16.mxu0 %v10434_v30  ;;  %v10494_v29 = vld [vmem:[%s14202_s1 + $0x15cc] ss:$16 sps:$4 sm:$0xff]  }
 0x347   : > { %7601 = vmatprep.subr.bf16.mxu1 %v10437_v54  ;;  %v10497_v30 = vld [vmem:[%s14202_s1 + $0x17cc] ss:$16 sps:$4 sm:$0xff]   ;;  %v10492_v54 = vld [vmem:[%s14202_s1 + $0x15c8] ss:$16 sps:$4 sm:$0xff]  }
 0x349   : > { %7561 = vmatpush2.bf16.msra.mxu0 %v10432_v60  ;;  %v10495_v60 = vld [vmem:[%s14202_s1 + $0x17c8] ss:$16 sps:$4 sm:$0xff]  }
 0x34a   : > { %7602 = vmatpush2.bf16.msra.mxu1 %v10435_v14  ;;  %7612 = vmatprep.subr.bf16.mxu0 %v10440_v15  ;;  %v10500_v14 = vld [vmem:[%s14202_s1 + $0x15ac] ss:$16 sps:$4 sm:$0xff]  }
 0x34b   : > { %7653 = vmatprep.subr.bf16.mxu1 %v10443_v39  ;;  %v10503_v15 = vld [vmem:[%s14202_s1 + $0x17ac] ss:$16 sps:$4 sm:$0xff]   ;;  %v10498_v39 = vld [vmem:[%s14202_s1 + $0x15a8] ss:$16 sps:$4 sm:$0xff]  }
 0x34c   : > { %v7318_v0 = vpop.f32.mrf.mxu0  ;;  %7563 = vmatmul.mubr.bf16.vlgmr.msra.gmra.mxu0 %v11649_v21  ;;  %v10452_v21 = vld [vmem:[%s14202_s1 + $0x14ac] ss:$16 sps:$4 sm:$0xff]  }
 0x34d   : > { %v7359_v1 = vpop.f32.mrf.mxu1  ;;  %7604 = vmatmul.mubr.bf16.vlgmr.msra.gmra.mxu1 %v11652_v22  ;;  %v7319_v20 = vadd.f32 %v7318_v0, %v13364_v7  ;;  %7613 = vmatpush1.bf16.msra.mxu0 %v10438_v45  ;;  %v10455_v22 = vld [vmem:[%s14202_s1 + $0x16ac] ss:$16 sps:$4 sm:$0xff]   ;;  %v10501_v45 = vld [vmem:[%s14202_s1 + $0x17a8] ss:$16 sps:$4 sm:$0xff]  }
 0x34e   : > { %7654 = vmatpush1.bf16.msra.mxu1 %v10441_v16  ;;  %v7320_v48 = vpop.f32.mrf.mxu0  ;;  %7614 = vmatprep.subr.bf16.mxu0 %v10446_v4  ;;  %v10506_v16 = vld [vmem:[%s14202_s1 + $0x158c] ss:$16 sps:$4 sm:$0xff]   ;;  %v10507_v0 = vld [vmem:[%s14202_s1 + $0x1788] ss:$16 sps:$4 sm:$0xff]  }
 0x34f   : > { %v7361_v17 = vpop.f32.mrf.mxu1  ;;  %7655 = vmatprep.subr.bf16.mxu1 %v10449_v18  ;;  %v13565_v7 = vadd.f32 %v7359_v1, %v7319_v20  ;;  %v7321_v12 = vadd.f32 %v7320_v48, %v13368_v13  ;;  %7644 = vmatprep.mubr.bf16.mxu0 %v11889_v32  ;;  %v10458_v32 = vld [vmem:[%s14202_s1 + $0x148c] ss:$16 sps:$4 sm:$0xff]   ;;  %v10504_v18 = vld [vmem:[%s14202_s1 + $0x1588] ss:$16 sps:$4 sm:$0xff]  }
 0x350   : > { %7685 = vmatprep.mubr.bf16.mxu1 %v11893_v33  ;;  %v7322_v34 = vpop.f32.mrf.mxu0  ;;  %v10461_v33 = vld [vmem:[%s14202_s1 + $0x168c] ss:$16 sps:$4 sm:$0xff]  }
 0x351   : > { %v7363_v31 = vpop.f32.mrf.mxu1  ;;  %v13570_v40 = vadd.f32 %v7361_v17, %v7321_v12  ;;  %7615 = vmatpush1.bf16.msra.mxu0 %v10444_v49  ;;  %v10509_v4 = vld [vmem:[%s14202_s1 + $0x178c] ss:$16 sps:$4 sm:$0xff]   ;;  %v10510_v49 = vld [vmem:[%s14202_s1 + $0x1568] ss:$16 sps:$4 sm:$0xff]  }
 0x352   : > { %7656 = vmatpush1.bf16.msra.mxu1 %v10447_v44  ;;  %v7323_v27 = vpop.f32.mrf.mxu0  ;;  %7616 = vmatprep.subr.bf16.mxu0 %v10452_v21  ;;  %v10512_v1 = vld [vmem:[%s14202_s1 + $0x156c] ss:$16 sps:$4 sm:$0xff]   ;;  %v10513_v44 = vld [vmem:[%s14202_s1 + $0x1768] ss:$16 sps:$4 sm:$0xff]  }
 0x353   : > { %v7364_v13 = vpop.f32.mrf.mxu1  ;;  %7657 = vmatprep.subr.bf16.mxu1 %v10455_v22  ;;  %v10515_v20 = vld [vmem:[%s14202_s1 + $0x176c] ss:$16 sps:$4 sm:$0xff]   ;;  %v10516_v21 = vld [vmem:[%s14202_s1 + $0x1548] ss:$16 sps:$4 sm:$0xff]  }
 0x354   : > { %v10518_v48 = vld [vmem:[%s14202_s1 + $0x154c] ss:$16 sps:$4 sm:$0xff]   ;;  %v10519_v22 = vld [vmem:[%s14202_s1 + $0x1748] ss:$16 sps:$4 sm:$0xff]  }
 0x355   : > { %7617 = vmatpush1.bf16.msra.mxu0 %v10450_v25  ;;  %v10521_v17 = vld [vmem:[%s14202_s1 + $0x174c] ss:$16 sps:$4 sm:$0xff]   ;;  %v10522_v31 = vld [vmem:[%s14202_s1 + $0x1528] ss:$16 sps:$4 sm:$0xff]  }
 0x356   : > { %7658 = vmatpush1.bf16.msra.mxu1 %v10453_v26  ;;  %7618 = vmatprep.subr.bf16.mxu0 %v10458_v32  ;;  %v10524_v12 = vld [vmem:[%s14202_s1 + $0x152c] ss:$16 sps:$4 sm:$0xff]   ;;  %v10525_v25 = vld [vmem:[%s14202_s1 + $0x1728] ss:$16 sps:$4 sm:$0xff]  }
 0x357   : > { %7659 = vmatprep.subr.bf16.mxu1 %v10461_v33  ;;  %v10527_v34 = vld [vmem:[%s14202_s1 + $0x172c] ss:$16 sps:$4 sm:$0xff]   ;;  %v10528_v13 = vld [vmem:[%s14202_s1 + $0x1508] ss:$16 sps:$4 sm:$0xff]  }
 0x358   : > { %v10530_v26 = vld [vmem:[%s14202_s1 + $0x150c] ss:$16 sps:$4 sm:$0xff]   ;;  %v10531_v32 = vld [vmem:[%s14202_s1 + $0x1708] ss:$16 sps:$4 sm:$0xff]  }
 0x359   : > { %7619 = vmatpush1.bf16.msra.mxu0 %v10456_v38  ;;  %v10533_v27 = vld [vmem:[%s14202_s1 + $0x170c] ss:$16 sps:$4 sm:$0xff]  }
 0x35a   : > { %7660 = vmatpush1.bf16.msra.mxu1 %v10459_v9  ;;  %7620 = vmatprep.subr.bf16.mxu0 %v10464_v41  ;;  %v10536_v33 = vld [vmem:[%s14202_s1 + $0x18ec] ss:$16 sps:$4 sm:$0xff]   ;;  %v10534_v9 = vld [vmem:[%s14202_s1 + $0x18e8] ss:$16 sps:$4 sm:$0xff]  }
 0x35b   : > { %7661 = vmatprep.subr.bf16.mxu1 %v10467_v42  ;;  %v10539_v38 = vld [vmem:[%s14202_s1 + $0x1aec] ss:$16 sps:$4 sm:$0xff]   ;;  %v10537_v41 = vld [vmem:[%s14202_s1 + $0x1ae8] ss:$16 sps:$4 sm:$0xff]  }
 0x35c   : > { %v10542_v42 = vld [vmem:[%s14202_s1 + $0x18cc] ss:$16 sps:$4 sm:$0xff]  }
 0x35d   : > { %7621 = vmatpush1.bf16.msra.mxu0 %v10462_v46  ;;  %v10545_v46 = vld [vmem:[%s14202_s1 + $0x1acc] ss:$16 sps:$4 sm:$0xff]  }
 0x35e   : > { %7662 = vmatpush1.bf16.msra.mxu1 %v10465_v50  ;;  %7622 = vmatprep.subr.bf16.mxu0 %v10470_v53 }
 0x35f   : > { %7663 = vmatprep.subr.bf16.mxu1 %v10473_v57 }
 0x361   : > { %7623 = vmatpush1.bf16.msra.mxu0 %v10468_v58  ;;  %v10540_v58 = vld [vmem:[%s14202_s1 + $0x18c8] ss:$16 sps:$4 sm:$0xff]  }
 0x362   : > { %7664 = vmatpush1.bf16.msra.mxu1 %v10471_v2  ;;  %7624 = vmatprep.subr.bf16.mxu0 %v10476_v61  ;;  %v10543_v2 = vld [vmem:[%s14202_s1 + $0x1ac8] ss:$16 sps:$4 sm:$0xff]  }
 0x363   : > { %7665 = vmatprep.subr.bf16.mxu1 %v10479_v5 }
 0x365   : > { %7625 = vmatpush1.bf16.msra.mxu0 %v10474_v19 }
 0x366   : > { %7666 = vmatpush1.bf16.msra.mxu1 %v10477_v55  ;;  %7626 = vmatprep.subr.bf16.mxu0 %v10482_v56 }
 0x367   : > { %7667 = vmatprep.subr.bf16.mxu1 %v10485_v8 }
 0x369   : > { %7627 = vmatpush1.bf16.msra.mxu0 %v10480_v10  ;;  %v10546_v10 = vld [vmem:[%s14202_s1 + $0x18a8] ss:$16 sps:$4 sm:$0xff]  }
 0x36a   : > { %7668 = vmatpush1.bf16.msra.mxu1 %v10483_v28  ;;  %7628 = vmatprep.subr.bf16.mxu0 %v10488_v59  ;;  %v10549_v28 = vld [vmem:[%s14202_s1 + $0x1aa8] ss:$16 sps:$4 sm:$0xff]  }
 0x36b   : > { %7669 = vmatprep.subr.bf16.mxu1 %v10491_v62  ;;  %v10552_v62 = vld [vmem:[%s14202_s1 + $0x1888] ss:$16 sps:$4 sm:$0xff]  }
 0x36d   : > { %7629 = vmatpush2.bf16.msra.mxu0 %v10486_v35  ;;  %v10555_v35 = vld [vmem:[%s14202_s1 + $0x1a88] ss:$16 sps:$4 sm:$0xff]  }
 0x36e   : > { %7670 = vmatpush2.bf16.msra.mxu1 %v10489_v3  ;;  %7630 = vmatprep.subr.bf16.mxu0 %v10494_v29  ;;  %v10560_v3 = vld [vmem:[%s14202_s1 + $0x186c] ss:$16 sps:$4 sm:$0xff]  }
 0x36f   : > { %7671 = vmatprep.subr.bf16.mxu1 %v10497_v30  ;;  %v10563_v29 = vld [vmem:[%s14202_s1 + $0x1a6c] ss:$16 sps:$4 sm:$0xff]   ;;  %v10558_v30 = vld [vmem:[%s14202_s1 + $0x1868] ss:$16 sps:$4 sm:$0xff]  }
 0x371   : > { %7631 = vmatpush2.bf16.msra.mxu0 %v10492_v54  ;;  %v10561_v54 = vld [vmem:[%s14202_s1 + $0x1a68] ss:$16 sps:$4 sm:$0xff]  }
 0x372   : > { %7672 = vmatpush2.bf16.msra.mxu1 %v10495_v60  ;;  %7632 = vmatprep.subr.bf16.mxu0 %v10500_v14  ;;  %v10566_v60 = vld [vmem:[%s14202_s1 + $0x184c] ss:$16 sps:$4 sm:$0xff]  }
 0x373   : > { %7673 = vmatprep.subr.bf16.mxu1 %v10503_v15  ;;  %v10569_v14 = vld [vmem:[%s14202_s1 + $0x1a4c] ss:$16 sps:$4 sm:$0xff]   ;;  %v10564_v15 = vld [vmem:[%s14202_s1 + $0x1848] ss:$16 sps:$4 sm:$0xff]  }
 0x375   : > { %7633 = vmatpush2.bf16.msra.mxu0 %v10498_v39  ;;  %v10567_v39 = vld [vmem:[%s14202_s1 + $0x1a48] ss:$16 sps:$4 sm:$0xff]  }
 0x376   : > { %7674 = vmatpush2.bf16.msra.mxu1 %v10501_v45  ;;  %7634 = vmatprep.subr.bf16.mxu0 %v10506_v16  ;;  %v10572_v45 = vld [vmem:[%s14202_s1 + $0x182c] ss:$16 sps:$4 sm:$0xff]  }
 0x377   : > { %7675 = vmatprep.subr.bf16.mxu1 %v10509_v4  ;;  %v10575_v16 = vld [vmem:[%s14202_s1 + $0x1a2c] ss:$16 sps:$4 sm:$0xff]   ;;  %v10570_v4 = vld [vmem:[%s14202_s1 + $0x1828] ss:$16 sps:$4 sm:$0xff]  }
 0x379   : > { %7635 = vmatpush2.bf16.msra.mxu0 %v10504_v18  ;;  %v10573_v18 = vld [vmem:[%s14202_s1 + $0x1a28] ss:$16 sps:$4 sm:$0xff]  }
 0x37a   : > { %7676 = vmatpush2.bf16.msra.mxu1 %v10507_v0  ;;  %7636 = vmatprep.subr.bf16.mxu0 %v10512_v1  ;;  %v10578_v0 = vld [vmem:[%s14202_s1 + $0x180c] ss:$16 sps:$4 sm:$0xff]  }
 0x37b   : > { %7677 = vmatprep.subr.bf16.mxu1 %v10515_v20  ;;  %v10581_v1 = vld [vmem:[%s14202_s1 + $0x1a0c] ss:$16 sps:$4 sm:$0xff]   ;;  %v10576_v20 = vld [vmem:[%s14202_s1 + $0x1808] ss:$16 sps:$4 sm:$0xff]  }
 0x37d   : > { %7637 = vmatpush2.bf16.msra.mxu0 %v10510_v49  ;;  %v10579_v49 = vld [vmem:[%s14202_s1 + $0x1a08] ss:$16 sps:$4 sm:$0xff]  }
 0x37e   : > { %7678 = vmatpush2.bf16.msra.mxu1 %v10513_v44  ;;  %7638 = vmatprep.subr.bf16.mxu0 %v10518_v48  ;;  %v10584_v44 = vld [vmem:[%s14202_s1 + $0x19ec] ss:$16 sps:$4 sm:$0xff]  }
 0x37f   : > { %7679 = vmatprep.subr.bf16.mxu1 %v10521_v17  ;;  %v10587_v48 = vld [vmem:[%s14202_s1 + $0x1bec] ss:$16 sps:$4 sm:$0xff]   ;;  %v10582_v17 = vld [vmem:[%s14202_s1 + $0x19e8] ss:$16 sps:$4 sm:$0xff]  }
 0x381   : > { %7639 = vmatpush2.bf16.msra.mxu0 %v10516_v21  ;;  %v10585_v21 = vld [vmem:[%s14202_s1 + $0x1be8] ss:$16 sps:$4 sm:$0xff]  }
 0x382   : > { %7680 = vmatpush2.bf16.msra.mxu1 %v10519_v22  ;;  %7640 = vmatprep.subr.bf16.mxu0 %v10524_v12  ;;  %v10590_v22 = vld [vmem:[%s14202_s1 + $0x19cc] ss:$16 sps:$4 sm:$0xff]  }
 0x383   : > { %7681 = vmatprep.subr.bf16.mxu1 %v10527_v34  ;;  %v10593_v12 = vld [vmem:[%s14202_s1 + $0x1bcc] ss:$16 sps:$4 sm:$0xff]   ;;  %v10588_v34 = vld [vmem:[%s14202_s1 + $0x19c8] ss:$16 sps:$4 sm:$0xff]  }
 0x385   : > { %7641 = vmatpush2.bf16.msra.mxu0 %v10522_v31  ;;  %v10591_v31 = vld [vmem:[%s14202_s1 + $0x1bc8] ss:$16 sps:$4 sm:$0xff]  }
 0x386   : > { %7682 = vmatpush2.bf16.msra.mxu1 %v10525_v25  ;;  %7642 = vmatprep.subr.bf16.mxu0 %v10530_v26  ;;  %v10596_v25 = vld [vmem:[%s14202_s1 + $0x19ac] ss:$16 sps:$4 sm:$0xff]  }
 0x387   : > { %7683 = vmatprep.subr.bf16.mxu1 %v10533_v27  ;;  %v10599_v26 = vld [vmem:[%s14202_s1 + $0x1bac] ss:$16 sps:$4 sm:$0xff]   ;;  %v10594_v27 = vld [vmem:[%s14202_s1 + $0x19a8] ss:$16 sps:$4 sm:$0xff]  }
 0x389   : > { %7643 = vmatpush2.bf16.msra.mxu0 %v10528_v13  ;;  %v10597_v13 = vld [vmem:[%s14202_s1 + $0x1ba8] ss:$16 sps:$4 sm:$0xff]  }
 0x38a   : > { %7684 = vmatpush2.bf16.msra.mxu1 %v10531_v32  ;;  %7694 = vmatprep.subr.bf16.mxu0 %v10536_v33  ;;  %v10602_v32 = vld [vmem:[%s14202_s1 + $0x198c] ss:$16 sps:$4 sm:$0xff]  }
 0x38b   : > { %7735 = vmatprep.subr.bf16.mxu1 %v10539_v38  ;;  %v10605_v33 = vld [vmem:[%s14202_s1 + $0x1b8c] ss:$16 sps:$4 sm:$0xff]   ;;  %v10600_v38 = vld [vmem:[%s14202_s1 + $0x1988] ss:$16 sps:$4 sm:$0xff]  }
 0x38c   : > { %v7400_v50 = vpop.f32.mrf.mxu0  ;;  %7645 = vmatmul.mubr.bf16.vlgmr.msra.gmra.mxu0 %v11870_v23  ;;  %v10548_v23 = vld [vmem:[%s14202_s1 + $0x18ac] ss:$16 sps:$4 sm:$0xff]  }
 0x38d   : > { %v7441_v53 = vpop.f32.mrf.mxu1  ;;  %7686 = vmatmul.mubr.bf16.vlgmr.msra.gmra.mxu1 %v11873_v24  ;;  %v7401_v57 = vadd.f32 %v7400_v50, %v13565_v7  ;;  %7695 = vmatpush1.bf16.msra.mxu0 %v10534_v9  ;;  %v10551_v24 = vld [vmem:[%s14202_s1 + $0x1aac] ss:$16 sps:$4 sm:$0xff]   ;;  %v10603_v9 = vld [vmem:[%s14202_s1 + $0x1b88] ss:$16 sps:$4 sm:$0xff]  }
 0x38e   : > { %7736 = vmatpush1.bf16.msra.mxu1 %v10537_v41  ;;  %v7402_v61 = vpop.f32.mrf.mxu0  ;;  %7696 = vmatprep.subr.bf16.mxu0 %v10542_v42  ;;  %v10608_v41 = vld [vmem:[%s14202_s1 + $0x196c] ss:$16 sps:$4 sm:$0xff]   ;;  %v10609_v50 = vld [vmem:[%s14202_s1 + $0x1b68] ss:$16 sps:$4 sm:$0xff]  }
 0x38f   : > { %v7443_v5 = vpop.f32.mrf.mxu1  ;;  %7737 = vmatprep.subr.bf16.mxu1 %v10545_v46  ;;  %v13767_v7 = vadd.f32 %v7441_v53, %v7401_v57  ;;  %v7403_v19 = vadd.f32 %v7402_v61, %v13570_v40  ;;  %7726 = vmatprep.mubr.bf16.mxu0 %v12106_v47  ;;  %v10554_v47 = vld [vmem:[%s14202_s1 + $0x188c] ss:$16 sps:$4 sm:$0xff]   ;;  %v10606_v46 = vld [vmem:[%s14202_s1 + $0x1968] ss:$16 sps:$4 sm:$0xff]  }
 0x390   : > { %7767 = vmatprep.mubr.bf16.mxu1 %v12110_v52  ;;  %v7404_v55 = vpop.f32.mrf.mxu0  ;;  %v10557_v52 = vld [vmem:[%s14202_s1 + $0x1a8c] ss:$16 sps:$4 sm:$0xff]  }
 0x391   : > { %v7445_v56 = vpop.f32.mrf.mxu1  ;;  %v13772_v8 = vadd.f32 %v7443_v5, %v7403_v19  ;;  %7697 = vmatpush1.bf16.msra.mxu0 %v10540_v58  ;;  %v10611_v42 = vld [vmem:[%s14202_s1 + $0x1b6c] ss:$16 sps:$4 sm:$0xff]   ;;  %v10612_v58 = vld [vmem:[%s14202_s1 + $0x1948] ss:$16 sps:$4 sm:$0xff]  }
 0x392   : > { %7738 = vmatpush1.bf16.msra.mxu1 %v10543_v2  ;;  %v7405_v59 = vpop.f32.mrf.mxu0  ;;  %7698 = vmatprep.subr.bf16.mxu0 %v10548_v23  ;;  %v10614_v53 = vld [vmem:[%s14202_s1 + $0x194c] ss:$16 sps:$4 sm:$0xff]   ;;  %v10615_v2 = vld [vmem:[%s14202_s1 + $0x1b48] ss:$16 sps:$4 sm:$0xff]  }
 0x393   : > { %v7446_v40 = vpop.f32.mrf.mxu1  ;;  %7739 = vmatprep.subr.bf16.mxu1 %v10551_v24  ;;  %v10617_v57 = vld [vmem:[%s14202_s1 + $0x1b4c] ss:$16 sps:$4 sm:$0xff]   ;;  %v10618_v23 = vld [vmem:[%s14202_s1 + $0x1928] ss:$16 sps:$4 sm:$0xff]  }
 0x394   : > { %v10620_v61 = vld [vmem:[%s14202_s1 + $0x192c] ss:$16 sps:$4 sm:$0xff]   ;;  %v10621_v24 = vld [vmem:[%s14202_s1 + $0x1b28] ss:$16 sps:$4 sm:$0xff]  }
 0x395   : > { %7699 = vmatpush1.bf16.msra.mxu0 %v10546_v10  ;;  %v10623_v5 = vld [vmem:[%s14202_s1 + $0x1b2c] ss:$16 sps:$4 sm:$0xff]   ;;  %v10624_v56 = vld [vmem:[%s14202_s1 + $0x1908] ss:$16 sps:$4 sm:$0xff]  }
 0x396   : > { %7740 = vmatpush1.bf16.msra.mxu1 %v10549_v28  ;;  %7700 = vmatprep.subr.bf16.mxu0 %v10554_v47  ;;  %v10626_v19 = vld [vmem:[%s14202_s1 + $0x190c] ss:$16 sps:$4 sm:$0xff]   ;;  %v10627_v10 = vld [vmem:[%s14202_s1 + $0x1b08] ss:$16 sps:$4 sm:$0xff]  }
 0x397   : > { %7741 = vmatprep.subr.bf16.mxu1 %v10557_v52  ;;  %v10629_v55 = vld [vmem:[%s14202_s1 + $0x1b0c] ss:$16 sps:$4 sm:$0xff]   ;;  %v10630_v40 = vld [vmem:[%s14202_s1 + $0x1ce8] ss:$16 sps:$4 sm:$0xff]  }
 0x398   : > { %v10632_v28 = vld [vmem:[%s14202_s1 + $0x1cec] ss:$16 sps:$4 sm:$0xff]   ;;  %v10633_v47 = vld [vmem:[%s14202_s1 + $0x1ee8] ss:$16 sps:$4 sm:$0xff]  }
 0x399   : > { %7701 = vmatpush1.bf16.msra.mxu0 %v10552_v62  ;;  %v10635_v59 = vld [vmem:[%s14202_s1 + $0x1eec] ss:$16 sps:$4 sm:$0xff]  }
 0x39a   : > { %7742 = vmatpush1.bf16.msra.mxu1 %v10555_v35  ;;  %7702 = vmatprep.subr.bf16.mxu0 %v10560_v3  ;;  %v10638_v52 = vld [vmem:[%s14202_s1 + $0x1ccc] ss:$16 sps:$4 sm:$0xff]  }
 0x39b   : > { %7743 = vmatprep.subr.bf16.mxu1 %v10563_v29  ;;  %v10641_v62 = vld [vmem:[%s14202_s1 + $0x1ecc] ss:$16 sps:$4 sm:$0xff]  }
 0x39d   : > { %7703 = vmatpush1.bf16.msra.mxu0 %v10558_v30  ;;  %v10636_v30 = vld [vmem:[%s14202_s1 + $0x1cc8] ss:$16 sps:$4 sm:$0xff]  }
 0x39e   : > { %7744 = vmatpush1.bf16.msra.mxu1 %v10561_v54  ;;  %7704 = vmatprep.subr.bf16.mxu0 %v10566_v60  ;;  %v10639_v54 = vld [vmem:[%s14202_s1 + $0x1ec8] ss:$16 sps:$4 sm:$0xff]  }
 0x39f   : > { %7745 = vmatprep.subr.bf16.mxu1 %v10569_v14 }
 0x3a1   : > { %7705 = vmatpush1.bf16.msra.mxu0 %v10564_v15 }
 0x3a2   : > { %7746 = vmatpush1.bf16.msra.mxu1 %v10567_v39  ;;  %7706 = vmatprep.subr.bf16.mxu0 %v10572_v45 }
 0x3a3   : > { %7747 = vmatprep.subr.bf16.mxu1 %v10575_v16 }
 0x3a5   : > { %7707 = vmatpush1.bf16.msra.mxu0 %v10570_v4  ;;  %v10642_v4 = vld [vmem:[%s14202_s1 + $0x1ca8] ss:$16 sps:$4 sm:$0xff]  }
 0x3a6   : > { %7748 = vmatpush1.bf16.msra.mxu1 %v10573_v18  ;;  %7708 = vmatprep.subr.bf16.mxu0 %v10578_v0  ;;  %v10645_v18 = vld [vmem:[%s14202_s1 + $0x1ea8] ss:$16 sps:$4 sm:$0xff]  }
 0x3a7   : > { %7749 = vmatprep.subr.bf16.mxu1 %v10581_v1  ;;  %v10648_v1 = vld [vmem:[%s14202_s1 + $0x1c88] ss:$16 sps:$4 sm:$0xff]  }
 0x3a9   : > { %7709 = vmatpush1.bf16.msra.mxu0 %v10576_v20  ;;  %v10651_v20 = vld [vmem:[%s14202_s1 + $0x1e88] ss:$16 sps:$4 sm:$0xff]  }
 0x3aa   : > { %7750 = vmatpush1.bf16.msra.mxu1 %v10579_v49  ;;  %7710 = vmatprep.subr.bf16.mxu0 %v10584_v44  ;;  %v10656_v49 = vld [vmem:[%s14202_s1 + $0x1c6c] ss:$16 sps:$4 sm:$0xff]  }
 0x3ab   : > { %7751 = vmatprep.subr.bf16.mxu1 %v10587_v48  ;;  %v10659_v44 = vld [vmem:[%s14202_s1 + $0x1e6c] ss:$16 sps:$4 sm:$0xff]   ;;  %v10654_v48 = vld [vmem:[%s14202_s1 + $0x1c68] ss:$16 sps:$4 sm:$0xff]  }
 0x3ad   : > { %7711 = vmatpush2.bf16.msra.mxu0 %v10582_v17  ;;  %v10657_v17 = vld [vmem:[%s14202_s1 + $0x1e68] ss:$16 sps:$4 sm:$0xff]  }
 0x3ae   : > { %7752 = vmatpush2.bf16.msra.mxu1 %v10585_v21  ;;  %7712 = vmatprep.subr.bf16.mxu0 %v10590_v22  ;;  %v10662_v21 = vld [vmem:[%s14202_s1 + $0x1c4c] ss:$16 sps:$4 sm:$0xff]  }
 0x3af   : > { %7753 = vmatprep.subr.bf16.mxu1 %v10593_v12  ;;  %v10665_v22 = vld [vmem:[%s14202_s1 + $0x1e4c] ss:$16 sps:$4 sm:$0xff]   ;;  %v10660_v12 = vld [vmem:[%s14202_s1 + $0x1c48] ss:$16 sps:$4 sm:$0xff]  }
 0x3b1   : > { %7713 = vmatpush2.bf16.msra.mxu0 %v10588_v34  ;;  %v10663_v34 = vld [vmem:[%s14202_s1 + $0x1e48] ss:$16 sps:$4 sm:$0xff]  }
 0x3b2   : > { %7754 = vmatpush2.bf16.msra.mxu1 %v10591_v31  ;;  %7714 = vmatprep.subr.bf16.mxu0 %v10596_v25  ;;  %v10668_v31 = vld [vmem:[%s14202_s1 + $0x1c2c] ss:$16 sps:$4 sm:$0xff]  }
 0x3b3   : > { %7755 = vmatprep.subr.bf16.mxu1 %v10599_v26  ;;  %v10671_v25 = vld [vmem:[%s14202_s1 + $0x1e2c] ss:$16 sps:$4 sm:$0xff]   ;;  %v10666_v26 = vld [vmem:[%s14202_s1 + $0x1c28] ss:$16 sps:$4 sm:$0xff]  }
 0x3b5   : > { %7715 = vmatpush2.bf16.msra.mxu0 %v10594_v27  ;;  %v10669_v27 = vld [vmem:[%s14202_s1 + $0x1e28] ss:$16 sps:$4 sm:$0xff]  }
 0x3b6   : > { %7756 = vmatpush2.bf16.msra.mxu1 %v10597_v13  ;;  %7716 = vmatprep.subr.bf16.mxu0 %v10602_v32  ;;  %v10674_v13 = vld [vmem:[%s14202_s1 + $0x1c0c] ss:$16 sps:$4 sm:$0xff]  }
 0x3b7   : > { %7757 = vmatprep.subr.bf16.mxu1 %v10605_v33  ;;  %v10677_v32 = vld [vmem:[%s14202_s1 + $0x1e0c] ss:$16 sps:$4 sm:$0xff]   ;;  %v10672_v33 = vld [vmem:[%s14202_s1 + $0x1c08] ss:$16 sps:$4 sm:$0xff]  }
 0x3b9   : > { %7717 = vmatpush2.bf16.msra.mxu0 %v10600_v38  ;;  %v10675_v38 = vld [vmem:[%s14202_s1 + $0x1e08] ss:$16 sps:$4 sm:$0xff]  }
 0x3ba   : > { %7758 = vmatpush2.bf16.msra.mxu1 %v10603_v9  ;;  %7718 = vmatprep.subr.bf16.mxu0 %v10608_v41  ;;  %v10680_v9 = vld [vmem:[%s14202_s1 + $0x1dec] ss:$16 sps:$4 sm:$0xff]  }
 0x3bb   : > { %7759 = vmatprep.subr.bf16.mxu1 %v10611_v42  ;;  %v10683_v41 = vld [vmem:[%s14202_s1 + $0x1fec] ss:$16 sps:$4 sm:$0xff]   ;;  %v10678_v42 = vld [vmem:[%s14202_s1 + $0x1de8] ss:$16 sps:$4 sm:$0xff]  }
 0x3bd   : > { %7719 = vmatpush2.bf16.msra.mxu0 %v10606_v46  ;;  %v10681_v46 = vld [vmem:[%s14202_s1 + $0x1fe8] ss:$16 sps:$4 sm:$0xff]  }
 0x3be   : > { %7760 = vmatpush2.bf16.msra.mxu1 %v10609_v50  ;;  %7720 = vmatprep.subr.bf16.mxu0 %v10614_v53  ;;  %v10686_v50 = vld [vmem:[%s14202_s1 + $0x1dcc] ss:$16 sps:$4 sm:$0xff]  }
 0x3bf   : > { %7761 = vmatprep.subr.bf16.mxu1 %v10617_v57  ;;  %v10689_v53 = vld [vmem:[%s14202_s1 + $0x1fcc] ss:$16 sps:$4 sm:$0xff]   ;;  %v10684_v57 = vld [vmem:[%s14202_s1 + $0x1dc8] ss:$16 sps:$4 sm:$0xff]  }
 0x3c1   : > { %7721 = vmatpush2.bf16.msra.mxu0 %v10612_v58  ;;  %v10687_v58 = vld [vmem:[%s14202_s1 + $0x1fc8] ss:$16 sps:$4 sm:$0xff]  }
 0x3c2   : > { %7762 = vmatpush2.bf16.msra.mxu1 %v10615_v2  ;;  %7722 = vmatprep.subr.bf16.mxu0 %v10620_v61  ;;  %v10692_v2 = vld [vmem:[%s14202_s1 + $0x1dac] ss:$16 sps:$4 sm:$0xff]  }
 0x3c3   : > { %7763 = vmatprep.subr.bf16.mxu1 %v10623_v5  ;;  %v10695_v61 = vld [vmem:[%s14202_s1 + $0x1fac] ss:$16 sps:$4 sm:$0xff]   ;;  %v10690_v5 = vld [vmem:[%s14202_s1 + $0x1da8] ss:$16 sps:$4 sm:$0xff]  }
 0x3c5   : > { %7723 = vmatpush2.bf16.msra.mxu0 %v10618_v23  ;;  %v10693_v23 = vld [vmem:[%s14202_s1 + $0x1fa8] ss:$16 sps:$4 sm:$0xff]  }
 0x3c6   : > { %7764 = vmatpush2.bf16.msra.mxu1 %v10621_v24  ;;  %7724 = vmatprep.subr.bf16.mxu0 %v10626_v19  ;;  %v10698_v24 = vld [vmem:[%s14202_s1 + $0x1d8c] ss:$16 sps:$4 sm:$0xff]  }
 0x3c7   : > { %7765 = vmatprep.subr.bf16.mxu1 %v10629_v55  ;;  %v10701_v19 = vld [vmem:[%s14202_s1 + $0x1f8c] ss:$16 sps:$4 sm:$0xff]   ;;  %v10696_v55 = vld [vmem:[%s14202_s1 + $0x1d88] ss:$16 sps:$4 sm:$0xff]  }
 0x3c9   : > { %7725 = vmatpush2.bf16.msra.mxu0 %v10624_v56  ;;  %v10699_v56 = vld [vmem:[%s14202_s1 + $0x1f88] ss:$16 sps:$4 sm:$0xff]  }
 0x3ca   : > { %7766 = vmatpush2.bf16.msra.mxu1 %v10627_v10  ;;  %7776 = vmatprep.subr.bf16.mxu0 %v10632_v28  ;;  %v10704_v10 = vld [vmem:[%s14202_s1 + $0x1d6c] ss:$16 sps:$4 sm:$0xff]  }
 0x3cb   : > { %7817 = vmatprep.subr.bf16.mxu1 %v10635_v59  ;;  %v10707_v28 = vld [vmem:[%s14202_s1 + $0x1f6c] ss:$16 sps:$4 sm:$0xff]   ;;  %v10702_v59 = vld [vmem:[%s14202_s1 + $0x1d68] ss:$16 sps:$4 sm:$0xff]  }
 0x3cc   : > { %v7482_v35 = vpop.f32.mrf.mxu0  ;;  %7727 = vmatmul.mubr.bf16.vlgmr.msra.gmra.mxu0 %v12087_v36  ;;  %v10644_v36 = vld [vmem:[%s14202_s1 + $0x1cac] ss:$16 sps:$4 sm:$0xff]  }
 0x3cd   : > { %v7523_v3 = vpop.f32.mrf.mxu1  ;;  %7768 = vmatmul.mubr.bf16.vlgmr.msra.gmra.mxu1 %v12090_v37  ;;  %v7483_v29 = vadd.f32 %v7482_v35, %v13767_v7  ;;  %7777 = vmatpush1.bf16.msra.mxu0 %v10630_v40  ;;  %v10647_v37 = vld [vmem:[%s14202_s1 + $0x1eac] ss:$16 sps:$4 sm:$0xff]   ;;  %v10705_v40 = vld [vmem:[%s14202_s1 + $0x1f68] ss:$16 sps:$4 sm:$0xff]  }
 0x3ce   : > { %7818 = vmatpush1.bf16.msra.mxu1 %v10633_v47  ;;  %v7484_v60 = vpop.f32.mrf.mxu0  ;;  %7778 = vmatprep.subr.bf16.mxu0 %v10638_v52  ;;  %v10710_v47 = vld [vmem:[%s14202_s1 + $0x1d4c] ss:$16 sps:$4 sm:$0xff]   ;;  %v10711_v35 = vld [vmem:[%s14202_s1 + $0x1f48] ss:$16 sps:$4 sm:$0xff]  }
 0x3cf   : > { %v7525_v14 = vpop.f32.mrf.mxu1  ;;  %7819 = vmatprep.subr.bf16.mxu1 %v10641_v62  ;;  %v13969_v7 = vadd.f32 %v7523_v3, %v7483_v29  ;;  %v7485_v15 = vadd.f32 %v7484_v60, %v13772_v8  ;;  %7808 = vmatprep.mubr.bf16.mxu0 %v12323_v63  ;;  %v10650_v63 = vld [vmem:[%s14202_s1 + $0x1c8c] ss:$16 sps:$4 sm:$0xff]   ;;  %v10708_v62 = vld [vmem:[%s14202_s1 + $0x1d48] ss:$16 sps:$4 sm:$0xff]  }
 0x3d0   : > { %7849 = vmatprep.mubr.bf16.mxu1 %v12327_v11  ;;  %v7486_v39 = vpop.f32.mrf.mxu0  ;;  %v10653_v11 = vld [vmem:[%s14202_s1 + $0x1e8c] ss:$16 sps:$4 sm:$0xff]  }
 0x3d1   : > { %v7527_v45 = vpop.f32.mrf.mxu1  ;;  %v13974_v16 = vadd.f32 %v7525_v14, %v7485_v15  ;;  %7779 = vmatpush1.bf16.msra.mxu0 %v10636_v30  ;;  %v10713_v52 = vld [vmem:[%s14202_s1 + $0x1f4c] ss:$16 sps:$4 sm:$0xff]   ;;  %v10714_v30 = vld [vmem:[%s14202_s1 + $0x1d28] ss:$16 sps:$4 sm:$0xff]  }
 0x3d2   : > { %7820 = vmatpush1.bf16.msra.mxu1 %v10639_v54  ;;  %v7487_v0 = vpop.f32.mrf.mxu0  ;;  %7780 = vmatprep.subr.bf16.mxu0 %v10644_v36  ;;  %v10716_v3 = vld [vmem:[%s14202_s1 + $0x1d2c] ss:$16 sps:$4 sm:$0xff]   ;;  %v10717_v54 = vld [vmem:[%s14202_s1 + $0x1f28] ss:$16 sps:$4 sm:$0xff]  }
 0x3d3   : > { %v7528_v8 = vpop.f32.mrf.mxu1  ;;  %7821 = vmatprep.subr.bf16.mxu1 %v10647_v37  ;;  %v10719_v29 = vld [vmem:[%s14202_s1 + $0x1f2c] ss:$16 sps:$4 sm:$0xff]   ;;  %v10720_v36 = vld [vmem:[%s14202_s1 + $0x1d08] ss:$16 sps:$4 sm:$0xff]  }
 0x3d4   : > { %v10722_v60 = vld [vmem:[%s14202_s1 + $0x1d0c] ss:$16 sps:$4 sm:$0xff]   ;;  %v10723_v37 = vld [vmem:[%s14202_s1 + $0x1f08] ss:$16 sps:$4 sm:$0xff]  }
 0x3d5   : > { %7781 = vmatpush1.bf16.msra.mxu0 %v10642_v4  ;;  %v10725_v14 = vld [vmem:[%s14202_s1 + $0x1f0c] ss:$16 sps:$4 sm:$0xff]  }
 0x3d6   : > { %7822 = vmatpush1.bf16.msra.mxu1 %v10645_v18  ;;  %7782 = vmatprep.subr.bf16.mxu0 %v10650_v63 }
 0x3d7   : > { %7823 = vmatprep.subr.bf16.mxu1 %v10653_v11 }
 0x3d9   : > { %7783 = vmatpush1.bf16.msra.mxu0 %v10648_v1 }
 0x3da   : > { %7824 = vmatpush1.bf16.msra.mxu1 %v10651_v20  ;;  %7784 = vmatprep.subr.bf16.mxu0 %v10656_v49 }
 0x3db   : > { %7825 = vmatprep.subr.bf16.mxu1 %v10659_v44 }
 0x3dd   : > { %7785 = vmatpush1.bf16.msra.mxu0 %v10654_v48 }
 0x3de   : > { %7826 = vmatpush1.bf16.msra.mxu1 %v10657_v17  ;;  %7786 = vmatprep.subr.bf16.mxu0 %v10662_v21 }
 0x3df   : > { %7827 = vmatprep.subr.bf16.mxu1 %v10665_v22 }
 0x3e1   : > { %7787 = vmatpush1.bf16.msra.mxu0 %v10660_v12 }
 0x3e2   : > { %7828 = vmatpush1.bf16.msra.mxu1 %v10663_v34  ;;  %7788 = vmatprep.subr.bf16.mxu0 %v10668_v31 }
 0x3e3   : > { %7829 = vmatprep.subr.bf16.mxu1 %v10671_v25 }
 0x3e5   : > { %7789 = vmatpush1.bf16.msra.mxu0 %v10666_v26 }
 0x3e6   : > { %7830 = vmatpush1.bf16.msra.mxu1 %v10669_v27  ;;  %7790 = vmatprep.subr.bf16.mxu0 %v10674_v13 }
 0x3e7   : > { %7831 = vmatprep.subr.bf16.mxu1 %v10677_v32 }
 0x3e9   : > { %7791 = vmatpush1.bf16.msra.mxu0 %v10672_v33 }
 0x3ea   : > { %7832 = vmatpush1.bf16.msra.mxu1 %v10675_v38  ;;  %7792 = vmatprep.subr.bf16.mxu0 %v10680_v9 }
 0x3eb   : > { %7833 = vmatprep.subr.bf16.mxu1 %v10683_v41 }
 0x3ed   : > { %7793 = vmatpush2.bf16.msra.mxu0 %v10678_v42 }
 0x3ee   : > { %7834 = vmatpush2.bf16.msra.mxu1 %v10681_v46  ;;  %7794 = vmatprep.subr.bf16.mxu0 %v10686_v50 }
 0x3ef   : > { %7835 = vmatprep.subr.bf16.mxu1 %v10689_v53 }
 0x3f1   : > { %7795 = vmatpush2.bf16.msra.mxu0 %v10684_v57 }
 0x3f2   : > { %7836 = vmatpush2.bf16.msra.mxu1 %v10687_v58  ;;  %7796 = vmatprep.subr.bf16.mxu0 %v10692_v2 }
 0x3f3   : > { %7837 = vmatprep.subr.bf16.mxu1 %v10695_v61 }
 0x3f5   : > { %7797 = vmatpush2.bf16.msra.mxu0 %v10690_v5 }
 0x3f6   : > { %7838 = vmatpush2.bf16.msra.mxu1 %v10693_v23  ;;  %7798 = vmatprep.subr.bf16.mxu0 %v10698_v24 }
 0x3f7   : > { %7839 = vmatprep.subr.bf16.mxu1 %v10701_v19 }
 0x3f9   : > { %7799 = vmatpush2.bf16.msra.mxu0 %v10696_v55 }
 0x3fa   : > { %7840 = vmatpush2.bf16.msra.mxu1 %v10699_v56  ;;  %7800 = vmatprep.subr.bf16.mxu0 %v10704_v10 }
 0x3fb   : > { %7841 = vmatprep.subr.bf16.mxu1 %v10707_v28 }
 0x3fd   : > { %7801 = vmatpush2.bf16.msra.mxu0 %v10702_v59 }
 0x3fe   : > { %7842 = vmatpush2.bf16.msra.mxu1 %v10705_v40  ;;  %7802 = vmatprep.subr.bf16.mxu0 %v10710_v47 }
 0x3ff   : > { %7843 = vmatprep.subr.bf16.mxu1 %v10713_v52 }
 0x401   : > { %7803 = vmatpush2.bf16.msra.mxu0 %v10708_v62 }
 0x402   : > { %7844 = vmatpush2.bf16.msra.mxu1 %v10711_v35  ;;  %7804 = vmatprep.subr.bf16.mxu0 %v10716_v3 }
 0x403   : > { %7845 = vmatprep.subr.bf16.mxu1 %v10719_v29 }
 0x405   : > { %7805 = vmatpush2.bf16.msra.mxu0 %v10714_v30 }
 0x406   : > { %7846 = vmatpush2.bf16.msra.mxu1 %v10717_v54  ;;  %7806 = vmatprep.subr.bf16.mxu0 %v10722_v60 }
 0x407   : > { %7847 = vmatprep.subr.bf16.mxu1 %v10725_v14 }
 0x409   : > { %7807 = vmatpush2.bf16.msra.mxu0 %v10720_v36 }
 0x40a   : > { %7848 = vmatpush2.bf16.msra.mxu1 %v10723_v37 }
 0x40c   : > { %v7564_v15 = vpop.f32.mrf.mxu0  ;;  %7809 = vmatmul.mubr.bf16.vlgmr.msra.gmra.mxu0 %v12304_v51 }
 0x40d   : > { %v7605_v39 = vpop.f32.mrf.mxu1  ;;  %7850 = vmatmul.mubr.bf16.vlgmr.msra.gmra.mxu1 %v12307_v6  ;;  %v7565_v45 = vadd.f32 %v7564_v15, %v13969_v7 }
 0x40e   : > { %v7566_v4 = vpop.f32.mrf.mxu0 }
 0x40f   : > { %v7607_v18 = vpop.f32.mrf.mxu1  ;;  %v7606_v0 = vadd.f32 %v7605_v39, %v7565_v45  ;;  %v7567_v8 = vadd.f32 %v7566_v4, %v13974_v16 }
 0x410   : > { %v7568_v63 = vpop.f32.mrf.mxu0 }
 0x411   : > { %v7609_v11 = vpop.f32.mrf.mxu1  ;;  %v7608_v1 = vadd.f32 %v7607_v18, %v7567_v8 }
 0x412   : > { %v7569_v20 = vpop.f32.mrf.mxu0 }
 0x413   : > { %v7610_v49 = vpop.f32.mrf.mxu1 }
 0x44c   : > { %v7646_v44 = vpop.f32.mrf.mxu0 }
 0x44d   : > { %v7687_v48 = vpop.f32.mrf.mxu1  ;;  %v7647_v17 = vadd.f32 %v7646_v44, %v7606_v0 }
 0x44e   : > { %v7648_v21 = vpop.f32.mrf.mxu0 }
 0x44f   : > { %v7689_v22 = vpop.f32.mrf.mxu1  ;;  %v7688_v51 = vadd.f32 %v7687_v48, %v7647_v17  ;;  %v7649_v12 = vadd.f32 %v7648_v21, %v7608_v1 }
 0x450   : > { %v7650_v6 = vpop.f32.mrf.mxu0 }
 0x451   : > { %v7691_v34 = vpop.f32.mrf.mxu1  ;;  %v7690_v7 = vadd.f32 %v7689_v22, %v7649_v12 }
 0x452   : > { %v7651_v31 = vpop.f32.mrf.mxu0 }
 0x453   : > { %v7692_v25 = vpop.f32.mrf.mxu1 }
 0x454   : > { %v9166_v25 = vld [vmem:[%s14204_s3 + $0x20] sm:$0xff] }
 0x48c   : > { %v7728_v26 = vpop.f32.mrf.mxu0 }
 0x48d   : > { %v7769_v27 = vpop.f32.mrf.mxu1  ;;  %v7729_v16 = vadd.f32 %v7728_v26, %v7688_v51  ;;  %v7956_v26 = vld [vmem:[%s14204_s3] sm:$0xff] }
 0x48e   : > { %v7730_v13 = vpop.f32.mrf.mxu0 }
 0x48f   : > { %v7771_v32 = vpop.f32.mrf.mxu1  ;;  %v7770_v33 = vadd.f32 %v7769_v27, %v7729_v16  ;;  %v7731_v46 = vadd.f32 %v7730_v13, %v7690_v7  ;;  %v9168_v27 = vld [vmem:[%s14204_s3 + $0x30] sm:$0xff]  ;;  %v8020_v13 = vmul.f32 %v9166_v25, %v13342_v43 }
 0x490   : > { %v7732_v38 = vpop.f32.mrf.mxu0  ;;  %v9164_v16 = vld [vmem:[%s14204_s3 + $0x10] sm:$0xff] }
 0x491   : > { %v7773_v9 = vpop.f32.mrf.mxu1  ;;  %v7772_v57 = vadd.f32 %v7771_v32, %v7731_v46  ;;  %v8047_v38 = vmul.f32 %v9168_v27, %v13342_v43 }
 0x492   : > { %v7733_v41 = vpop.f32.mrf.mxu0  ;;  %v7993_v9 = vmul.f32 %v9164_v16, %v13342_v43 }
 0x493   : > { %v7774_v42 = vpop.f32.mrf.mxu1 }
 0x4cc   : > { %v7810_v50 = vpop.f32.mrf.mxu0 }
 0x4cd   : > { %v7851_v53 = vpop.f32.mrf.mxu1  ;;  %v7811_v58 = vadd.f32 %v7810_v50, %v7770_v33  ;;  %v7966_v33 = vmul.f32 %v13342_v43, %v7956_v26  ;;  %v7957_v43 = vld [vmem:[%s14204_s3 + $0x8] sm:$0xff] }
 0x4ce   : > { %v7812_v2 = vpop.f32.mrf.mxu0 }
 0x4cf   : > { %v7853_v61 = vpop.f32.mrf.mxu1  ;;  %v7852_v5 = vadd.f32 %v7851_v53, %v7811_v58  ;;  %v7813_v23 = vadd.f32 %v7812_v2, %v7772_v57  ;;  %v8024_v53 = vcombine.high %v8020_v13, %v8020_v13  ;;  %v7970_v57 = vcombine.high %v7966_v33, %v7966_v33 }
 0x4d0   : > { %v7814_v24 = vpop.f32.mrf.mxu0  ;;  %v8051_v58 = vcombine.high %v8047_v38, %v8047_v38  ;;  %v7997_v2 = vcombine.high %v7993_v9, %v7993_v9 }
 0x4d1   : > { %v7855_v19 = vpop.f32.mrf.mxu1  ;;  %v7873_v55 = vsel %vm7858_vm0, %v7852_v5, 0.0  ;;  %v7854_v56 = vadd.f32 %v7853_v61, %v7813_v23 }
 0x4d2   : > { %v7874_v10 = vrot.slane %v7873_v55, 4  ;;  %v7815_v28 = vpop.f32.mrf.mxu0  ;;  %v8029_v19 = vsel %vm7858_vm0, %v8024_v53, 0.0 }
 0x4d3   : > { %v7856_v59 = vpop.f32.mrf.mxu1  ;;  %v7880_v40 = vsel %vm7858_vm0, %v7854_v56, 0.0  ;;  %v7975_v28 = vsel %vm7858_vm0, %v7970_v57, 0.0 }
 0x4d4   : > { %v7875_v47 = vadd.f32 %v7874_v10, %v7873_v55  ;;  %v7881_v52 = vrot.slane %v7880_v40, 4  ;;  %v9169_v55 = vld [vmem:[%s14204_s3 + $0x38] sm:$0xff]  ;;  %v8056_v59 = vsel %vm7858_vm0, %v8051_v58, 0.0 }
 0x4d6   : > { %v7876_v62 = vrot.slane %v7875_v47, 2  ;;  %v7882_v35 = vadd.f32 %v7881_v52, %v7880_v40  ;;  %v8002_v40 = vsel %vm7858_vm0, %v7997_v2, 0.0  ;;  %v7974_v52 = vsel %vm7858_vm0, %v7966_v33, 0.0 }
 0x4d8   : > { %v7877_v3 = vadd.f32 %v7876_v62, %v7875_v47  ;;  %v7883_v29 = vrot.slane %v7882_v35, 2  ;;  %v8028_v47 = vsel %vm7858_vm0, %v8020_v13, 0.0  ;;  %v8055_v62 = vsel %vm7858_vm0, %v8047_v38, 0.0 }
 0x4da   : > { %v7878_v30 = vrot.slane %v7877_v3, 1  ;;  %v7884_v54 = vadd.f32 %v7883_v29, %v7882_v35  ;;  %v8001_v35 = vsel %vm7858_vm0, %v7993_v9, 0.0 }
 0x4dc   : > { %v7879_v60 = vadd.f32 %v7878_v30, %v7877_v3  ;;  %v7885_v14 = vrot.slane %v7884_v54, 1 }
 0x4de   : > { %v7890_v36 = vmul.f32 0.25, %v7879_v60  ;;  %v7886_v37 = vadd.f32 %v7885_v14, %v7884_v54  ;;  %v8030_v60 = vadd.f32 %v8029_v19, %v8028_v47  ;;  %v7976_v14 = vadd.f32 %v7975_v28, %v7974_v52 }
 0x4e0   : > { %v7894_v15 = vsub.f32 %v7852_v5, %v7890_v36  ;;  %v7891_v39 = vmul.f32 0.25, %v7886_v37  ;;  %v9167_v5 = vld [vmem:[%s14204_s3 + $0x28] sm:$0xff]  ;;  %v8057_v36 = vadd.f32 %v8056_v59, %v8055_v62  ;;  %v8003_v37 = vadd.f32 %v8002_v40, %v8001_v35 }
 0x4e2   : > { %v7898_v45 = vmul.f32 %v7894_v15, %v7894_v15  ;;  %v7895_v4 = vsub.f32 %v7854_v56, %v7891_v39  ;;  %v9165_v56 = vld [vmem:[%s14204_s3 + $0x18] sm:$0xff] }
 0x4e4   : > { %v7914_v18 = vsel %vm7858_vm0, %v7898_v45, 0.0  ;;  %v7899_v0 = vmul.f32 %v7895_v4, %v7895_v4 }
 0x4e5   : > { %v7915_v8 = vrot.slane %v7914_v18, 4 }
 0x4e6   : > { %v7921_v63 = vsel %vm7858_vm0, %v7899_v0, 0.0 }
 0x4e7   : > { %v7916_v11 = vadd.f32 %v7915_v8, %v7914_v18  ;;  %v7922_v1 = vrot.slane %v7921_v63, 4 }
 0x4e9   : > { %v7917_v20 = vrot.slane %v7916_v11, 2  ;;  %v7923_v49 = vadd.f32 %v7922_v1, %v7921_v63 }
 0x4eb   : > { %v7918_v44 = vadd.f32 %v7917_v20, %v7916_v11  ;;  %v7924_v48 = vrot.slane %v7923_v49, 2 }
 0x4ed   : > { %v7919_v17 = vrot.slane %v7918_v44, 1  ;;  %v7925_v21 = vadd.f32 %v7924_v48, %v7923_v49 }
 0x4ef   : > { %v7920_v22 = vadd.f32 %v7919_v17, %v7918_v44  ;;  %v7926_v51 = vrot.slane %v7925_v21, 1 }
 0x4f1   : > { %v7930_v12 = vmul.f32 0.25, %v7920_v22  ;;  %v7927_v6 = vadd.f32 %v7926_v51, %v7925_v21 }
 0x4f3   : > { %v7934_v34 = vadd.f32 1e-05, %v7930_v12  ;;  %v7931_v7 = vmul.f32 0.25, %v7927_v6 }
 0x4f5   : > { %10730 = vrsqrt.f32 %v7934_v34  ;;  %v7935_v31 = vadd.f32 1e-05, %v7931_v7 }
 0x4f7   : > { %10732 = vrsqrt.f32 %v7935_v31 }
 0x502   : > { %v10731_v32 = vpop.eup %10730 }
 0x503   : > { %v7942_v41 = vmul.f32 %v10731_v32, %v7894_v15 }
 0x504   : > { %v10733_v42 = vpop.eup %10732 }
 0x505   : > { %v7950_v46 = vmul.f32 0.2, %v7942_v41  ;;  %v7943_v50 = vmul.f32 %v10733_v42, %v7895_v4  ;;  %vm7946_vm3 = vcmp.ge.f32.partialorder %v7942_v41, 0.0 }
 0x507   : > { %vm7947_vm4 = vcmp.ge.f32.partialorder %v7943_v50, 0.0  ;;  %v7951_v61 = vmul.f32 0.2, %v7943_v50  ;;  %v7954_v23 = vsel %vm7946_vm3, %v7942_v41, %v7950_v46 }
 0x509   : > { %v7955_v24 = vsel %vm7947_vm4, %v7943_v50, %v7951_v61 }
 0x50a   : > { %v7963_v10 = vcombine.low %v7954_v23, %v7955_v24 }
 0x50c   : > { %v8021_v3 = vmul.f32 %v9167_v5, %v7963_v10  ;;  %v7967_v29 = vmul.f32 %v7963_v10, %v7957_v43  ;;  %v8048_v30 = vmul.f32 %v9169_v55, %v7963_v10  ;;  %v7994_v54 = vmul.f32 %v9165_v56, %v7963_v10 }
 0x50e   : > { %v8025_v15 = vcombine.high %v8021_v3, %v8021_v3  ;;  %v8031_v39 = vsel %vm7858_vm0, %v8021_v3, 0.0  ;;  %v7971_v45 = vcombine.high %v7967_v29, %v7967_v29  ;;  %v7977_v4 = vsel %vm7858_vm0, %v7967_v29, 0.0 }
 0x50f   : > { %v8032_v18 = vadd.f32 %v8031_v39, %v8030_v60  ;;  %v7978_v0 = vadd.f32 %v7977_v4, %v7976_v14  ;;  %v8052_v8 = vcombine.high %v8048_v30, %v8048_v30  ;;  %v8058_v63 = vsel %vm7858_vm0, %v8048_v30, 0.0 }
 0x510   : > { %v8033_v11 = vsel %vm7858_vm0, %v8025_v15, 0.0  ;;  %v7979_v1 = vsel %vm7858_vm0, %v7971_v45, 0.0  ;;  %v8059_v20 = vadd.f32 %v8058_v63, %v8057_v36  ;;  %v7998_v49 = vcombine.high %v7994_v54, %v7994_v54 }
 0x511   : > { %v8034_v44 = vadd.f32 %v8033_v11, %v8032_v18  ;;  %v7980_v48 = vadd.f32 %v7979_v1, %v7978_v0  ;;  %v8060_v17 = vsel %vm7858_vm0, %v8052_v8, 0.0  ;;  %v8004_v21 = vsel %vm7858_vm0, %v7994_v54, 0.0 }
 0x512   : > { %v8061_v22 = vadd.f32 %v8060_v17, %v8059_v20  ;;  %v8005_v51 = vadd.f32 %v8004_v21, %v8003_v37  ;;  %v8006_v12 = vsel %vm7858_vm0, %v7998_v49, 0.0 }
 0x513   : > { %8035 = vadd.xlane.f32.xlu1 %v8034_v44  ;;  %7981 = vadd.xlane.f32.xlu0 %v7980_v48 }
 0x514   : > { %v8007_v6 = vadd.f32 %v8006_v12, %v8005_v51 }
 0x517   : > { %8062 = vadd.xlane.f32.xlu1 %v8061_v22  ;;  %8008 = vadd.xlane.f32.xlu0 %v8007_v6 }
 0x59c   : > { %v8036_v34 = vpop.xlane.xlu1 %8035  ;;  %v7982_v7 = vpop.xlane.xlu0 %7981 }
 0x59d   : > { %v8037_v31 = vsel %vm7858_vm0, %v8036_v34, 0.0  ;;  %v7983_v25 = vsel %vm7858_vm0, %v7982_v7, 0.0 }
 0x59e   : > { %v8038_v26 = vrot.slane %v8037_v31, 4  ;;  %v7984_v27 = vrot.slane %v7983_v25, 4 }
 0x5a0   : > { %v8039_v16 = vadd.f32 %v8038_v26, %v8037_v31  ;;  %v7985_v13 = vadd.f32 %v7984_v27, %v7983_v25  ;;  %v8063_v32 = vpop.xlane.xlu1 %8062  ;;  %v8009_v33 = vpop.xlane.xlu0 %8008 }
 0x5a1   : > { %v8064_v38 = vsel %vm7858_vm0, %v8063_v32, 0.0  ;;  %v8010_v9 = vsel %vm7858_vm0, %v8009_v33, 0.0 }
 0x5a2   : > { %v8040_v41 = vrot.slane %v8039_v16, 2  ;;  %v7986_v42 = vrot.slane %v7985_v13, 2  ;;  %v8065_v46 = vrot.slane %v8064_v38, 4  ;;  %v8011_v50 = vrot.slane %v8010_v9, 4 }
 0x5a4   : > { %v7987_v53 = vadd.f32 %v7986_v42, %v7985_v13  ;;  %v8066_v57 = vadd.f32 %v8065_v46, %v8064_v38  ;;  %v8012_v58 = vadd.f32 %v8011_v50, %v8010_v9  ;;  %v8041_v2 = vadd.f32 %v8040_v41, %v8039_v16 }
 0x5a6   : > { %v8067_v61 = vrot.slane %v8066_v57, 2  ;;  %v8013_v5 = vrot.slane %v8012_v58, 2  ;;  %v7988_v23 = vrot.slane %v7987_v53, 1  ;;  %v8042_v43 = vrot.slane %v8041_v2, 1 }
 0x5a8   : > { %v8068_v24 = vadd.f32 %v8067_v61, %v8066_v57  ;;  %v8014_v19 = vadd.f32 %v8013_v5, %v8012_v58  ;;  %v7989_v10 = vadd.f32 %v7988_v23, %v7987_v53  ;;  %v8043_v59 = vadd.f32 %v8042_v43, %v8041_v2 }
 0x5aa   : > { %v8069_v55 = vrot.slane %v8068_v24, 1  ;;  %v8015_v56 = vrot.slane %v8014_v19, 1 }
 0x5ac   : > { %v8016_v28 = vadd.f32 %v8015_v56, %v8014_v19  ;;  %v8070_v40 = vadd.f32 %v8069_v55, %v8068_v24 }
 0x5ae   : > { %v8072_v47 = vsel %vm8071_vm5, %v7989_v10, %v8016_v28 }
 0x5af   : > { %v8074_v52 = vsel %vm8073_vm6, %v8072_v47, %v8043_v59 }
 0x5b0   : > { %v8076_v62 = vsel %vm8075_vm7, %v8074_v52, %v8070_v40 }
 0x5b1   : > { %8078 = vst.msk [vmem:[%s195_s12] sm:$0xf] %vm8077_vm8, %v8076_v62 }
 0x5b2 PF: > { %s14_s15 = sadd.s32 1, %s10741_s15  }
 0x5b3   : > { %p11_p4 = scmp.ge.s32.totalorder %s14_s15, 4  }
 0x5b5   :  { %13 = sbr.rel (!%p11_p4) target bundleno = 1 (0x1), region = 69 }

</bundles_post_ra>
